<compile_context>
chip_gen: v5e
topology: v5e:2x2
jax: 0.10.0
libtpu: 0.0.40
codegen_flags: <defaults>
</compile_context>

<pallas_src>
import jax
import jax.numpy as jnp
from jax.experimental import pallas as pl
from jax.experimental.pallas import tpu as pltpu

# Geometry is fixed by fc1 = Linear(16*5*5, 120): 3x32x32 input.
_H1, _C1 = 32, 3            # input spatial / channels
_K = 5                      # conv kernel size
_CO1, _CO2 = 6, 16          # conv1 / conv2 real output channels
_H2 = 14                    # pooled conv1 spatial (28 // 2)
_H3 = 5                     # pooled conv2 spatial (10 // 2)
_LANE = 128                 # lane-padded channel / output width
_K1P = 128                  # conv1 patch features 3*5*5 = 75   -> 128
_K2P = 256                  # conv2 patch features 6*5*5 = 150  -> 256
_KFP = 512                  # fc1 input features  16*5*5 = 400  -> 512
_PREC = jax.lax.Precision.HIGHEST


# ------------------------------- Pallas kernel ------------------------------

def _forward_kernel(x_ref, w1_ref, b1_ref, w2_ref, b2_ref,
                    wf1_ref, bf1_ref, wf2_ref, bf2_ref, wf3_ref, bf3_ref,
                    out_ref, a1_s, a2_s, pool_s):
    """Whole CNNCifar_WS forward for one sample (grid iterates over batch)."""

    def conv_relu_pool(read_piece, write_row, w_ref, b_ref, *, ho_out, wo, cin, kpad):
        # read_piece(row, j) -> [wo, cin] slice of the source activation.
        # write_row(p, v[wo//2, 128]) stores pooled output row p.
        w = w_ref[...]                                     # [kpad, 128]
        b = b_ref[...]                                     # [1, 128]
        k_real = _K * _K * cin

        def conv_row(ho):
            # In-kernel im2col for one output row: 25 shifted slices, feature
            # order (kh, kw, cin), zero-padded to a lane-dense K.
            parts = [read_piece(ho + i, j) for i in range(_K) for j in range(_K)]
            parts.append(jnp.zeros((wo, kpad - k_real), jnp.float32))
            patch = jnp.concatenate(parts, axis=-1)        # [wo, kpad]
            y = jnp.dot(patch, w, preferred_element_type=jnp.float32,
                        precision=_PREC)                   # [wo, 128] (MXU)
            return jnp.maximum(y + b, 0.0)                 # bias + ReLU

        def body(p, carry):
            # Fused 2x2 max-pool: the H-pair max stays in vregs, the W-pair
            # max uses strided pl.ds reads of the VMEM row scratch.
            z = jnp.maximum(conv_row(2 * p), conv_row(2 * p + 1))      # [wo,128]
            pool_s[0:wo, :] = z
            pooled = jnp.maximum(pool_s[pl.ds(0, wo // 2, 2), :],
                                 pool_s[pl.ds(1, wo // 2, 2), :])      # [wo//2,128]
            write_row(p, pooled)
            return carry

        jax.lax.fori_loop(0, ho_out, body, 0)

    # -- stage 1: conv1 (3 -> 6ch, padded to 128) + ReLU + pool -> a1_s -------
    def src1(row, j):
        return x_ref[0, row, j:j + 2 * _H2, :]             # [28, 3]

    def dst1(p, v):
        a1_s[p, :, :] = v

    conv_relu_pool(src1, dst1, w1_ref, b1_ref,
                   ho_out=_H2, wo=2 * _H2, cin=_C1, kpad=_K1P)

    # -- stage 2: conv2 (6 -> 16ch, padded to 128) + ReLU + pool -> a2_s ------
    def src2(row, j):
        return a1_s[row, j:j + 2 * _H3, 0:_CO1]            # [10, 6]

    def dst2(p, v):
        a2_s[p, :, :] = v

    conv_relu_pool(src2, dst2, w2_ref, b2_ref,
                   ho_out=_H3, wo=2 * _H3, cin=_CO1, kpad=_K2P)

    # -- stage 3: fused fc1 + fc2 + fc3 (NHWC flatten order, K/out padded) ----
    parts = [a2_s[h, w:w + 1, 0:_CO2] for h in range(_H3) for w in range(_H3)]
    parts.append(jnp.zeros((1, _KFP - _H3 * _H3 * _CO2), jnp.float32))
    flat = jnp.concatenate(parts, axis=-1)                 # [1, 512]
    h1 = jnp.maximum(
        jnp.dot(flat, wf1_ref[...], preferred_element_type=jnp.float32,
                precision=_PREC) + bf1_ref[...], 0.0)
    h2 = jnp.maximum(
        jnp.dot(h1, wf2_ref[...], preferred_element_type=jnp.float32,
                precision=_PREC) + bf2_ref[...], 0.0)
    h3 = jnp.dot(h2, wf3_ref[...], preferred_element_type=jnp.float32,
                 precision=_PREC) + bf3_ref[...]
    out_ref[0, :, :] = h3                                  # [1, 128] lane-dense


# ------------------------- parameter preparation (JAX) ----------------------

def _weight_standardize(w):
    # Conv2d_stand: w -= mean over (Cin,KH,KW); w /= (unbiased std + 1e-5).
    mean = w.mean(axis=(1, 2, 3), keepdims=True)
    wc = w - mean
    std = jnp.std(wc.reshape(w.shape[0], -1), axis=1, ddof=1)
    return wc / (std.reshape(-1, 1, 1, 1) + 1e-5)


def _conv_wmat(w_oihw, kpad):
    # [Cout, Cin, KH, KW] -> [KH*KW*Cin, Cout] (matches in-kernel patch order),
    # zero-padded to [kpad, 128].
    cout, cin, kh, kw = w_oihw.shape
    m = jnp.transpose(w_oihw, (2, 3, 1, 0)).reshape(kh * kw * cin, cout)
    return jnp.pad(m, ((0, kpad - kh * kw * cin), (0, _LANE - cout)))


def _fc_wmat(w_oi, kpad):
    # PyTorch Linear weight [out, in] -> [in, out], zero-padded lane-dense.
    o, i = w_oi.shape
    return jnp.pad(w_oi.T, ((0, kpad - i), (0, _LANE - o)))


def _fc1_wmat(w):
    # Permute fc1 columns from PyTorch NCHW flatten (c,h,w) to the kernel's
    # NHWC flatten (h,w,c) so no activation transpose is needed before fc1.
    o = w.shape[0]
    w_nhwc = (w.reshape(o, _CO2, _H3, _H3)
               .transpose(0, 2, 3, 1)
               .reshape(o, _H3 * _H3 * _CO2))
    return _fc_wmat(w_nhwc, _KFP)


def _bias(b):
    return jnp.pad(b, (0, _LANE - b.shape[0])).reshape(1, _LANE)


# ------------------------------- model forward ------------------------------

def cnn_cifar_ws_forward(params, x_nchw):
    n = x_nchw.shape[0]
    num_classes = params["fc3_b"].shape[0]
    x = jnp.transpose(x_nchw, (0, 2, 3, 1))                # NCHW -> NHWC (tiny)

    # Weight standardization is part of the module's forward; padding / layout
    # permutations make every in-kernel operand lane-dense.
    w1 = _conv_wmat(_weight_standardize(params["conv1_w"]), _K1P)   # [128,128]
    w2 = _conv_wmat(_weight_standardize(params["conv2_w"]), _K2P)   # [256,128]
    wf1 = _fc1_wmat(params["fc1_w"])                                # [512,128]
    wf2 = _fc_wmat(params["fc2_w"], _LANE)                          # [128,128]
    wf3 = _fc_wmat(params["fc3_w"], _LANE)                          # [128,128]
    b1, b2 = _bias(params["conv1_b"]), _bias(params["conv2_b"])
    bf1, bf2, bf3 = (_bias(params["fc1_b"]), _bias(params["fc2_b"]),
                     _bias(params["fc3_b"]))

    def full(shape):
        return pl.BlockSpec(shape, lambda i: (0,) * len(shape))

    out = pl.pallas_call(
        _forward_kernel,
        out_shape=jax.ShapeDtypeStruct((n, 1, _LANE), jnp.float32),
        grid=(n,),
        in_specs=[
            pl.BlockSpec((1, _H1, _H1, _C1), lambda i: (i, 0, 0, 0)),
            full((_K1P, _LANE)), full((1, _LANE)),
            full((_K2P, _LANE)), full((1, _LANE)),
            full((_KFP, _LANE)), full((1, _LANE)),
            full((_LANE, _LANE)), full((1, _LANE)),
            full((_LANE, _LANE)), full((1, _LANE)),
        ],
        out_specs=pl.BlockSpec((1, 1, _LANE), lambda i: (i, 0, 0)),
        scratch_shapes=[
            pltpu.VMEM((_H2, _H2, _LANE), jnp.float32),    # pooled conv1 act
            pltpu.VMEM((_H3, _H3, _LANE), jnp.float32),    # pooled conv2 act
            pltpu.VMEM((2 * _H2, _LANE), jnp.float32),     # pool row scratch
        ],
        compiler_params=pltpu.CompilerParams(
            dimension_semantics=("parallel",),
            vmem_limit_bytes=32 * 1024 * 1024),
    )(x, w1, b1, w2, b2, wf1, bf1, wf2, bf2, wf3, bf3)

    return out[:, 0, :num_classes]


# ------------------------------- init / reference ---------------------------

def init_params(key, num_classes=10):
    ks = jax.random.split(key, 10)

    def u(k, shape, fan_in):
        bound = 1.0 / jnp.sqrt(jnp.float32(fan_in))
        return jax.random.uniform(k, shape, jnp.float32, -bound, bound)

    return {
        "conv1_w": u(ks[0], (6, 3, 5, 5), 3 * 25),
        "conv1_b": u(ks[1], (6,), 3 * 25),
        "conv2_w": u(ks[2], (16, 6, 5, 5), 6 * 25),
        "conv2_b": u(ks[3], (16,), 6 * 25),
        "fc1_w": u(ks[4], (120, 400), 400),   # PyTorch Linear: [out, in]
        "fc1_b": u(ks[5], (120,), 400),
        "fc2_w": u(ks[6], (84, 120), 120),
        "fc2_b": u(ks[7], (84,), 120),
        "fc3_w": u(ks[8], (num_classes, 84), 84),
        "fc3_b": u(ks[9], (num_classes,), 84),
    }


def reference_forward(params, x_nchw):
    def conv(x, w, b):
        y = jax.lax.conv_general_dilated(
            x, w, (1, 1), "VALID",
            dimension_numbers=("NCHW", "OIHW", "NCHW"), precision=_PREC)
        return jax.nn.relu(y + b.reshape(1, -1, 1, 1))

    def pool(x):
        return jax.lax.reduce_window(
            x, -jnp.inf, jax.lax.max, (1, 1, 2, 2), (1, 1, 2, 2), "VALID")

    x = pool(conv(x_nchw, _weight_standardize(params["conv1_w"]), params["conv1_b"]))
    x = pool(conv(x, _weight_standardize(params["conv2_w"]), params["conv2_b"]))
    x = x.reshape(x.shape[0], -1)                          # NCHW flatten (c,h,w)
    x = jax.nn.relu(jnp.dot(x, params["fc1_w"].T, precision=_PREC) + params["fc1_b"])
    x = jax.nn.relu(jnp.dot(x, params["fc2_w"].T, precision=_PREC) + params["fc2_b"])
    return jnp.dot(x, params["fc3_w"].T, precision=_PREC) + params["fc3_b"]


if __name__ == "__main__":
    key = jax.random.PRNGKey(0)
    k_x, k_p = jax.random.split(key)

    # CIFAR geometry is fixed by fc1 = Linear(16*5*5, 120): 3x32x32 input.
    x = jax.random.normal(k_x, (2, 3, 32, 32), dtype=jnp.float32)
    params = init_params(k_p, num_classes=10)

    out = jax.jit(cnn_cifar_ws_forward)(params, x)
    out = jax.block_until_ready(out)
    assert out.shape == (2, 10), out.shape

    ref = reference_forward(params, x)
    err = float(jnp.max(jnp.abs(out - ref)))
    scale = float(jnp.max(jnp.abs(ref)))
    assert err <= 2e-2 * scale + 1e-3, (err, scale)

    print("KERNEL_OK")
</pallas_src>

<mosaic_0001>
module attributes {stable_mosaic.version = 11 : i64} {
  func.func @_forward_kernel(%arg0: i32, %arg1: memref<1x32x32x3xf32, #tpu.memory_space<vmem>>, %arg2: memref<128x128xf32, #tpu.memory_space<vmem>>, %arg3: memref<1x128xf32, #tpu.memory_space<vmem>>, %arg4: memref<256x128xf32, #tpu.memory_space<vmem>>, %arg5: memref<1x128xf32, #tpu.memory_space<vmem>>, %arg6: memref<512x128xf32, #tpu.memory_space<vmem>>, %arg7: memref<1x128xf32, #tpu.memory_space<vmem>>, %arg8: memref<128x128xf32, #tpu.memory_space<vmem>>, %arg9: memref<1x128xf32, #tpu.memory_space<vmem>>, %arg10: memref<128x128xf32, #tpu.memory_space<vmem>>, %arg11: memref<1x128xf32, #tpu.memory_space<vmem>>, %arg12: memref<1x1x128xf32, #tpu.memory_space<vmem>>, %arg13: memref<14x14x128xf32, #tpu.memory_space<vmem>>, %arg14: memref<5x5x128xf32, #tpu.memory_space<vmem>>, %arg15: memref<28x128xf32, #tpu.memory_space<vmem>>) attributes {dimension_semantics = [#tpu.dimension_semantics<parallel>], iteration_bounds = array<i64: 2>, scalar_prefetch = 0 : i64, scratch_operands = 3 : i64, tpu.core_type = #tpu.core_type<tc>, window_params = [{transform_indices = @transform_0, window_bounds = array<i64: 1, 32, 32, 3>}, {pipeline_mode = #tpu.pipeline_mode<synchronous>, transform_indices = @transform_1, window_bounds = array<i64: 128, 128>}, {pipeline_mode = #tpu.pipeline_mode<synchronous>, transform_indices = @transform_2, window_bounds = array<i64: 1, 128>}, {pipeline_mode = #tpu.pipeline_mode<synchronous>, transform_indices = @transform_3, window_bounds = array<i64: 256, 128>}, {pipeline_mode = #tpu.pipeline_mode<synchronous>, transform_indices = @transform_4, window_bounds = array<i64: 1, 128>}, {pipeline_mode = #tpu.pipeline_mode<synchronous>, transform_indices = @transform_5, window_bounds = array<i64: 512, 128>}, {pipeline_mode = #tpu.pipeline_mode<synchronous>, transform_indices = @transform_6, window_bounds = array<i64: 1, 128>}, {pipeline_mode = #tpu.pipeline_mode<synchronous>, transform_indices = @transform_7, window_bounds = array<i64: 128, 128>}, {pipeline_mode = #tpu.pipeline_mode<synchronous>, transform_indices = @transform_8, window_bounds = array<i64: 1, 128>}, {pipeline_mode = #tpu.pipeline_mode<synchronous>, transform_indices = @transform_9, window_bounds = array<i64: 128, 128>}, {pipeline_mode = #tpu.pipeline_mode<synchronous>, transform_indices = @transform_10, window_bounds = array<i64: 1, 128>}, {transform_indices = @transform_11, window_bounds = array<i64: 1, 1, 128>}]} {
    %c0 = arith.constant 0 : index
    %c0_0 = arith.constant 0 : index
    %0 = vector.load %arg2[%c0, %c0_0] : memref<128x128xf32, #tpu.memory_space<vmem>>, vector<128x128xf32>
    %c0_1 = arith.constant 0 : index
    %c0_2 = arith.constant 0 : index
    %1 = vector.load %arg3[%c0_1, %c0_2] : memref<1x128xf32, #tpu.memory_space<vmem>>, vector<1x128xf32>
    %c0_i32 = arith.constant 0 : i32
    %c14_i32 = arith.constant 14 : i32
    %2 = arith.addi %c0_i32, %c14_i32 : i32
    %c1_i32 = arith.constant 1 : i32
    scf.for %arg16 = %c0_i32 to %2 step %c1_i32  : i32 {
      %c2_i32 = arith.constant 2 : i32
      %79 = arith.muli %c2_i32, %arg16 : i32
      %c0_i32_102 = arith.constant 0 : i32
      %80 = arith.addi %79, %c0_i32_102 : i32
      %c0_103 = arith.constant 0 : index
      %81 = arith.index_cast %80 : i32 to index
      %c0_104 = arith.constant 0 : index
      %c0_105 = arith.constant 0 : index
      %82 = vector.load %arg1[%c0_103, %81, %c0_104, %c0_105] : memref<1x32x32x3xf32, #tpu.memory_space<vmem>>, vector<1x1x28x3xf32>
      %83 = vector.shape_cast %82 : vector<1x1x28x3xf32> to vector<28x3xf32>
      %c0_i32_106 = arith.constant 0 : i32
      %84 = arith.addi %79, %c0_i32_106 : i32
      %c0_107 = arith.constant 0 : index
      %85 = arith.index_cast %84 : i32 to index
      %c1_108 = arith.constant 1 : index
      %c0_109 = arith.constant 0 : index
      %86 = vector.load %arg1[%c0_107, %85, %c1_108, %c0_109] : memref<1x32x32x3xf32, #tpu.memory_space<vmem>>, vector<1x1x28x3xf32>
      %87 = vector.shape_cast %86 : vector<1x1x28x3xf32> to vector<28x3xf32>
      %c0_i32_110 = arith.constant 0 : i32
      %88 = arith.addi %79, %c0_i32_110 : i32
      %c0_111 = arith.constant 0 : index
      %89 = arith.index_cast %88 : i32 to index
      %c2_112 = arith.constant 2 : index
      %c0_113 = arith.constant 0 : index
      %90 = vector.load %arg1[%c0_111, %89, %c2_112, %c0_113] : memref<1x32x32x3xf32, #tpu.memory_space<vmem>>, vector<1x1x28x3xf32>
      %91 = vector.shape_cast %90 : vector<1x1x28x3xf32> to vector<28x3xf32>
      %c0_i32_114 = arith.constant 0 : i32
      %92 = arith.addi %79, %c0_i32_114 : i32
      %c0_115 = arith.constant 0 : index
      %93 = arith.index_cast %92 : i32 to index
      %c3_116 = arith.constant 3 : index
      %c0_117 = arith.constant 0 : index
      %94 = vector.load %arg1[%c0_115, %93, %c3_116, %c0_117] : memref<1x32x32x3xf32, #tpu.memory_space<vmem>>, vector<1x1x28x3xf32>
      %95 = vector.shape_cast %94 : vector<1x1x28x3xf32> to vector<28x3xf32>
      %c0_i32_118 = arith.constant 0 : i32
      %96 = arith.addi %79, %c0_i32_118 : i32
      %c0_119 = arith.constant 0 : index
      %97 = arith.index_cast %96 : i32 to index
      %c4_120 = arith.constant 4 : index
      %c0_121 = arith.constant 0 : index
      %98 = vector.load %arg1[%c0_119, %97, %c4_120, %c0_121] : memref<1x32x32x3xf32, #tpu.memory_space<vmem>>, vector<1x1x28x3xf32>
      %99 = vector.shape_cast %98 : vector<1x1x28x3xf32> to vector<28x3xf32>
      %c1_i32_122 = arith.constant 1 : i32
      %100 = arith.addi %79, %c1_i32_122 : i32
      %c0_123 = arith.constant 0 : index
      %101 = arith.index_cast %100 : i32 to index
      %c0_124 = arith.constant 0 : index
      %c0_125 = arith.constant 0 : index
      %102 = vector.load %arg1[%c0_123, %101, %c0_124, %c0_125] : memref<1x32x32x3xf32, #tpu.memory_space<vmem>>, vector<1x1x28x3xf32>
      %103 = vector.shape_cast %102 : vector<1x1x28x3xf32> to vector<28x3xf32>
      %c1_i32_126 = arith.constant 1 : i32
      %104 = arith.addi %79, %c1_i32_126 : i32
      %c0_127 = arith.constant 0 : index
      %105 = arith.index_cast %104 : i32 to index
      %c1_128 = arith.constant 1 : index
      %c0_129 = arith.constant 0 : index
      %106 = vector.load %arg1[%c0_127, %105, %c1_128, %c0_129] : memref<1x32x32x3xf32, #tpu.memory_space<vmem>>, vector<1x1x28x3xf32>
      %107 = vector.shape_cast %106 : vector<1x1x28x3xf32> to vector<28x3xf32>
      %c1_i32_130 = arith.constant 1 : i32
      %108 = arith.addi %79, %c1_i32_130 : i32
      %c0_131 = arith.constant 0 : index
      %109 = arith.index_cast %108 : i32 to index
      %c2_132 = arith.constant 2 : index
      %c0_133 = arith.constant 0 : index
      %110 = vector.load %arg1[%c0_131, %109, %c2_132, %c0_133] : memref<1x32x32x3xf32, #tpu.memory_space<vmem>>, vector<1x1x28x3xf32>
      %111 = vector.shape_cast %110 : vector<1x1x28x3xf32> to vector<28x3xf32>
      %c1_i32_134 = arith.constant 1 : i32
      %112 = arith.addi %79, %c1_i32_134 : i32
      %c0_135 = arith.constant 0 : index
      %113 = arith.index_cast %112 : i32 to index
      %c3_136 = arith.constant 3 : index
      %c0_137 = arith.constant 0 : index
      %114 = vector.load %arg1[%c0_135, %113, %c3_136, %c0_137] : memref<1x32x32x3xf32, #tpu.memory_space<vmem>>, vector<1x1x28x3xf32>
      %115 = vector.shape_cast %114 : vector<1x1x28x3xf32> to vector<28x3xf32>
      %c1_i32_138 = arith.constant 1 : i32
      %116 = arith.addi %79, %c1_i32_138 : i32
      %c0_139 = arith.constant 0 : index
      %117 = arith.index_cast %116 : i32 to index
      %c4_140 = arith.constant 4 : index
      %c0_141 = arith.constant 0 : index
      %118 = vector.load %arg1[%c0_139, %117, %c4_140, %c0_141] : memref<1x32x32x3xf32, #tpu.memory_space<vmem>>, vector<1x1x28x3xf32>
      %119 = vector.shape_cast %118 : vector<1x1x28x3xf32> to vector<28x3xf32>
      %c2_i32_142 = arith.constant 2 : i32
      %120 = arith.addi %79, %c2_i32_142 : i32
      %c0_143 = arith.constant 0 : index
      %121 = arith.index_cast %120 : i32 to index
      %c0_144 = arith.constant 0 : index
      %c0_145 = arith.constant 0 : index
      %122 = vector.load %arg1[%c0_143, %121, %c0_144, %c0_145] : memref<1x32x32x3xf32, #tpu.memory_space<vmem>>, vector<1x1x28x3xf32>
      %123 = vector.shape_cast %122 : vector<1x1x28x3xf32> to vector<28x3xf32>
      %c2_i32_146 = arith.constant 2 : i32
      %124 = arith.addi %79, %c2_i32_146 : i32
      %c0_147 = arith.constant 0 : index
      %125 = arith.index_cast %124 : i32 to index
      %c1_148 = arith.constant 1 : index
      %c0_149 = arith.constant 0 : index
      %126 = vector.load %arg1[%c0_147, %125, %c1_148, %c0_149] : memref<1x32x32x3xf32, #tpu.memory_space<vmem>>, vector<1x1x28x3xf32>
      %127 = vector.shape_cast %126 : vector<1x1x28x3xf32> to vector<28x3xf32>
      %c2_i32_150 = arith.constant 2 : i32
      %128 = arith.addi %79, %c2_i32_150 : i32
      %c0_151 = arith.constant 0 : index
      %129 = arith.index_cast %128 : i32 to index
      %c2_152 = arith.constant 2 : index
      %c0_153 = arith.constant 0 : index
      %130 = vector.load %arg1[%c0_151, %129, %c2_152, %c0_153] : memref<1x32x32x3xf32, #tpu.memory_space<vmem>>, vector<1x1x28x3xf32>
      %131 = vector.shape_cast %130 : vector<1x1x28x3xf32> to vector<28x3xf32>
      %c2_i32_154 = arith.constant 2 : i32
      %132 = arith.addi %79, %c2_i32_154 : i32
      %c0_155 = arith.constant 0 : index
      %133 = arith.index_cast %132 : i32 to index
      %c3_156 = arith.constant 3 : index
      %c0_157 = arith.constant 0 : index
      %134 = vector.load %arg1[%c0_155, %133, %c3_156, %c0_157] : memref<1x32x32x3xf32, #tpu.memory_space<vmem>>, vector<1x1x28x3xf32>
      %135 = vector.shape_cast %134 : vector<1x1x28x3xf32> to vector<28x3xf32>
      %c2_i32_158 = arith.constant 2 : i32
      %136 = arith.addi %79, %c2_i32_158 : i32
      %c0_159 = arith.constant 0 : index
      %137 = arith.index_cast %136 : i32 to index
      %c4_160 = arith.constant 4 : index
      %c0_161 = arith.constant 0 : index
      %138 = vector.load %arg1[%c0_159, %137, %c4_160, %c0_161] : memref<1x32x32x3xf32, #tpu.memory_space<vmem>>, vector<1x1x28x3xf32>
      %139 = vector.shape_cast %138 : vector<1x1x28x3xf32> to vector<28x3xf32>
      %c3_i32 = arith.constant 3 : i32
      %140 = arith.addi %79, %c3_i32 : i32
      %c0_162 = arith.constant 0 : index
      %141 = arith.index_cast %140 : i32 to index
      %c0_163 = arith.constant 0 : index
      %c0_164 = arith.constant 0 : index
      %142 = vector.load %arg1[%c0_162, %141, %c0_163, %c0_164] : memref<1x32x32x3xf32, #tpu.memory_space<vmem>>, vector<1x1x28x3xf32>
      %143 = vector.shape_cast %142 : vector<1x1x28x3xf32> to vector<28x3xf32>
      %c3_i32_165 = arith.constant 3 : i32
      %144 = arith.addi %79, %c3_i32_165 : i32
      %c0_166 = arith.constant 0 : index
      %145 = arith.index_cast %144 : i32 to index
      %c1_167 = arith.constant 1 : index
      %c0_168 = arith.constant 0 : index
      %146 = vector.load %arg1[%c0_166, %145, %c1_167, %c0_168] : memref<1x32x32x3xf32, #tpu.memory_space<vmem>>, vector<1x1x28x3xf32>
      %147 = vector.shape_cast %146 : vector<1x1x28x3xf32> to vector<28x3xf32>
      %c3_i32_169 = arith.constant 3 : i32
      %148 = arith.addi %79, %c3_i32_169 : i32
      %c0_170 = arith.constant 0 : index
      %149 = arith.index_cast %148 : i32 to index
      %c2_171 = arith.constant 2 : index
      %c0_172 = arith.constant 0 : index
      %150 = vector.load %arg1[%c0_170, %149, %c2_171, %c0_172] : memref<1x32x32x3xf32, #tpu.memory_space<vmem>>, vector<1x1x28x3xf32>
      %151 = vector.shape_cast %150 : vector<1x1x28x3xf32> to vector<28x3xf32>
      %c3_i32_173 = arith.constant 3 : i32
      %152 = arith.addi %79, %c3_i32_173 : i32
      %c0_174 = arith.constant 0 : index
      %153 = arith.index_cast %152 : i32 to index
      %c3_175 = arith.constant 3 : index
      %c0_176 = arith.constant 0 : index
      %154 = vector.load %arg1[%c0_174, %153, %c3_175, %c0_176] : memref<1x32x32x3xf32, #tpu.memory_space<vmem>>, vector<1x1x28x3xf32>
      %155 = vector.shape_cast %154 : vector<1x1x28x3xf32> to vector<28x3xf32>
      %c3_i32_177 = arith.constant 3 : i32
      %156 = arith.addi %79, %c3_i32_177 : i32
      %c0_178 = arith.constant 0 : index
      %157 = arith.index_cast %156 : i32 to index
      %c4_179 = arith.constant 4 : index
      %c0_180 = arith.constant 0 : index
      %158 = vector.load %arg1[%c0_178, %157, %c4_179, %c0_180] : memref<1x32x32x3xf32, #tpu.memory_space<vmem>>, vector<1x1x28x3xf32>
      %159 = vector.shape_cast %158 : vector<1x1x28x3xf32> to vector<28x3xf32>
      %c4_i32 = arith.constant 4 : i32
      %160 = arith.addi %79, %c4_i32 : i32
      %c0_181 = arith.constant 0 : index
      %161 = arith.index_cast %160 : i32 to index
      %c0_182 = arith.constant 0 : index
      %c0_183 = arith.constant 0 : index
      %162 = vector.load %arg1[%c0_181, %161, %c0_182, %c0_183] : memref<1x32x32x3xf32, #tpu.memory_space<vmem>>, vector<1x1x28x3xf32>
      %163 = vector.shape_cast %162 : vector<1x1x28x3xf32> to vector<28x3xf32>
      %c4_i32_184 = arith.constant 4 : i32
      %164 = arith.addi %79, %c4_i32_184 : i32
      %c0_185 = arith.constant 0 : index
      %165 = arith.index_cast %164 : i32 to index
      %c1_186 = arith.constant 1 : index
      %c0_187 = arith.constant 0 : index
      %166 = vector.load %arg1[%c0_185, %165, %c1_186, %c0_187] : memref<1x32x32x3xf32, #tpu.memory_space<vmem>>, vector<1x1x28x3xf32>
      %167 = vector.shape_cast %166 : vector<1x1x28x3xf32> to vector<28x3xf32>
      %c4_i32_188 = arith.constant 4 : i32
      %168 = arith.addi %79, %c4_i32_188 : i32
      %c0_189 = arith.constant 0 : index
      %169 = arith.index_cast %168 : i32 to index
      %c2_190 = arith.constant 2 : index
      %c0_191 = arith.constant 0 : index
      %170 = vector.load %arg1[%c0_189, %169, %c2_190, %c0_191] : memref<1x32x32x3xf32, #tpu.memory_space<vmem>>, vector<1x1x28x3xf32>
      %171 = vector.shape_cast %170 : vector<1x1x28x3xf32> to vector<28x3xf32>
      %c4_i32_192 = arith.constant 4 : i32
      %172 = arith.addi %79, %c4_i32_192 : i32
      %c0_193 = arith.constant 0 : index
      %173 = arith.index_cast %172 : i32 to index
      %c3_194 = arith.constant 3 : index
      %c0_195 = arith.constant 0 : index
      %174 = vector.load %arg1[%c0_193, %173, %c3_194, %c0_195] : memref<1x32x32x3xf32, #tpu.memory_space<vmem>>, vector<1x1x28x3xf32>
      %175 = vector.shape_cast %174 : vector<1x1x28x3xf32> to vector<28x3xf32>
      %c4_i32_196 = arith.constant 4 : i32
      %176 = arith.addi %79, %c4_i32_196 : i32
      %c0_197 = arith.constant 0 : index
      %177 = arith.index_cast %176 : i32 to index
      %c4_198 = arith.constant 4 : index
      %c0_199 = arith.constant 0 : index
      %178 = vector.load %arg1[%c0_197, %177, %c4_198, %c0_199] : memref<1x32x32x3xf32, #tpu.memory_space<vmem>>, vector<1x1x28x3xf32>
      %179 = vector.shape_cast %178 : vector<1x1x28x3xf32> to vector<28x3xf32>
      %cst_200 = arith.constant 0.000000e+00 : f32
      %180 = vector.broadcast %cst_200 : f32 to vector<28x53xf32>
      %181 = tpu.concatenate %83, %87, %91, %95, %99, %103, %107, %111, %115, %119, %123, %127, %131, %135, %139, %143 in 1 : vector<28x3xf32>, vector<28x3xf32>, vector<28x3xf32>, vector<28x3xf32>, vector<28x3xf32>, vector<28x3xf32>, vector<28x3xf32>, vector<28x3xf32>, vector<28x3xf32>, vector<28x3xf32>, vector<28x3xf32>, vector<28x3xf32>, vector<28x3xf32>, vector<28x3xf32>, vector<28x3xf32>, vector<28x3xf32> -> vector<28x48xf32>
      %182 = tpu.concatenate %147, %151, %155, %159, %163, %167, %171, %175, %179, %180 in 1 : vector<28x3xf32>, vector<28x3xf32>, vector<28x3xf32>, vector<28x3xf32>, vector<28x3xf32>, vector<28x3xf32>, vector<28x3xf32>, vector<28x3xf32>, vector<28x3xf32>, vector<28x53xf32> -> vector<28x80xf32>
      %183 = tpu.concatenate %181, %182 in 1 : vector<28x48xf32>, vector<28x80xf32> -> vector<28x128xf32>
      %cst_201 = arith.constant dense<0.000000e+00> : vector<28x128xf32>
      %184 = tpu.matmul %183, %0, %cst_201 {dimension_numbers = #tpu.dot_dimension_numbers<[1], [0], [0], [1], [0, 0, 1, 1], [], []>, precision = #tpu.contract_precision<fp32>} : vector<28x128xf32>, vector<128x128xf32>, vector<28x128xf32> -> vector<28x128xf32>
      %185 = vector.broadcast %1 : vector<1x128xf32> to vector<28x128xf32>
      %186 = arith.addf %184, %185 : vector<28x128xf32>
      %cst_202 = arith.constant 0.000000e+00 : f32
      %187 = vector.broadcast %cst_202 : f32 to vector<28x128xf32>
      %188 = arith.maximumf %186, %187 : vector<28x128xf32>
      %c2_i32_203 = arith.constant 2 : i32
      %189 = arith.muli %c2_i32_203, %arg16 : i32
      %c1_i32_204 = arith.constant 1 : i32
      %190 = arith.addi %189, %c1_i32_204 : i32
      %c0_i32_205 = arith.constant 0 : i32
      %191 = arith.addi %190, %c0_i32_205 : i32
      %c0_206 = arith.constant 0 : index
      %192 = arith.index_cast %191 : i32 to index
      %c0_207 = arith.constant 0 : index
      %c0_208 = arith.constant 0 : index
      %193 = vector.load %arg1[%c0_206, %192, %c0_207, %c0_208] : memref<1x32x32x3xf32, #tpu.memory_space<vmem>>, vector<1x1x28x3xf32>
      %194 = vector.shape_cast %193 : vector<1x1x28x3xf32> to vector<28x3xf32>
      %c0_i32_209 = arith.constant 0 : i32
      %195 = arith.addi %190, %c0_i32_209 : i32
      %c0_210 = arith.constant 0 : index
      %196 = arith.index_cast %195 : i32 to index
      %c1_211 = arith.constant 1 : index
      %c0_212 = arith.constant 0 : index
      %197 = vector.load %arg1[%c0_210, %196, %c1_211, %c0_212] : memref<1x32x32x3xf32, #tpu.memory_space<vmem>>, vector<1x1x28x3xf32>
      %198 = vector.shape_cast %197 : vector<1x1x28x3xf32> to vector<28x3xf32>
      %c0_i32_213 = arith.constant 0 : i32
      %199 = arith.addi %190, %c0_i32_213 : i32
      %c0_214 = arith.constant 0 : index
      %200 = arith.index_cast %199 : i32 to index
      %c2_215 = arith.constant 2 : index
      %c0_216 = arith.constant 0 : index
      %201 = vector.load %arg1[%c0_214, %200, %c2_215, %c0_216] : memref<1x32x32x3xf32, #tpu.memory_space<vmem>>, vector<1x1x28x3xf32>
      %202 = vector.shape_cast %201 : vector<1x1x28x3xf32> to vector<28x3xf32>
      %c0_i32_217 = arith.constant 0 : i32
      %203 = arith.addi %190, %c0_i32_217 : i32
      %c0_218 = arith.constant 0 : index
      %204 = arith.index_cast %203 : i32 to index
      %c3_219 = arith.constant 3 : index
      %c0_220 = arith.constant 0 : index
      %205 = vector.load %arg1[%c0_218, %204, %c3_219, %c0_220] : memref<1x32x32x3xf32, #tpu.memory_space<vmem>>, vector<1x1x28x3xf32>
      %206 = vector.shape_cast %205 : vector<1x1x28x3xf32> to vector<28x3xf32>
      %c0_i32_221 = arith.constant 0 : i32
      %207 = arith.addi %190, %c0_i32_221 : i32
      %c0_222 = arith.constant 0 : index
      %208 = arith.index_cast %207 : i32 to index
      %c4_223 = arith.constant 4 : index
      %c0_224 = arith.constant 0 : index
      %209 = vector.load %arg1[%c0_222, %208, %c4_223, %c0_224] : memref<1x32x32x3xf32, #tpu.memory_space<vmem>>, vector<1x1x28x3xf32>
      %210 = vector.shape_cast %209 : vector<1x1x28x3xf32> to vector<28x3xf32>
      %c1_i32_225 = arith.constant 1 : i32
      %211 = arith.addi %190, %c1_i32_225 : i32
      %c0_226 = arith.constant 0 : index
      %212 = arith.index_cast %211 : i32 to index
      %c0_227 = arith.constant 0 : index
      %c0_228 = arith.constant 0 : index
      %213 = vector.load %arg1[%c0_226, %212, %c0_227, %c0_228] : memref<1x32x32x3xf32, #tpu.memory_space<vmem>>, vector<1x1x28x3xf32>
      %214 = vector.shape_cast %213 : vector<1x1x28x3xf32> to vector<28x3xf32>
      %c1_i32_229 = arith.constant 1 : i32
      %215 = arith.addi %190, %c1_i32_229 : i32
      %c0_230 = arith.constant 0 : index
      %216 = arith.index_cast %215 : i32 to index
      %c1_231 = arith.constant 1 : index
      %c0_232 = arith.constant 0 : index
      %217 = vector.load %arg1[%c0_230, %216, %c1_231, %c0_232] : memref<1x32x32x3xf32, #tpu.memory_space<vmem>>, vector<1x1x28x3xf32>
      %218 = vector.shape_cast %217 : vector<1x1x28x3xf32> to vector<28x3xf32>
      %c1_i32_233 = arith.constant 1 : i32
      %219 = arith.addi %190, %c1_i32_233 : i32
      %c0_234 = arith.constant 0 : index
      %220 = arith.index_cast %219 : i32 to index
      %c2_235 = arith.constant 2 : index
      %c0_236 = arith.constant 0 : index
      %221 = vector.load %arg1[%c0_234, %220, %c2_235, %c0_236] : memref<1x32x32x3xf32, #tpu.memory_space<vmem>>, vector<1x1x28x3xf32>
      %222 = vector.shape_cast %221 : vector<1x1x28x3xf32> to vector<28x3xf32>
      %c1_i32_237 = arith.constant 1 : i32
      %223 = arith.addi %190, %c1_i32_237 : i32
      %c0_238 = arith.constant 0 : index
      %224 = arith.index_cast %223 : i32 to index
      %c3_239 = arith.constant 3 : index
      %c0_240 = arith.constant 0 : index
      %225 = vector.load %arg1[%c0_238, %224, %c3_239, %c0_240] : memref<1x32x32x3xf32, #tpu.memory_space<vmem>>, vector<1x1x28x3xf32>
      %226 = vector.shape_cast %225 : vector<1x1x28x3xf32> to vector<28x3xf32>
      %c1_i32_241 = arith.constant 1 : i32
      %227 = arith.addi %190, %c1_i32_241 : i32
      %c0_242 = arith.constant 0 : index
      %228 = arith.index_cast %227 : i32 to index
      %c4_243 = arith.constant 4 : index
      %c0_244 = arith.constant 0 : index
      %229 = vector.load %arg1[%c0_242, %228, %c4_243, %c0_244] : memref<1x32x32x3xf32, #tpu.memory_space<vmem>>, vector<1x1x28x3xf32>
      %230 = vector.shape_cast %229 : vector<1x1x28x3xf32> to vector<28x3xf32>
      %c2_i32_245 = arith.constant 2 : i32
      %231 = arith.addi %190, %c2_i32_245 : i32
      %c0_246 = arith.constant 0 : index
      %232 = arith.index_cast %231 : i32 to index
      %c0_247 = arith.constant 0 : index
      %c0_248 = arith.constant 0 : index
      %233 = vector.load %arg1[%c0_246, %232, %c0_247, %c0_248] : memref<1x32x32x3xf32, #tpu.memory_space<vmem>>, vector<1x1x28x3xf32>
      %234 = vector.shape_cast %233 : vector<1x1x28x3xf32> to vector<28x3xf32>
      %c2_i32_249 = arith.constant 2 : i32
      %235 = arith.addi %190, %c2_i32_249 : i32
      %c0_250 = arith.constant 0 : index
      %236 = arith.index_cast %235 : i32 to index
      %c1_251 = arith.constant 1 : index
      %c0_252 = arith.constant 0 : index
      %237 = vector.load %arg1[%c0_250, %236, %c1_251, %c0_252] : memref<1x32x32x3xf32, #tpu.memory_space<vmem>>, vector<1x1x28x3xf32>
      %238 = vector.shape_cast %237 : vector<1x1x28x3xf32> to vector<28x3xf32>
      %c2_i32_253 = arith.constant 2 : i32
      %239 = arith.addi %190, %c2_i32_253 : i32
      %c0_254 = arith.constant 0 : index
      %240 = arith.index_cast %239 : i32 to index
      %c2_255 = arith.constant 2 : index
      %c0_256 = arith.constant 0 : index
      %241 = vector.load %arg1[%c0_254, %240, %c2_255, %c0_256] : memref<1x32x32x3xf32, #tpu.memory_space<vmem>>, vector<1x1x28x3xf32>
      %242 = vector.shape_cast %241 : vector<1x1x28x3xf32> to vector<28x3xf32>
      %c2_i32_257 = arith.constant 2 : i32
      %243 = arith.addi %190, %c2_i32_257 : i32
      %c0_258 = arith.constant 0 : index
      %244 = arith.index_cast %243 : i32 to index
      %c3_259 = arith.constant 3 : index
      %c0_260 = arith.constant 0 : index
      %245 = vector.load %arg1[%c0_258, %244, %c3_259, %c0_260] : memref<1x32x32x3xf32, #tpu.memory_space<vmem>>, vector<1x1x28x3xf32>
      %246 = vector.shape_cast %245 : vector<1x1x28x3xf32> to vector<28x3xf32>
      %c2_i32_261 = arith.constant 2 : i32
      %247 = arith.addi %190, %c2_i32_261 : i32
      %c0_262 = arith.constant 0 : index
      %248 = arith.index_cast %247 : i32 to index
      %c4_263 = arith.constant 4 : index
      %c0_264 = arith.constant 0 : index
      %249 = vector.load %arg1[%c0_262, %248, %c4_263, %c0_264] : memref<1x32x32x3xf32, #tpu.memory_space<vmem>>, vector<1x1x28x3xf32>
      %250 = vector.shape_cast %249 : vector<1x1x28x3xf32> to vector<28x3xf32>
      %c3_i32_265 = arith.constant 3 : i32
      %251 = arith.addi %190, %c3_i32_265 : i32
      %c0_266 = arith.constant 0 : index
      %252 = arith.index_cast %251 : i32 to index
      %c0_267 = arith.constant 0 : index
      %c0_268 = arith.constant 0 : index
      %253 = vector.load %arg1[%c0_266, %252, %c0_267, %c0_268] : memref<1x32x32x3xf32, #tpu.memory_space<vmem>>, vector<1x1x28x3xf32>
      %254 = vector.shape_cast %253 : vector<1x1x28x3xf32> to vector<28x3xf32>
      %c3_i32_269 = arith.constant 3 : i32
      %255 = arith.addi %190, %c3_i32_269 : i32
      %c0_270 = arith.constant 0 : index
      %256 = arith.index_cast %255 : i32 to index
      %c1_271 = arith.constant 1 : index
      %c0_272 = arith.constant 0 : index
      %257 = vector.load %arg1[%c0_270, %256, %c1_271, %c0_272] : memref<1x32x32x3xf32, #tpu.memory_space<vmem>>, vector<1x1x28x3xf32>
      %258 = vector.shape_cast %257 : vector<1x1x28x3xf32> to vector<28x3xf32>
      %c3_i32_273 = arith.constant 3 : i32
      %259 = arith.addi %190, %c3_i32_273 : i32
      %c0_274 = arith.constant 0 : index
      %260 = arith.index_cast %259 : i32 to index
      %c2_275 = arith.constant 2 : index
      %c0_276 = arith.constant 0 : index
      %261 = vector.load %arg1[%c0_274, %260, %c2_275, %c0_276] : memref<1x32x32x3xf32, #tpu.memory_space<vmem>>, vector<1x1x28x3xf32>
      %262 = vector.shape_cast %261 : vector<1x1x28x3xf32> to vector<28x3xf32>
      %c3_i32_277 = arith.constant 3 : i32
      %263 = arith.addi %190, %c3_i32_277 : i32
      %c0_278 = arith.constant 0 : index
      %264 = arith.index_cast %263 : i32 to index
      %c3_279 = arith.constant 3 : index
      %c0_280 = arith.constant 0 : index
      %265 = vector.load %arg1[%c0_278, %264, %c3_279, %c0_280] : memref<1x32x32x3xf32, #tpu.memory_space<vmem>>, vector<1x1x28x3xf32>
      %266 = vector.shape_cast %265 : vector<1x1x28x3xf32> to vector<28x3xf32>
      %c3_i32_281 = arith.constant 3 : i32
      %267 = arith.addi %190, %c3_i32_281 : i32
      %c0_282 = arith.constant 0 : index
      %268 = arith.index_cast %267 : i32 to index
      %c4_283 = arith.constant 4 : index
      %c0_284 = arith.constant 0 : index
      %269 = vector.load %arg1[%c0_282, %268, %c4_283, %c0_284] : memref<1x32x32x3xf32, #tpu.memory_space<vmem>>, vector<1x1x28x3xf32>
      %270 = vector.shape_cast %269 : vector<1x1x28x3xf32> to vector<28x3xf32>
      %c4_i32_285 = arith.constant 4 : i32
      %271 = arith.addi %190, %c4_i32_285 : i32
      %c0_286 = arith.constant 0 : index
      %272 = arith.index_cast %271 : i32 to index
      %c0_287 = arith.constant 0 : index
      %c0_288 = arith.constant 0 : index
      %273 = vector.load %arg1[%c0_286, %272, %c0_287, %c0_288] : memref<1x32x32x3xf32, #tpu.memory_space<vmem>>, vector<1x1x28x3xf32>
      %274 = vector.shape_cast %273 : vector<1x1x28x3xf32> to vector<28x3xf32>
      %c4_i32_289 = arith.constant 4 : i32
      %275 = arith.addi %190, %c4_i32_289 : i32
      %c0_290 = arith.constant 0 : index
      %276 = arith.index_cast %275 : i32 to index
      %c1_291 = arith.constant 1 : index
      %c0_292 = arith.constant 0 : index
      %277 = vector.load %arg1[%c0_290, %276, %c1_291, %c0_292] : memref<1x32x32x3xf32, #tpu.memory_space<vmem>>, vector<1x1x28x3xf32>
      %278 = vector.shape_cast %277 : vector<1x1x28x3xf32> to vector<28x3xf32>
      %c4_i32_293 = arith.constant 4 : i32
      %279 = arith.addi %190, %c4_i32_293 : i32
      %c0_294 = arith.constant 0 : index
      %280 = arith.index_cast %279 : i32 to index
      %c2_295 = arith.constant 2 : index
      %c0_296 = arith.constant 0 : index
      %281 = vector.load %arg1[%c0_294, %280, %c2_295, %c0_296] : memref<1x32x32x3xf32, #tpu.memory_space<vmem>>, vector<1x1x28x3xf32>
      %282 = vector.shape_cast %281 : vector<1x1x28x3xf32> to vector<28x3xf32>
      %c4_i32_297 = arith.constant 4 : i32
      %283 = arith.addi %190, %c4_i32_297 : i32
      %c0_298 = arith.constant 0 : index
      %284 = arith.index_cast %283 : i32 to index
      %c3_299 = arith.constant 3 : index
      %c0_300 = arith.constant 0 : index
      %285 = vector.load %arg1[%c0_298, %284, %c3_299, %c0_300] : memref<1x32x32x3xf32, #tpu.memory_space<vmem>>, vector<1x1x28x3xf32>
      %286 = vector.shape_cast %285 : vector<1x1x28x3xf32> to vector<28x3xf32>
      %c4_i32_301 = arith.constant 4 : i32
      %287 = arith.addi %190, %c4_i32_301 : i32
      %c0_302 = arith.constant 0 : index
      %288 = arith.index_cast %287 : i32 to index
      %c4_303 = arith.constant 4 : index
      %c0_304 = arith.constant 0 : index
      %289 = vector.load %arg1[%c0_302, %288, %c4_303, %c0_304] : memref<1x32x32x3xf32, #tpu.memory_space<vmem>>, vector<1x1x28x3xf32>
      %290 = vector.shape_cast %289 : vector<1x1x28x3xf32> to vector<28x3xf32>
      %cst_305 = arith.constant 0.000000e+00 : f32
      %291 = vector.broadcast %cst_305 : f32 to vector<28x53xf32>
      %292 = tpu.concatenate %194, %198, %202, %206, %210, %214, %218, %222, %226, %230, %234, %238, %242, %246, %250, %254 in 1 : vector<28x3xf32>, vector<28x3xf32>, vector<28x3xf32>, vector<28x3xf32>, vector<28x3xf32>, vector<28x3xf32>, vector<28x3xf32>, vector<28x3xf32>, vector<28x3xf32>, vector<28x3xf32>, vector<28x3xf32>, vector<28x3xf32>, vector<28x3xf32>, vector<28x3xf32>, vector<28x3xf32>, vector<28x3xf32> -> vector<28x48xf32>
      %293 = tpu.concatenate %258, %262, %266, %270, %274, %278, %282, %286, %290, %291 in 1 : vector<28x3xf32>, vector<28x3xf32>, vector<28x3xf32>, vector<28x3xf32>, vector<28x3xf32>, vector<28x3xf32>, vector<28x3xf32>, vector<28x3xf32>, vector<28x3xf32>, vector<28x53xf32> -> vector<28x80xf32>
      %294 = tpu.concatenate %292, %293 in 1 : vector<28x48xf32>, vector<28x80xf32> -> vector<28x128xf32>
      %cst_306 = arith.constant dense<0.000000e+00> : vector<28x128xf32>
      %295 = tpu.matmul %294, %0, %cst_306 {dimension_numbers = #tpu.dot_dimension_numbers<[1], [0], [0], [1], [0, 0, 1, 1], [], []>, precision = #tpu.contract_precision<fp32>} : vector<28x128xf32>, vector<128x128xf32>, vector<28x128xf32> -> vector<28x128xf32>
      %296 = vector.broadcast %1 : vector<1x128xf32> to vector<28x128xf32>
      %297 = arith.addf %295, %296 : vector<28x128xf32>
      %cst_307 = arith.constant 0.000000e+00 : f32
      %298 = vector.broadcast %cst_307 : f32 to vector<28x128xf32>
      %299 = arith.maximumf %297, %298 : vector<28x128xf32>
      %300 = arith.maximumf %188, %299 : vector<28x128xf32>
      %c0_308 = arith.constant 0 : index
      %c0_309 = arith.constant 0 : index
      %301 = vector.load %arg15[%c0_308, %c0_309] : memref<28x128xf32, #tpu.memory_space<vmem>>, vector<28x128xf32>
      tpu.vector_store %arg15[%c0_308, %c0_309], %300 {strides = array<i32>} : memref<28x128xf32, #tpu.memory_space<vmem>>, vector<28x128xf32>,
      %c0_310 = arith.constant 0 : index
      %c0_311 = arith.constant 0 : index
      %302 = tpu.strided_load %arg15[%c0_310, %c0_311] {strides = array<i32: 2, 1>} : memref<28x128xf32, #tpu.memory_space<vmem>>, vector<14x128xf32>
      %c1_312 = arith.constant 1 : index
      %c0_313 = arith.constant 0 : index
      %303 = tpu.strided_load %arg15[%c1_312, %c0_313] {strides = array<i32: 2, 1>} : memref<28x128xf32, #tpu.memory_space<vmem>>, vector<14x128xf32>
      %304 = arith.maximumf %302, %303 : vector<14x128xf32>
      %305 = arith.index_cast %arg16 : i32 to index
      %c0_314 = arith.constant 0 : index
      %c0_315 = arith.constant 0 : index
      %306 = vector.load %arg13[%305, %c0_314, %c0_315] : memref<14x14x128xf32, #tpu.memory_space<vmem>>, vector<1x14x128xf32>
      %307 = vector.shape_cast %306 : vector<1x14x128xf32> to vector<14x128xf32>
      %308 = vector.shape_cast %304 : vector<14x128xf32> to vector<1x14x128xf32>
      tpu.vector_store %arg13[%305, %c0_314, %c0_315], %308 {strides = array<i32>} : memref<14x14x128xf32, #tpu.memory_space<vmem>>, vector<1x14x128xf32>,
    }
    %c14_i32_3 = arith.constant 14 : i32
    %c0_4 = arith.constant 0 : index
    %c0_5 = arith.constant 0 : index
    %3 = vector.load %arg4[%c0_4, %c0_5] : memref<256x128xf32, #tpu.memory_space<vmem>>, vector<256x128xf32>
    %c0_6 = arith.constant 0 : index
    %c0_7 = arith.constant 0 : index
    %4 = vector.load %arg5[%c0_6, %c0_7] : memref<1x128xf32, #tpu.memory_space<vmem>>, vector<1x128xf32>
    %c0_i32_8 = arith.constant 0 : i32
    %c5_i32 = arith.constant 5 : i32
    %5 = arith.addi %c0_i32_8, %c5_i32 : i32
    %c1_i32_9 = arith.constant 1 : i32
    scf.for %arg16 = %c0_i32_8 to %5 step %c1_i32_9  : i32 {
      %c2_i32 = arith.constant 2 : i32
      %79 = arith.muli %c2_i32, %arg16 : i32
      %c0_i32_102 = arith.constant 0 : i32
      %80 = arith.addi %79, %c0_i32_102 : i32
      %81 = arith.index_cast %80 : i32 to index
      %c0_103 = arith.constant 0 : index
      %c0_104 = arith.constant 0 : index
      %82 = vector.load %arg13[%81, %c0_103, %c0_104] : memref<14x14x128xf32, #tpu.memory_space<vmem>>, vector<1x10x6xf32>
      %83 = vector.shape_cast %82 : vector<1x10x6xf32> to vector<10x6xf32>
      %c0_i32_105 = arith.constant 0 : i32
      %84 = arith.addi %79, %c0_i32_105 : i32
      %85 = arith.index_cast %84 : i32 to index
      %c1_106 = arith.constant 1 : index
      %c0_107 = arith.constant 0 : index
      %86 = vector.load %arg13[%85, %c1_106, %c0_107] : memref<14x14x128xf32, #tpu.memory_space<vmem>>, vector<1x10x6xf32>
      %87 = vector.shape_cast %86 : vector<1x10x6xf32> to vector<10x6xf32>
      %c0_i32_108 = arith.constant 0 : i32
      %88 = arith.addi %79, %c0_i32_108 : i32
      %89 = arith.index_cast %88 : i32 to index
      %c2_109 = arith.constant 2 : index
      %c0_110 = arith.constant 0 : index
      %90 = vector.load %arg13[%89, %c2_109, %c0_110] : memref<14x14x128xf32, #tpu.memory_space<vmem>>, vector<1x10x6xf32>
      %91 = vector.shape_cast %90 : vector<1x10x6xf32> to vector<10x6xf32>
      %c0_i32_111 = arith.constant 0 : i32
      %92 = arith.addi %79, %c0_i32_111 : i32
      %93 = arith.index_cast %92 : i32 to index
      %c3_112 = arith.constant 3 : index
      %c0_113 = arith.constant 0 : index
      %94 = vector.load %arg13[%93, %c3_112, %c0_113] : memref<14x14x128xf32, #tpu.memory_space<vmem>>, vector<1x10x6xf32>
      %95 = vector.shape_cast %94 : vector<1x10x6xf32> to vector<10x6xf32>
      %c0_i32_114 = arith.constant 0 : i32
      %96 = arith.addi %79, %c0_i32_114 : i32
      %97 = arith.index_cast %96 : i32 to index
      %c4_115 = arith.constant 4 : index
      %c0_116 = arith.constant 0 : index
      %98 = vector.load %arg13[%97, %c4_115, %c0_116] : memref<14x14x128xf32, #tpu.memory_space<vmem>>, vector<1x10x6xf32>
      %99 = vector.shape_cast %98 : vector<1x10x6xf32> to vector<10x6xf32>
      %c1_i32_117 = arith.constant 1 : i32
      %100 = arith.addi %79, %c1_i32_117 : i32
      %101 = arith.index_cast %100 : i32 to index
      %c0_118 = arith.constant 0 : index
      %c0_119 = arith.constant 0 : index
      %102 = vector.load %arg13[%101, %c0_118, %c0_119] : memref<14x14x128xf32, #tpu.memory_space<vmem>>, vector<1x10x6xf32>
      %103 = vector.shape_cast %102 : vector<1x10x6xf32> to vector<10x6xf32>
      %c1_i32_120 = arith.constant 1 : i32
      %104 = arith.addi %79, %c1_i32_120 : i32
      %105 = arith.index_cast %104 : i32 to index
      %c1_121 = arith.constant 1 : index
      %c0_122 = arith.constant 0 : index
      %106 = vector.load %arg13[%105, %c1_121, %c0_122] : memref<14x14x128xf32, #tpu.memory_space<vmem>>, vector<1x10x6xf32>
      %107 = vector.shape_cast %106 : vector<1x10x6xf32> to vector<10x6xf32>
      %c1_i32_123 = arith.constant 1 : i32
      %108 = arith.addi %79, %c1_i32_123 : i32
      %109 = arith.index_cast %108 : i32 to index
      %c2_124 = arith.constant 2 : index
      %c0_125 = arith.constant 0 : index
      %110 = vector.load %arg13[%109, %c2_124, %c0_125] : memref<14x14x128xf32, #tpu.memory_space<vmem>>, vector<1x10x6xf32>
      %111 = vector.shape_cast %110 : vector<1x10x6xf32> to vector<10x6xf32>
      %c1_i32_126 = arith.constant 1 : i32
      %112 = arith.addi %79, %c1_i32_126 : i32
      %113 = arith.index_cast %112 : i32 to index
      %c3_127 = arith.constant 3 : index
      %c0_128 = arith.constant 0 : index
      %114 = vector.load %arg13[%113, %c3_127, %c0_128] : memref<14x14x128xf32, #tpu.memory_space<vmem>>, vector<1x10x6xf32>
      %115 = vector.shape_cast %114 : vector<1x10x6xf32> to vector<10x6xf32>
      %c1_i32_129 = arith.constant 1 : i32
      %116 = arith.addi %79, %c1_i32_129 : i32
      %117 = arith.index_cast %116 : i32 to index
      %c4_130 = arith.constant 4 : index
      %c0_131 = arith.constant 0 : index
      %118 = vector.load %arg13[%117, %c4_130, %c0_131] : memref<14x14x128xf32, #tpu.memory_space<vmem>>, vector<1x10x6xf32>
      %119 = vector.shape_cast %118 : vector<1x10x6xf32> to vector<10x6xf32>
      %c2_i32_132 = arith.constant 2 : i32
      %120 = arith.addi %79, %c2_i32_132 : i32
      %121 = arith.index_cast %120 : i32 to index
      %c0_133 = arith.constant 0 : index
      %c0_134 = arith.constant 0 : index
      %122 = vector.load %arg13[%121, %c0_133, %c0_134] : memref<14x14x128xf32, #tpu.memory_space<vmem>>, vector<1x10x6xf32>
      %123 = vector.shape_cast %122 : vector<1x10x6xf32> to vector<10x6xf32>
      %c2_i32_135 = arith.constant 2 : i32
      %124 = arith.addi %79, %c2_i32_135 : i32
      %125 = arith.index_cast %124 : i32 to index
      %c1_136 = arith.constant 1 : index
      %c0_137 = arith.constant 0 : index
      %126 = vector.load %arg13[%125, %c1_136, %c0_137] : memref<14x14x128xf32, #tpu.memory_space<vmem>>, vector<1x10x6xf32>
      %127 = vector.shape_cast %126 : vector<1x10x6xf32> to vector<10x6xf32>
      %c2_i32_138 = arith.constant 2 : i32
      %128 = arith.addi %79, %c2_i32_138 : i32
      %129 = arith.index_cast %128 : i32 to index
      %c2_139 = arith.constant 2 : index
      %c0_140 = arith.constant 0 : index
      %130 = vector.load %arg13[%129, %c2_139, %c0_140] : memref<14x14x128xf32, #tpu.memory_space<vmem>>, vector<1x10x6xf32>
      %131 = vector.shape_cast %130 : vector<1x10x6xf32> to vector<10x6xf32>
      %c2_i32_141 = arith.constant 2 : i32
      %132 = arith.addi %79, %c2_i32_141 : i32
      %133 = arith.index_cast %132 : i32 to index
      %c3_142 = arith.constant 3 : index
      %c0_143 = arith.constant 0 : index
      %134 = vector.load %arg13[%133, %c3_142, %c0_143] : memref<14x14x128xf32, #tpu.memory_space<vmem>>, vector<1x10x6xf32>
      %135 = vector.shape_cast %134 : vector<1x10x6xf32> to vector<10x6xf32>
      %c2_i32_144 = arith.constant 2 : i32
      %136 = arith.addi %79, %c2_i32_144 : i32
      %137 = arith.index_cast %136 : i32 to index
      %c4_145 = arith.constant 4 : index
      %c0_146 = arith.constant 0 : index
      %138 = vector.load %arg13[%137, %c4_145, %c0_146] : memref<14x14x128xf32, #tpu.memory_space<vmem>>, vector<1x10x6xf32>
      %139 = vector.shape_cast %138 : vector<1x10x6xf32> to vector<10x6xf32>
      %c3_i32 = arith.constant 3 : i32
      %140 = arith.addi %79, %c3_i32 : i32
      %141 = arith.index_cast %140 : i32 to index
      %c0_147 = arith.constant 0 : index
      %c0_148 = arith.constant 0 : index
      %142 = vector.load %arg13[%141, %c0_147, %c0_148] : memref<14x14x128xf32, #tpu.memory_space<vmem>>, vector<1x10x6xf32>
      %143 = vector.shape_cast %142 : vector<1x10x6xf32> to vector<10x6xf32>
      %c3_i32_149 = arith.constant 3 : i32
      %144 = arith.addi %79, %c3_i32_149 : i32
      %145 = arith.index_cast %144 : i32 to index
      %c1_150 = arith.constant 1 : index
      %c0_151 = arith.constant 0 : index
      %146 = vector.load %arg13[%145, %c1_150, %c0_151] : memref<14x14x128xf32, #tpu.memory_space<vmem>>, vector<1x10x6xf32>
      %147 = vector.shape_cast %146 : vector<1x10x6xf32> to vector<10x6xf32>
      %c3_i32_152 = arith.constant 3 : i32
      %148 = arith.addi %79, %c3_i32_152 : i32
      %149 = arith.index_cast %148 : i32 to index
      %c2_153 = arith.constant 2 : index
      %c0_154 = arith.constant 0 : index
      %150 = vector.load %arg13[%149, %c2_153, %c0_154] : memref<14x14x128xf32, #tpu.memory_space<vmem>>, vector<1x10x6xf32>
      %151 = vector.shape_cast %150 : vector<1x10x6xf32> to vector<10x6xf32>
      %c3_i32_155 = arith.constant 3 : i32
      %152 = arith.addi %79, %c3_i32_155 : i32
      %153 = arith.index_cast %152 : i32 to index
      %c3_156 = arith.constant 3 : index
      %c0_157 = arith.constant 0 : index
      %154 = vector.load %arg13[%153, %c3_156, %c0_157] : memref<14x14x128xf32, #tpu.memory_space<vmem>>, vector<1x10x6xf32>
      %155 = vector.shape_cast %154 : vector<1x10x6xf32> to vector<10x6xf32>
      %c3_i32_158 = arith.constant 3 : i32
      %156 = arith.addi %79, %c3_i32_158 : i32
      %157 = arith.index_cast %156 : i32 to index
      %c4_159 = arith.constant 4 : index
      %c0_160 = arith.constant 0 : index
      %158 = vector.load %arg13[%157, %c4_159, %c0_160] : memref<14x14x128xf32, #tpu.memory_space<vmem>>, vector<1x10x6xf32>
      %159 = vector.shape_cast %158 : vector<1x10x6xf32> to vector<10x6xf32>
      %c4_i32 = arith.constant 4 : i32
      %160 = arith.addi %79, %c4_i32 : i32
      %161 = arith.index_cast %160 : i32 to index
      %c0_161 = arith.constant 0 : index
      %c0_162 = arith.constant 0 : index
      %162 = vector.load %arg13[%161, %c0_161, %c0_162] : memref<14x14x128xf32, #tpu.memory_space<vmem>>, vector<1x10x6xf32>
      %163 = vector.shape_cast %162 : vector<1x10x6xf32> to vector<10x6xf32>
      %c4_i32_163 = arith.constant 4 : i32
      %164 = arith.addi %79, %c4_i32_163 : i32
      %165 = arith.index_cast %164 : i32 to index
      %c1_164 = arith.constant 1 : index
      %c0_165 = arith.constant 0 : index
      %166 = vector.load %arg13[%165, %c1_164, %c0_165] : memref<14x14x128xf32, #tpu.memory_space<vmem>>, vector<1x10x6xf32>
      %167 = vector.shape_cast %166 : vector<1x10x6xf32> to vector<10x6xf32>
      %c4_i32_166 = arith.constant 4 : i32
      %168 = arith.addi %79, %c4_i32_166 : i32
      %169 = arith.index_cast %168 : i32 to index
      %c2_167 = arith.constant 2 : index
      %c0_168 = arith.constant 0 : index
      %170 = vector.load %arg13[%169, %c2_167, %c0_168] : memref<14x14x128xf32, #tpu.memory_space<vmem>>, vector<1x10x6xf32>
      %171 = vector.shape_cast %170 : vector<1x10x6xf32> to vector<10x6xf32>
      %c4_i32_169 = arith.constant 4 : i32
      %172 = arith.addi %79, %c4_i32_169 : i32
      %173 = arith.index_cast %172 : i32 to index
      %c3_170 = arith.constant 3 : index
      %c0_171 = arith.constant 0 : index
      %174 = vector.load %arg13[%173, %c3_170, %c0_171] : memref<14x14x128xf32, #tpu.memory_space<vmem>>, vector<1x10x6xf32>
      %175 = vector.shape_cast %174 : vector<1x10x6xf32> to vector<10x6xf32>
      %c4_i32_172 = arith.constant 4 : i32
      %176 = arith.addi %79, %c4_i32_172 : i32
      %177 = arith.index_cast %176 : i32 to index
      %c4_173 = arith.constant 4 : index
      %c0_174 = arith.constant 0 : index
      %178 = vector.load %arg13[%177, %c4_173, %c0_174] : memref<14x14x128xf32, #tpu.memory_space<vmem>>, vector<1x10x6xf32>
      %179 = vector.shape_cast %178 : vector<1x10x6xf32> to vector<10x6xf32>
      %cst_175 = arith.constant 0.000000e+00 : f32
      %180 = vector.broadcast %cst_175 : f32 to vector<10x106xf32>
      %181 = tpu.concatenate %83, %87, %91, %95, %99, %103, %107, %111, %115, %119, %123, %127, %131, %135, %139, %143 in 1 : vector<10x6xf32>, vector<10x6xf32>, vector<10x6xf32>, vector<10x6xf32>, vector<10x6xf32>, vector<10x6xf32>, vector<10x6xf32>, vector<10x6xf32>, vector<10x6xf32>, vector<10x6xf32>, vector<10x6xf32>, vector<10x6xf32>, vector<10x6xf32>, vector<10x6xf32>, vector<10x6xf32>, vector<10x6xf32> -> vector<10x96xf32>
      %182 = tpu.concatenate %147, %151, %155, %159, %163, %167, %171, %175, %179, %180 in 1 : vector<10x6xf32>, vector<10x6xf32>, vector<10x6xf32>, vector<10x6xf32>, vector<10x6xf32>, vector<10x6xf32>, vector<10x6xf32>, vector<10x6xf32>, vector<10x6xf32>, vector<10x106xf32> -> vector<10x160xf32>
      %183 = tpu.concatenate %181, %182 in 1 : vector<10x96xf32>, vector<10x160xf32> -> vector<10x256xf32>
      %cst_176 = arith.constant dense<0.000000e+00> : vector<10x128xf32>
      %184 = tpu.matmul %183, %3, %cst_176 {dimension_numbers = #tpu.dot_dimension_numbers<[1], [0], [0], [1], [0, 0, 1, 1], [], []>, precision = #tpu.contract_precision<fp32>} : vector<10x256xf32>, vector<256x128xf32>, vector<10x128xf32> -> vector<10x128xf32>
      %185 = vector.broadcast %4 : vector<1x128xf32> to vector<10x128xf32>
      %186 = arith.addf %184, %185 : vector<10x128xf32>
      %cst_177 = arith.constant 0.000000e+00 : f32
      %187 = vector.broadcast %cst_177 : f32 to vector<10x128xf32>
      %188 = arith.maximumf %186, %187 : vector<10x128xf32>
      %c2_i32_178 = arith.constant 2 : i32
      %189 = arith.muli %c2_i32_178, %arg16 : i32
      %c1_i32_179 = arith.constant 1 : i32
      %190 = arith.addi %189, %c1_i32_179 : i32
      %c0_i32_180 = arith.constant 0 : i32
      %191 = arith.addi %190, %c0_i32_180 : i32
      %192 = arith.index_cast %191 : i32 to index
      %c0_181 = arith.constant 0 : index
      %c0_182 = arith.constant 0 : index
      %193 = vector.load %arg13[%192, %c0_181, %c0_182] : memref<14x14x128xf32, #tpu.memory_space<vmem>>, vector<1x10x6xf32>
      %194 = vector.shape_cast %193 : vector<1x10x6xf32> to vector<10x6xf32>
      %c0_i32_183 = arith.constant 0 : i32
      %195 = arith.addi %190, %c0_i32_183 : i32
      %196 = arith.index_cast %195 : i32 to index
      %c1_184 = arith.constant 1 : index
      %c0_185 = arith.constant 0 : index
      %197 = vector.load %arg13[%196, %c1_184, %c0_185] : memref<14x14x128xf32, #tpu.memory_space<vmem>>, vector<1x10x6xf32>
      %198 = vector.shape_cast %197 : vector<1x10x6xf32> to vector<10x6xf32>
      %c0_i32_186 = arith.constant 0 : i32
      %199 = arith.addi %190, %c0_i32_186 : i32
      %200 = arith.index_cast %199 : i32 to index
      %c2_187 = arith.constant 2 : index
      %c0_188 = arith.constant 0 : index
      %201 = vector.load %arg13[%200, %c2_187, %c0_188] : memref<14x14x128xf32, #tpu.memory_space<vmem>>, vector<1x10x6xf32>
      %202 = vector.shape_cast %201 : vector<1x10x6xf32> to vector<10x6xf32>
      %c0_i32_189 = arith.constant 0 : i32
      %203 = arith.addi %190, %c0_i32_189 : i32
      %204 = arith.index_cast %203 : i32 to index
      %c3_190 = arith.constant 3 : index
      %c0_191 = arith.constant 0 : index
      %205 = vector.load %arg13[%204, %c3_190, %c0_191] : memref<14x14x128xf32, #tpu.memory_space<vmem>>, vector<1x10x6xf32>
      %206 = vector.shape_cast %205 : vector<1x10x6xf32> to vector<10x6xf32>
      %c0_i32_192 = arith.constant 0 : i32
      %207 = arith.addi %190, %c0_i32_192 : i32
      %208 = arith.index_cast %207 : i32 to index
      %c4_193 = arith.constant 4 : index
      %c0_194 = arith.constant 0 : index
      %209 = vector.load %arg13[%208, %c4_193, %c0_194] : memref<14x14x128xf32, #tpu.memory_space<vmem>>, vector<1x10x6xf32>
      %210 = vector.shape_cast %209 : vector<1x10x6xf32> to vector<10x6xf32>
      %c1_i32_195 = arith.constant 1 : i32
      %211 = arith.addi %190, %c1_i32_195 : i32
      %212 = arith.index_cast %211 : i32 to index
      %c0_196 = arith.constant 0 : index
      %c0_197 = arith.constant 0 : index
      %213 = vector.load %arg13[%212, %c0_196, %c0_197] : memref<14x14x128xf32, #tpu.memory_space<vmem>>, vector<1x10x6xf32>
      %214 = vector.shape_cast %213 : vector<1x10x6xf32> to vector<10x6xf32>
      %c1_i32_198 = arith.constant 1 : i32
      %215 = arith.addi %190, %c1_i32_198 : i32
      %216 = arith.index_cast %215 : i32 to index
      %c1_199 = arith.constant 1 : index
      %c0_200 = arith.constant 0 : index
      %217 = vector.load %arg13[%216, %c1_199, %c0_200] : memref<14x14x128xf32, #tpu.memory_space<vmem>>, vector<1x10x6xf32>
      %218 = vector.shape_cast %217 : vector<1x10x6xf32> to vector<10x6xf32>
      %c1_i32_201 = arith.constant 1 : i32
      %219 = arith.addi %190, %c1_i32_201 : i32
      %220 = arith.index_cast %219 : i32 to index
      %c2_202 = arith.constant 2 : index
      %c0_203 = arith.constant 0 : index
      %221 = vector.load %arg13[%220, %c2_202, %c0_203] : memref<14x14x128xf32, #tpu.memory_space<vmem>>, vector<1x10x6xf32>
      %222 = vector.shape_cast %221 : vector<1x10x6xf32> to vector<10x6xf32>
      %c1_i32_204 = arith.constant 1 : i32
      %223 = arith.addi %190, %c1_i32_204 : i32
      %224 = arith.index_cast %223 : i32 to index
      %c3_205 = arith.constant 3 : index
      %c0_206 = arith.constant 0 : index
      %225 = vector.load %arg13[%224, %c3_205, %c0_206] : memref<14x14x128xf32, #tpu.memory_space<vmem>>, vector<1x10x6xf32>
      %226 = vector.shape_cast %225 : vector<1x10x6xf32> to vector<10x6xf32>
      %c1_i32_207 = arith.constant 1 : i32
      %227 = arith.addi %190, %c1_i32_207 : i32
      %228 = arith.index_cast %227 : i32 to index
      %c4_208 = arith.constant 4 : index
      %c0_209 = arith.constant 0 : index
      %229 = vector.load %arg13[%228, %c4_208, %c0_209] : memref<14x14x128xf32, #tpu.memory_space<vmem>>, vector<1x10x6xf32>
      %230 = vector.shape_cast %229 : vector<1x10x6xf32> to vector<10x6xf32>
      %c2_i32_210 = arith.constant 2 : i32
      %231 = arith.addi %190, %c2_i32_210 : i32
      %232 = arith.index_cast %231 : i32 to index
      %c0_211 = arith.constant 0 : index
      %c0_212 = arith.constant 0 : index
      %233 = vector.load %arg13[%232, %c0_211, %c0_212] : memref<14x14x128xf32, #tpu.memory_space<vmem>>, vector<1x10x6xf32>
      %234 = vector.shape_cast %233 : vector<1x10x6xf32> to vector<10x6xf32>
      %c2_i32_213 = arith.constant 2 : i32
      %235 = arith.addi %190, %c2_i32_213 : i32
      %236 = arith.index_cast %235 : i32 to index
      %c1_214 = arith.constant 1 : index
      %c0_215 = arith.constant 0 : index
      %237 = vector.load %arg13[%236, %c1_214, %c0_215] : memref<14x14x128xf32, #tpu.memory_space<vmem>>, vector<1x10x6xf32>
      %238 = vector.shape_cast %237 : vector<1x10x6xf32> to vector<10x6xf32>
      %c2_i32_216 = arith.constant 2 : i32
      %239 = arith.addi %190, %c2_i32_216 : i32
      %240 = arith.index_cast %239 : i32 to index
      %c2_217 = arith.constant 2 : index
      %c0_218 = arith.constant 0 : index
      %241 = vector.load %arg13[%240, %c2_217, %c0_218] : memref<14x14x128xf32, #tpu.memory_space<vmem>>, vector<1x10x6xf32>
      %242 = vector.shape_cast %241 : vector<1x10x6xf32> to vector<10x6xf32>
      %c2_i32_219 = arith.constant 2 : i32
      %243 = arith.addi %190, %c2_i32_219 : i32
      %244 = arith.index_cast %243 : i32 to index
      %c3_220 = arith.constant 3 : index
      %c0_221 = arith.constant 0 : index
      %245 = vector.load %arg13[%244, %c3_220, %c0_221] : memref<14x14x128xf32, #tpu.memory_space<vmem>>, vector<1x10x6xf32>
      %246 = vector.shape_cast %245 : vector<1x10x6xf32> to vector<10x6xf32>
      %c2_i32_222 = arith.constant 2 : i32
      %247 = arith.addi %190, %c2_i32_222 : i32
      %248 = arith.index_cast %247 : i32 to index
      %c4_223 = arith.constant 4 : index
      %c0_224 = arith.constant 0 : index
      %249 = vector.load %arg13[%248, %c4_223, %c0_224] : memref<14x14x128xf32, #tpu.memory_space<vmem>>, vector<1x10x6xf32>
      %250 = vector.shape_cast %249 : vector<1x10x6xf32> to vector<10x6xf32>
      %c3_i32_225 = arith.constant 3 : i32
      %251 = arith.addi %190, %c3_i32_225 : i32
      %252 = arith.index_cast %251 : i32 to index
      %c0_226 = arith.constant 0 : index
      %c0_227 = arith.constant 0 : index
      %253 = vector.load %arg13[%252, %c0_226, %c0_227] : memref<14x14x128xf32, #tpu.memory_space<vmem>>, vector<1x10x6xf32>
      %254 = vector.shape_cast %253 : vector<1x10x6xf32> to vector<10x6xf32>
      %c3_i32_228 = arith.constant 3 : i32
      %255 = arith.addi %190, %c3_i32_228 : i32
      %256 = arith.index_cast %255 : i32 to index
      %c1_229 = arith.constant 1 : index
      %c0_230 = arith.constant 0 : index
      %257 = vector.load %arg13[%256, %c1_229, %c0_230] : memref<14x14x128xf32, #tpu.memory_space<vmem>>, vector<1x10x6xf32>
      %258 = vector.shape_cast %257 : vector<1x10x6xf32> to vector<10x6xf32>
      %c3_i32_231 = arith.constant 3 : i32
      %259 = arith.addi %190, %c3_i32_231 : i32
      %260 = arith.index_cast %259 : i32 to index
      %c2_232 = arith.constant 2 : index
      %c0_233 = arith.constant 0 : index
      %261 = vector.load %arg13[%260, %c2_232, %c0_233] : memref<14x14x128xf32, #tpu.memory_space<vmem>>, vector<1x10x6xf32>
      %262 = vector.shape_cast %261 : vector<1x10x6xf32> to vector<10x6xf32>
      %c3_i32_234 = arith.constant 3 : i32
      %263 = arith.addi %190, %c3_i32_234 : i32
      %264 = arith.index_cast %263 : i32 to index
      %c3_235 = arith.constant 3 : index
      %c0_236 = arith.constant 0 : index
      %265 = vector.load %arg13[%264, %c3_235, %c0_236] : memref<14x14x128xf32, #tpu.memory_space<vmem>>, vector<1x10x6xf32>
      %266 = vector.shape_cast %265 : vector<1x10x6xf32> to vector<10x6xf32>
      %c3_i32_237 = arith.constant 3 : i32
      %267 = arith.addi %190, %c3_i32_237 : i32
      %268 = arith.index_cast %267 : i32 to index
      %c4_238 = arith.constant 4 : index
      %c0_239 = arith.constant 0 : index
      %269 = vector.load %arg13[%268, %c4_238, %c0_239] : memref<14x14x128xf32, #tpu.memory_space<vmem>>, vector<1x10x6xf32>
      %270 = vector.shape_cast %269 : vector<1x10x6xf32> to vector<10x6xf32>
      %c4_i32_240 = arith.constant 4 : i32
      %271 = arith.addi %190, %c4_i32_240 : i32
      %272 = arith.index_cast %271 : i32 to index
      %c0_241 = arith.constant 0 : index
      %c0_242 = arith.constant 0 : index
      %273 = vector.load %arg13[%272, %c0_241, %c0_242] : memref<14x14x128xf32, #tpu.memory_space<vmem>>, vector<1x10x6xf32>
      %274 = vector.shape_cast %273 : vector<1x10x6xf32> to vector<10x6xf32>
      %c4_i32_243 = arith.constant 4 : i32
      %275 = arith.addi %190, %c4_i32_243 : i32
      %276 = arith.index_cast %275 : i32 to index
      %c1_244 = arith.constant 1 : index
      %c0_245 = arith.constant 0 : index
      %277 = vector.load %arg13[%276, %c1_244, %c0_245] : memref<14x14x128xf32, #tpu.memory_space<vmem>>, vector<1x10x6xf32>
      %278 = vector.shape_cast %277 : vector<1x10x6xf32> to vector<10x6xf32>
      %c4_i32_246 = arith.constant 4 : i32
      %279 = arith.addi %190, %c4_i32_246 : i32
      %280 = arith.index_cast %279 : i32 to index
      %c2_247 = arith.constant 2 : index
      %c0_248 = arith.constant 0 : index
      %281 = vector.load %arg13[%280, %c2_247, %c0_248] : memref<14x14x128xf32, #tpu.memory_space<vmem>>, vector<1x10x6xf32>
      %282 = vector.shape_cast %281 : vector<1x10x6xf32> to vector<10x6xf32>
      %c4_i32_249 = arith.constant 4 : i32
      %283 = arith.addi %190, %c4_i32_249 : i32
      %284 = arith.index_cast %283 : i32 to index
      %c3_250 = arith.constant 3 : index
      %c0_251 = arith.constant 0 : index
      %285 = vector.load %arg13[%284, %c3_250, %c0_251] : memref<14x14x128xf32, #tpu.memory_space<vmem>>, vector<1x10x6xf32>
      %286 = vector.shape_cast %285 : vector<1x10x6xf32> to vector<10x6xf32>
      %c4_i32_252 = arith.constant 4 : i32
      %287 = arith.addi %190, %c4_i32_252 : i32
      %288 = arith.index_cast %287 : i32 to index
      %c4_253 = arith.constant 4 : index
      %c0_254 = arith.constant 0 : index
      %289 = vector.load %arg13[%288, %c4_253, %c0_254] : memref<14x14x128xf32, #tpu.memory_space<vmem>>, vector<1x10x6xf32>
      %290 = vector.shape_cast %289 : vector<1x10x6xf32> to vector<10x6xf32>
      %cst_255 = arith.constant 0.000000e+00 : f32
      %291 = vector.broadcast %cst_255 : f32 to vector<10x106xf32>
      %292 = tpu.concatenate %194, %198, %202, %206, %210, %214, %218, %222, %226, %230, %234, %238, %242, %246, %250, %254 in 1 : vector<10x6xf32>, vector<10x6xf32>, vector<10x6xf32>, vector<10x6xf32>, vector<10x6xf32>, vector<10x6xf32>, vector<10x6xf32>, vector<10x6xf32>, vector<10x6xf32>, vector<10x6xf32>, vector<10x6xf32>, vector<10x6xf32>, vector<10x6xf32>, vector<10x6xf32>, vector<10x6xf32>, vector<10x6xf32> -> vector<10x96xf32>
      %293 = tpu.concatenate %258, %262, %266, %270, %274, %278, %282, %286, %290, %291 in 1 : vector<10x6xf32>, vector<10x6xf32>, vector<10x6xf32>, vector<10x6xf32>, vector<10x6xf32>, vector<10x6xf32>, vector<10x6xf32>, vector<10x6xf32>, vector<10x6xf32>, vector<10x106xf32> -> vector<10x160xf32>
      %294 = tpu.concatenate %292, %293 in 1 : vector<10x96xf32>, vector<10x160xf32> -> vector<10x256xf32>
      %cst_256 = arith.constant dense<0.000000e+00> : vector<10x128xf32>
      %295 = tpu.matmul %294, %3, %cst_256 {dimension_numbers = #tpu.dot_dimension_numbers<[1], [0], [0], [1], [0, 0, 1, 1], [], []>, precision = #tpu.contract_precision<fp32>} : vector<10x256xf32>, vector<256x128xf32>, vector<10x128xf32> -> vector<10x128xf32>
      %296 = vector.broadcast %4 : vector<1x128xf32> to vector<10x128xf32>
      %297 = arith.addf %295, %296 : vector<10x128xf32>
      %cst_257 = arith.constant 0.000000e+00 : f32
      %298 = vector.broadcast %cst_257 : f32 to vector<10x128xf32>
      %299 = arith.maximumf %297, %298 : vector<10x128xf32>
      %300 = arith.maximumf %188, %299 : vector<10x128xf32>
      %c0_258 = arith.constant 0 : index
      %c0_259 = arith.constant 0 : index
      %301 = vector.load %arg15[%c0_258, %c0_259] : memref<28x128xf32, #tpu.memory_space<vmem>>, vector<10x128xf32>
      tpu.vector_store %arg15[%c0_258, %c0_259], %300 {strides = array<i32>} : memref<28x128xf32, #tpu.memory_space<vmem>>, vector<10x128xf32>,
      %c0_260 = arith.constant 0 : index
      %c0_261 = arith.constant 0 : index
      %302 = tpu.strided_load %arg15[%c0_260, %c0_261] {strides = array<i32: 2, 1>} : memref<28x128xf32, #tpu.memory_space<vmem>>, vector<5x128xf32>
      %c1_262 = arith.constant 1 : index
      %c0_263 = arith.constant 0 : index
      %303 = tpu.strided_load %arg15[%c1_262, %c0_263] {strides = array<i32: 2, 1>} : memref<28x128xf32, #tpu.memory_space<vmem>>, vector<5x128xf32>
      %304 = arith.maximumf %302, %303 : vector<5x128xf32>
      %305 = arith.index_cast %arg16 : i32 to index
      %c0_264 = arith.constant 0 : index
      %c0_265 = arith.constant 0 : index
      %306 = vector.load %arg14[%305, %c0_264, %c0_265] : memref<5x5x128xf32, #tpu.memory_space<vmem>>, vector<1x5x128xf32>
      %307 = vector.shape_cast %306 : vector<1x5x128xf32> to vector<5x128xf32>
      %308 = vector.shape_cast %304 : vector<5x128xf32> to vector<1x5x128xf32>
      tpu.vector_store %arg14[%305, %c0_264, %c0_265], %308 {strides = array<i32>} : memref<5x5x128xf32, #tpu.memory_space<vmem>>, vector<1x5x128xf32>,
    }
    %c5_i32_10 = arith.constant 5 : i32
    %c0_11 = arith.constant 0 : index
    %c0_12 = arith.constant 0 : index
    %c0_13 = arith.constant 0 : index
    %6 = vector.load %arg14[%c0_11, %c0_12, %c0_13] : memref<5x5x128xf32, #tpu.memory_space<vmem>>, vector<1x1x16xf32>
    %7 = vector.shape_cast %6 : vector<1x1x16xf32> to vector<1x16xf32>
    %c0_14 = arith.constant 0 : index
    %c1 = arith.constant 1 : index
    %c0_15 = arith.constant 0 : index
    %8 = vector.load %arg14[%c0_14, %c1, %c0_15] : memref<5x5x128xf32, #tpu.memory_space<vmem>>, vector<1x1x16xf32>
    %9 = vector.shape_cast %8 : vector<1x1x16xf32> to vector<1x16xf32>
    %c0_16 = arith.constant 0 : index
    %c2 = arith.constant 2 : index
    %c0_17 = arith.constant 0 : index
    %10 = vector.load %arg14[%c0_16, %c2, %c0_17] : memref<5x5x128xf32, #tpu.memory_space<vmem>>, vector<1x1x16xf32>
    %11 = vector.shape_cast %10 : vector<1x1x16xf32> to vector<1x16xf32>
    %c0_18 = arith.constant 0 : index
    %c3 = arith.constant 3 : index
    %c0_19 = arith.constant 0 : index
    %12 = vector.load %arg14[%c0_18, %c3, %c0_19] : memref<5x5x128xf32, #tpu.memory_space<vmem>>, vector<1x1x16xf32>
    %13 = vector.shape_cast %12 : vector<1x1x16xf32> to vector<1x16xf32>
    %c0_20 = arith.constant 0 : index
    %c4 = arith.constant 4 : index
    %c0_21 = arith.constant 0 : index
    %14 = vector.load %arg14[%c0_20, %c4, %c0_21] : memref<5x5x128xf32, #tpu.memory_space<vmem>>, vector<1x1x16xf32>
    %15 = vector.shape_cast %14 : vector<1x1x16xf32> to vector<1x16xf32>
    %c1_22 = arith.constant 1 : index
    %c0_23 = arith.constant 0 : index
    %c0_24 = arith.constant 0 : index
    %16 = vector.load %arg14[%c1_22, %c0_23, %c0_24] : memref<5x5x128xf32, #tpu.memory_space<vmem>>, vector<1x1x16xf32>
    %17 = vector.shape_cast %16 : vector<1x1x16xf32> to vector<1x16xf32>
    %c1_25 = arith.constant 1 : index
    %c1_26 = arith.constant 1 : index
    %c0_27 = arith.constant 0 : index
    %18 = vector.load %arg14[%c1_25, %c1_26, %c0_27] : memref<5x5x128xf32, #tpu.memory_space<vmem>>, vector<1x1x16xf32>
    %19 = vector.shape_cast %18 : vector<1x1x16xf32> to vector<1x16xf32>
    %c1_28 = arith.constant 1 : index
    %c2_29 = arith.constant 2 : index
    %c0_30 = arith.constant 0 : index
    %20 = vector.load %arg14[%c1_28, %c2_29, %c0_30] : memref<5x5x128xf32, #tpu.memory_space<vmem>>, vector<1x1x16xf32>
    %21 = vector.shape_cast %20 : vector<1x1x16xf32> to vector<1x16xf32>
    %c1_31 = arith.constant 1 : index
    %c3_32 = arith.constant 3 : index
    %c0_33 = arith.constant 0 : index
    %22 = vector.load %arg14[%c1_31, %c3_32, %c0_33] : memref<5x5x128xf32, #tpu.memory_space<vmem>>, vector<1x1x16xf32>
    %23 = vector.shape_cast %22 : vector<1x1x16xf32> to vector<1x16xf32>
    %c1_34 = arith.constant 1 : index
    %c4_35 = arith.constant 4 : index
    %c0_36 = arith.constant 0 : index
    %24 = vector.load %arg14[%c1_34, %c4_35, %c0_36] : memref<5x5x128xf32, #tpu.memory_space<vmem>>, vector<1x1x16xf32>
    %25 = vector.shape_cast %24 : vector<1x1x16xf32> to vector<1x16xf32>
    %c2_37 = arith.constant 2 : index
    %c0_38 = arith.constant 0 : index
    %c0_39 = arith.constant 0 : index
    %26 = vector.load %arg14[%c2_37, %c0_38, %c0_39] : memref<5x5x128xf32, #tpu.memory_space<vmem>>, vector<1x1x16xf32>
    %27 = vector.shape_cast %26 : vector<1x1x16xf32> to vector<1x16xf32>
    %c2_40 = arith.constant 2 : index
    %c1_41 = arith.constant 1 : index
    %c0_42 = arith.constant 0 : index
    %28 = vector.load %arg14[%c2_40, %c1_41, %c0_42] : memref<5x5x128xf32, #tpu.memory_space<vmem>>, vector<1x1x16xf32>
    %29 = vector.shape_cast %28 : vector<1x1x16xf32> to vector<1x16xf32>
    %c2_43 = arith.constant 2 : index
    %c2_44 = arith.constant 2 : index
    %c0_45 = arith.constant 0 : index
    %30 = vector.load %arg14[%c2_43, %c2_44, %c0_45] : memref<5x5x128xf32, #tpu.memory_space<vmem>>, vector<1x1x16xf32>
    %31 = vector.shape_cast %30 : vector<1x1x16xf32> to vector<1x16xf32>
    %c2_46 = arith.constant 2 : index
    %c3_47 = arith.constant 3 : index
    %c0_48 = arith.constant 0 : index
    %32 = vector.load %arg14[%c2_46, %c3_47, %c0_48] : memref<5x5x128xf32, #tpu.memory_space<vmem>>, vector<1x1x16xf32>
    %33 = vector.shape_cast %32 : vector<1x1x16xf32> to vector<1x16xf32>
    %c2_49 = arith.constant 2 : index
    %c4_50 = arith.constant 4 : index
    %c0_51 = arith.constant 0 : index
    %34 = vector.load %arg14[%c2_49, %c4_50, %c0_51] : memref<5x5x128xf32, #tpu.memory_space<vmem>>, vector<1x1x16xf32>
    %35 = vector.shape_cast %34 : vector<1x1x16xf32> to vector<1x16xf32>
    %c3_52 = arith.constant 3 : index
    %c0_53 = arith.constant 0 : index
    %c0_54 = arith.constant 0 : index
    %36 = vector.load %arg14[%c3_52, %c0_53, %c0_54] : memref<5x5x128xf32, #tpu.memory_space<vmem>>, vector<1x1x16xf32>
    %37 = vector.shape_cast %36 : vector<1x1x16xf32> to vector<1x16xf32>
    %c3_55 = arith.constant 3 : index
    %c1_56 = arith.constant 1 : index
    %c0_57 = arith.constant 0 : index
    %38 = vector.load %arg14[%c3_55, %c1_56, %c0_57] : memref<5x5x128xf32, #tpu.memory_space<vmem>>, vector<1x1x16xf32>
    %39 = vector.shape_cast %38 : vector<1x1x16xf32> to vector<1x16xf32>
    %c3_58 = arith.constant 3 : index
    %c2_59 = arith.constant 2 : index
    %c0_60 = arith.constant 0 : index
    %40 = vector.load %arg14[%c3_58, %c2_59, %c0_60] : memref<5x5x128xf32, #tpu.memory_space<vmem>>, vector<1x1x16xf32>
    %41 = vector.shape_cast %40 : vector<1x1x16xf32> to vector<1x16xf32>
    %c3_61 = arith.constant 3 : index
    %c3_62 = arith.constant 3 : index
    %c0_63 = arith.constant 0 : index
    %42 = vector.load %arg14[%c3_61, %c3_62, %c0_63] : memref<5x5x128xf32, #tpu.memory_space<vmem>>, vector<1x1x16xf32>
    %43 = vector.shape_cast %42 : vector<1x1x16xf32> to vector<1x16xf32>
    %c3_64 = arith.constant 3 : index
    %c4_65 = arith.constant 4 : index
    %c0_66 = arith.constant 0 : index
    %44 = vector.load %arg14[%c3_64, %c4_65, %c0_66] : memref<5x5x128xf32, #tpu.memory_space<vmem>>, vector<1x1x16xf32>
    %45 = vector.shape_cast %44 : vector<1x1x16xf32> to vector<1x16xf32>
    %c4_67 = arith.constant 4 : index
    %c0_68 = arith.constant 0 : index
    %c0_69 = arith.constant 0 : index
    %46 = vector.load %arg14[%c4_67, %c0_68, %c0_69] : memref<5x5x128xf32, #tpu.memory_space<vmem>>, vector<1x1x16xf32>
    %47 = vector.shape_cast %46 : vector<1x1x16xf32> to vector<1x16xf32>
    %c4_70 = arith.constant 4 : index
    %c1_71 = arith.constant 1 : index
    %c0_72 = arith.constant 0 : index
    %48 = vector.load %arg14[%c4_70, %c1_71, %c0_72] : memref<5x5x128xf32, #tpu.memory_space<vmem>>, vector<1x1x16xf32>
    %49 = vector.shape_cast %48 : vector<1x1x16xf32> to vector<1x16xf32>
    %c4_73 = arith.constant 4 : index
    %c2_74 = arith.constant 2 : index
    %c0_75 = arith.constant 0 : index
    %50 = vector.load %arg14[%c4_73, %c2_74, %c0_75] : memref<5x5x128xf32, #tpu.memory_space<vmem>>, vector<1x1x16xf32>
    %51 = vector.shape_cast %50 : vector<1x1x16xf32> to vector<1x16xf32>
    %c4_76 = arith.constant 4 : index
    %c3_77 = arith.constant 3 : index
    %c0_78 = arith.constant 0 : index
    %52 = vector.load %arg14[%c4_76, %c3_77, %c0_78] : memref<5x5x128xf32, #tpu.memory_space<vmem>>, vector<1x1x16xf32>
    %53 = vector.shape_cast %52 : vector<1x1x16xf32> to vector<1x16xf32>
    %c4_79 = arith.constant 4 : index
    %c4_80 = arith.constant 4 : index
    %c0_81 = arith.constant 0 : index
    %54 = vector.load %arg14[%c4_79, %c4_80, %c0_81] : memref<5x5x128xf32, #tpu.memory_space<vmem>>, vector<1x1x16xf32>
    %55 = vector.shape_cast %54 : vector<1x1x16xf32> to vector<1x16xf32>
    %cst = arith.constant 0.000000e+00 : f32
    %56 = vector.broadcast %cst : f32 to vector<1x112xf32>
    %57 = tpu.concatenate %7, %9, %11, %13, %15, %17, %19, %21, %23, %25, %27, %29, %31, %33, %35, %37 in 1 : vector<1x16xf32>, vector<1x16xf32>, vector<1x16xf32>, vector<1x16xf32>, vector<1x16xf32>, vector<1x16xf32>, vector<1x16xf32>, vector<1x16xf32>, vector<1x16xf32>, vector<1x16xf32>, vector<1x16xf32>, vector<1x16xf32>, vector<1x16xf32>, vector<1x16xf32>, vector<1x16xf32>, vector<1x16xf32> -> vector<1x256xf32>
    %58 = tpu.concatenate %39, %41, %43, %45, %47, %49, %51, %53, %55, %56 in 1 : vector<1x16xf32>, vector<1x16xf32>, vector<1x16xf32>, vector<1x16xf32>, vector<1x16xf32>, vector<1x16xf32>, vector<1x16xf32>, vector<1x16xf32>, vector<1x16xf32>, vector<1x112xf32> -> vector<1x256xf32>
    %59 = tpu.concatenate %57, %58 in 1 : vector<1x256xf32>, vector<1x256xf32> -> vector<1x512xf32>
    %c0_82 = arith.constant 0 : index
    %c0_83 = arith.constant 0 : index
    %60 = vector.load %arg6[%c0_82, %c0_83] : memref<512x128xf32, #tpu.memory_space<vmem>>, vector<512x128xf32>
    %cst_84 = arith.constant dense<0.000000e+00> : vector<1x128xf32>
    %61 = tpu.matmul %59, %60, %cst_84 {dimension_numbers = #tpu.dot_dimension_numbers<[1], [0], [0], [1], [0, 0, 1, 1], [], []>, precision = #tpu.contract_precision<fp32>} : vector<1x512xf32>, vector<512x128xf32>, vector<1x128xf32> -> vector<1x128xf32>
    %c0_85 = arith.constant 0 : index
    %c0_86 = arith.constant 0 : index
    %62 = vector.load %arg7[%c0_85, %c0_86] : memref<1x128xf32, #tpu.memory_space<vmem>>, vector<1x128xf32>
    %63 = arith.addf %61, %62 : vector<1x128xf32>
    %cst_87 = arith.constant 0.000000e+00 : f32
    %64 = vector.broadcast %cst_87 : f32 to vector<1x128xf32>
    %65 = arith.maximumf %63, %64 : vector<1x128xf32>
    %c0_88 = arith.constant 0 : index
    %c0_89 = arith.constant 0 : index
    %66 = vector.load %arg8[%c0_88, %c0_89] : memref<128x128xf32, #tpu.memory_space<vmem>>, vector<128x128xf32>
    %cst_90 = arith.constant dense<0.000000e+00> : vector<1x128xf32>
    %67 = tpu.matmul %65, %66, %cst_90 {dimension_numbers = #tpu.dot_dimension_numbers<[1], [0], [0], [1], [0, 0, 1, 1], [], []>, precision = #tpu.contract_precision<fp32>} : vector<1x128xf32>, vector<128x128xf32>, vector<1x128xf32> -> vector<1x128xf32>
    %c0_91 = arith.constant 0 : index
    %c0_92 = arith.constant 0 : index
    %68 = vector.load %arg9[%c0_91, %c0_92] : memref<1x128xf32, #tpu.memory_space<vmem>>, vector<1x128xf32>
    %69 = arith.addf %67, %68 : vector<1x128xf32>
    %cst_93 = arith.constant 0.000000e+00 : f32
    %70 = vector.broadcast %cst_93 : f32 to vector<1x128xf32>
    %71 = arith.maximumf %69, %70 : vector<1x128xf32>
    %c0_94 = arith.constant 0 : index
    %c0_95 = arith.constant 0 : index
    %72 = vector.load %arg10[%c0_94, %c0_95] : memref<128x128xf32, #tpu.memory_space<vmem>>, vector<128x128xf32>
    %cst_96 = arith.constant dense<0.000000e+00> : vector<1x128xf32>
    %73 = tpu.matmul %71, %72, %cst_96 {dimension_numbers = #tpu.dot_dimension_numbers<[1], [0], [0], [1], [0, 0, 1, 1], [], []>, precision = #tpu.contract_precision<fp32>} : vector<1x128xf32>, vector<128x128xf32>, vector<1x128xf32> -> vector<1x128xf32>
    %c0_97 = arith.constant 0 : index
    %c0_98 = arith.constant 0 : index
    %74 = vector.load %arg11[%c0_97, %c0_98] : memref<1x128xf32, #tpu.memory_space<vmem>>, vector<1x128xf32>
    %75 = arith.addf %73, %74 : vector<1x128xf32>
    %c0_99 = arith.constant 0 : index
    %c0_100 = arith.constant 0 : index
    %c0_101 = arith.constant 0 : index
    %76 = vector.load %arg12[%c0_99, %c0_100, %c0_101] : memref<1x1x128xf32, #tpu.memory_space<vmem>>, vector<1x1x128xf32>
    %77 = vector.shape_cast %76 : vector<1x1x128xf32> to vector<1x128xf32>
    %78 = vector.shape_cast %75 : vector<1x128xf32> to vector<1x1x128xf32>
    tpu.vector_store %arg12[%c0_99, %c0_100, %c0_101], %78 {strides = array<i32>} : memref<1x1x128xf32, #tpu.memory_space<vmem>>, vector<1x1x128xf32>,
    return
  }
  func.func @transform_0(%arg0: i32) -> (i32, i32, i32, i32) {
    %c0_i32 = arith.constant 0 : i32
    %c0_i32_0 = arith.constant 0 : i32
    %c0_i32_1 = arith.constant 0 : i32
    %c0_i32_2 = arith.constant 0 : i32
    return %arg0, %c0_i32, %c0_i32_0, %c0_i32_1 : i32, i32, i32, i32
  }
  func.func @transform_1(%arg0: i32) -> (i32, i32) {
    %c0_i32 = arith.constant 0 : i32
    %c0_i32_0 = arith.constant 0 : i32
    %c0_i32_1 = arith.constant 0 : i32
    return %c0_i32, %c0_i32_0 : i32, i32
  }
  func.func @transform_2(%arg0: i32) -> (i32, i32) {
    %c0_i32 = arith.constant 0 : i32
    %c0_i32_0 = arith.constant 0 : i32
    %c0_i32_1 = arith.constant 0 : i32
    return %c0_i32, %c0_i32_0 : i32, i32
  }
  func.func @transform_3(%arg0: i32) -> (i32, i32) {
    %c0_i32 = arith.constant 0 : i32
    %c0_i32_0 = arith.constant 0 : i32
    %c0_i32_1 = arith.constant 0 : i32
    return %c0_i32, %c0_i32_0 : i32, i32
  }
  func.func @transform_4(%arg0: i32) -> (i32, i32) {
    %c0_i32 = arith.constant 0 : i32
    %c0_i32_0 = arith.constant 0 : i32
    %c0_i32_1 = arith.constant 0 : i32
    return %c0_i32, %c0_i32_0 : i32, i32
  }
  func.func @transform_5(%arg0: i32) -> (i32, i32) {
    %c0_i32 = arith.constant 0 : i32
    %c0_i32_0 = arith.constant 0 : i32
    %c0_i32_1 = arith.constant 0 : i32
    return %c0_i32, %c0_i32_0 : i32, i32
  }
  func.func @transform_6(%arg0: i32) -> (i32, i32) {
    %c0_i32 = arith.constant 0 : i32
    %c0_i32_0 = arith.constant 0 : i32
    %c0_i32_1 = arith.constant 0 : i32
    return %c0_i32, %c0_i32_0 : i32, i32
  }
  func.func @transform_7(%arg0: i32) -> (i32, i32) {
    %c0_i32 = arith.constant 0 : i32
    %c0_i32_0 = arith.constant 0 : i32
    %c0_i32_1 = arith.constant 0 : i32
    return %c0_i32, %c0_i32_0 : i32, i32
  }
  func.func @transform_8(%arg0: i32) -> (i32, i32) {
    %c0_i32 = arith.constant 0 : i32
    %c0_i32_0 = arith.constant 0 : i32
    %c0_i32_1 = arith.constant 0 : i32
    return %c0_i32, %c0_i32_0 : i32, i32
  }
  func.func @transform_9(%arg0: i32) -> (i32, i32) {
    %c0_i32 = arith.constant 0 : i32
    %c0_i32_0 = arith.constant 0 : i32
    %c0_i32_1 = arith.constant 0 : i32
    return %c0_i32, %c0_i32_0 : i32, i32
  }
  func.func @transform_10(%arg0: i32) -> (i32, i32) {
    %c0_i32 = arith.constant 0 : i32
    %c0_i32_0 = arith.constant 0 : i32
    %c0_i32_1 = arith.constant 0 : i32
    return %c0_i32, %c0_i32_0 : i32, i32
  }
  func.func @transform_11(%arg0: i32) -> (i32, i32, i32) {
    %c0_i32 = arith.constant 0 : i32
    %c0_i32_0 = arith.constant 0 : i32
    %c0_i32_1 = arith.constant 0 : i32
    return %arg0, %c0_i32, %c0_i32_0 : i32, i32, i32
  }
}

</mosaic_0001>

<bundles_post_ra>
// kernel: cnn_cifar_ws_forward.1
= control target key start
LH: loop header
LB: loop body
LE: loop exit
PB: predicated region body
PF: predicated region fallthrough
CT: control target
= control target key end

     0   :  { %s12435_s0 = inlined_call_operand.vmem [shape: f32[2,32,32,3], index: 0, kind: input, shape index: {}]   ;;  %s12436_s1 = inlined_call_operand.vmem [shape: f32[128,128], index: 1, kind: input, shape index: {}]   ;;  %s12437_s2 = inlined_call_operand.vmem [shape: f32[1,128], index: 2, kind: input, shape index: {}]   ;;  %s12438_s3 = inlined_call_operand.vmem [shape: f32[256,128], index: 3, kind: input, shape index: {}]   ;;  %s12439_s4 = inlined_call_operand.vmem [shape: f32[1,128], index: 4, kind: input, shape index: {}]   ;;  %s12440_s5 = inlined_call_operand.vmem [shape: f32[512,128], index: 5, kind: input, shape index: {}]   ;;  %s12441_s6 = inlined_call_operand.vmem [shape: f32[1,128], index: 6, kind: input, shape index: {}]   ;;  %s12442_s7 = inlined_call_operand.vmem [shape: f32[128,128], index: 7, kind: input, shape index: {}]   ;;  %s12443_s8 = inlined_call_operand.vmem [shape: f32[1,128], index: 8, kind: input, shape index: {}]   ;;  %s12444_s9 = inlined_call_operand.vmem [shape: f32[128,128], index: 9, kind: input, shape index: {}]   ;;  %s12445_s10 = inlined_call_operand.vmem [shape: f32[1,128], index: 10, kind: input, shape index: {}]   ;;  %s12446_s11 = inlined_call_operand.hbm [shape: f32[2,1,128], index: 11, kind: output, shape index: {}]  }
   0x1   :  { %12750 = sst [smem:[#allocation182_spill]] %s12435_s0 }
   0x2   :  { %12751 = sst [smem:[#allocation183_spill]] %s12436_s1 }
   0x3   :  { %12752 = sst [smem:[#allocation184_spill]] %s12437_s2 }
   0x4   :  { %16 = vsyncpa [#allocation6], 0 }
   0x5   :  { %18 = vsyncpa [#allocation6 + $0x1], 0  ;;  %s7407_s17 = smov 0   ;;  %s7409_s18 = smov 0  }
   0x6   :  { %s7411_s19 = smov 0   ;;  %s7413_s20 = smov 0  }
   0x7 LB: > { %12753 = sst [smem:[#allocation8_spill]] %s7285_s17  ;;  %s7428_s21 = sadd.s32 4294967295, %s7297_s20   ;;  %s7297_s20 = sphi %s7413_s20, %s13223_s20   ;;  %s7293_s19 = sphi %s7411_s19, %s13225_s19   ;;  %s7289_s18 = sphi %s7409_s18, %s13227_s18   ;;  %s7285_s17 = sphi %s7407_s17, %s13226_s17  }
   0x8   : > { %12754 = sst [smem:[#allocation9_spill]] %s7293_s19  ;;  %s6877_s22 = sadd.s32 4294967294, %s7297_s20  }
   0x9   : > { %12755 = sst [smem:[#allocation10_spill]] %s7297_s20  ;;  %s7432_s23 = sadd.s32 1, %s7297_s20  }
   0xa   : > { %12756 = sst [smem:[#allocation11_spill]] %s7432_s23  ;;  %s267_s24 = sadd.s32 1, %s7293_s19 }
   0xb   : > { %s264_s25 = ssub.s32 %s7297_s20, %s7432_s23  ;;  %p277_p0 = scmp.ne.s32.totalorder %s7293_s19, %s7289_s18 }
   0xc   : > { %p265_p1 = scmp.eq.s32.totalorder %s264_s25, 0  ;;  %p278_p2 = scmp.eq.s32.totalorder %s7428_s21, 1 }
   0xd   : > { %p283_p3 = scmp.ne.s32.totalorder %s7289_s18, %s7285_s17  ;;  %p284_p4 = scmp.eq.s32.totalorder %s6877_s22, 1 }
   0xe   : > { %s7443_s26 = scalar_select %p265_p1, %s7293_s19, %s267_s24  }
   0xf   : > { %p7445_p5 = por %p278_p2, %p277_p0  ;;  %p7449_p6 = por %p284_p4, %p283_p3 }
  0x10   : > { %12757 = sst [smem:[#allocation12_spill]] %s7443_s26  ;;  %p6880_p7 = scmp.ge.s32.totalorder %s7297_s20, 1 }
  0x11   : > { %s12759_s28 = scalar_select %p7449_p6, 1, 0 }
  0x12   : > { %p340_p8 = scmp.lt.s32.totalorder %s7297_s20, 3 }
  0x13   : > { %12760 = sst [smem:[#allocation13_spill]] %s12759_s28 }
  0x14   : > { %p341_p9 = pnand %p6880_p7, %p340_p8 }
  0x16   : > { %344 = sbr.rel (%p341_p9) target bundleno = 2262 (0x8d6), region = 64 }
  0x1b   : > { %p379_p10 = scmp.lt.s32.totalorder %s7428_s21, 1  ;;  %s12761_s1 = sld [smem:[#allocation183_spill]] }
  0x1c   : > { %s12777_s0 = sld [smem:[#allocation182_spill]]  ;;  %s12782_s24 = sand.u32 1, %s7289_s18  }
  0x1d   : > { %s380_s13 = scalar_select %p379_p10, %s7428_s21, 1 }
  0x1e   : > { %s12780_s2 = sld [smem:[#allocation184_spill]]  ;;  %s7550_s25 = scalar_lea.vmem [#allocation5], %s12782_s24 }
  0x1f   : > { %s7061_s16 = sshll.u32 %s380_s13, 10  ;;  %s7552_s30 = smov 0  }
  0x21   : > { %v7460_v0 = vld [vmem:[%s12761_s1] sm:$0xff]  ;;  %v7465_v1 = vld [vmem:[%s12761_s1 + $0x8] sm:$0xff]  ;;  %v7470_v2 = vld [vmem:[%s12761_s1 + $0x10] sm:$0xff] }
  0x22   : > { %12762 = vst [vmem:[#allocation14_spill] sm:$0xff] %v7460_v0  ;;  %v7475_v3 = vld [vmem:[%s12761_s1 + $0x18] sm:$0xff]  ;;  %v7480_v4 = vld [vmem:[%s12761_s1 + $0x20] sm:$0xff]  ;;  %v7485_v5 = vld [vmem:[%s12761_s1 + $0x28] sm:$0xff]  ;;  %s7536_s15 = scalar_lea.vmem %s12777_s0, %s7061_s16 }
  0x23   : > { %12763 = vst [vmem:[#allocation15_spill] sm:$0xff] %v7465_v1  ;;  %v7491_v6 = vld [vmem:[%s12761_s1 + $0x30] sm:$0xff]  ;;  %v7496_v7 = vld [vmem:[%s12761_s1 + $0x38] sm:$0xff]  ;;  %v7501_v8 = vld [vmem:[%s12761_s1 + $0x40] sm:$0xff]  ;;  %12778 = sst [smem:[#allocation29_spill]] %s7536_s15 }
  0x24   : > { %12764 = vst [vmem:[#allocation16_spill] sm:$0xff] %v7470_v2  ;;  %v7506_v9 = vld [vmem:[%s12761_s1 + $0x48] sm:$0xff]  ;;  %v7511_v10 = vld [vmem:[%s12761_s1 + $0x50] sm:$0xff]  ;;  %v7516_v11 = vld [vmem:[%s12761_s1 + $0x58] sm:$0xff] }
  0x25   : > { %12765 = vst [vmem:[#allocation17_spill] sm:$0xff] %v7475_v3  ;;  %v7521_v12 = vld [vmem:[%s12761_s1 + $0x60] sm:$0xff]  ;;  %v7526_v13 = vld [vmem:[%s12761_s1 + $0x68] sm:$0xff]  ;;  %v7531_v14 = vld [vmem:[%s12761_s1 + $0x70] sm:$0xff] }
  0x26   : > { %12766 = vst [vmem:[#allocation18_spill] sm:$0xff] %v7480_v4  ;;  %v7541_v15 = vld [vmem:[%s12761_s1 + $0x78] sm:$0xff]  ;;  %v7546_v16 = vld [vmem:[%s12780_s2] sm:$0x1] }
  0x27   : > { %12767 = vst [vmem:[#allocation19_spill] sm:$0xff] %v7485_v5 }
  0x28   : > { %12768 = vst [vmem:[#allocation20_spill] sm:$0xff] %v7491_v6 }
  0x29   : > { %12769 = vst [vmem:[#allocation21_spill] sm:$0xff] %v7496_v7 }
  0x2a   : > { %12770 = vst [vmem:[#allocation22_spill] sm:$0xff] %v7501_v8 }
  0x2b   : > { %12771 = vst [vmem:[#allocation23_spill] sm:$0xff] %v7506_v9 }
  0x2c   : > { %12772 = vst [vmem:[#allocation24_spill] sm:$0xff] %v7511_v10 }
  0x2d   : > { %12773 = vst [vmem:[#allocation25_spill] sm:$0xff] %v7516_v11 }
  0x2e   : > { %12774 = vst [vmem:[#allocation26_spill] sm:$0xff] %v7521_v12 }
  0x2f   : > { %12775 = vst [vmem:[#allocation27_spill] sm:$0xff] %v7526_v13 }
  0x30   : > { %12776 = vst [vmem:[#allocation28_spill] sm:$0xff] %v7531_v14 }
  0x31   : > { %12779 = vst [vmem:[#allocation30_spill] sm:$0xff] %v7541_v15 }
  0x32   : > { %12781 = vst [vmem:[#allocation31_spill] sm:$0xff] %v7546_v16 }
  0x33 LB: >> { %s12784_s15 = sld [smem:[#allocation29_spill]]  ;;  %s7062_s19 = sshll.u32 %s7301_s30, 6  ;;  %vm762_vm0 = vcmask 23552   ;;  %vm767_vm1 = vcmask 48128   ;;  %vm772_vm2 = vcmask 72704   ;;  %vm777_vm3 = vcmask 97280   ;;  %s7301_s30 = sphi %s7552_s30, %s406_s30  }
  0x34   : >> { %s12495_s26 = smov 3   ;;  %s12493_s12 = smov 6   ;;  %vm782_vm4 = vcmask 121856   ;;  %vm787_vm5 = vcmask 146432   ;;  %vm792_vm6 = vcmask 171008   ;;  %vm797_vm7 = vcmask 195584  }
  0x35   : >> { %s12497_s14 = smov 9   ;;  %s12502_s13 = smov 12   ;;  %vm802_vm8 = vcmask 220160   ;;  %vm807_vm9 = vcmask 244736   ;;  %vm812_vm10 = vcmask 269312   ;;  %vm822_vm11 = vcmask 318464  }
  0x36   : >> { %s12523_s22 = smov 15   ;;  %s12448_s29 = smov 18   ;;  %vm817_vm12 = vcmask 293888   ;;  %vm827_vm13 = vcmask 343040   ;;  %vm832_vm14 = vcmask 367616   ;;  %vm1017_vm15 = vcmask 392192  }
  0x37   : >> { %s12454_s24 = smov 21   ;;  %s12847_s0 = smov 42  }
  0x38   : >> { %v12783_v15 = vld [vmem:[#allocation30_spill] sm:$0xff]  ;;  %s12850_s1 = smov 15   ;;  %s12851_s2 = smov 39  }
  0x39   : >> { %s7559_s16 = scalar_lea.vmem %s12784_s15, %s7062_s19  ;;  %s12450_s19 = smov 24  }
  0x3a   : >> { %v416_v17 = vld [vmem:[%s7559_s16 + $0x11] sm:$0xff]  ;;  %v414_v18 = vld [vmem:[%s7559_s16 + $0x1] sm:$0xff]  ;;  %v417_v20 = vld [vmem:[%s7559_s16 + $0x19] sm:$0xf]  ;;  %s12853_s15 = smov 48   ;;  %s12854_s23 = smov 9  }
  0x3b   : >> { %530 = vrot.lane.b32.xlu1 %v416_v17, %s12495_s26  ;;  %526 = vrot.lane.b32.xlu0 %v414_v18, %s12495_s26  ;;  %v418_v19 = vld [vmem:[%s7559_s16 + $0x2] sm:$0xff]  ;;  %v419_v22 = vld [vmem:[%s7559_s16 + $0xa] sm:$0xff]  ;;  %s12855_s28 = smov 36   ;;  %s12862_s17 = smov 45  }
  0x3c   : >> { %542 = vrot.lane.b32.xlu2 %v418_v19, %s12493_s12  ;;  %v415_v21 = vld [vmem:[%s7559_s16 + $0x9] sm:$0xff]  ;;  %v421_v23 = vld [vmem:[%s7559_s16 + $0x1a] sm:$0xf]  ;;  %v420_v24 = vld [vmem:[%s7559_s16 + $0x12] sm:$0xff]  ;;  %s12865_s20 = smov 3  }
  0x3d   : >> { %v422_v25 = vld [vmem:[%s7559_s16 + $0x3] sm:$0xff]  ;;  %v424_v26 = vld [vmem:[%s7559_s16 + $0x13] sm:$0xff]  ;;  %v423_v27 = vld [vmem:[%s7559_s16 + $0xb] sm:$0xff] }
  0x3e   : >> { %v425_v28 = vld [vmem:[%s7559_s16 + $0x1b] sm:$0xf]  ;;  %v427_v29 = vld [vmem:[%s7559_s16 + $0xc] sm:$0xff]  ;;  %v426_v30 = vld [vmem:[%s7559_s16 + $0x4] sm:$0xff] }
  0x3f   : >> { %v428_v31 = vld [vmem:[%s7559_s16 + $0x14] sm:$0xff]  ;;  %v6887_v32 = vld [vmem:[%s7559_s16 + $0x20] sm:$0xff]  ;;  %v429_v33 = vld [vmem:[%s7559_s16 + $0x1c] sm:$0xf] }
  0x40   : >> { %v6888_v34 = vld [vmem:[%s7559_s16 + $0x28] sm:$0xff]  ;;  %v6890_v35 = vld [vmem:[%s7559_s16 + $0x38] sm:$0xf]  ;;  %v6889_v36 = vld [vmem:[%s7559_s16 + $0x30] sm:$0xff] }
  0x41   : >> { %v7600_v37 = vld [vmem:[%s7559_s16 + $0x21] sm:$0xff]  ;;  %v6893_v38 = vld [vmem:[%s7559_s16 + $0x31] sm:$0xff]  ;;  %v7608_v39 = vld [vmem:[%s7559_s16 + $0x29] sm:$0xff] }
  0x42   : >> { %v6894_v40 = vld [vmem:[%s7559_s16 + $0x39] sm:$0xf]  ;;  %v7616_v41 = vld [vmem:[%s7559_s16 + $0x2a] sm:$0xff]  ;;  %v6895_v42 = vld [vmem:[%s7559_s16 + $0x22] sm:$0xff] }
  0x43   : >> { %532 = vrot.lane.b32.xlu1 %v417_v20, %s12495_s26  ;;  %528 = vrot.lane.b32.xlu0 %v415_v21, %s12495_s26  ;;  %12785 = vst [vmem:[#allocation32_spill] sm:$0xff] %v7616_v41  ;;  %v6897_v43 = vld [vmem:[%s7559_s16 + $0x32] sm:$0xff]  ;;  %v7625_v44 = vld [vmem:[%s7559_s16 + $0x23] sm:$0xff] }
  0x44   : >> { %544 = vrot.lane.b32.xlu2 %v419_v22, %s12493_s12  ;;  %v6898_v45 = vld [vmem:[%s7559_s16 + $0x3a] sm:$0xf]  ;;  %v6900_v46 = vld [vmem:[%s7559_s16 + $0x2b] sm:$0xff]  ;;  %v6909_v55 = vld [vmem:[%s7559_s16 + $0x40] sm:$0xff] }
  0x45   : >> { %v6902_v47 = vld [vmem:[%s7559_s16 + $0x3b] sm:$0xf]  ;;  %v6901_v48 = vld [vmem:[%s7559_s16 + $0x33] sm:$0xff]  ;;  %v7636_v49 = vld [vmem:[%s7559_s16 + $0x24] sm:$0xff] }
  0x46   : >> { %v6905_v50 = vld [vmem:[%s7559_s16 + $0x34] sm:$0xff]  ;;  %v6904_v51 = vld [vmem:[%s7559_s16 + $0x2c] sm:$0xff]  ;;  %v6906_v52 = vld [vmem:[%s7559_s16 + $0x3c] sm:$0xf] }
  0x47   : >> { %v7651_v54 = vld [vmem:[%s7559_s16 + $0x48] sm:$0xff]  ;;  %v6911_v56 = vld [vmem:[%s7559_s16 + $0x50] sm:$0xff]  ;;  %v6912_v59 = vld [vmem:[%s7559_s16 + $0x58] sm:$0xf] }
  0x48   : >> { %12786 = vst [vmem:[#allocation33_spill] sm:$0xff] %v7651_v54  ;;  %v7662_v58 = vld [vmem:[%s7559_s16 + $0x41] sm:$0xff]  ;;  %v6914_v60 = vld [vmem:[%s7559_s16 + $0x49] sm:$0xff]  ;;  %v6916_v62 = vld [vmem:[%s7559_s16 + $0x59] sm:$0xf] }
  0x49   : >> { %v6915_v63 = vld [vmem:[%s7559_s16 + $0x51] sm:$0xff]  ;;  %v7675_v17 = vld [vmem:[%s7559_s16 + $0x42] sm:$0xff]  ;;  %v7836_v4 = vld [vmem:[%s7559_s16 + $0x99] sm:$0xf] }
  0x4a   : >> { %12787 = vst [vmem:[#allocation34_spill] sm:$0xff] %v7675_v17  ;;  %v6919_v21 = vld [vmem:[%s7559_s16 + $0x52] sm:$0xff]  ;;  %v6918_v22 = vld [vmem:[%s7559_s16 + $0x4a] sm:$0xff]  ;;  %v6953_v0 = vld [vmem:[%s7559_s16 + $0x80] sm:$0xff] }
  0x4b   : >> { %548 = vrot.lane.b32.xlu1 %v421_v23, %s12493_s12  ;;  %546 = vrot.lane.b32.xlu0 %v420_v24, %s12493_s12  ;;  %v6920_v23 = vld [vmem:[%s7559_s16 + $0x5a] sm:$0xf]  ;;  %v7820_v1 = vld [vmem:[%s7559_s16 + $0x81] sm:$0xff]  ;;  %12794 = vst [vmem:[#allocation41_spill] sm:$0xff] %v7836_v4 }
  0x4c   : >> { %558 = vrot.lane.b32.xlu2 %v422_v25, %s12497_s14  ;;  %12792 = vst [vmem:[#allocation39_spill] sm:$0xff] %v7820_v1  ;;  %v6956_v2 = vld [vmem:[%s7559_s16 + $0x98] sm:$0xf]  ;;  %v7824_v3 = vld [vmem:[%s7559_s16 + $0x89] sm:$0xff] }
  0x4d   : >> { %12793 = vst [vmem:[#allocation40_spill] sm:$0xff] %v7824_v3  ;;  %v7840_v5 = vld [vmem:[%s7559_s16 + $0x82] sm:$0xff]  ;;  %v412_v6 = vld [vmem:[%s7559_s16 + $0x10] sm:$0xff]  ;;  %v7881_v11 = vld [vmem:[%s7559_s16 + $0x9a] sm:$0xf] }
  0x4e   : >> { %v7858_v7 = vld [vmem:[%s7559_s16 + $0x8a] sm:$0xff]  ;;  %v7922_v14 = vld [vmem:[%s7559_s16 + $0x93] sm:$0xff] }
  0x4f   : >> { %v7861_v8 = vld [vmem:[%s7559_s16 + $0x83] sm:$0xff] }
  0x50   : >> { %v7884_v12 = vld [vmem:[%s7559_s16 + $0x84] sm:$0xff] }
  0x53   : >> { %562 = vrot.lane.b32.xlu1 %v424_v26, %s12497_s14  ;;  %560 = vrot.lane.b32.xlu0 %v423_v27, %s12497_s14  ;;  %v6922_v27 = vld [vmem:[%s7559_s16 + $0x4b] sm:$0xff] }
  0x54   : >> { %564 = vrot.lane.b32.xlu2 %v425_v28, %s12497_s14  ;;  %v6921_v28 = vld [vmem:[%s7559_s16 + $0x43] sm:$0xff] }
  0x5b   : >> { %576 = vrot.lane.b32.xlu1 %v427_v29, %s12502_s13  ;;  %574 = vrot.lane.b32.xlu0 %v426_v30, %s12502_s13  ;;  %v6923_v29 = vld [vmem:[%s7559_s16 + $0x53] sm:$0xff] }
  0x5c   : >> { %578 = vrot.lane.b32.xlu2 %v428_v31, %s12502_s13 }
  0x63   : >> { %590 = vrot.lane.b32.xlu1 %v6887_v32, %s12523_s22  ;;  %580 = vrot.lane.b32.xlu0 %v429_v33, %s12502_s13  ;;  %v7712_v33 = vld [vmem:[%s7559_s16 + $0x44] sm:$0xff] }
  0x64   : >> { %592 = vrot.lane.b32.xlu2 %v6888_v34, %s12523_s22  ;;  %12788 = vst [vmem:[#allocation35_spill] sm:$0xff] %v7712_v33  ;;  %v6924_v34 = vld [vmem:[%s7559_s16 + $0x5b] sm:$0xf] }
  0x6b   : >> { %596 = vrot.lane.b32.xlu1 %v6890_v35, %s12523_s22  ;;  %594 = vrot.lane.b32.xlu0 %v6889_v36, %s12523_s22  ;;  %v6926_v35 = vld [vmem:[%s7559_s16 + $0x4c] sm:$0xff] }
  0x6c   : >> { %606 = vrot.lane.b32.xlu2 %v7600_v37, %s12448_s29 }
  0x73   : >> { %610 = vrot.lane.b32.xlu1 %v6893_v38, %s12448_s29  ;;  %608 = vrot.lane.b32.xlu0 %v7608_v39, %s12448_s29 }
  0x74   : >> { %612 = vrot.lane.b32.xlu2 %v6894_v40, %s12448_s29  ;;  %s12452_s29 = smov 27  }
  0x7b   : >> { %624 = vrot.lane.b32.xlu1 %v7616_v41, %s12454_s24  ;;  %622 = vrot.lane.b32.xlu0 %v6895_v42, %s12454_s24  ;;  %v6928_v42 = vld [vmem:[%s7559_s16 + $0x5c] sm:$0xf]  ;;  %v7887_v41 = vld [vmem:[%s7559_s16 + $0x8b] sm:$0xff] }
  0x7c   : >> { %626 = vrot.lane.b32.xlu2 %v6897_v43, %s12454_s24  ;;  %v6927_v43 = vld [vmem:[%s7559_s16 + $0x54] sm:$0xff] }
  0x83   : >> { %638 = vrot.lane.b32.xlu1 %v7625_v44, %s12450_s19  ;;  %628 = vrot.lane.b32.xlu0 %v6898_v45, %s12454_s24  ;;  %s12458_s24 = smov 36   ;;  %v7729_v45 = vld [vmem:[%s7559_s16 + $0x60] sm:$0xff] }
  0x84   : >> { %640 = vrot.lane.b32.xlu2 %v6900_v46, %s12450_s19  ;;  %12789 = vst [vmem:[#allocation36_spill] sm:$0xff] %v7729_v45 }
  0x8b   : >> { %644 = vrot.lane.b32.xlu1 %v6902_v47, %s12450_s19  ;;  %642 = vrot.lane.b32.xlu0 %v6901_v48, %s12450_s19  ;;  %s12456_s19 = smov 30  }
  0x8c   : >> { %654 = vrot.lane.b32.xlu2 %v7636_v49, %s12452_s29 }
  0x93   : >> { %658 = vrot.lane.b32.xlu1 %v6905_v50, %s12452_s29  ;;  %656 = vrot.lane.b32.xlu0 %v6904_v51, %s12452_s29  ;;  %v6933_v50 = vld [vmem:[%s7559_s16 + $0x70] sm:$0xff]  ;;  %v6932_v51 = vld [vmem:[%s7559_s16 + $0x68] sm:$0xff] }
  0x94   : >> { %660 = vrot.lane.b32.xlu2 %v6906_v52, %s12452_s29  ;;  %s12489_s29 = smov 33   ;;  %v6934_v52 = vld [vmem:[%s7559_s16 + $0x78] sm:$0xf] }
  0x96   : >> { %v7648_v53 = vpop.permute.xlu2 %542 }
  0x9b   : >> { %672 = vrot.lane.b32.xlu1 %v7651_v54, %s12456_s19  ;;  %670 = vrot.lane.b32.xlu0 %v6909_v55, %s12456_s19  ;;  %v6959_v54 = vld [vmem:[%s7559_s16 + $0x91] sm:$0xff] }
  0x9c   : >> { %674 = vrot.lane.b32.xlu2 %v6911_v56, %s12456_s19 }
  0x9e   : >> { %v7659_v57 = vpop.permute.xlu2 %544 }
  0xa3   : >> { %686 = vrot.lane.b32.xlu1 %v7662_v58, %s12489_s29  ;;  %676 = vrot.lane.b32.xlu0 %v6912_v59, %s12456_s19  ;;  %s12460_s19 = smov 39  }
  0xa4   : >> { %688 = vrot.lane.b32.xlu2 %v6914_v60, %s12489_s29  ;;  %v6940_v60 = vld [vmem:[%s7559_s16 + $0x6a] sm:$0xff] }
  0xa6   : >> { %v7670_v61 = vpop.permute.xlu2 %558 }
  0xab   : >> { %692 = vrot.lane.b32.xlu1 %v6916_v62, %s12489_s29  ;;  %690 = vrot.lane.b32.xlu0 %v6915_v63, %s12489_s29  ;;  %v6939_v62 = vld [vmem:[%s7559_s16 + $0x62] sm:$0xff]  ;;  %v6941_v63 = vld [vmem:[%s7559_s16 + $0x72] sm:$0xff]  ;;  %s12797_s29 = smov 24  }
  0xac   : >> { %702 = vrot.lane.b32.xlu2 %v7675_v17, %s12458_s24 }
  0xad   : >> { %v7681_v18 = vpop.permute.xlu1 %530  ;;  %v7683_v19 = vpop.permute.xlu0 %526 }
  0xae   : >> { %v7685_v20 = vpop.permute.xlu2 %564 }
  0xb3   : >> { %706 = vrot.lane.b32.xlu1 %v6919_v21, %s12458_s24  ;;  %704 = vrot.lane.b32.xlu0 %v6918_v22, %s12458_s24 }
  0xb4   : >> { %708 = vrot.lane.b32.xlu2 %v6920_v23, %s12458_s24  ;;  %s12479_s24 = smov 42  }
  0xb5   : >> { %v7693_v24 = vpop.permute.xlu1 %532  ;;  %v7695_v25 = vpop.permute.xlu0 %528 }
  0xb6   : >> { %v7697_v26 = vpop.permute.xlu2 %578 }
  0xbb   : >> { %720 = vrot.lane.b32.xlu1 %v6922_v27, %s12460_s19  ;;  %718 = vrot.lane.b32.xlu0 %v6921_v28, %s12460_s19  ;;  %v7766_v27 = vld [vmem:[%s7559_s16 + $0x63] sm:$0xff]  ;;  %v6942_v28 = vld [vmem:[%s7559_s16 + $0x7a] sm:$0xf] }
  0xbc   : >> { %722 = vrot.lane.b32.xlu2 %v6923_v29, %s12460_s19  ;;  %12790 = vst [vmem:[#allocation37_spill] sm:$0xff] %v7766_v27  ;;  %v6944_v29 = vld [vmem:[%s7559_s16 + $0x6b] sm:$0xff] }
  0xbd   : >> { %v7705_v30 = vpop.permute.xlu1 %548  ;;  %v7707_v31 = vpop.permute.xlu0 %546 }
  0xbe   : >> { %v7709_v32 = vpop.permute.xlu2 %592 }
  0xc3   : >> { %734 = vrot.lane.b32.xlu1 %v7712_v33, %s12479_s24  ;;  %724 = vrot.lane.b32.xlu0 %v6924_v34, %s12460_s19  ;;  %s12471_s19 = smov 45  }
  0xc4   : >> { %736 = vrot.lane.b32.xlu2 %v6926_v35, %s12479_s24 }
  0xc5   : >> { %v7720_v36 = vpop.permute.xlu1 %562  ;;  %v7722_v38 = vpop.permute.xlu0 %560 }
  0xc6   : >> { %v7724_v40 = vpop.permute.xlu2 %606 }
  0xcb   : >> { %740 = vrot.lane.b32.xlu1 %v6928_v42, %s12479_s24  ;;  %738 = vrot.lane.b32.xlu0 %v6927_v43, %s12479_s24  ;;  %v6946_v43 = vld [vmem:[%s7559_s16 + $0x7b] sm:$0xf]  ;;  %s12796_s24 = smov 21  }
  0xcc   : >> { %750 = vrot.lane.b32.xlu2 %v7729_v45, %s12471_s19 }
  0xcd   : >> { %v7735_v46 = vpop.permute.xlu1 %576  ;;  %v7737_v47 = vpop.permute.xlu0 %574 }
  0xce   : >> { %v7739_v48 = vpop.permute.xlu2 %612 }
  0xd3   : >> { %754 = vrot.lane.b32.xlu1 %v6933_v50, %s12471_s19  ;;  %752 = vrot.lane.b32.xlu0 %v6932_v51, %s12471_s19  ;;  %v6945_v50 = vld [vmem:[%s7559_s16 + $0x73] sm:$0xff]  ;;  %v7783_v51 = vld [vmem:[%s7559_s16 + $0x64] sm:$0xff] }
  0xd4   : >> { %756 = vrot.lane.b32.xlu2 %v6934_v52, %s12471_s19  ;;  %12791 = vst [vmem:[#allocation38_spill] sm:$0xff] %v7783_v51  ;;  %s12795_s19 = smov 18  }
  0xd5   : >> { %v7747_v55 = vpop.permute.xlu1 %590  ;;  %v7749_v56 = vpop.permute.xlu0 %580 }
  0xd6   : >> { %v7751_v59 = vpop.permute.xlu2 %626 }
  0xdb   : >> { %843 = vrot.lane.b32.xlu1 %v6940_v60, %s12495_s26  ;;  %841 = vrot.lane.b32.xlu0 %v6939_v62, %s12495_s26 }
  0xdc   : >> { %845 = vrot.lane.b32.xlu2 %v6941_v63, %s12495_s26  ;;  %v6949_v63 = vld [vmem:[%s7559_s16 + $0x74] sm:$0xff] }
  0xdd   : >> { %v7759_v21 = vpop.permute.xlu1 %596  ;;  %v7761_v22 = vpop.permute.xlu0 %594 }
  0xde   : >> { %v7763_v23 = vpop.permute.xlu2 %640 }
  0xe3   : >> { %857 = vrot.lane.b32.xlu1 %v7766_v27, %s12493_s12  ;;  %847 = vrot.lane.b32.xlu0 %v6942_v28, %s12495_s26  ;;  %v6948_v28 = vld [vmem:[%s7559_s16 + $0x6c] sm:$0xff] }
  0xe4   : >> { %859 = vrot.lane.b32.xlu2 %v6944_v29, %s12493_s12  ;;  %v6950_v29 = vld [vmem:[%s7559_s16 + $0x7c] sm:$0xf]  ;;  %v6954_v27 = vld [vmem:[%s7559_s16 + $0x88] sm:$0xff] }
  0xe5   : >> { %v7774_v34 = vpop.permute.xlu1 %610  ;;  %v7776_v35 = vpop.permute.xlu0 %608 }
  0xe6   : >> { %v7778_v42 = vpop.permute.xlu2 %654 }
  0xeb   : >> { %863 = vrot.lane.b32.xlu1 %v6946_v43, %s12493_s12  ;;  %861 = vrot.lane.b32.xlu0 %v6945_v50, %s12493_s12 }
  0xec   : >> { %873 = vrot.lane.b32.xlu2 %v7783_v51, %s12497_s14  ;;  %v6955_v51 = vld [vmem:[%s7559_s16 + $0x90] sm:$0xff] }
  0xed   : >> { %v7789_v52 = vpop.permute.xlu1 %624  ;;  %v7791_v60 = vpop.permute.xlu0 %622 }
  0xee   : >> { %v7793_v62 = vpop.permute.xlu2 %660 }
  0xf3   : >> { %877 = vrot.lane.b32.xlu1 %v6949_v63, %s12497_s14  ;;  %875 = vrot.lane.b32.xlu0 %v6948_v28, %s12497_s14 }
  0xf4   : >> { %879 = vrot.lane.b32.xlu2 %v6950_v29, %s12497_s14 }
  0xf5   : >> { %v7801_v43 = vpop.permute.xlu1 %638  ;;  %v7803_v50 = vpop.permute.xlu0 %628 }
  0xf6   : >> { %v7805_v16 = vpop.permute.xlu2 %674 }
  0xfb   : >> { %891 = vrot.lane.b32.xlu1 %v6954_v27, %s12502_s13  ;;  %889 = vrot.lane.b32.xlu0 %v6953_v0, %s12502_s13 }
  0xfc   : >> { %893 = vrot.lane.b32.xlu2 %v6955_v51, %s12502_s13 }
  0xfd   : >> { %v7813_v63 = vpop.permute.xlu1 %644  ;;  %v7815_v28 = vpop.permute.xlu0 %642 }
  0xfe   : >> { %v7817_v29 = vpop.permute.xlu2 %688 }
 0x103   : >> { %905 = vrot.lane.b32.xlu1 %v7820_v1, %s12523_s22  ;;  %895 = vrot.lane.b32.xlu0 %v6956_v2, %s12502_s13 }
 0x104   : >> { %907 = vrot.lane.b32.xlu2 %v7824_v3, %s12523_s22  ;;  %v7855_v3 = vld [vmem:[%s7559_s16 + $0x92] sm:$0xff] }
 0x105   : >> { %v659_v0 = vpop.permute.xlu1 %658  ;;  %v7831_v27 = vpop.permute.xlu0 %656 }
 0x106   : >> { %v7833_v51 = vpop.permute.xlu2 %702 }
 0x10b   : >> { %911 = vrot.lane.b32.xlu1 %v7836_v4, %s12523_s22  ;;  %909 = vrot.lane.b32.xlu0 %v6959_v54, %s12523_s22  ;;  %v765_v54 = vsel %vm762_vm0, %v412_v6, %v7681_v18  ;;  %v411_v18 = vld [vmem:[%s7559_s16 + $0x8] sm:$0xff] }
 0x10c   : >> { %921 = vrot.lane.b32.xlu2 %v7840_v5, %s12795_s19  ;;  %v770_v33 = vsel %vm767_vm1, %v765_v54, %v7707_v31  ;;  %v764_v13 = vsel %vm762_vm0, %v411_v18, %v7695_v25 }
 0x10d   : >> { %v7847_v2 = vpop.permute.xlu1 %672  ;;  %v7849_v1 = vpop.permute.xlu0 %670  ;;  %v775_v10 = vsel %vm772_vm2, %v770_v33, %v7720_v36  ;;  %v410_v33 = vld [vmem:[%s7559_s16] sm:$0xff]  ;;  %v769_v25 = vsel %vm767_vm1, %v764_v13, %v7659_v57 }
 0x10e   : >> { %v7851_v45 = vpop.permute.xlu2 %708  ;;  %v780_v31 = vsel %vm777_vm3, %v775_v10, %v7697_v26  ;;  %v413_v10 = vld [vmem:[%s7559_s16 + $0x18] sm:$0xf]  ;;  %v774_v18 = vsel %vm772_vm2, %v769_v25, %v7722_v38  ;;  %v7925_v38 = vld [vmem:[%s7559_s16 + $0x8c] sm:$0xff] }
 0x10f   : >> { %v785_v54 = vsel %vm782_vm4, %v780_v31, %v7761_v22  ;;  %v766_v13 = vsel %vm762_vm0, %v413_v10, %v7693_v24 }
 0x110   : >> { %v790_v36 = vsel %vm787_vm5, %v785_v54, %v7774_v34  ;;  %v763_v34 = vsel %vm762_vm0, %v410_v33, %v7683_v19  ;;  %v779_v54 = vsel %vm777_vm3, %v774_v18, %v7735_v46  ;;  %v7929_v33 = vld [vmem:[%s7559_s16 + $0x94] sm:$0xff]  ;;  %v771_v24 = vsel %vm767_vm1, %v766_v13, %v7705_v30 }
 0x111   : >> { %v795_v17 = vsel %vm792_vm6, %v790_v36, %v7751_v59  ;;  %v768_v46 = vsel %vm767_vm1, %v763_v34, %v7648_v53  ;;  %v784_v59 = vsel %vm782_vm4, %v779_v54, %v7709_v32  ;;  %v7969_v34 = vld [vmem:[%s7559_s16 + $0x9b] sm:$0xf] }
 0x112   : >> { %v800_v57 = vsel %vm797_vm7, %v795_v17, %v7815_v28  ;;  %v789_v17 = vsel %vm787_vm5, %v784_v59, %v7776_v35  ;;  %v773_v30 = vsel %vm772_vm2, %v768_v46, %v7670_v61 }
 0x113   : >> { %925 = vrot.lane.b32.xlu1 %v7855_v3, %s12795_s19  ;;  %923 = vrot.lane.b32.xlu0 %v7858_v7, %s12795_s19  ;;  %v805_v19 = vsel %vm802_vm8, %v800_v57, %v659_v0  ;;  %v794_v28 = vsel %vm792_vm6, %v789_v17, %v7789_v52  ;;  %v778_v52 = vsel %vm777_vm3, %v773_v30, %v7737_v47  ;;  %v6975_v17 = vld [vmem:[%s7559_s16 + $0xa0] sm:$0xff] }
 0x114   : >> { %937 = vrot.lane.b32.xlu2 %v7861_v8, %s12796_s24  ;;  %v810_v53 = vsel %vm807_vm9, %v805_v19, %v7805_v16  ;;  %v776_v16 = vsel %vm772_vm2, %v771_v24, %v7685_v20  ;;  %v783_v25 = vsel %vm782_vm4, %v778_v52, %v7747_v55  ;;  %v7974_v55 = vld [vmem:[%s7559_s16 + $0x9c] sm:$0xf]  ;;  %v6983_v24 = vld [vmem:[%s7559_s16 + $0xa2] sm:$0xff] }
 0x115   : >> { %v7871_v4 = vpop.permute.xlu1 %686  ;;  %v7873_v9 = vpop.permute.xlu0 %676  ;;  %v781_v61 = vsel %vm777_vm3, %v776_v16, %v7749_v56  ;;  %v788_v56 = vsel %vm787_vm5, %v783_v25, %v7724_v40  ;;  %v6987_v52 = vld [vmem:[%s7559_s16 + $0xa3] sm:$0xff] }
 0x116   : >> { %v723_v6 = vpop.permute.xlu2 %722  ;;  %v786_v47 = vsel %vm782_vm4, %v781_v61, %v7759_v21 }
 0x11b   : >> { %927 = vrot.lane.b32.xlu1 %v7881_v11, %s12795_s19  ;;  %953 = vrot.lane.b32.xlu0 %v7884_v12, %s12797_s29 }
 0x11c   : >> { %939 = vrot.lane.b32.xlu2 %v7887_v41, %s12796_s24 }
 0x11d   : >> { %v7907_v26 = vpop.permute.xlu1 %692  ;;  %v691_v22 = vpop.permute.xlu0 %690 }
 0x11e   : >> { %v737_v31 = vpop.permute.xlu2 %736  ;;  %v815_v32 = vsel %vm812_vm10, %v810_v53, %v691_v22  ;;  %v799_v22 = vsel %vm797_vm7, %v794_v28, %v7763_v23  ;;  %v793_v23 = vsel %vm792_vm6, %v788_v56, %v7791_v60  ;;  %v6984_v56 = vld [vmem:[%s7559_s16 + $0xaa] sm:$0xff] }
 0x11f   : >> { %v804_v20 = vsel %vm802_vm8, %v799_v22, %v7831_v27  ;;  %v798_v21 = vsel %vm797_vm7, %v793_v23, %v7801_v43  ;;  %v6976_v22 = vld [vmem:[%s7559_s16 + $0xa8] sm:$0xff] }
 0x120   : >> { %v809_v54 = vsel %vm807_vm9, %v804_v20, %v7847_v2  ;;  %v6988_v23 = vld [vmem:[%s7559_s16 + $0xab] sm:$0xff] }
 0x121   : >> { %v814_v40 = vsel %vm812_vm10, %v809_v54, %v7817_v29 }
 0x123   : >> { %941 = vrot.lane.b32.xlu1 %v7922_v14, %s12796_s24  ;;  %955 = vrot.lane.b32.xlu0 %v7925_v38, %s12797_s29 }
 0x124   : >> { %957 = vrot.lane.b32.xlu2 %v7929_v33, %s12797_s29 }
 0x125   : >> { %v707_v35 = vpop.permute.xlu1 %706  ;;  %v705_v0 = vpop.permute.xlu0 %704 }
 0x126   : >> { %v820_v36 = vsel %vm817_vm12, %v815_v32, %v707_v35  ;;  %v751_v10 = vpop.permute.xlu2 %750  ;;  %v819_v60 = vsel %vm817_vm12, %v814_v40, %v705_v0  ;;  %v6991_v0 = vld [vmem:[%s7559_s16 + $0xa4] sm:$0xff] }
 0x127   : >> { %v825_v18 = vsel %vm822_vm11, %v820_v36, %v723_v6  ;;  %v791_v6 = vsel %vm787_vm5, %v786_v47, %v7739_v48 }
 0x128   : >> { %v796_v27 = vsel %vm792_vm6, %v791_v6, %v7803_v50  ;;  %v803_v50 = vsel %vm802_vm8, %v798_v21, %v7778_v42 }
 0x129   : >> { %v801_v48 = vsel %vm797_vm7, %v796_v27, %v7813_v63  ;;  %v808_v29 = vsel %vm807_vm9, %v803_v50, %v7849_v1  ;;  %v6938_v27 = vld [vmem:[%s7559_s16 + $0x79] sm:$0xf]  ;;  %v6977_v50 = vld [vmem:[%s7559_s16 + $0xb0] sm:$0xff] }
 0x12a   : >> { %v806_v19 = vsel %vm802_vm8, %v801_v48, %v7793_v62  ;;  %v813_v63 = vsel %vm812_vm10, %v808_v29, %v7871_v4  ;;  %v6985_v29 = vld [vmem:[%s7559_s16 + $0xb2] sm:$0xff] }
 0x12b   : >> { %943 = vrot.lane.b32.xlu0 %v7969_v34, %s12796_s24  ;;  %1730 = vrot.lane.b32.xlu1 %v7840_v5, %s12495_s26  ;;  %v811_v46 = vsel %vm807_vm9, %v806_v19, %v7873_v9  ;;  %v818_v1 = vsel %vm817_vm12, %v813_v63, %v7833_v51  ;;  %v6979_v51 = vld [vmem:[%s7559_s16 + $0xa1] sm:$0xff]  ;;  %v6989_v19 = vld [vmem:[%s7559_s16 + $0xb3] sm:$0xff] }
 0x12c   : >> { %959 = vrot.lane.b32.xlu2 %v7974_v55, %s12797_s29  ;;  %v816_v59 = vsel %vm812_vm10, %v811_v46, %v7907_v26 }
 0x12d   : >> { %v721_v2 = vpop.permute.xlu1 %720  ;;  %v719_v5 = vpop.permute.xlu0 %718  ;;  %v821_v9 = vsel %vm817_vm12, %v816_v59, %v7851_v45 }
 0x12e   : >> { %v824_v13 = vsel %vm822_vm11, %v819_v60, %v721_v2  ;;  %v757_v43 = vpop.permute.xlu2 %756  ;;  %v823_v4 = vsel %vm822_vm11, %v818_v1, %v719_v5  ;;  %v6992_v5 = vld [vmem:[%s7559_s16 + $0xac] sm:$0xff] }
 0x12f   : >> { %v829_v57 = vsel %vm827_vm13, %v824_v13, %v737_v31 }
 0x133   : >> { %1742 = vrot.lane.b32.xlu0 %v7861_v8, %s12493_s12  ;;  %1754 = vrot.lane.b32.xlu1 %v7884_v12, %s12497_s14 }
 0x134   : >> { %1770 = vrot.lane.b32.xlu2 %v6975_v17, %s12502_s13 }
 0x135   : >> { %v735_v42 = vpop.permute.xlu1 %734  ;;  %v725_v62 = vpop.permute.xlu0 %724 }
 0x136   : >> { %v828_v26 = vsel %vm827_vm13, %v823_v4, %v735_v42  ;;  %v826_v8 = vsel %vm822_vm11, %v821_v9, %v725_v62  ;;  %v8022_v31 = vpop.permute.xlu2 %845  ;;  %v6978_v42 = vld [vmem:[%s7559_s16 + $0xb8] sm:$0xf] }
 0x137   : >> { %v8025_v12 = vsel %vm832_vm14, %v828_v26, %v751_v10 }
 0x138   : >> { %12798 = vst [vmem:[#allocation42_spill] sm:$0xff] %v8025_v12 }
 0x13b   : >> { %1786 = vrot.lane.b32.xlu0 %v6979_v51, %s12523_s22  ;;  %1802 = vrot.lane.b32.xlu1 %v6983_v24, %s12795_s19  ;;  %v6986_v51 = vld [vmem:[%s7559_s16 + $0xba] sm:$0xf] }
 0x13c   : >> { %1818 = vrot.lane.b32.xlu2 %v6987_v52, %s12796_s24 }
 0x13d   : >> { %v741_v45 = vpop.permute.xlu1 %740  ;;  %v739_v28 = vpop.permute.xlu0 %738 }
 0x13e   : >> { %v831_v53 = vsel %vm827_vm13, %v826_v8, %v741_v45  ;;  %v830_v30 = vsel %vm827_vm13, %v825_v18, %v739_v28  ;;  %v860_v32 = vpop.permute.xlu2 %859  ;;  %v8104_v8 = vld [vmem:[%s7559_s16 + $0x61] sm:$0xff] }
 0x13f   : >> { %v8036_v35 = vsel %vm832_vm14, %v831_v53, %v757_v43 }
 0x140   : >> { %12799 = vst [vmem:[#allocation43_spill] sm:$0xff] %v8036_v35 }
 0x143   : >> { %1834 = vrot.lane.b32.xlu0 %v6991_v0, %s12797_s29  ;;  %1732 = vrot.lane.b32.xlu1 %v7858_v7, %s12495_s26  ;;  %v8056_v7 = vld [vmem:[%s7559_s16 + $0x69] sm:$0xff] }
 0x144   : >> { %1744 = vrot.lane.b32.xlu2 %v7887_v41, %s12493_s12  ;;  %v6980_v41 = vld [vmem:[%s7559_s16 + $0xa9] sm:$0xff] }
 0x145   : >> { %v755_v16 = vpop.permute.xlu1 %754  ;;  %v753_v36 = vpop.permute.xlu0 %752 }
 0x146   : >> { %v8045_v10 = vsel %vm832_vm14, %v830_v30, %v755_v16  ;;  %v8048_v25 = vsel %vm832_vm14, %v829_v57, %v753_v36  ;;  %v8050_v61 = vpop.permute.xlu2 %873  ;;  %v8120_v16 = vld [vmem:[%s7559_s16 + $0x71] sm:$0xff] }
 0x147   : >> { %12800 = vst [vmem:[#allocation44_spill] sm:$0xff] %v8045_v10  ;;  %v12836_v10 = vld [vmem:[#allocation17_spill] sm:$0xff] }
 0x148   : >> { %12801 = vst [vmem:[#allocation45_spill] sm:$0xff] %v8048_v25 }
 0x149   : >> { %12802 = vst [vmem:[#allocation46_spill] sm:$0xff] %v8120_v16 }
 0x14b   : >> { %1756 = vrot.lane.b32.xlu0 %v7925_v38, %s12497_s14  ;;  %1772 = vrot.lane.b32.xlu1 %v6976_v22, %s12502_s13 }
 0x14c   : >> { %1788 = vrot.lane.b32.xlu2 %v6980_v41, %s12523_s22 }
 0x14d   : >> { %v844_v18 = vpop.permute.xlu1 %843  ;;  %v842_v47 = vpop.permute.xlu0 %841 }
 0x14e   : >> { %v966_v20 = vsel %vm762_vm0, %v8056_v7, %v844_v18  ;;  %v880_v38 = vpop.permute.xlu2 %879  ;;  %v965_v24 = vsel %vm762_vm0, %v8104_v8, %v842_v47 }
 0x14f   : >> { %v8064_v54 = vsel %vm767_vm1, %v966_v20, %v860_v32 }
 0x153   : >> { %1804 = vrot.lane.b32.xlu0 %v6984_v56, %s12795_s19  ;;  %1820 = vrot.lane.b32.xlu1 %v6988_v23, %s12796_s24 }
 0x154   : >> { %1836 = vrot.lane.b32.xlu2 %v6992_v5, %s12797_s29 }
 0x155   : >> { %v858_v6 = vpop.permute.xlu1 %857  ;;  %v848_v21 = vpop.permute.xlu0 %847 }
 0x156   : >> { %v894_v40 = vpop.permute.xlu2 %893  ;;  %v968_v48 = vsel %vm762_vm0, %v6938_v27, %v848_v21  ;;  %v969_v17 = vsel %vm767_vm1, %v965_v24, %v858_v6  ;;  %v12811_v24 = vld [vmem:[#allocation26_spill] sm:$0xff] }
 0x15b   : >> { %1734 = vrot.lane.b32.xlu0 %v7855_v3, %s12495_s26  ;;  %1746 = vrot.lane.b32.xlu1 %v7922_v14, %s12493_s12 }
 0x15d   : >> { %v864_v60 = vpop.permute.xlu1 %863  ;;  %v862_v2 = vpop.permute.xlu0 %861 }
 0x15e   : >> { %v972_v13 = vsel %vm767_vm1, %v968_v48, %v864_v60  ;;  %v8088_v57 = vpop.permute.xlu2 %907  ;;  %v6981_v48 = vld [vmem:[%s7559_s16 + $0xb1] sm:$0xff] }
 0x15f   : >> { %v976_v43 = vsel %vm772_vm2, %v972_v13, %v880_v38 }
 0x163   : >> { %1758 = vrot.lane.b32.xlu0 %v7929_v33, %s12497_s14  ;;  %1774 = vrot.lane.b32.xlu1 %v6977_v50, %s12502_s13  ;;  %v6993_v50 = vld [vmem:[%s7559_s16 + $0xb4] sm:$0xff] }
 0x165   : >> { %v878_v3 = vpop.permute.xlu1 %877  ;;  %v8086_v14 = vpop.permute.xlu0 %875 }
 0x166   : >> { %v922_v33 = vpop.permute.xlu2 %921 }
 0x16b   : >> { %1806 = vrot.lane.b32.xlu0 %v6985_v29, %s12795_s19  ;;  %1822 = vrot.lane.b32.xlu1 %v6989_v19, %s12796_s24 }
 0x16d   : >> { %v892_v63 = vpop.permute.xlu1 %891  ;;  %v890_v46 = vpop.permute.xlu0 %889 }
 0x16e   : >> { %v938_v62 = vpop.permute.xlu2 %937 }
 0x173   : >> { %1736 = vrot.lane.b32.xlu0 %v7881_v11, %s12495_s26  ;;  %1748 = vrot.lane.b32.xlu1 %v7969_v34, %s12493_s12  ;;  %v6990_v34 = vld [vmem:[%s7559_s16 + $0xbb] sm:$0xf]  ;;  %s12499_s12 = smov 48  }
 0x175   : >> { %v906_v59 = vpop.permute.xlu1 %905  ;;  %v896_v1 = vpop.permute.xlu0 %895 }
 0x176   : >> { %v980_v4 = vsel %vm777_vm3, %v976_v43, %v896_v1  ;;  %v940_v45 = vpop.permute.xlu2 %939 }
 0x17b   : >> { %1760 = vrot.lane.b32.xlu0 %v7974_v55, %s12497_s14  ;;  %1776 = vrot.lane.b32.xlu1 %v6978_v42, %s12502_s13  ;;  %v973_v55 = vsel %vm772_vm2, %v969_v17, %v8050_v61  ;;  %v967_v61 = vsel %vm762_vm0, %v8120_v16, %v8022_v31  ;;  %v8220_v17 = vand.u32 4294901760, %v12811_v24 }
 0x17c   : >> { %v977_v30 = vsel %vm777_vm3, %v973_v55, %v890_v46  ;;  %v971_v56 = vsel %vm767_vm1, %v967_v61, %v862_v2  ;;  %v6982_v55 = vld [vmem:[%s7559_s16 + $0xb9] sm:$0xf] }
 0x17d   : >> { %v912_v9 = vpop.permute.xlu1 %911  ;;  %v910_v26 = vpop.permute.xlu0 %909  ;;  %v981_v32 = vsel %vm782_vm4, %v977_v30, %v906_v59  ;;  %v12804_v59 = vld [vmem:[#allocation28_spill] sm:$0xff] }
 0x17e   : >> { %v984_v11 = vsel %vm782_vm4, %v980_v4, %v912_v9  ;;  %v985_v0 = vsel %vm787_vm5, %v981_v32, %v922_v33  ;;  %v958_v52 = vpop.permute.xlu2 %957  ;;  %v8187_v1 = vand.u32 4294901760, %v12804_v59 }
 0x17f   : >> { %v989_v36 = vsel %vm792_vm6, %v985_v0, %v938_v62  ;;  %v12807_v62 = vld [vmem:[#allocation27_spill] sm:$0xff]  ;;  %v8238_v0 = vsub.f32 %v12811_v24, %v8220_v17 }
 0x180   : >> { %v8199_v42 = vsub.f32 %v12804_v59, %v8187_v1  ;;  %v8203_v9 = vand.u32 4294901760, %v12807_v62  ;;  %v12834_v59 = vld [vmem:[#allocation18_spill] sm:$0xff] }
 0x181   : >> { %12812 = vst [vmem:[#allocation48_spill] sm:$0xff] %v8238_v0  ;;  %v8252_v61 = vand.u32 4294901760, %v8238_v0 }
 0x183   : >> { %1808 = vrot.lane.b32.xlu0 %v6986_v51, %s12795_s19  ;;  %1824 = vrot.lane.b32.xlu1 %v6990_v34, %s12796_s24  ;;  %v8212_v51 = vand.u32 4294901760, %v8199_v42  ;;  %v8216_v34 = vsub.f32 %v12807_v62, %v8203_v9  ;;  %v8372_v62 = vand.u32 4294901760, %v12834_v59 }
 0x185   : >> { %v926_v28 = vpop.permute.xlu1 %925  ;;  %v924_v53 = vpop.permute.xlu0 %923  ;;  %v1099_v30 = vsub.f32 %v8199_v42, %v8212_v51  ;;  %v8234_v32 = vand.u32 4294901760, %v8216_v34 }
 0x186   : >> { %v8140_v6 = vpop.permute.xlu2 %959 }
 0x18b   : >> { %1486 = vrot.lane.b32.xlu0 %v7600_v37, %s12495_s26  ;;  %v975_v37 = vsel %vm772_vm2, %v971_v56, %v878_v3 }
 0x18c   : >> { %v979_v38 = vsel %vm777_vm3, %v975_v37, %v894_v40 }
 0x18d   : >> { %v928_v22 = vpop.permute.xlu1 %927  ;;  %v954_v18 = vpop.permute.xlu0 %953  ;;  %v983_v31 = vsel %vm782_vm4, %v979_v38, %v910_v26  ;;  %v12809_v26 = vld [vmem:[#allocation32_spill] sm:$0xff]  ;;  %v12817_v38 = vld [vmem:[#allocation35_spill] sm:$0xff] }
 0x18e   : >> { %v8129_v47 = vsel %vm787_vm5, %v984_v11, %v928_v22  ;;  %v993_v20 = vsel %vm797_vm7, %v989_v36, %v954_v18  ;;  %v987_v21 = vsel %vm787_vm5, %v983_v31, %v926_v28  ;;  %v8155_v13 = vpop.permute.xlu2 %1770  ;;  %12810 = vst [vmem:[#allocation32_spill] sm:$0xff] %v8216_v34  ;;  %v8247_v22 = vand.u32 4294901760, %v1099_v30 }
 0x18f   : >> { %v997_v23 = vsel %vm802_vm8, %v993_v20, 0.0  ;;  %v1105_v18 = vsub.f32 %v8216_v34, %v8234_v32 }
 0x190   : >> { %1005 = vrot.lane.b32.xlu2 %v997_v23, %s12499_s12  ;;  %v12815_v23 = vld [vmem:[#allocation24_spill] sm:$0xff] }
 0x191   : >> { %v8261_v37 = vand.u32 4294901760, %v12815_v23  ;;  %v8267_v31 = vand.u32 4294901760, %v1105_v18 }
 0x193   : >> { %1510 = vrot.lane.b32.xlu0 %v7625_v44, %s12497_s14  ;;  %v974_v44 = vsel %vm772_vm2, %v8064_v54, %v8086_v14  ;;  %s12816_s14 = smov 27  }
 0x194   : >> { %v978_v5 = vsel %vm777_vm3, %v974_v44, %v892_v63  ;;  %v12822_v44 = vld [vmem:[#allocation22_spill] sm:$0xff] }
 0x195   : >> { %v942_v41 = vpop.permute.xlu1 %941  ;;  %v956_v27 = vpop.permute.xlu0 %955  ;;  %v982_v29 = vsel %vm782_vm4, %v978_v5, %v8088_v57  ;;  %v8177_v57 = vand.u32 4294901760, %v12783_v15  ;;  %v8293_v5 = vand.u32 4294901760, %v12822_v44 }
 0x196   : >> { %v991_v60 = vsel %vm792_vm6, %v987_v21, %v942_v41  ;;  %v986_v19 = vsel %vm787_vm5, %v982_v29, %v924_v53  ;;  %v8179_v46 = vpop.permute.xlu2 %1818  ;;  %v1111_v21 = vsub.f32 %v8238_v0, %v8252_v61  ;;  %v12818_v41 = vld [vmem:[#allocation23_spill] sm:$0xff] }
 0x197   : >> { %v995_v2 = vsel %vm797_vm7, %v991_v60, %v958_v52  ;;  %1273 = vmatpush.msra.mxu3 %v8177_v57  ;;  %1026 = vmatpush.msra.mxu0 %v8177_v57  ;;  %v12813_v52 = vld [vmem:[#allocation25_spill] sm:$0xff]  ;;  %v8279_v60 = vsub.f32 %v12815_v23, %v8261_v37 }
 0x198   : >> { %1790 = vrot.lane.b32.xlu2 %v6981_v48, %s12523_s22  ;;  %v999_v40 = vsel %vm802_vm8, %v995_v2, 0.0  ;;  %v8242_v36 = vand.u32 4294901760, %v12813_v52  ;;  %v8286_v2 = vand.u32 4294901760, %v1111_v21 }
 0x199   : >> { %1009 = vrot.lane.b32.xlu1 %v999_v40, %s12499_s12  ;;  %1275 = vmatpush.msra.mxu3 %v8187_v1  ;;  %12819 = vst [vmem:[#allocation35_spill] sm:$0xff] %v8279_v60  ;;  %v8298_v29 = vand.u32 4294901760, %v8279_v60 }
 0x19a   : >> { %1028 = vmatpush.msra.mxu0 %v8187_v1  ;;  %v8258_v56 = vsub.f32 %v12813_v52, %v8242_v36 }
 0x19b   : >> { %1546 = vrot.lane.b32.xlu0 %v7662_v58, %s12795_s19  ;;  %v990_v58 = vsel %vm792_vm6, %v986_v19, %v940_v45  ;;  %1277 = vmatpush.msra.mxu3 %v8203_v9  ;;  %v6994_v19 = vld [vmem:[%s7559_s16 + $0xbc] sm:$0xf]  ;;  %v1123_v18 = vsub.f32 %v8279_v60, %v8298_v29 }
 0x19c   : >> { %v994_v54 = vsel %vm797_vm7, %v990_v58, %v956_v27  ;;  %1030 = vmatpush.msra.mxu0 %v8203_v9  ;;  %12814 = vst [vmem:[#allocation49_spill] sm:$0xff] %v8258_v56  ;;  %v8272_v27 = vand.u32 4294901760, %v12818_v41  ;;  %v8275_v48 = vand.u32 4294901760, %v8258_v56 }
 0x19d   : >> { %v8157_v43 = vpop.permute.xlu0 %943  ;;  %v8160_v3 = vpop.permute.xlu1 %1730  ;;  %v998_v33 = vsel %vm802_vm8, %v994_v54, 0.0  ;;  %1279 = vmatpush.msra.mxu3 %v8220_v17 }
 0x19e   : >> { %1032 = vmatpush.msra.mxu0 %v8220_v17  ;;  %v1745_v20 = vpop.permute.xlu2 %1744  ;;  %v8290_v40 = vsub.f32 %v12818_v41, %v8272_v27 }
 0x19f   : >> { %1281 = vmatpush.msra.mxu3 %v8242_v36 }
 0x1a0   : >> { %1838 = vrot.lane.b32.xlu2 %v6993_v50, %s12797_s29  ;;  %12821 = vst [vmem:[#allocation50_spill] sm:$0xff] %v8290_v40  ;;  %v1117_v50 = vsub.f32 %v8258_v56, %v8275_v48  ;;  %1034 = vmatpush.msra.mxu0 %v8242_v36  ;;  %v8307_v54 = vand.u32 4294901760, %v8290_v40 }
 0x1a1   : >> { %1522 = vrot.lane.b32.xlu1 %v7636_v49, %s12502_s13  ;;  %v8184_v49 = vsub.f32 %v12783_v15, %v8177_v57  ;;  %1283 = vmatpush.msra.mxu3 %v8261_v37  ;;  %s12828_s13 = smov 30  }
 0x1a2   : >> { %v8319_v30 = vand.u32 4294901760, %v1117_v50  ;;  %1036 = vmatpush.msra.mxu0 %v8261_v37  ;;  %v1129_v21 = vsub.f32 %v8290_v40, %v8307_v54  ;;  %v8334_v50 = vand.u32 4294901760, %v1123_v18 }
 0x1a3   : >> { %1488 = vrot.lane.b32.xlu0 %v7608_v39, %s12495_s26  ;;  %12803 = vst [vmem:[#allocation47_spill] sm:$0xff] %v8184_v49  ;;  %v12805_v39 = vld [vmem:[#allocation34_spill] sm:$0xff]  ;;  %v8195_v4 = vand.u32 4294901760, %v8184_v49  ;;  %1205 = vmatpush.msra.mxu2 %v8184_v49  ;;  %s12808_s26 = smov 6  }
 0x1a4   : >> { %12806 = vst [vmem:[#allocation34_spill] sm:$0xff] %v8199_v42  ;;  %1285 = vmatpush.msra.mxu3 %v8272_v27  ;;  %v8345_v23 = vand.u32 4294901760, %v1129_v21  ;;  %1038 = vmatpush.msra.mxu0 %v8272_v27  ;;  %v12832_v21 = vld [vmem:[#allocation33_spill] sm:$0xff] }
 0x1a5   : >> { %v8172_v14 = vpop.permute.xlu0 %1742  ;;  %v8174_v63 = vpop.permute.xlu1 %1754  ;;  %v1093_v11 = vsub.f32 %v8184_v49, %v8195_v4  ;;  %1208 = vmatpush.msra.mxu2 %v8199_v42 }
 0x1a6   : >> { %1287 = vmatpush.msra.mxu3 %v8293_v5  ;;  %v1789_v41 = vpop.permute.xlu2 %1788  ;;  %1040 = vmatpush.msra.mxu0 %v8293_v5 }
 0x1a7   : >> { %v8229_v53 = vand.u32 4294901760, %v1093_v11  ;;  %1211 = vmatpush.msra.mxu2 %v8216_v34  ;;  %v12825_v11 = vld [vmem:[#allocation40_spill] sm:$0xff] }
 0x1a8   : >> { %1007 = vrot.lane.b32.xlu2 %v998_v33, %s12499_s12  ;;  %s12820_s12 = smov 33   ;;  %v8311_v33 = vsub.f32 %v12822_v44, %v8293_v5 }
 0x1a9   : >> { %1558 = vrot.lane.b32.xlu1 %v12805_v39, %s12796_s24  ;;  %1095 = vmatpush.msra.mxu1 %v8229_v53  ;;  %v12824_v39 = vld [vmem:[#allocation21_spill] sm:$0xff] }
 0x1aa   : >> { %1214 = vmatpush.msra.mxu2 %v8238_v0  ;;  %12823 = vst [vmem:[#allocation51_spill] sm:$0xff] %v8311_v33  ;;  %v8329_v15 = vand.u32 4294901760, %v8311_v33 }
 0x1ab   : >> { %1500 = vrot.lane.b32.xlu0 %v12809_v26, %s12808_s26  ;;  %1101 = vmatpush.msra.mxu1 %v8247_v22  ;;  %v8314_v26 = vand.u32 4294901760, %v12824_v39 }
 0x1ac   : >> { %1217 = vmatpush.msra.mxu2 %v8258_v56  ;;  %v1135_v24 = vsub.f32 %v8311_v33, %v8329_v15 }
 0x1ad   : >> { %v8224_v45 = vpop.permute.xlu0 %1786  ;;  %v8227_v28 = vpop.permute.xlu1 %1802  ;;  %1107 = vmatpush.msra.mxu1 %v8267_v31  ;;  %1289 = vmatpush.msra.mxu3 %v8314_v26 }
 0x1ae   : >> { %1220 = vmatpush.msra.mxu2 %v8279_v60  ;;  %1042 = vmatpush.msra.mxu0 %v8314_v26  ;;  %v1837_v49 = vpop.permute.xlu2 %1836 }
 0x1af   : >> { %1113 = vmatpush.msra.mxu1 %v8286_v2 }
 0x1b0   : >> { %1792 = vrot.lane.b32.xlu2 %v6982_v55, %s12523_s22  ;;  %1223 = vmatpush.msra.mxu2 %v8290_v40 }
 0x1b1   : >> { %1582 = vrot.lane.b32.xlu1 %v12817_v38, %s12816_s14  ;;  %1119 = vmatpush.msra.mxu1 %v8319_v30 }
 0x1b2   : >> { %1226 = vmatpush.msra.mxu2 %v8311_v33  ;;  %v12837_v33 = vld [vmem:[#allocation39_spill] sm:$0xff] }
 0x1b3   : >> { %1610 = vrot.lane.b32.xlu0 %v8104_v8, %s12820_s12  ;;  %1125 = vmatpush.msra.mxu1 %v8334_v50  ;;  %v1846_v40 = vsel %vm762_vm0, %v12837_v33, %v8160_v3  ;;  %v7169_v33 = vld [vmem:[%s7559_s16 + $0x22] sm:$0xff] }
 0x1b5   : >> { %v8302_v8 = vpop.permute.xlu0 %1834  ;;  %v1733_v58 = vpop.permute.xlu1 %1732  ;;  %1131 = vmatpush.msra.mxu1 %v8345_v23 }
 0x1b6   : >> { %v1847_v55 = vsel %vm762_vm0, %v12825_v11, %v1733_v58  ;;  %v8338_v58 = vsub.f32 %v12824_v39, %v8314_v26  ;;  %v12827_v11 = vld [vmem:[#allocation20_spill] sm:$0xff] }
 0x1b7   : >> { %v1851_v38 = vsel %vm767_vm1, %v1847_v55, %v1745_v20  ;;  %v8341_v20 = vand.u32 4294901760, %v12827_v11  ;;  %v12829_v55 = vld [vmem:[#allocation36_spill] sm:$0xff] }
 0x1b8   : >> { %1840 = vrot.lane.b32.xlu2 %v6994_v19, %s12797_s29  ;;  %12826 = vst [vmem:[#allocation40_spill] sm:$0xff] %v8338_v58  ;;  %v12830_v19 = vld [vmem:[#allocation19_spill] sm:$0xff]  ;;  %v8355_v39 = vand.u32 4294901760, %v8338_v58  ;;  %1229 = vmatpush.msra.mxu2 %v8338_v58 }
 0x1b9   : >> { %1594 = vrot.lane.b32.xlu1 %v12829_v55, %s12828_s13  ;;  %v8351_v18 = vand.u32 4294901760, %v12830_v19  ;;  %v8359_v44 = vsub.f32 %v12827_v11, %v8341_v20  ;;  %v8364_v55 = vand.u32 4294901760, %v1135_v24  ;;  %1291 = vmatpush.msra.mxu3 %v8341_v20 }
 0x1ba   : >> { %v1141_v11 = vsub.f32 %v8338_v58, %v8355_v39  ;;  %v8391_v58 = vand.u32 4294901760, %v12836_v10  ;;  %1044 = vmatpush.msra.mxu0 %v8341_v20 }
 0x1bb   : >> { %12831 = vst [vmem:[#allocation36_spill] sm:$0xff] %v8359_v44  ;;  %1536 = vrot.lane.b32.xlu0 %v12832_v21, %s12523_s22  ;;  %v8369_v52 = vsub.f32 %v12830_v19, %v8351_v18  ;;  %v8378_v16 = vand.u32 4294901760, %v8359_v44  ;;  %1232 = vmatpush.msra.mxu2 %v8359_v44  ;;  %v8388_v19 = vsub.f32 %v12834_v59, %v8372_v62  ;;  %s12842_s22 = smov 12  }
 0x1bc   : >> { %1137 = vmatpush.msra.mxu1 %v8364_v55  ;;  %v8398_v60 = vand.u32 4294901760, %v1141_v11  ;;  %v8413_v3 = vsub.f32 %v12836_v10, %v8391_v58  ;;  %v12841_v11 = vld [vmem:[#allocation16_spill] sm:$0xff]  ;;  %1293 = vmatpush.msra.mxu3 %v8351_v18 }
 0x1bd   : >> { %12833 = vst [vmem:[#allocation33_spill] sm:$0xff] %v8369_v52  ;;  %v1757_v24 = vpop.permute.xlu0 %1756  ;;  %v1773_v21 = vpop.permute.xlu1 %1772  ;;  %v8382_v35 = vand.u32 4294901760, %v8369_v52  ;;  %v1147_v56 = vsub.f32 %v8359_v44, %v8378_v16  ;;  %v8407_v34 = vand.u32 4294901760, %v8388_v19  ;;  %1235 = vmatpush.msra.mxu2 %v8369_v52  ;;  %1046 = vmatpush.msra.mxu0 %v8351_v18 }
 0x1be   : >> { %12835 = vst [vmem:[#allocation52_spill] sm:$0xff] %v8388_v19  ;;  %v1855_v25 = vsel %vm772_vm2, %v1851_v38, %v1757_v24  ;;  %1143 = vmatpush.msra.mxu1 %v8398_v60  ;;  %v8422_v24 = vand.u32 4294901760, %v12841_v11  ;;  %v8431_v44 = vand.u32 4294901760, %v8413_v3  ;;  %1295 = vmatpush.msra.mxu3 %v8372_v62 }
 0x1bf   : >> { %v1859_v59 = vsel %vm777_vm3, %v1855_v25, %v1773_v21  ;;  %v1153_v0 = vsub.f32 %v8369_v52, %v8382_v35  ;;  %12838 = vst [vmem:[#allocation39_spill] sm:$0xff] %v8407_v34  ;;  %v8419_v25 = vand.u32 4294901760, %v1147_v56  ;;  %v7170_v21 = vld [vmem:[%s7559_s16 + $0x2c] sm:$0xff]  ;;  %v1159_v10 = vsub.f32 %v8388_v19, %v8407_v34  ;;  %1238 = vmatpush.msra.mxu2 %v8388_v19 }
 0x1c0   : >> { %12839 = vst [vmem:[#allocation53_spill] sm:$0xff] %v8413_v3  ;;  %1498 = vrot.lane.b32.xlu2 %v7169_v33, %s12808_s26  ;;  %v1863_v38 = vsel %vm782_vm4, %v1859_v59, %v1789_v41  ;;  %v12845_v59 = vld [vmem:[#allocation15_spill] sm:$0xff]  ;;  %v1850_v56 = vsel %vm767_vm1, %v1846_v40, %v8172_v14  ;;  %v12848_v33 = vld [vmem:[#allocation38_spill] sm:$0xff]  ;;  %v1165_v19 = vsub.f32 %v8413_v3, %v8431_v44  ;;  %v12849_v40 = vld [vmem:[#allocation14_spill] sm:$0xff] }
 0x1c1   : >> { %12840 = vst [vmem:[#allocation54_spill] sm:$0xff] %v8419_v25  ;;  %1524 = vrot.lane.b32.xlu1 %v7170_v21, %s12842_s22  ;;  %v8426_v52 = vand.u32 4294901760, %v1153_v0  ;;  %v8435_v41 = vand.u32 4294901760, %v12845_v59  ;;  %1149 = vmatpush.msra.mxu1 %v8419_v25  ;;  %v8443_v0 = vsub.f32 %v12841_v11, %v8422_v24  ;;  %v8447_v21 = vand.u32 4294901760, %v1159_v10 }
 0x1c2   : >> { %12844 = vst [vmem:[#allocation56_spill] sm:$0xff] %v8431_v44  ;;  %v8457_v42 = vand.u32 4294901760, %v12849_v40  ;;  %1241 = vmatpush.msra.mxu2 %v8413_v3  ;;  %v8464_v44 = vand.u32 4294901760, %v1165_v19  ;;  %v1854_v12 = vsel %vm772_vm2, %v1850_v56, %v8174_v63  ;;  %1297 = vmatpush.msra.mxu3 %v8391_v58 }
 0x1c3   : >> { %12843 = vst [vmem:[#allocation55_spill] sm:$0xff] %v8426_v52  ;;  %1646 = vrot.lane.b32.xlu0 %v12848_v33, %s12847_s0  ;;  %v8454_v14 = vsub.f32 %v12845_v59, %v8435_v41  ;;  %1155 = vmatpush.msra.mxu1 %v8426_v52  ;;  %v8461_v11 = vand.u32 4294901760, %v8443_v0 }
 0x1c4   : >> { %12846 = vst [vmem:[#allocation57_spill] sm:$0xff] %v8443_v0  ;;  %v8473_v52 = vsub.f32 %v12849_v40, %v8457_v42  ;;  %1244 = vmatpush.msra.mxu2 %v8443_v0  ;;  %1048 = vmatpush.msra.mxu0 %v8372_v62 }
 0x1c5   : >> { %v1805_v10 = vpop.permute.xlu0 %1804  ;;  %v1821_v33 = vpop.permute.xlu1 %1820  ;;  %v8469_v59 = vand.u32 4294901760, %v8454_v14  ;;  %1161 = vmatpush.msra.mxu1 %v8447_v21  ;;  %v1171_v19 = vsub.f32 %v8443_v0, %v8461_v11  ;;  %1299 = vmatpush.msra.mxu3 %v8422_v24 }
 0x1c6   : >> { %v1867_v3 = vsel %vm787_vm5, %v1863_v38, %v1805_v10  ;;  %v8488_v63 = vand.u32 4294901760, %v8473_v52  ;;  %v7171_v38 = vld [vmem:[%s7559_s16 + $0x40] sm:$0xff]  ;;  %v1858_v10 = vsel %vm777_vm3, %v1854_v12, %v8155_v13  ;;  %1247 = vmatpush.msra.mxu2 %v8454_v14  ;;  %1050 = vmatpush.msra.mxu0 %v8391_v58 }
 0x1c7   : >> { %v1871_v25 = vsel %vm792_vm6, %v1867_v3, %v1821_v33  ;;  %v1177_v34 = vsub.f32 %v8454_v14, %v8469_v59  ;;  %1167 = vmatpush.msra.mxu1 %v8464_v44  ;;  %v8496_v3 = vand.u32 4294901760, %v1171_v19  ;;  %v12852_v33 = vld [vmem:[#allocation37_spill] sm:$0xff]  ;;  %v1862_v12 = vsel %vm782_vm4, %v1858_v10, %v8224_v45  ;;  %1301 = vmatpush.msra.mxu3 %v8435_v41  ;;  %v7175_v10 = vld [vmem:[%s7559_s16 + $0x4c] sm:$0xff] }
 0x1c8   : >> { %1534 = vrot.lane.b32.xlu2 %v7171_v38, %s12850_s1  ;;  %v8493_v56 = vsel %vm797_vm7, %v1871_v25, %v1837_v49  ;;  %v1183_v0 = vsub.f32 %v8473_v52, %v8488_v63  ;;  %v7172_v49 = vld [vmem:[%s7559_s16 + $0x4b] sm:$0xff]  ;;  %1250 = vmatpush.msra.mxu2 %v8473_v52  ;;  %v1866_v45 = vsel %vm787_vm5, %v1862_v12, %v8227_v28 }
 0x1c9   : >> { %1634 = vrot.lane.b32.xlu1 %v12852_v33, %s12851_s2  ;;  %v8502_v40 = vand.u32 4294901760, %v1177_v34  ;;  %1173 = vmatpush.msra.mxu1 %v8496_v3  ;;  %v992_v19 = vsel %vm792_vm6, %v8129_v47, %v8157_v43  ;;  %v7174_v38 = vld [vmem:[%s7559_s16 + $0x4a] sm:$0xff]  ;;  %v1870_v28 = vsel %vm792_vm6, %v1866_v45, %v8179_v46  ;;  %v12856_v45 = vld [vmem:[#allocation41_spill] sm:$0xff] }
 0x1ca   : >> { %v8511_v25 = vand.u32 4294901760, %v1183_v0  ;;  %1052 = vmatpush.msra.mxu0 %v8422_v24  ;;  %1903 = vmatpush.msrb.mxu2 %v8177_v57  ;;  %v7173_v0 = vld [vmem:[%s7559_s16 + $0x43] sm:$0xff]  ;;  %v996_v47 = vsel %vm797_vm7, %v992_v19, %v8140_v6  ;;  %v1874_v43 = vsel %vm797_vm7, %v1870_v28, %v8302_v8  ;;  %v12857_v19 = vld [vmem:[#allocation39_spill] sm:$0xff] }
 0x1cb   : >> { %1572 = vrot.lane.b32.xlu0 %v7172_v49, %s12797_s29  ;;  %1179 = vmatpush.msra.mxu1 %v8502_v40  ;;  %v1000_v6 = vsel %vm802_vm8, %v996_v47, 0.0  ;;  %v12859_v28 = vld [vmem:[#allocation42_spill] sm:$0xff] }
 0x1cc   : >> { %1303 = vmatpush.msra.mxu3 %v8457_v42  ;;  %1054 = vmatpush.msra.mxu0 %v8435_v41  ;;  %v7181_v47 = vld [vmem:[%s7559_s16 + $0x51] sm:$0xff] }
 0x1cd   : >> { %v8518_v13 = vpop.permute.xlu0 %1734  ;;  %v8520_v34 = vpop.permute.xlu1 %1746  ;;  %1185 = vmatpush.msra.mxu1 %v8511_v25  ;;  %1905 = vmatpush.msrb.mxu2 %v8187_v1 }
 0x1ce   : >> { %1056 = vmatpush.msra.mxu0 %v8457_v42  ;;  %1972 = vmatpush.msrb.mxu3 %v8229_v53  ;;  %v1878_v53 = vsel %vm802_vm8, %v1874_v43, 0.0  ;;  %v12860_v43 = vld [vmem:[#allocation56_spill] sm:$0xff] }
 0x1cf   : >> { %1411 = vmatpush.msrb.mxu1 %v8177_v57  ;;  %1907 = vmatpush.msrb.mxu2 %v8203_v9 }
 0x1d0   : >> { %1570 = vrot.lane.b32.xlu2 %v7173_v0, %s12797_s29  ;;  %1332 = vmatpush.msrb.mxu0 %v8195_v4 }
 0x1d1   : >> { %1560 = vrot.lane.b32.xlu1 %v7174_v38, %s12796_s24  ;;  %1413 = vmatpush.msrb.mxu1 %v8187_v1 }
 0x1d2   : >> { %1336 = vmatpush.msrb.mxu0 %v8212_v51  ;;  %1978 = vmatpush.msrb.mxu3 %v8247_v22  ;;  %v7176_v22 = vld [vmem:[%s7559_s16 + $0x33] sm:$0xff] }
 0x1d3   : >> { %1584 = vrot.lane.b32.xlu0 %v7175_v10, %s12816_s14  ;;  %1415 = vmatpush.msrb.mxu1 %v8203_v9 }
 0x1d4   : >> { %1340 = vmatpush.msrb.mxu0 %v8234_v32  ;;  %1984 = vmatpush.msrb.mxu3 %v8267_v31 }
 0x1d5   : >> { %v8552_v46 = vpop.permute.xlu0 %1758  ;;  %v8554_v33 = vpop.permute.xlu1 %1774  ;;  %1417 = vmatpush.msrb.mxu1 %v8220_v17  ;;  %1909 = vmatpush.msrb.mxu2 %v8220_v17 }
 0x1d6   : >> { %1344 = vmatpush.msrb.mxu0 %v8252_v61  ;;  %1990 = vmatpush.msrb.mxu3 %v8286_v2  ;;  %v7177_v2 = vld [vmem:[%s7559_s16 + $0x2b] sm:$0xff] }
 0x1d7   : >> { %1419 = vmatpush.msrb.mxu1 %v8242_v36  ;;  %1911 = vmatpush.msrb.mxu2 %v8242_v36 }
 0x1d8   : >> { %1011 = vrot.lane.b32.xlu2 %v1000_v6, %s12853_s15  ;;  %1348 = vmatpush.msrb.mxu0 %v8275_v48 }
 0x1d9   : >> { %1886 = vrot.lane.b32.xlu1 %v1878_v53, %s12853_s15  ;;  %1421 = vmatpush.msrb.mxu1 %v8261_v37 }
 0x1da   : >> { %1996 = vmatpush.msrb.mxu3 %v8319_v30  ;;  %1352 = vmatpush.msrb.mxu0 %v8298_v29  ;;  %v7178_v30 = vld [vmem:[%s7559_s16 + $0x32] sm:$0xff] }
 0x1db   : >> { %1514 = vrot.lane.b32.xlu0 %v7176_v22, %s12854_s23  ;;  %1423 = vmatpush.msrb.mxu1 %v8272_v27 }
 0x1dc   : >> { %2002 = vmatpush.msrb.mxu3 %v8334_v50  ;;  %1356 = vmatpush.msrb.mxu0 %v8307_v54  ;;  %v7179_v50 = vld [vmem:[%s7559_s16 + $0x6a] sm:$0xff] }
 0x1dd   : >> { %v8575_v31 = vpop.permute.xlu0 %1806  ;;  %v8577_v8 = vpop.permute.xlu1 %1822  ;;  %1425 = vmatpush.msrb.mxu1 %v8293_v5  ;;  %1913 = vmatpush.msrb.mxu2 %v8261_v37 }
 0x1de   : >> { %1360 = vmatpush.msrb.mxu0 %v8329_v15  ;;  %2008 = vmatpush.msrb.mxu3 %v8345_v23 }
 0x1df   : >> { %1427 = vmatpush.msrb.mxu1 %v8314_v26  ;;  %1915 = vmatpush.msrb.mxu2 %v8272_v27 }
 0x1e0   : >> { %1512 = vrot.lane.b32.xlu2 %v7177_v2, %s12854_s23  ;;  %1364 = vmatpush.msrb.mxu0 %v8355_v39 }
 0x1e1   : >> { %1502 = vrot.lane.b32.xlu1 %v7178_v30, %s12808_s26  ;;  %1429 = vmatpush.msrb.mxu1 %v8341_v20 }
 0x1e2   : >> { %2014 = vmatpush.msrb.mxu3 %v8364_v55  ;;  %1368 = vmatpush.msrb.mxu0 %v8378_v16  ;;  %v7180_v55 = vld [vmem:[%s7559_s16 + $0x62] sm:$0xff] }
 0x1e3   : >> { %1624 = vrot.lane.b32.xlu0 %v7179_v50, %s12855_s28  ;;  %1431 = vmatpush.msrb.mxu1 %v8351_v18 }
 0x1e4   : >> { %2020 = vmatpush.msrb.mxu3 %v8398_v60  ;;  %1372 = vmatpush.msrb.mxu0 %v8382_v35  ;;  %v12858_v60 = vld [vmem:[#allocation54_spill] sm:$0xff] }
 0x1e5   : >> { %v1737_v49 = vpop.permute.xlu0 %1736  ;;  %v1749_v12 = vpop.permute.xlu1 %1748  ;;  %1433 = vmatpush.msrb.mxu1 %v8372_v62  ;;  %1917 = vmatpush.msrb.mxu2 %v8293_v5 }
 0x1e6   : >> { %v1849_v0 = vsel %vm762_vm0, %v12856_v45, %v1737_v49  ;;  %1376 = vmatpush.msrb.mxu0 %v12857_v19  ;;  %2026 = vmatpush.msrb.mxu3 %v12858_v60  ;;  %v7182_v49 = vld [vmem:[%s7559_s16 + $0x49] sm:$0xff]  ;;  %v12863_v60 = vld [vmem:[#allocation47_spill] sm:$0xff] }
 0x1e7   : >> { %v1853_v23 = vsel %vm767_vm1, %v1849_v0, %v1749_v12  ;;  %1435 = vmatpush.msrb.mxu1 %v8391_v58  ;;  %v7183_v45 = vld [vmem:[%s7559_s16 + $0x50] sm:$0xff]  ;;  %1919 = vmatpush.msrb.mxu2 %v8314_v26 }
 0x1e8   : >> { %1622 = vrot.lane.b32.xlu2 %v7180_v55, %s12855_s28  ;;  %1380 = vmatpush.msrb.mxu0 %v12860_v43 }
 0x1e9   : >> { %1612 = vrot.lane.b32.xlu1 %v8056_v7, %s12820_s12  ;;  %1437 = vmatpush.msrb.mxu1 %v8422_v24  ;;  %v12861_v7 = vld [vmem:[#allocation55_spill] sm:$0xff] }
 0x1ea   : >> { %v1006_v38 = vpop.permute.xlu2 %1005  ;;  %2032 = vmatpush.msrb.mxu3 %v12861_v7  ;;  %1384 = vmatpush.msrb.mxu0 %v8461_v11  ;;  %v7187_v7 = vld [vmem:[%s7559_s16 + $0x39] sm:$0xf] }
 0x1eb   : >> { %v1018_v10 = vsel %vm1017_vm15, %v12859_v28, %v1006_v38  ;;  %1550 = vrot.lane.b32.xlu0 %v7181_v47, %s12795_s19  ;;  %1439 = vmatpush.msrb.mxu1 %v8435_v41  ;;  %v7185_v28 = vld [vmem:[%s7559_s16 + $0x80] sm:$0xff]  ;;  %v12864_v47 = vld [vmem:[#allocation34_spill] sm:$0xff] }
 0x1ec   : >> { %v8620_v6 = vand.u32 4294901760, %v1018_v10  ;;  %2038 = vmatpush.msrb.mxu3 %v8447_v21  ;;  %1388 = vmatpush.msrb.mxu0 %v8469_v59 }
 0x1ed   : >> { %v1761_v53 = vpop.permute.xlu0 %1760  ;;  %v1777_v2 = vpop.permute.xlu1 %1776  ;;  %1441 = vmatpush.msrb.mxu1 %v8457_v42  ;;  %1921 = vmatpush.msrb.mxu2 %v8341_v20 }
 0x1ee   : >> { %v1058_v22 = vsub.f32 %v1018_v10, %v8620_v6  ;;  %1187 = vmatmul.f32.vlgmr.msra.gmra.mxu1 %v8620_v6  ;;  %v1857_v30 = vsel %vm772_vm2, %v1853_v23, %v1761_v53  ;;  %1392 = vmatpush.msrb.mxu0 %v8488_v63  ;;  %v7184_v23 = vld [vmem:[%s7559_s16 + $0x88] sm:$0xff]  ;;  %v12866_v53 = vld [vmem:[#allocation32_spill] sm:$0xff] }
 0x1ef   : >> { %v8631_v50 = vsel %vm777_vm3, %v1857_v30, %v1777_v2  ;;  %2150 = vmatpush.msra.mxu1 %v8177_v57  ;;  %2044 = vmatpush.msrb.mxu3 %v8464_v44  ;;  %v7186_v10 = vld [vmem:[%s7559_s16 + $0x6c] sm:$0xff]  ;;  %v12868_v30 = vld [vmem:[#allocation49_spill] sm:$0xff] }
 0x1f0   : >> { %1548 = vrot.lane.b32.xlu2 %v7182_v49, %s12795_s19  ;;  %1253 = vmatmul.f32.vlgmr.msra.gmra.mxu2 %v1058_v22  ;;  %v1059_v12 = vand.u32 4294901760, %v1058_v22  ;;  %v7188_v2 = vld [vmem:[%s7559_s16 + $0x31] sm:$0xff] }
 0x1f1   : >> { %1538 = vrot.lane.b32.xlu1 %v7183_v45, %s12850_s1  ;;  %2152 = vmatpush.msra.mxu1 %v8187_v1  ;;  %v12869_v45 = vld [vmem:[#allocation35_spill] sm:$0xff] }
 0x1f2   : >> { %v8640_v0 = vpop.permute.xlu2 %1790  ;;  %1307 = vmatmul.f32.vlgmr.msra.gmra.mxu3 %v1059_v12  ;;  %v1060_v21 = vsub.f32 %v1058_v22, %v1059_v12  ;;  %1923 = vmatpush.msrb.mxu2 %v8351_v18  ;;  %v12867_v22 = vld [vmem:[#allocation48_spill] sm:$0xff] }
 0x1f3   : >> { %1660 = vrot.lane.b32.xlu0 %v7184_v23, %s12862_s17  ;;  %2154 = vmatpush.msra.mxu1 %v8203_v9  ;;  %v7190_v23 = vld [vmem:[%s7559_s16 + $0x70] sm:$0xff] }
 0x1f4   : >> { %v1061_v55 = vand.u32 4294901760, %v1060_v21  ;;  %2050 = vmatpush.msrb.mxu3 %v8496_v3  ;;  %1925 = vmatpush.msrb.mxu2 %v8372_v62 }
 0x1f5   : >> { %v8648_v38 = vpop.permute.xlu0 %1808  ;;  %2156 = vmatpush.msra.mxu1 %v8220_v17  ;;  %v1825_v49 = vpop.permute.xlu1 %1824 }
 0x1f6   : >> { %1062 = vmatmul.f32.vlgmr.msra.gmra.mxu0 %v1061_v55  ;;  %2056 = vmatpush.msrb.mxu3 %v8502_v40  ;;  %v7189_v40 = vld [vmem:[%s7559_s16 + $0x53] sm:$0xff] }
 0x1f7   : >> { %2082 = vmatpush.msra.mxu0 %v12863_v60  ;;  %2158 = vmatpush.msra.mxu1 %v8242_v36  ;;  %v12871_v60 = vld [vmem:[#allocation50_spill] sm:$0xff] }
 0x1f8   : >> { %1658 = vrot.lane.b32.xlu2 %v7185_v28, %s12862_s17  ;;  %2062 = vmatpush.msrb.mxu3 %v8511_v25  ;;  %v12870_v25 = vld [vmem:[#allocation45_spill] sm:$0xff] }
 0x1f9   : >> { %1648 = vrot.lane.b32.xlu1 %v7186_v10, %s12847_s0  ;;  %2085 = vmatpush.msra.mxu0 %v12864_v47  ;;  %v12872_v47 = vld [vmem:[#allocation51_spill] sm:$0xff] }
 0x1fa   : >> { %v8660_v44 = vpop.permute.xlu2 %1838  ;;  %2160 = vmatpush.msra.mxu1 %v8261_v37  ;;  %1927 = vmatpush.msrb.mxu2 %v8391_v58 }
 0x1fb   : >> { %1492 = vrot.lane.b32.xlu0 %v7187_v7, %s12865_s20  ;;  %2088 = vmatpush.msra.mxu0 %v12866_v53  ;;  %v7191_v7 = vld [vmem:[%s7559_s16 + $0x68] sm:$0xff] }
 0x1fc   : >> { %2162 = vmatpush.msra.mxu1 %v8272_v27  ;;  %1929 = vmatpush.msrb.mxu2 %v8422_v24 }
 0x1fd   : >> { %v8669_v3 = vpop.permute.xlu0 %1486  ;;  %2091 = vmatpush.msra.mxu0 %v12867_v22  ;;  %2288 = vmatpush.msra.mxu3 %v8177_v57  ;;  %v7192_v22 = vld [vmem:[%s7559_s16 + $0x54] sm:$0xff] }
 0x1fe   : >> { %2164 = vmatpush.msra.mxu1 %v8293_v5  ;;  %1931 = vmatpush.msrb.mxu2 %v8435_v41  ;;  %v12873_v57 = vld [vmem:[#allocation40_spill] sm:$0xff] }
 0x1ff   : >> { %2094 = vmatpush.msra.mxu0 %v12868_v30  ;;  %2290 = vmatpush.msra.mxu3 %v8187_v1 }
 0x200   : >> { %1490 = vrot.lane.b32.xlu2 %v7188_v2, %s12865_s20  ;;  %2166 = vmatpush.msra.mxu1 %v8314_v26 }
 0x201   : >> { %1574 = vrot.lane.b32.xlu1 %v7189_v40, %s12797_s29  ;;  %2097 = vmatpush.msra.mxu0 %v12869_v45 }
 0x202   : >> { %v1008_v12 = vpop.permute.xlu2 %1007  ;;  %2168 = vmatpush.msra.mxu1 %v8341_v20  ;;  %1933 = vmatpush.msrb.mxu2 %v8457_v42 }
 0x203   : >> { %v1019_v21 = vsel %vm1017_vm15, %v12870_v25, %v1008_v12  ;;  %1598 = vrot.lane.b32.xlu0 %v7190_v23, %s12828_s13  ;;  %2100 = vmatpush.msra.mxu0 %v12871_v60  ;;  %v7193_v12 = vld [vmem:[%s7559_s16 + $0x3c] sm:$0xf] }
 0x204   : >> { %v8690_v55 = vand.u32 4294901760, %v1019_v21  ;;  %2170 = vmatpush.msra.mxu1 %v8351_v18  ;;  %v12874_v25 = vld [vmem:[#allocation36_spill] sm:$0xff]  ;;  %2209 = vmatpush.msra.mxu2 %v8195_v4 }
 0x205   : >> { %v8694_v28 = vpop.permute.xlu0 %1510  ;;  %2103 = vmatpush.msra.mxu0 %v12872_v47  ;;  %v12875_v23 = vld [vmem:[#allocation44_spill] sm:$0xff]  ;;  %2292 = vmatpush.msra.mxu3 %v8203_v9 }
 0x206   : >> { %v1066_v10 = vsub.f32 %v1019_v21, %v8690_v55  ;;  %1191 = vmatmul.f32.gmra.mxu1 %v8690_v55  ;;  %2213 = vmatpush.msra.mxu2 %v8212_v51  ;;  %v7199_v51 = vld [vmem:[%s7559_s16 + $0x72] sm:$0xff] }
 0x207   : >> { %2172 = vmatpush.msra.mxu1 %v8372_v62  ;;  %2106 = vmatpush.msra.mxu0 %v12873_v57  ;;  %v12877_v57 = vld [vmem:[#allocation52_spill] sm:$0xff] }
 0x208   : >> { %1596 = vrot.lane.b32.xlu2 %v7191_v7, %s12828_s13  ;;  %1258 = vmatmul.f32.gmra.mxu2 %v1066_v10  ;;  %v1067_v53 = vand.u32 4294901760, %v1066_v10 }
 0x209   : >> { %1586 = vrot.lane.b32.xlu1 %v7192_v22, %s12816_s14  ;;  %2174 = vmatpush.msra.mxu1 %v8391_v58 }
 0x20a   : >> { %v1793_v2 = vpop.permute.xlu2 %1792  ;;  %1313 = vmatmul.f32.gmra.mxu3 %v1067_v53  ;;  %v1068_v30 = vsub.f32 %v1066_v10, %v1067_v53  ;;  %2109 = vmatpush.msra.mxu0 %v12874_v25  ;;  %v12876_v53 = vld [vmem:[#allocation33_spill] sm:$0xff] }
 0x20b   : >> { %v1865_v40 = vsel %vm782_vm4, %v8631_v50, %v1793_v2  ;;  %1528 = vrot.lane.b32.xlu0 %v7193_v12, %s12842_s22  ;;  %v1010_v45 = vpop.permute.xlu1 %1009  ;;  %2176 = vmatpush.msra.mxu1 %v8422_v24  ;;  %v7196_v2 = vld [vmem:[%s7559_s16 + $0x3b] sm:$0xf] }
 0x20c   : >> { %v1869_v21 = vsel %vm787_vm5, %v1865_v40, %v8648_v38  ;;  %v1020_v60 = vsel %vm1017_vm15, %v12875_v23, %v1010_v45  ;;  %v1069_v10 = vand.u32 4294901760, %v1068_v30  ;;  %2112 = vmatpush.msra.mxu0 %v12876_v53  ;;  %v7194_v38 = vld [vmem:[%s7559_s16 + $0x91] sm:$0xff]  ;;  %v12878_v40 = vld [vmem:[#allocation53_spill] sm:$0xff]  ;;  %2294 = vmatpush.msra.mxu3 %v8220_v17 }
 0x20d   : >> { %v8720_v47 = vand.u32 4294901760, %v1020_v60  ;;  %v8722_v50 = vpop.permute.xlu0 %1546  ;;  %v1873_v7 = vsel %vm792_vm6, %v1869_v21, %v1825_v49  ;;  %v1848_v22 = vsel %vm762_vm0, %v7194_v38, %v8518_v13  ;;  %2178 = vmatpush.msra.mxu1 %v8435_v41  ;;  %v7195_v49 = vld [vmem:[%s7559_s16 + $0x34] sm:$0xff]  ;;  %v12879_v23 = vld [vmem:[#allocation57_spill] sm:$0xff]  ;;  %2217 = vmatpush.msra.mxu2 %v8234_v32  ;;  %v7198_v17 = vld [vmem:[%s7559_s16 + $0x6b] sm:$0xff] }
 0x20e   : >> { %1070 = vmatmul.f32.gmra.mxu0 %v1069_v10  ;;  %v1852_v4 = vsel %vm767_vm1, %v1848_v22, %v8520_v34  ;;  %v7197_v45 = vld [vmem:[%s7559_s16 + $0x73] sm:$0xff]  ;;  %2296 = vmatpush.msra.mxu3 %v8242_v36 }
 0x20f   : >> { %v1074_v1 = vsub.f32 %v1020_v60, %v8720_v47  ;;  %1195 = vmatmul.f32.gmra.mxu1 %v8720_v47  ;;  %2115 = vmatpush.msra.mxu0 %v12877_v57  ;;  %v1856_v21 = vsel %vm772_vm2, %v1852_v4, %v8552_v46  ;;  %v7202_v53 = vld [vmem:[%s7559_s16 + $0x52] sm:$0xff]  ;;  %v7210_v22 = vld [vmem:[%s7559_s16 + $0x7a] sm:$0xf] }
 0x210   : >> { %1526 = vrot.lane.b32.xlu2 %v7195_v49, %s12842_s22  ;;  %2180 = vmatpush.msra.mxu1 %v8457_v42  ;;  %v1860_v10 = vsel %vm777_vm3, %v1856_v21, %v8554_v33 }
 0x211   : >> { %1263 = vmatmul.f32.gmra.mxu2 %v1074_v1  ;;  %v1075_v13 = vand.u32 4294901760, %v1074_v1  ;;  %1516 = vrot.lane.b32.xlu1 %v7196_v2, %s12854_s23  ;;  %v1864_v46 = vsel %vm782_vm4, %v1860_v10, %v8640_v0  ;;  %v7201_v0 = vld [vmem:[%s7559_s16 + $0x5a] sm:$0xf] }
 0x212   : >> { %v1841_v30 = vpop.permute.xlu2 %1840  ;;  %2118 = vmatpush.msra.mxu0 %v12878_v40  ;;  %2298 = vmatpush.msra.mxu3 %v8261_v37  ;;  %v1868_v32 = vsel %vm787_vm5, %v1864_v46, %v8575_v31  ;;  %v7211_v40 = vld [vmem:[%s7559_s16 + $0x58] sm:$0xf] }
 0x213   : >> { %v8744_v12 = vsel %vm797_vm7, %v1873_v7, %v1841_v30  ;;  %1638 = vrot.lane.b32.xlu0 %v7197_v45, %s12851_s2  ;;  %v8748_v25 = vpop.permute.xlu1 %1522  ;;  %1319 = vmatmul.f32.gmra.mxu3 %v1075_v13  ;;  %v1076_v34 = vsub.f32 %v1074_v1, %v1075_v13  ;;  %v7213_v10 = vld [vmem:[%s7559_s16 + $0x74] sm:$0xff] }
 0x214   : >> { %2121 = vmatpush.msra.mxu0 %v12879_v23  ;;  %2221 = vmatpush.msra.mxu2 %v8252_v61  ;;  %v1872_v61 = vsel %vm792_vm6, %v1868_v32, %v8577_v8  ;;  %v7209_v8 = vld [vmem:[%s7559_s16 + $0x7c] sm:$0xf] }
 0x215   : >> { %v1489_v9 = vpop.permute.xlu0 %1488  ;;  %v1077_v60 = vand.u32 4294901760, %v1076_v34  ;;  %2300 = vmatpush.msra.mxu3 %v8272_v27  ;;  %v1876_v7 = vsel %vm797_vm7, %v1872_v61, %v8660_v44  ;;  %v7203_v27 = vld [vmem:[%s7559_s16 + $0x59] sm:$0xf] }
 0x216   : >> { %2124 = vmatpush.msra.mxu0 %v8454_v14  ;;  %v7200_v14 = vld [vmem:[%s7559_s16 + $0x28] sm:$0xff]  ;;  %2225 = vmatpush.msra.mxu2 %v8275_v48  ;;  %v1880_v48 = vsel %vm802_vm8, %v1876_v7, 0.0 }
 0x217   : >> { %1078 = vmatmul.f32.gmra.mxu0 %v1077_v60  ;;  %v1671_v33 = vsel %vm762_vm0, %v7200_v14, %v1489_v9  ;;  %2302 = vmatpush.msra.mxu3 %v8293_v5  ;;  %v7214_v14 = vld [vmem:[%s7559_s16 + $0x5b] sm:$0xf] }
 0x218   : >> { %1636 = vrot.lane.b32.xlu2 %v7198_v17, %s12851_s2  ;;  %2127 = vmatpush.msra.mxu0 %v8473_v52 }
 0x219   : >> { %1626 = vrot.lane.b32.xlu1 %v7199_v51, %s12855_s28  ;;  %2229 = vmatpush.msra.mxu2 %v8298_v29 }
 0x21a   : >> { %v8768_v36 = vpop.permute.xlu2 %1498  ;;  %2304 = vmatpush.msra.mxu3 %v8314_v26  ;;  %v1879_v26 = vsel %vm802_vm8, %v8493_v56, 0.0  ;;  %v12880_v56 = vld [vmem:[#allocation43_spill] sm:$0xff] }
 0x21b   : >> { %1564 = vrot.lane.b32.xlu0 %v7201_v0, %s12796_s24  ;;  %v8777_v52 = vpop.permute.xlu1 %1558  ;;  %2233 = vmatpush.msra.mxu2 %v8307_v54 }
 0x21c   : >> { %2306 = vmatpush.msra.mxu3 %v8341_v20  ;;  %v7207_v20 = vld [vmem:[%s7559_s16 + $0x20] sm:$0xff] }
 0x21d   : >> { %v1501_v37 = vpop.permute.xlu0 %1500  ;;  %2237 = vmatpush.msra.mxu2 %v8329_v15  ;;  %v7204_v15 = vld [vmem:[%s7559_s16 + $0x90] sm:$0xff] }
 0x21e   : >> { %v8785_v31 = vsel %vm767_vm1, %v1671_v33, %v1501_v37  ;;  %2308 = vmatpush.msra.mxu3 %v8351_v18  ;;  %v1670_v18 = vsel %vm762_vm0, %v7207_v20, %v8669_v3  ;;  %v12881_v3 = vld [vmem:[#allocation46_spill] sm:$0xff] }
 0x21f   : >> { %2241 = vmatpush.msra.mxu2 %v8355_v39  ;;  %v7205_v39 = vld [vmem:[%s7559_s16 + $0x79] sm:$0xf] }
 0x220   : >> { %1562 = vrot.lane.b32.xlu2 %v7202_v53, %s12796_s24  ;;  %2310 = vmatpush.msra.mxu3 %v8372_v62 }
 0x221   : >> { %1552 = vrot.lane.b32.xlu1 %v7203_v27, %s12795_s19  ;;  %2245 = vmatpush.msra.mxu2 %v8378_v16  ;;  %v7215_v27 = vld [vmem:[%s7559_s16 + $0x78] sm:$0xf] }
 0x222   : >> { %v1535_v5 = vpop.permute.xlu2 %1534  ;;  %2312 = vmatpush.msra.mxu3 %v8391_v58  ;;  %v7206_v58 = vld [vmem:[%s7559_s16 + $0x3a] sm:$0xf] }
 0x223   : >> { %v8799_v29 = vpop.permute.xlu1 %1582  ;;  %1890 = vrot.lane.b32.xlu0 %v1880_v48, %s12853_s15  ;;  %2249 = vmatpush.msra.mxu2 %v8382_v35 }
 0x224   : >> { %2314 = vmatpush.msra.mxu3 %v8422_v24  ;;  %v7208_v24 = vld [vmem:[%s7559_s16 + $0x5c] sm:$0xf] }
 0x225   : >> { %v8804_v54 = vpop.permute.xlu0 %1610  ;;  %2253 = vmatpush.msra.mxu2 %v12857_v19 }
 0x226   : >> { %2316 = vmatpush.msra.mxu3 %v8435_v41 }
 0x227   : >> { %2257 = vmatpush.msra.mxu2 %v12860_v43 }
 0x228   : >> { %1888 = vrot.lane.b32.xlu2 %v1879_v26, %s12853_s15  ;;  %2318 = vmatpush.msra.mxu3 %v8457_v42 }
 0x229   : >> { %1662 = vrot.lane.b32.xlu1 %v7204_v15, %s12862_s17  ;;  %2261 = vmatpush.msra.mxu2 %v8461_v11 }
 0x22a   : >> { %v1571_v62 = vpop.permute.xlu2 %1570 }
 0x22b   : >> { %v1595_v16 = vpop.permute.xlu1 %1594  ;;  %1616 = vrot.lane.b32.xlu0 %v7205_v39, %s12820_s12  ;;  %2265 = vmatpush.msra.mxu2 %v8469_v59  ;;  %v1674_v59 = vsel %vm767_vm1, %v1670_v18, %v8768_v36 }
 0x22d   : >> { %v8821_v35 = vpop.permute.xlu0 %1536  ;;  %2269 = vmatpush.msra.mxu2 %v8488_v63  ;;  %v1678_v63 = vsel %vm772_vm2, %v1674_v59, %v8694_v28 }
 0x22e   : >> { %v1682_v1 = vsel %vm777_vm3, %v1678_v63, %v8748_v25  ;;  %v7212_v25 = vld [vmem:[%s7559_s16 + $0x98] sm:$0xf] }
 0x22f   : >> { %v1686_v4 = vsel %vm782_vm4, %v1682_v1, %v1535_v5 }
 0x230   : >> { %1504 = vrot.lane.b32.xlu2 %v7206_v58, %s12808_s26  ;;  %v1690_v30 = vsel %vm787_vm5, %v1686_v4, %v8722_v50  ;;  %v1881_v58 = vsel %vm802_vm8, %v8744_v12, 0.0 }
 0x231   : >> { %1588 = vrot.lane.b32.xlu1 %v7208_v24, %s12816_s14  ;;  %v1694_v45 = vsel %vm792_vm6, %v1690_v30, %v8777_v52 }
 0x232   : >> { %v1012_v41 = vpop.permute.xlu2 %1011  ;;  %v1698_v34 = vsel %vm797_vm7, %v1694_v45, %v1571_v62 }
 0x233   : >> { %v1021_v42 = vsel %vm1017_vm15, %v12880_v56, %v1012_v41  ;;  %v8836_v11 = vpop.permute.xlu1 %1524  ;;  %1652 = vrot.lane.b32.xlu0 %v7209_v8, %s12847_s0  ;;  %v1702_v50 = vsel %vm802_vm8, %v1698_v34, %v8799_v29 }
 0x234   : >> { %v8842_v19 = vand.u32 4294901760, %v1021_v42  ;;  %v1706_v60 = vsel %vm807_vm9, %v1702_v50, %v1595_v16 }
 0x235   : >> { %v1647_v43 = vpop.permute.xlu0 %1646  ;;  %v1710_v17 = vsel %vm812_vm10, %v1706_v60, %v8804_v54 }
 0x236   : >> { %v1082_v44 = vsub.f32 %v1021_v42, %v8842_v19  ;;  %1199 = vmatmul.f32.gmra.mxu1 %v8842_v19 }
 0x238   : >> { %1614 = vrot.lane.b32.xlu2 %v12881_v3, %s12820_s12  ;;  %1268 = vmatmul.f32.gmra.mxu2 %v1082_v44  ;;  %v1083_v38 = vand.u32 4294901760, %v1082_v44 }
 0x239   : >> { %1628 = vrot.lane.b32.xlu1 %v7210_v22, %s12855_s28 }
 0x23a   : >> { %v1513_v57 = vpop.permute.xlu2 %1512  ;;  %1325 = vmatmul.f32.gmra.mxu3 %v1083_v38  ;;  %v1084_v49 = vsub.f32 %v1082_v44, %v1083_v38 }
 0x23b   : >> { %v1635_v13 = vpop.permute.xlu1 %1634  ;;  %v1679_v39 = vsel %vm772_vm2, %v8785_v31, %v1513_v57 }
 0x23c   : >> { %v1085_v28 = vand.u32 4294901760, %v1084_v49  ;;  %v1683_v20 = vsel %vm777_vm3, %v1679_v39, %v8836_v11 }
 0x23d   : >> { %v8855_v2 = vpop.permute.xlu0 %1572  ;;  %v1687_v24 = vsel %vm782_vm4, %v1683_v20, %v8821_v35 }
 0x23e   : >> { %1086 = vmatmul.f32.gmra.mxu0 %v1085_v28  ;;  %1443 = vmatmul.f32.vlgmr.msrb.gmra.mxu1 %v8620_v6 }
 0x240   : >> { %1540 = vrot.lane.b32.xlu2 %v7211_v40, %s12850_s1 }
 0x241   : >> { %1664 = vrot.lane.b32.xlu1 %v7212_v25, %s12862_s17 }
 0x242   : >> { %v1623_v21 = vpop.permute.xlu2 %1622 }
 0x243   : >> { %v1561_v23 = vpop.permute.xlu1 %1560  ;;  %v1714_v36 = vsel %vm817_vm12, %v1710_v17, %v1623_v21 }
 0x245   : >> { %v1585_v9 = vpop.permute.xlu0 %1584 }
 0x246   : >> { %1394 = vmatmul.f32.vlgmr.msrb.gmra.mxu0 %v8620_v6  ;;  %1447 = vmatmul.f32.gmra.mxu1 %v8690_v55  ;;  %v1718_v6 = vsel %vm822_vm11, %v1714_v36, %v1635_v13  ;;  %v7217_v13 = vld [vmem:[%s7559_s16 + $0x30] sm:$0xff] }
 0x247   : >> { %v1722_v0 = vsel %vm827_vm13, %v1718_v6, %v1647_v43 }
 0x248   : >> { %1650 = vrot.lane.b32.xlu2 %v7213_v10, %s12847_s0  ;;  %s6995_s0 = sshll.u32 %s7301_s30, 4  ;;  %s406_s30 = sadd.s32 1, %s7301_s30  }
 0x249   : >> { %s2358_s1 = scalar_lea.vmem [#allocation2], %s6995_s0  ;;  %p403_p11 = scmp.ge.s32.totalorder %s406_s30, 14  }
 0x24a   : >> { %v1549_v46 = vpop.permute.xlu2 %1548  ;;  %s9153_s22 = smov (%p403_p11), 0  }
 0x24b   : >> { %v1887_v51 = vpop.permute.xlu1 %1886  ;;  %v1691_v56 = vsel %vm787_vm5, %v1687_v24, %v1549_v46 }
 0x24c   : >> { %v1695_v8 = vsel %vm792_vm6, %v1691_v56, %v1561_v23 }
 0x24d   : >> { %v8877_v32 = vpop.permute.xlu0 %1514  ;;  %v1699_v31 = vsel %vm797_vm7, %v1695_v8, %v8855_v2 }
 0x24e   : >> { %1398 = vmatmul.f32.gmra.mxu0 %v8690_v55  ;;  %1451 = vmatmul.f32.gmra.mxu1 %v8720_v47  ;;  %v1703_v11 = vsel %vm802_vm8, %v1699_v31, %v1585_v9 }
 0x250   : >> { %1576 = vrot.lane.b32.xlu2 %v7214_v14, %s12797_s29 }
 0x252   : >> { %v1659_v33 = vpop.permute.xlu2 %1658 }
 0x253   : >> { %v1726_v52 = vsel %vm832_vm14, %v1722_v0, %v1659_v33  ;;  %v1503_v37 = vpop.permute.xlu1 %1502 }
 0x254   : >> { %v1898_v61 = vsel %vm1017_vm15, %v1726_v52, %v1887_v51 }
 0x255   : >> { %v8887_v7 = vand.u32 4294901760, %v1898_v61  ;;  %v1625_v53 = vpop.permute.xlu0 %1624 }
 0x256   : >> { %1402 = vmatmul.f32.gmra.mxu0 %v8720_v47  ;;  %1455 = vmatmul.f32.gmra.mxu1 %v8842_v19  ;;  %v7216_v47 = vld [vmem:[%s7559_s16 + $0x7b] sm:$0xf] }
 0x257   : >> { %v1935_v55 = vsub.f32 %v1898_v61, %v8887_v7  ;;  %2064 = vmatmul.f32.vlgmr.msrb.gmra.mxu3 %v8887_v7 }
 0x258   : >> { %1600 = vrot.lane.b32.xlu2 %v7215_v27, %s12828_s13 }
 0x259   : >> { %v1936_v48 = vand.u32 4294901760, %v1935_v55 }
 0x25a   : >> { %v1491_v5 = vpop.permute.xlu2 %1490 }
 0x25b   : >> { %v1613_v29 = vpop.permute.xlu1 %1612  ;;  %v1937_v54 = vsub.f32 %v1935_v55, %v1936_v48  ;;  %v1672_v28 = vsel %vm762_vm0, %v7217_v13, %v1491_v5 }
 0x25c   : >> { %v1676_v25 = vsel %vm767_vm1, %v1672_v28, %v1503_v37 }
 0x25d   : >> { %v1938_v26 = vand.u32 4294901760, %v1937_v54  ;;  %v1551_v15 = vpop.permute.xlu0 %1550  ;;  %v1680_v21 = vsel %vm772_vm2, %v1676_v25, %v8877_v32 }
 0x25e   : >> { %1406 = vmatmul.f32.gmra.mxu0 %v8842_v19  ;;  %2184 = vmatmul.f32.vlgmr.msra.gmra.mxu1 %v1936_v48 }
 0x25f   : >> { %1939 = vmatmul.f32.vlgmr.msrb.gmra.mxu2 %v1938_v26 }
 0x260   : >> { %1640 = vrot.lane.b32.xlu2 %v7216_v47, %s12851_s2 }
 0x262   : >> { %v1597_v62 = vpop.permute.xlu2 %1596 }
 0x263   : >> { %v1539_v16 = vpop.permute.xlu1 %1538  ;;  %v1707_v43 = vsel %vm807_vm9, %v1703_v11, %v1597_v62 }
 0x264   : >> { %v1711_v44 = vsel %vm812_vm10, %v1707_v43, %v1613_v29 }
 0x265   : >> { %v1661_v18 = vpop.permute.xlu0 %1660  ;;  %v1715_v63 = vsel %vm817_vm12, %v1711_v44, %v1625_v53 }
 0x266   : >> { %2130 = vmatmul.f32.vlgmr.msra.gmra.mxu0 %v1935_v55  ;;  %v7218_v55 = vld [vmem:[%s7559_s16 + $0x38] sm:$0xf] }
 0x268   : >> { %1892 = vrot.lane.b32.xlu2 %v1881_v58, %s12853_s15 }
 0x26a   : >> { %v1527_v41 = vpop.permute.xlu2 %1526 }
 0x26b   : >> { %v1649_v42 = vpop.permute.xlu1 %1648  ;;  %v1684_v9 = vsel %vm777_vm3, %v1680_v21, %v1527_v41 }
 0x26c   : >> { %v1688_v46 = vsel %vm782_vm4, %v1684_v9, %v1539_v16 }
 0x26d   : >> { %v1493_v12 = vpop.permute.xlu0 %1492  ;;  %v1692_v51 = vsel %vm787_vm5, %v1688_v46, %v1551_v15 }
 0x26e   : >> { %v1673_v27 = vsel %vm762_vm0, %v7218_v55, %v1493_v12 }
 0x272   : >> { %v1637_v59 = vpop.permute.xlu2 %1636 }
 0x273   : >> { %v1575_v19 = vpop.permute.xlu1 %1574  ;;  %v1719_v3 = vsel %vm822_vm11, %v1715_v63, %v1637_v59  ;;  %v1063_v21 = vpop.f32.mrf.mxu0 }
 0x274   : >> { %v1723_v1 = vsel %vm827_vm13, %v1719_v3, %v1649_v42 }
 0x275   : >> { %v1599_v38 = vpop.permute.xlu0 %1598  ;;  %v1727_v49 = vsel %vm832_vm14, %v1723_v1, %v1661_v18  ;;  %v1308_v9 = vpop.f32.mrf.mxu3 }
 0x27a   : >> { %v1563_v35 = vpop.permute.xlu2 %1562 }
 0x27b   : >> { %v1587_v22 = vpop.permute.xlu1 %1586  ;;  %v1696_v36 = vsel %vm792_vm6, %v1692_v51, %v1563_v35 }
 0x27c   : >> { %v1700_v14 = vsel %vm797_vm7, %v1696_v36, %v1575_v19 }
 0x27d   : >> { %v1529_v40 = vpop.permute.xlu0 %1528  ;;  %v1704_v33 = vsel %vm802_vm8, %v1700_v14, %v1587_v22 }
 0x27e   : >> { %v1708_v37 = vsel %vm807_vm9, %v1704_v33, %v1599_v38 }
 0x282   : >> { %v1889_v57 = vpop.permute.xlu2 %1888 }
 0x283   : >> { %v1899_v4 = vsel %vm1017_vm15, %v1727_v49, %v1889_v57  ;;  %v1517_v30 = vpop.permute.xlu1 %1516 }
 0x284   : >> { %v8921_v2 = vand.u32 4294901760, %v1899_v4 }
 0x285   : >> { %v1639_v17 = vpop.permute.xlu0 %1638 }
 0x286   : >> { %v1943_v45 = vsub.f32 %v1899_v4, %v8921_v2  ;;  %2068 = vmatmul.f32.gmra.mxu3 %v8921_v2 }
 0x288   : >> { %2135 = vmatmul.f32.gmra.mxu0 %v1943_v45  ;;  %v1944_v34 = vand.u32 4294901760, %v1943_v45 }
 0x28a   : >> { %v1505_v23 = vpop.permute.xlu2 %1504  ;;  %2190 = vmatmul.f32.gmra.mxu1 %v1944_v34  ;;  %v1945_v50 = vsub.f32 %v1943_v45, %v1944_v34 }
 0x28b   : >> { %v1627_v10 = vpop.permute.xlu1 %1626  ;;  %v1677_v54 = vsel %vm767_vm1, %v1673_v27, %v1505_v23  ;;  %v1188_v23 = vpop.f32.mrf.mxu1 }
 0x28c   : >> { %v1946_v60 = vand.u32 4294901760, %v1945_v50  ;;  %v1681_v16 = vsel %vm772_vm2, %v1677_v54, %v1517_v30  ;;  %v1071_v50 = vpop.f32.mrf.mxu0 }
 0x28d   : >> { %v1565_v0 = vpop.permute.xlu0 %1564  ;;  %v1685_v20 = vsel %vm777_vm3, %v1681_v16, %v1529_v40  ;;  %v1314_v46 = vpop.f32.mrf.mxu3 }
 0x28e   : >> { %1947 = vmatmul.f32.gmra.mxu2 %v1946_v60 }
 0x292   : >> { %v1615_v6 = vpop.permute.xlu2 %1614 }
 0x293   : >> { %v1553_v32 = vpop.permute.xlu1 %1552  ;;  %v1712_v61 = vsel %vm812_vm10, %v1708_v37, %v1615_v6  ;;  %v1192_v60 = vpop.f32.mrf.mxu1 }
 0x294   : >> { %v1716_v53 = vsel %vm817_vm12, %v1712_v61, %v1627_v10  ;;  %v1254_v10 = vpop.f32.mrf.mxu2 }
 0x295   : >> { %v1720_v29 = vsel %vm822_vm11, %v1716_v53, %v1639_v17  ;;  %v1891_v15 = vpop.permute.xlu0 %1890  ;;  %v1079_v17 = vpop.f32.mrf.mxu0 }
 0x29a   : >> { %v1541_v52 = vpop.permute.xlu2 %1540 }
 0x29b   : >> { %v1663_v48 = vpop.permute.xlu1 %1662  ;;  %v1689_v18 = vsel %vm782_vm4, %v1685_v20, %v1541_v52  ;;  %v1196_v51 = vpop.f32.mrf.mxu1 }
 0x29c   : >> { %v1693_v8 = vsel %vm787_vm5, %v1689_v18, %v1553_v32  ;;  %v1259_v36 = vpop.f32.mrf.mxu2 }
 0x29d   : >> { %v1697_v12 = vsel %vm792_vm6, %v1693_v8, %v1565_v0  ;;  %v1617_v19 = vpop.permute.xlu0 %1616 }
 0x2a2   : >> { %v1651_v5 = vpop.permute.xlu2 %1650 }
 0x2a3   : >> { %v1724_v26 = vsel %vm827_vm13, %v1720_v29, %v1651_v5  ;;  %v1589_v56 = vpop.permute.xlu1 %1588 }
 0x2a4   : >> { %v1728_v47 = vsel %vm832_vm14, %v1724_v26, %v1663_v48  ;;  %v12882_v26 = vld [vmem:[#allocation31_spill] sm:$0xff] }
 0x2a5   : >> { %v1900_v62 = vsel %vm1017_vm15, %v1728_v47, %v1891_v15  ;;  %v1653_v1 = vpop.permute.xlu0 %1652  ;;  %v1023_v15 = vperm.slane %v12882_v26, 0 }
 0x2a6   : >> { %v1950_v39 = vand.u32 4294901760, %v1900_v62 }
 0x2a7   : >> { %v1064_v47 = vadd.f32 %v1063_v21, %v1023_v15 }
 0x2a8   : >> { %2072 = vmatmul.f32.gmra.mxu3 %v1950_v39  ;;  %v1951_v58 = vsub.f32 %v1900_v62, %v1950_v39 }
 0x2aa   : >> { %v1577_v24 = vpop.permute.xlu2 %1576  ;;  %2140 = vmatmul.f32.gmra.mxu0 %v1951_v58  ;;  %v1952_v41 = vand.u32 4294901760, %v1951_v58 }
 0x2ab   : >> { %v1701_v59 = vsel %vm797_vm7, %v1697_v12, %v1577_v24  ;;  %v1629_v35 = vpop.permute.xlu1 %1628 }
 0x2ac   : >> { %2196 = vmatmul.f32.gmra.mxu1 %v1952_v41  ;;  %v1953_v42 = vsub.f32 %v1951_v58, %v1952_v41  ;;  %v1705_v43 = vsel %vm802_vm8, %v1701_v59, %v1589_v56  ;;  %v1189_v58 = vadd.f32 %v1188_v23, %v1064_v47  ;;  %v1072_v41 = vadd.f32 %v1071_v50, %v1023_v15 }
 0x2ae   : >> { %v1954_v31 = vand.u32 4294901760, %v1953_v42  ;;  %v1255_v24 = vadd.f32 %v1254_v10, %v1189_v58  ;;  %v1193_v12 = vadd.f32 %v1192_v60, %v1072_v41 }
 0x2b0   : >> { %1955 = vmatmul.f32.gmra.mxu2 %v1954_v31  ;;  %v1309_v31 = vadd.f32 %v1308_v9, %v1255_v24 }
 0x2b2   : >> { %v1601_v11 = vpop.permute.xlu2 %1600 }
 0x2b3   : >> { %v1709_v44 = vsel %vm807_vm9, %v1705_v43, %v1601_v11  ;;  %v1665_v49 = vpop.permute.xlu1 %1664  ;;  %v8964_v14 = vpop.f32.mrf.mxu1 }
 0x2b4   : >> { %v1713_v63 = vsel %vm812_vm10, %v1709_v44, %v1617_v19  ;;  %v1080_v44 = vadd.f32 %v1079_v17, %v1023_v15 }
 0x2b5   : >> { %v1717_v38 = vsel %vm817_vm12, %v1713_v63, %v1629_v35  ;;  %v1260_v63 = vadd.f32 %v1259_v36, %v1193_v12 }
 0x2ba   : >> { %v1641_v3 = vpop.permute.xlu2 %1640 }
 0x2bb   : >> { %v1721_v22 = vsel %vm822_vm11, %v1717_v38, %v1641_v3  ;;  %v1087_v6 = vpop.f32.mrf.mxu0  ;;  %v1444_v0 = vpop.f32.mrf.mxu1 }
 0x2bc   : >> { %v1725_v57 = vsel %vm827_vm13, %v1721_v22, %v1653_v1  ;;  %v1088_v9 = vadd.f32 %v1087_v6, %v1023_v15 }
 0x2bd   : >> { %v1729_v4 = vsel %vm832_vm14, %v1725_v57, %v1665_v49  ;;  %v1197_v49 = vadd.f32 %v1196_v51, %v1080_v44 }
 0x2c2   : >> { %v1893_v13 = vpop.permute.xlu2 %1892 }
 0x2c3   : >> { %v1901_v28 = vsel %vm1017_vm15, %v1729_v4, %v1893_v13  ;;  %v1395_v33 = vpop.f32.mrf.mxu0  ;;  %v1448_v53 = vpop.f32.mrf.mxu1  ;;  %v1315_v13 = vadd.f32 %v1314_v46, %v1260_v63 }
 0x2c4   : >> { %v1958_v30 = vand.u32 4294901760, %v1901_v28  ;;  %v1396_v43 = vadd.f32 %v1395_v33, %v1309_v31 }
 0x2c6   : >> { %v1959_v40 = vsub.f32 %v1901_v28, %v1958_v30  ;;  %2076 = vmatmul.f32.gmra.mxu3 %v1958_v30  ;;  %v1445_v1 = vadd.f32 %v1444_v0, %v1396_v43 }
 0x2c8   : >> { %2145 = vmatmul.f32.gmra.mxu0 %v1959_v40  ;;  %v1960_v45 = vand.u32 4294901760, %v1959_v40 }
 0x2ca   : >> { %2202 = vmatmul.f32.gmra.mxu1 %v1960_v45  ;;  %v1961_v25 = vsub.f32 %v1959_v40, %v1960_v45  ;;  %v1459_v45 = vmax.f32 %v1445_v1, 0.0  ;;  %v8996_v1 = vld [vmem:[%s12438_s3 + $0x8] sm:$0xff] (%p403_p11) }
 0x2cb   : >> { %v1399_v61 = vpop.f32.mrf.mxu0  ;;  %v8970_v29 = vpop.f32.mrf.mxu1  ;;  %12884 = vst [vmem:[#allocation15_spill] sm:$0xff] (%p403_p11), %v8996_v1 }
 0x2cc   : >> { %v1962_v34 = vand.u32 4294901760, %v1961_v25  ;;  %v1400_v25 = vadd.f32 %v1399_v61, %v1315_v13  ;;  %v9016_v13 = vld [vmem:[%s12438_s3 + $0x28] sm:$0xff] (%p403_p11) }
 0x2cd   : > { %12888 = vst [vmem:[#allocation19_spill] sm:$0xff] (%p403_p11), %v9016_v13 }
 0x2ce   : >> { %1963 = vmatmul.f32.gmra.mxu2 %v1962_v34  ;;  %2320 = vmatmul.f32.vlgmr.msra.gmra.mxu3 %v8887_v7  ;;  %v1449_v33 = vadd.f32 %v1448_v53, %v1400_v25  ;;  %v9041_v25 = vld [vmem:[%s12438_s3 + $0x50] sm:$0xff] (%p403_p11) }
 0x2cf   : > { %12893 = vst [vmem:[#allocation24_spill] sm:$0xff] (%p403_p11), %v9041_v25 }
 0x2d3   : >> { %v1403_v48 = vpop.f32.mrf.mxu0  ;;  %v8975_v18 = vpop.f32.mrf.mxu1 }
 0x2d6   : >> { %2271 = vmatmul.f32.vlgmr.msra.gmra.mxu2 %v8887_v7  ;;  %2324 = vmatmul.f32.gmra.mxu3 %v8921_v2  ;;  %v8962_v7 = vpop.f32.mrf.mxu3 }
 0x2db   : >> { %v8973_v62 = vpop.f32.mrf.mxu0  ;;  %v2185_v35 = vpop.f32.mrf.mxu1 }
 0x2de   : >> { %2275 = vmatmul.f32.gmra.mxu2 %v8921_v2  ;;  %2328 = vmatmul.f32.gmra.mxu3 %v1950_v39  ;;  %v1264_v2 = vpop.f32.mrf.mxu2  ;;  %v8966_v32 = vpop.f32.mrf.mxu3 }
 0x2df   : >> { %v1265_v21 = vadd.f32 %v1264_v2, %v1197_v49  ;;  %v9006_v49 = vld [vmem:[%s12438_s3 + $0x18] sm:$0xff] (%p403_p11) }
 0x2e0   : > { %12886 = vst [vmem:[#allocation17_spill] sm:$0xff] (%p403_p11), %v9006_v49 }
 0x2e1   : >> { %v1321_v51 = vadd.f32 %v8962_v7, %v1265_v21  ;;  %v9051_v21 = vld [vmem:[%s12438_s3 + $0x60] sm:$0xff] (%p403_p11) }
 0x2e2   : > { %12895 = vst [vmem:[#allocation26_spill] sm:$0xff] (%p403_p11), %v9051_v21 }
 0x2e3   : >> { %v2131_v8 = vpop.f32.mrf.mxu0  ;;  %v1404_v2 = vadd.f32 %v1403_v48, %v1321_v51  ;;  %v9101_v51 = vld [vmem:[%s12438_s3 + $0xb0] sm:$0xff] (%p403_p11) }
 0x2e4   : > { %12905 = vst [vmem:[#allocation63_spill] sm:$0xff] (%p403_p11), %v9101_v51 }
 0x2e5   : >> { %v1453_v7 = vadd.f32 %v8970_v29, %v1404_v2  ;;  %v9136_v2 = vld [vmem:[%s12438_s3 + $0xe8] sm:$0xff] (%p403_p11) }
 0x2e6   : >> { %2279 = vmatmul.f32.gmra.mxu2 %v1950_v39  ;;  %2332 = vmatmul.f32.gmra.mxu3 %v1958_v30  ;;  %v8968_v52 = vpop.f32.mrf.mxu2  ;;  %v2065_v37 = vpop.f32.mrf.mxu3  ;;  %12912 = vst [vmem:[#allocation70_spill] sm:$0xff] (%p403_p11), %v9136_v2 }
 0x2e7   : >> { %v1461_v48 = vmax.f32 %v1453_v7, 0.0 }
 0x2ee   : >> { %2283 = vmatmul.f32.gmra.mxu2 %v1958_v30  ;;  %v1940_v55 = vpop.f32.mrf.mxu2 }
 0x2ef   : >> { %v1941_v20 = vadd.f32 %v1940_v55, %v1023_v15 }
 0x2f1   : >> { %v2066_v56 = vadd.f32 %v2065_v37, %v1941_v20  ;;  %v1201_v37 = vadd.f32 %v8964_v14, %v1088_v9  ;;  %v9066_v9 = vld [vmem:[%s12438_s3 + $0x78] sm:$0xff] (%p403_p11) }
 0x2f2   : > { %12898 = vst [vmem:[#allocation30_spill] sm:$0xff] (%p403_p11), %v9066_v9 }
 0x2f3   : >> { %v2132_v59 = vadd.f32 %v2131_v8, %v2066_v56  ;;  %v1270_v6 = vadd.f32 %v8968_v52, %v1201_v37  ;;  %v9111_v37 = vld [vmem:[%s12438_s3 + $0xc0] sm:$0xff] (%p403_p11) }
 0x2f4   : > { %12907 = vst [vmem:[#allocation65_spill] sm:$0xff] (%p403_p11), %v9111_v37 }
 0x2f5   : >> { %v2186_v38 = vadd.f32 %v2185_v35, %v2132_v59 }
 0x305   : >> { %v2136_v4 = vpop.f32.mrf.mxu0 }
 0x307   : >> { %v2191_v23 = vpop.f32.mrf.mxu1 }
 0x309   : >> { %v2069_v27 = vpop.f32.mrf.mxu3 }
 0x311   : >> { %v1948_v5 = vpop.f32.mrf.mxu2 }
 0x312   : >> { %v1949_v11 = vadd.f32 %v1948_v5, %v1023_v15  ;;  %v1460_v5 = vmax.f32 %v1449_v33, 0.0  ;;  %v9091_v33 = vld [vmem:[%s12438_s3 + $0xa0] sm:$0xff] (%p403_p11) }
 0x313   : > { %12903 = vst [vmem:[#allocation61_spill] sm:$0xff] (%p403_p11), %v9091_v33 }
 0x314   : >> { %v2070_v3 = vadd.f32 %v2069_v27, %v1949_v11 }
 0x316   : >> { %v2137_v40 = vadd.f32 %v2136_v4, %v2070_v3  ;;  %v9011_v4 = vld [vmem:[%s12438_s3 + $0x20] sm:$0xff] (%p403_p11) }
 0x317   : > { %12887 = vst [vmem:[#allocation18_spill] sm:$0xff] (%p403_p11), %v9011_v4 }
 0x318   : >> { %v2192_v17 = vadd.f32 %v2191_v23, %v2137_v40  ;;  %v9031_v40 = vld [vmem:[%s12438_s3 + $0x40] sm:$0xff] (%p403_p11)  ;;  %v9056_v23 = vld [vmem:[%s12438_s3 + $0x68] sm:$0xff] (%p403_p11) }
 0x319   : > { %12891 = vst [vmem:[#allocation22_spill] sm:$0xff] (%p403_p11), %v9031_v40 }
 0x31a   : > { %12896 = vst [vmem:[#allocation27_spill] sm:$0xff] (%p403_p11), %v9056_v23 }
 0x327   : >> { %v2141_v46 = vpop.f32.mrf.mxu0 }
 0x329   : >> { %v2197_v47 = vpop.f32.mrf.mxu1 }
 0x32b   : >> { %v2073_v54 = vpop.f32.mrf.mxu3 }
 0x333   : >> { %v1956_v16 = vpop.f32.mrf.mxu2 }
 0x334   : >> { %v1957_v28 = vadd.f32 %v1956_v16, %v1023_v15 }
 0x336   : >> { %v2074_v60 = vadd.f32 %v2073_v54, %v1957_v28  ;;  %v9021_v28 = vld [vmem:[%s12438_s3 + $0x30] sm:$0xff] (%p403_p11) }
 0x337   : > { %12889 = vst [vmem:[#allocation20_spill] sm:$0xff] (%p403_p11), %v9021_v28 }
 0x338   : >> { %v2142_v61 = vadd.f32 %v2141_v46, %v2074_v60  ;;  %v9071_v60 = vld [vmem:[%s12438_s3 + $0x80] sm:$0xff] (%p403_p11)  ;;  %v9106_v46 = vld [vmem:[%s12438_s3 + $0xb8] sm:$0xff] (%p403_p11) }
 0x339   : > { %12899 = vst [vmem:[#allocation31_spill] sm:$0xff] (%p403_p11), %v9071_v60 }
 0x33a   : >> { %v2198_v53 = vadd.f32 %v2197_v47, %v2142_v61  ;;  %12906 = vst [vmem:[#allocation64_spill] sm:$0xff] (%p403_p11), %v9106_v46  ;;  %v9126_v61 = vld [vmem:[%s12438_s3 + $0xd8] sm:$0xff] (%p403_p11) }
 0x33b   : > { %12910 = vst [vmem:[#allocation68_spill] sm:$0xff] (%p403_p11), %v9126_v61  ;;  %v9146_v47 = vld [vmem:[%s12438_s3 + $0xf8] sm:$0xff] (%p403_p11) }
 0x33c   : > { %12914 = vst [vmem:[#allocation72_spill] sm:$0xff] (%p403_p11), %v9146_v47 }
 0x345   : >> { %v2146_v14 = vpop.f32.mrf.mxu0 }
 0x347   : >> { %v2203_v52 = vpop.f32.mrf.mxu1 }
 0x349   : >> { %v2077_v39 = vpop.f32.mrf.mxu3 }
 0x351   : >> { %v1964_v42 = vpop.f32.mrf.mxu2  ;;  %v2321_v19 = vpop.f32.mrf.mxu3 }
 0x352   : >> { %v1965_v55 = vadd.f32 %v1964_v42, %v1023_v15  ;;  %v1327_v15 = vadd.f32 %v8966_v32, %v1270_v6  ;;  %v9151_v6 = vld [vmem:[%s12439_s4] sm:$0x1] (%p403_p11) }
 0x353   : > { %12915 = vst [vmem:[#allocation73_spill] sm:$0xff] (%p403_p11), %v9151_v6 }
 0x354   : >> { %v2078_v54 = vadd.f32 %v2077_v39, %v1965_v55  ;;  %v1408_v42 = vadd.f32 %v8973_v62, %v1327_v15  ;;  %v9116_v55 = vld [vmem:[%s12438_s3 + $0xc8] sm:$0xff] (%p403_p11) }
 0x355   : > { %12908 = vst [vmem:[#allocation66_spill] sm:$0xff] (%p403_p11), %v9116_v55 }
 0x356   : >> { %v2147_v56 = vadd.f32 %v2146_v14, %v2078_v54  ;;  %v1457_v29 = vadd.f32 %v8975_v18, %v1408_v42  ;;  %v8991_v18 = vld [vmem:[%s12438_s3] sm:$0xff] (%p403_p11) }
 0x357   : > { %12883 = vst [vmem:[#allocation14_spill] sm:$0xff] (%p403_p11), %v8991_v18 }
 0x358   : >> { %v2204_v31 = vadd.f32 %v2203_v52, %v2147_v56  ;;  %v1462_v35 = vmax.f32 %v1457_v29, 0.0 }
 0x359   : >> { %v2272_v22 = vpop.f32.mrf.mxu2  ;;  %v2325_v50 = vpop.f32.mrf.mxu3 }
 0x35a   : >> { %v2273_v57 = vadd.f32 %v2272_v22, %v2186_v38 }
 0x35c   : >> { %v2322_v30 = vadd.f32 %v2321_v19, %v2273_v57  ;;  %v9001_v57 = vld [vmem:[%s12438_s3 + $0x10] sm:$0xff] (%p403_p11) }
 0x35d   : > { %12885 = vst [vmem:[#allocation16_spill] sm:$0xff] (%p403_p11), %v9001_v57 }
 0x35e   : >> { %v2336_v34 = vmax.f32 %v2322_v30, 0.0  ;;  %v9026_v30 = vld [vmem:[%s12438_s3 + $0x38] sm:$0xff] (%p403_p11) }
 0x35f   : > { %12890 = vst [vmem:[#allocation21_spill] sm:$0xff] (%p403_p11), %v9026_v30 }
 0x360   : >> { %v2340_v10 = vmax.f32 %v1459_v45, %v2336_v34  ;;  %v9036_v45 = vld [vmem:[%s12438_s3 + $0x48] sm:$0xff] (%p403_p11)  ;;  %v9046_v34 = vld [vmem:[%s12438_s3 + $0x58] sm:$0xff] (%p403_p11) }
 0x361   : >> { %v2276_v36 = vpop.f32.mrf.mxu2  ;;  %v2329_v58 = vpop.f32.mrf.mxu3  ;;  %12892 = vst [vmem:[#allocation23_spill] sm:$0xff] (%p403_p11), %v9036_v45 }
 0x362   : >> { %2344 = vst [vmem:[#allocation4] sm:$0xff] %v2340_v10  ;;  %v2277_v0 = vadd.f32 %v2276_v36, %v2192_v17  ;;  %v9076_v10 = vld [vmem:[%s12438_s3 + $0x88] sm:$0xff] (%p403_p11)  ;;  %v9081_v17 = vld [vmem:[%s12438_s3 + $0x90] sm:$0xff] (%p403_p11)  ;;  %v9086_v36 = vld [vmem:[%s12438_s3 + $0x98] sm:$0xff] (%p403_p11) }
 0x363   : > { %12894 = vst [vmem:[#allocation25_spill] sm:$0xff] (%p403_p11), %v9046_v34 }
 0x364   : >> { %v2326_v27 = vadd.f32 %v2325_v50, %v2277_v0  ;;  %v9061_v50 = vld [vmem:[%s12438_s3 + $0x70] sm:$0xff] (%p403_p11)  ;;  %12900 = vst [vmem:[#allocation58_spill] sm:$0xff] (%p403_p11), %v9076_v10  ;;  %v9096_v0 = vld [vmem:[%s12438_s3 + $0xa8] sm:$0xff] (%p403_p11) }
 0x365   : > { %12897 = vst [vmem:[#allocation28_spill] sm:$0xff] (%p403_p11), %v9061_v50 }
 0x366   : >> { %v2337_v26 = vmax.f32 %v2326_v27, 0.0  ;;  %12901 = vst [vmem:[#allocation59_spill] sm:$0xff] (%p403_p11), %v9081_v17  ;;  %v9121_v27 = vld [vmem:[%s12438_s3 + $0xd0] sm:$0xff] (%p403_p11) }
 0x367   : > { %12902 = vst [vmem:[#allocation60_spill] sm:$0xff] (%p403_p11), %v9086_v36 }
 0x368   : >> { %v2341_v16 = vmax.f32 %v1460_v5, %v2337_v26  ;;  %12904 = vst [vmem:[#allocation62_spill] sm:$0xff] (%p403_p11), %v9096_v0  ;;  %v9131_v5 = vld [vmem:[%s12438_s3 + $0xe0] sm:$0xff] (%p403_p11)  ;;  %v9141_v26 = vld [vmem:[%s12438_s3 + $0xf0] sm:$0xff] (%p403_p11) }
 0x369   : >> { %v2280_v20 = vpop.f32.mrf.mxu2  ;;  %v2333_v44 = vpop.f32.mrf.mxu3  ;;  %12909 = vst [vmem:[#allocation67_spill] sm:$0xff] (%p403_p11), %v9121_v27 }
 0x36a   : >> { %2345 = vst [vmem:[#allocation4 + $0x8] sm:$0xff] %v2341_v16  ;;  %v2281_v24 = vadd.f32 %v2280_v20, %v2198_v53 }
 0x36b   : > { %12911 = vst [vmem:[#allocation69_spill] sm:$0xff] (%p403_p11), %v9131_v5 }
 0x36c   : >> { %v2330_v41 = vadd.f32 %v2329_v58, %v2281_v24  ;;  %12913 = vst [vmem:[#allocation71_spill] sm:$0xff] (%p403_p11), %v9141_v26 }
 0x36e   : >> { %v2338_v8 = vmax.f32 %v2330_v41, 0.0 }
 0x370   : >> { %v2342_v39 = vmax.f32 %v1461_v48, %v2338_v8 }
 0x371   : >> { %v2348_v12 = vld [vmem:[#allocation4] ss:$2 sm:$0xff]  ;;  %v2352_v59 = vld [vmem:[#allocation4 + $0x1] ss:$2 sm:$0xff]  ;;  %v2284_v11 = vpop.f32.mrf.mxu2 }
 0x372   : >> { %v2355_v19 = vmax.f32 %v2348_v12, %v2352_v59  ;;  %2346 = vst [vmem:[#allocation4 + $0x10] sm:$0xff] %v2342_v39  ;;  %v2285_v43 = vadd.f32 %v2284_v11, %v2204_v31 }
 0x374   : >> { %2359 = vst [vmem:[%s2358_s1] sm:$0xff] %v2355_v19  ;;  %v2334_v32 = vadd.f32 %v2333_v44, %v2285_v43 }
 0x376   : >> { %v2339_v63 = vmax.f32 %v2334_v32, 0.0 }
 0x378   : >> { %v2343_v62 = vmax.f32 %v1462_v35, %v2339_v63 }
 0x37a   : >> { %2347 = vst [vmem:[#allocation4 + $0x18] sm:$0xf] %v2343_v62 }
 0x380   : > { %405 = sbr.rel (!%p403_p11) target bundleno = 51 (0x33), region = 135 }
 0x381   : >> { %v2350_v3 = vld [vmem:[#allocation4 + $0x10] ss:$2 sm:$0x3f]  ;;  %v2354_v38 = vld [vmem:[#allocation4 + $0x11] ss:$2 sm:$0x3f] }
 0x382   : >> { %v2356_v22 = vmax.f32 %v2350_v3, %v2354_v38 }
 0x384   : >> { %2360 = vst [vmem:[%s2358_s1 + $0x8] sm:$0x3f] %v2356_v22 }
 0x385 LB: >> { %v12916_v0 = vld [vmem:[#allocation62_spill] sm:$0xff]  ;;  %v12917_v51 = vld [vmem:[#allocation63_spill] sm:$0xff]  ;;  %v12918_v46 = vld [vmem:[#allocation64_spill] sm:$0xff]  ;;  %s7068_s29 = sshll.u32 %s7305_s22, 5  ;;  %s7323_s19 = smov 30   ;;  %vm2609_vm0 = vcmask 441344   ;;  %s7305_s22 = sphi %s9153_s22, %s2399_s22  }
 0x386   : >> { %v12919_v37 = vld [vmem:[#allocation65_spill] sm:$0xff]  ;;  %v12920_v55 = vld [vmem:[#allocation66_spill] sm:$0xff]  ;;  %v12921_v27 = vld [vmem:[#allocation67_spill] sm:$0xff]  ;;  %s9159_s24 = scalar_lea.vmem [#allocation2], %s7068_s29  ;;  %s7324_s0 = smov 18   ;;  %vm2612_vm2 = vcmask 490496  }
 0x387   : >> { %v12922_v61 = vld [vmem:[#allocation68_spill] sm:$0xff]  ;;  %v12923_v5 = vld [vmem:[#allocation69_spill] sm:$0xff]  ;;  %v12924_v2 = vld [vmem:[#allocation70_spill] sm:$0xff]  ;;  %s7325_s1 = smov 6   ;;  %s7326_s2 = smov 36   ;;  %vm2615_vm4 = vcmask 539648  }
 0x388   : >> { %v12925_v26 = vld [vmem:[#allocation71_spill] sm:$0xff]  ;;  %v12926_v47 = vld [vmem:[#allocation72_spill] sm:$0xff]  ;;  %v12927_v18 = vld [vmem:[#allocation14_spill] sm:$0xff]  ;;  %s7327_s17 = smov 24   ;;  %s7328_s20 = smov 12   ;;  %vm2618_vm6 = vcmask 588800  }
 0x389   : >> { %v12928_v1 = vld [vmem:[#allocation15_spill] sm:$0xff]  ;;  %v12929_v57 = vld [vmem:[#allocation16_spill] sm:$0xff]  ;;  %v12930_v49 = vld [vmem:[#allocation17_spill] sm:$0xff]  ;;  %s7329_s23 = smov 48   ;;  %s7330_s28 = smov 42   ;;  %vm2621_vm8 = vcmask 637952  }
 0x38a   : >> { %v12931_v4 = vld [vmem:[#allocation18_spill] sm:$0xff]  ;;  %v12932_v13 = vld [vmem:[#allocation19_spill] sm:$0xff]  ;;  %v12933_v28 = vld [vmem:[#allocation20_spill] sm:$0xff]  ;;  %s7331_s15 = smov 54   ;;  %s7332_s16 = smov 66   ;;  %vm2624_vm10 = vcmask 687104  }
 0x38b   : >> { %v12934_v30 = vld [vmem:[#allocation21_spill] sm:$0xff]  ;;  %v12935_v40 = vld [vmem:[#allocation22_spill] sm:$0xff]  ;;  %v12936_v45 = vld [vmem:[#allocation23_spill] sm:$0xff]  ;;  %s7333_s26 = smov 60   ;;  %s7334_s30 = smov 72   ;;  %vm2627_vm11 = vcmask 736256  }
 0x38c   : >> { %v12937_v25 = vld [vmem:[#allocation24_spill] sm:$0xff]  ;;  %v12938_v34 = vld [vmem:[#allocation25_spill] sm:$0xff]  ;;  %v12939_v21 = vld [vmem:[#allocation26_spill] sm:$0xff]  ;;  %s7335_s12 = smov 84   ;;  %s7336_s14 = smov 78   ;;  %vm2721_vm14 = vcmask 785408  }
 0x38d   : >> { %v12940_v50 = vld [vmem:[#allocation28_spill] sm:$0xff]  ;;  %v12941_v23 = vld [vmem:[#allocation27_spill] sm:$0xff]  ;;  %v12942_v9 = vld [vmem:[#allocation30_spill] sm:$0xff]  ;;  %s7337_s13 = smov 90   ;;  %s7338_s29 = smov 96  }
 0x38e   : >> { %v7038_v54 = vld [vmem:[%s9159_s24 + $0x41] sm:$0xff]  ;;  %v9163_v16 = vld [vmem:[%s9159_s24 + $0x34] sm:$0xff]  ;;  %v7033_v41 = vld [vmem:[%s9159_s24 + $0x3c] sm:$0x3] }
 0x38f   : >> { %12943 = vst [vmem:[#allocation74_spill] sm:$0xff] %v9163_v16  ;;  %v9166_v53 = vld [vmem:[%s9159_s24 + $0x32] sm:$0xff]  ;;  %2664 = vrot.lane.b32.xlu2 %v7038_v54, %s7323_s19  ;;  %2648 = vrot.lane.b32.xlu1 %v9163_v16, %s7324_s0  ;;  %v9174_v58 = vld [vmem:[%s9159_s24 + $0x42] sm:$0xff] }
 0x390   : >> { %2632 = vrot.lane.b32.xlu0 %v9166_v53, %s7325_s1  ;;  %v9177_v20 = vld [vmem:[%s9159_s24 + $0x40] sm:$0xff]  ;;  %v9180_v7 = vld [vmem:[%s9159_s24 + $0x33] sm:$0xff]  ;;  %v7037_v56 = vld [vmem:[%s9159_s24 + $0x48] sm:$0x3] }
 0x391   : >> { %12944 = vst [vmem:[#allocation75_spill] sm:$0xff] %v9177_v20  ;;  %v9189_v24 = vld [vmem:[%s9159_s24 + $0x44] sm:$0xff]  ;;  %v7029_v14 = vld [vmem:[%s9159_s24 + $0x3a] sm:$0x3]  ;;  %v9221_v12 = vld [vmem:[%s9159_s24 + $0x4c] sm:$0x3] }
 0x392   : >> { %12945 = vst [vmem:[#allocation76_spill] sm:$0xff] %v9180_v7  ;;  %v9193_v15 = vld [vmem:[%s9159_s24 + $0x43] sm:$0xff]  ;;  %v7031_v48 = vld [vmem:[%s9159_s24 + $0x3b] sm:$0x3]  ;;  %v9210_v8 = vld [vmem:[%s9159_s24 + $0x4b] sm:$0x3] }
 0x393   : >> { %v9207_v42 = vld [vmem:[%s9159_s24 + $0x4a] sm:$0x3]  ;;  %v2407_v39 = vld [vmem:[%s9159_s24 + $0x2] sm:$0xff]  ;;  %v7000_v59 = vld [vmem:[%s9159_s24 + $0x10] sm:$0xff] }
 0x394   : >> { %v7039_v52 = vld [vmem:[%s9159_s24 + $0x49] sm:$0x3]  ;;  %v2405_v31 = vld [vmem:[%s9159_s24 + $0x1] sm:$0xff]  ;;  %v9234_v19 = vld [vmem:[%s9159_s24 + $0x13] sm:$0xff] }
 0x395   : >> { %v2411_v11 = vld [vmem:[%s9159_s24 + $0x4] sm:$0xff]  ;;  %v9237_v43 = vld [vmem:[%s9159_s24 + $0x12] sm:$0xff] }
 0x396   : >> { %v2409_v29 = vld [vmem:[%s9159_s24 + $0x3] sm:$0xff]  ;;  %v9240_v44 = vld [vmem:[%s9159_s24 + $0x11] sm:$0xff]  ;;  %v2410_v3 = vld [vmem:[%s9159_s24 + $0xb] sm:$0x3] }
 0x397   : >> { %2672 = vrot.lane.b32.xlu2 %v9174_v58, %s7326_s2  ;;  %2656 = vrot.lane.b32.xlu1 %v9177_v20, %s7327_s17  ;;  %v2408_v32 = vld [vmem:[%s9159_s24 + $0xa] sm:$0x3]  ;;  %v9250_v35 = vld [vmem:[%s9159_s24 + $0x14] sm:$0xff] }
 0x398   : >> { %2640 = vrot.lane.b32.xlu0 %v9180_v7, %s7328_s20  ;;  %v2406_v63 = vld [vmem:[%s9159_s24 + $0x9] sm:$0x3]  ;;  %v9258_v62 = vld [vmem:[%s9159_s24 + $0x21] sm:$0xff]  ;;  %v7001_v22 = vld [vmem:[%s9159_s24 + $0x18] sm:$0x3] }
 0x399   : >> { %v9262_v38 = vld [vmem:[%s9159_s24 + $0x20] sm:$0xff]  ;;  %v7048_v6 = vld [vmem:[%s9159_s24 + $0x50] sm:$0xff]  ;;  %v9347_v33 = vld [vmem:[%s9159_s24 + $0x2b] sm:$0x3] }
 0x39a   : >> { %v9271_v54 = vld [vmem:[%s9159_s24 + $0x22] sm:$0xff]  ;;  %v7050_v16 = vld [vmem:[%s9159_s24 + $0x51] sm:$0xff]  ;;  %12949 = vst [vmem:[#allocation80_spill] sm:$0xff] %v9347_v33 }
 0x39b   : >> { %v9335_v60 = vld [vmem:[%s9159_s24 + $0x31] sm:$0xff] }
 0x39f   : >> { %2688 = vrot.lane.b32.xlu1 %v9189_v24, %s7329_s23  ;;  %2634 = vrot.lane.b32.xlu2 %v7029_v14, %s7325_s1  ;;  %v2412_v14 = vld [vmem:[%s9159_s24 + $0xc] sm:$0x3] }
 0x3a0   : >> { %2680 = vrot.lane.b32.xlu0 %v9193_v15, %s7330_s28 }
 0x3a7   : >> { %2650 = vrot.lane.b32.xlu1 %v7033_v41, %s7324_s0  ;;  %2658 = vrot.lane.b32.xlu2 %v7037_v56, %s7327_s17  ;;  %v9279_v41 = vld [vmem:[%s9159_s24 + $0x24] sm:$0xff]  ;;  %v9282_v56 = vld [vmem:[%s9159_s24 + $0x19] sm:$0x3] }
 0x3a8   : >> { %2642 = vrot.lane.b32.xlu0 %v7031_v48, %s7328_s20  ;;  %v9285_v48 = vld [vmem:[%s9159_s24 + $0x23] sm:$0xff] }
 0x3af   : >> { %2674 = vrot.lane.b32.xlu1 %v9207_v42, %s7326_s2  ;;  %2682 = vrot.lane.b32.xlu2 %v9210_v8, %s7330_s28 }
 0x3b0   : >> { %2666 = vrot.lane.b32.xlu0 %v7039_v52, %s7323_s19 }
 0x3b7   : >> { %2475 = vrot.lane.b32.xlu2 %v2407_v39, %s7328_s20  ;;  %2467 = vrot.lane.b32.xlu1 %v2405_v31, %s7325_s1  ;;  %v9294_v39 = vld [vmem:[%s9159_s24 + $0x1b] sm:$0x3]  ;;  %v9297_v31 = vld [vmem:[%s9159_s24 + $0x30] sm:$0xff] }
 0x3b8   : >> { %2690 = vrot.lane.b32.xlu0 %v9221_v12, %s7329_s23 }
 0x3bf   : >> { %2499 = vrot.lane.b32.xlu2 %v7000_v59, %s7323_s19  ;;  %2491 = vrot.lane.b32.xlu1 %v2411_v11, %s7327_s17  ;;  %v9300_v59 = vld [vmem:[%s9159_s24 + $0x1a] sm:$0x3] }
 0x3c0   : >> { %2483 = vrot.lane.b32.xlu0 %v2409_v29, %s7324_s0  ;;  %v9309_v29 = vld [vmem:[%s9159_s24 + $0x1c] sm:$0x3] }
 0x3c1   : >> { %12946 = vst [vmem:[#allocation77_spill] sm:$0xff] %v9309_v29 }
 0x3c7   : >> { %2523 = vrot.lane.b32.xlu2 %v9234_v19, %s7329_s23  ;;  %2515 = vrot.lane.b32.xlu1 %v9237_v43, %s7330_s28 }
 0x3c8   : >> { %2507 = vrot.lane.b32.xlu0 %v9240_v44, %s7326_s2 }
 0x3cf   : >> { %2477 = vrot.lane.b32.xlu2 %v2408_v32, %s7328_s20  ;;  %2531 = vrot.lane.b32.xlu1 %v9250_v35, %s7331_s15 }
 0x3d0   : >> { %2469 = vrot.lane.b32.xlu0 %v2406_v63, %s7325_s1  ;;  %v9318_v63 = vld [vmem:[%s9159_s24 + $0x28] sm:$0x3] }
 0x3d1   : >> { %12947 = vst [vmem:[#allocation78_spill] sm:$0xff] %v9318_v63 }
 0x3d7   : >> { %2547 = vrot.lane.b32.xlu2 %v9258_v62, %s7332_s16  ;;  %2485 = vrot.lane.b32.xlu1 %v2410_v3, %s7324_s0  ;;  %v9321_v3 = vld [vmem:[%s9159_s24 + $0x29] sm:$0x3] }
 0x3d8   : >> { %2539 = vrot.lane.b32.xlu0 %v9262_v38, %s7333_s26 }
 0x3df   : >> { %2501 = vrot.lane.b32.xlu2 %v7001_v22, %s7323_s19  ;;  %2555 = vrot.lane.b32.xlu1 %v9271_v54, %s7334_s30 }
 0x3e0   : >> { %2493 = vrot.lane.b32.xlu0 %v2412_v14, %s7327_s17 }
 0x3e7   : >> { %2571 = vrot.lane.b32.xlu2 %v9279_v41, %s7335_s12  ;;  %2509 = vrot.lane.b32.xlu1 %v9282_v56, %s7326_s2 }
 0x3e8   : >> { %2563 = vrot.lane.b32.xlu0 %v9285_v48, %s7336_s14 }
 0x3e9   : >> { %v2665_v52 = vpop.permute.xlu2 %2664 }
 0x3ef   : >> { %2525 = vrot.lane.b32.xlu2 %v9294_v39, %s7329_s23  ;;  %2579 = vrot.lane.b32.xlu1 %v9297_v31, %s7337_s13 }
 0x3f0   : >> { %2517 = vrot.lane.b32.xlu0 %v9300_v59, %s7330_s28 }
 0x3f1   : >> { %v2673_v11 = vpop.permute.xlu2 %2672 }
 0x3f7   : >> { %2533 = vrot.lane.b32.xlu2 %v9309_v29, %s7331_s15  ;;  %3614 = vrot.lane.b32.xlu1 %v9174_v58, %s7325_s1 }
 0x3f8   : >> { %3620 = vrot.lane.b32.xlu0 %v9193_v15, %s7328_s20  ;;  %v9330_v15 = vld [vmem:[%s9159_s24 + $0x2a] sm:$0x3] }
 0x3f9   : >> { %v2635_v32 = vpop.permute.xlu2 %2634  ;;  %12948 = vst [vmem:[#allocation79_spill] sm:$0xff] %v9330_v15 }
 0x3ff   : >> { %3626 = vrot.lane.b32.xlu2 %v9189_v24, %s7324_s0  ;;  %2541 = vrot.lane.b32.xlu1 %v9318_v63, %s7333_s26  ;;  %v7052_v63 = vld [vmem:[%s9159_s24 + $0x52] sm:$0xff] }
 0x400   : >> { %2549 = vrot.lane.b32.xlu0 %v9321_v3, %s7332_s16 }
 0x401   : >> { %v2649_v22 = vpop.permute.xlu1 %2648  ;;  %v2659_v58 = vpop.permute.xlu2 %2658 }
 0x402   : >> { %v2633_v14 = vpop.permute.xlu0 %2632 }
 0x403   : >> { %v2694_v10 = vsel %vm767_vm1, %v9335_v60, %v2633_v14 }
 0x407   : >> { %2557 = vrot.lane.b32.xlu2 %v9330_v15, %s7334_s30  ;;  %3634 = vrot.lane.b32.xlu1 %v7048_v6, %s7327_s17 }
 0x408   : >> { %3642 = vrot.lane.b32.xlu0 %v7050_v16, %s7323_s19 }
 0x409   : >> { %v2657_v24 = vpop.permute.xlu1 %2656  ;;  %v2683_v7 = vpop.permute.xlu2 %2682 }
 0x40a   : >> { %v2641_v20 = vpop.permute.xlu0 %2640 }
 0x40b   : >> { %v2696_v17 = vsel %vm777_vm3, %v2694_v10, %v2641_v20 }
 0x40c   : >> { %v2698_v36 = vsel %vm787_vm5, %v2696_v17, %v2649_v22  ;;  %v7054_v22 = vld [vmem:[%s9159_s24 + $0x53] sm:$0xff] }
 0x40d   : >> { %v2700_v15 = vsel %vm797_vm7, %v2698_v36, %v2657_v24  ;;  %v9358_v36 = vld [vmem:[%s9159_s24 + $0x38] sm:$0x3] }
 0x40e   : >> { %v2702_v6 = vsel %vm807_vm9, %v2700_v15, %v2665_v52  ;;  %12950 = vst [vmem:[#allocation81_spill] sm:$0xff] %v9358_v36  ;;  %v9364_v52 = vld [vmem:[%s9159_s24 + $0x39] sm:$0x3] }
 0x40f   : >> { %3650 = vrot.lane.b32.xlu2 %v7052_v63, %s7326_s2  ;;  %2565 = vrot.lane.b32.xlu1 %v9347_v33, %s7336_s14  ;;  %v2704_v10 = vsel %vm817_vm12, %v2702_v6, %v2673_v11  ;;  %12951 = vst [vmem:[#allocation82_spill] sm:$0xff] %v9364_v52  ;;  %v2695_v15 = vsel %vm767_vm1, %v9364_v52, %v2635_v32  ;;  %v9372_v6 = vld [vmem:[%s9159_s24 + $0x2c] sm:$0x3] }
 0x410   : >> { %12952 = vst [vmem:[#allocation83_spill] sm:$0xff] %v9372_v6 }
 0x411   : >> { %v2689_v16 = vpop.permute.xlu1 %2688  ;;  %v2476_v14 = vpop.permute.xlu2 %2475 }
 0x412   : >> { %v2681_v29 = vpop.permute.xlu0 %2680 }
 0x413   : >> { %v2706_v17 = vsel %vm827_vm13, %v2704_v10, %v2681_v29 }
 0x414   : >> { %v2708_v20 = vsel %vm1017_vm15, %v2706_v17, %v2689_v16 }
 0x415   : >> { %v2710_v63 = vsel %vm2609_vm0, %v2708_v20, 0.0 }
 0x416   : >> { %2715 = vrot.lane.b32.xlu0 %v2710_v63, %s7338_s29  ;;  %v7056_v63 = vld [vmem:[%s9159_s24 + $0x54] sm:$0xff] }
 0x417   : >> { %2581 = vrot.lane.b32.xlu2 %v9358_v36, %s7337_s13  ;;  %3658 = vrot.lane.b32.xlu1 %v7054_v22, %s7330_s28  ;;  %v7049_v36 = vld [vmem:[%s9159_s24 + $0x58] sm:$0x3] }
 0x419   : >> { %v2651_v11 = vpop.permute.xlu1 %2650  ;;  %v2500_v29 = vpop.permute.xlu2 %2499 }
 0x41a   : >> { %v2643_v24 = vpop.permute.xlu0 %2642 }
 0x41b   : >> { %v2697_v16 = vsel %vm777_vm3, %v2695_v15, %v2643_v24  ;;  %v2403_v24 = vld [vmem:[%s9159_s24] sm:$0xff] }
 0x41c   : >> { %v2699_v10 = vsel %vm787_vm5, %v2697_v16, %v2651_v11 }
 0x41d   : >> { %v2701_v32 = vsel %vm797_vm7, %v2699_v10, %v2659_v58 }
 0x41e   : >> { %2573 = vrot.lane.b32.xlu0 %v9372_v6, %s7335_s12 }
 0x41f   : >> { %3616 = vrot.lane.b32.xlu2 %v9207_v42, %s7325_s1 }
 0x421   : >> { %v2675_v17 = vpop.permute.xlu1 %2674  ;;  %v9380_v20 = vpop.permute.xlu2 %2523 }
 0x422   : >> { %v2667_v22 = vpop.permute.xlu0 %2666 }
 0x423   : >> { %v2703_v52 = vsel %vm807_vm9, %v2701_v32, %v2667_v22 }
 0x424   : >> { %v2705_v15 = vsel %vm817_vm12, %v2703_v52, %v2675_v17 }
 0x425   : >> { %v2707_v6 = vsel %vm827_vm13, %v2705_v15, %v2683_v7  ;;  %v7051_v15 = vld [vmem:[%s9159_s24 + $0x59] sm:$0x3] }
 0x426   : >> { %3666 = vrot.lane.b32.xlu0 %v7056_v63, %s7329_s23 }
 0x427   : >> { %3636 = vrot.lane.b32.xlu2 %v7049_v36, %s7327_s17  ;;  %v7339_v36 = vmov 0.0  }
 0x429   : >> { %v9390_v42 = vpop.permute.xlu2 %2477  ;;  %v2468_v11 = vpop.permute.xlu1 %2467 }
 0x42a   : >> { %v2691_v16 = vpop.permute.xlu0 %2690  ;;  %v2586_v58 = vsel %vm767_vm1, %v2403_v24, %v2468_v11  ;;  %v9418_v11 = vand.u32 4294901760, %v12940_v50 }
 0x42b   : >> { %v2709_v10 = vsel %vm1017_vm15, %v2707_v6, %v2691_v16  ;;  %v2589_v22 = vsel %vm777_vm3, %v2586_v58, %v2476_v14  ;;  %v9407_v14 = vand.u32 4294901760, %v12942_v9  ;;  %v9433_v16 = vand.u32 4294901760, %v12941_v23 }
 0x42c   : >> { %v2711_v32 = vsel %vm2609_vm0, %v2709_v10, 0.0  ;;  %12956 = vst [vmem:[#allocation87_spill] sm:$0xff] %v9418_v11 }
 0x42d   : >> { %2719 = vrot.lane.b32.xlu1 %v2711_v32, %s7338_s29  ;;  %12954 = vst [vmem:[#allocation85_spill] sm:$0xff] %v9407_v14  ;;  %v9415_v24 = vsub.f32 %v12942_v9, %v9407_v14  ;;  %2947 = vmatpush.msra.mxu3 %v9407_v14 }
 0x42e   : >> { %3622 = vrot.lane.b32.xlu0 %v9210_v8, %s7328_s20  ;;  %2734 = vmatpush.msra.mxu0 %v9407_v14  ;;  %12959 = vst [vmem:[#allocation90_spill] sm:$0xff] %v9433_v16 }
 0x42f   : >> { %2717 = vrot.lane.b32.xlu2 %v7339_v36, %s7338_s29  ;;  %12955 = vst [vmem:[#allocation86_spill] sm:$0xff] %v9415_v24  ;;  %2889 = vmatpush.msra.mxu2 %v9415_v24 }
 0x430   : >> { %2949 = vmatpush.msra.mxu3 %v9418_v11  ;;  %2736 = vmatpush.msra.mxu0 %v9418_v11 }
 0x431   : >> { %v9401_v52 = vpop.permute.xlu2 %2547  ;;  %v2492_v17 = vpop.permute.xlu1 %2491 }
 0x432   : >> { %12953 = vst [vmem:[#allocation84_spill] sm:$0xff] %v9401_v52  ;;  %v2484_v7 = vpop.permute.xlu0 %2483  ;;  %2951 = vmatpush.msra.mxu3 %v9433_v16  ;;  %2738 = vmatpush.msra.mxu0 %v9433_v16 }
 0x433   : >> { %v2592_v63 = vsel %vm787_vm5, %v2589_v22, %v2484_v7  ;;  %v7053_v22 = vld [vmem:[%s9159_s24 + $0x5a] sm:$0x3]  ;;  %v9451_v7 = vand.u32 4294901760, %v12939_v21 }
 0x434   : >> { %v2595_v6 = vsel %vm797_vm7, %v2592_v63, %v2492_v17  ;;  %v9447_v17 = vsub.f32 %v12941_v23, %v9433_v16 }
 0x435   : >> { %3628 = vrot.lane.b32.xlu1 %v9221_v12, %s7324_s0  ;;  %v2598_v8 = vsel %vm807_vm9, %v2595_v6, %v2500_v29  ;;  %v9425_v12 = vand.u32 4294901760, %v9415_v24  ;;  %v9429_v29 = vsub.f32 %v12940_v50, %v9418_v11  ;;  %12962 = vst [vmem:[#allocation93_spill] sm:$0xff] %v9451_v7  ;;  %2953 = vmatpush.msra.mxu3 %v9451_v7 }
 0x436   : >> { %3644 = vrot.lane.b32.xlu0 %v7051_v15, %s7323_s19  ;;  %12961 = vst [vmem:[#allocation92_spill] sm:$0xff] %v9447_v17  ;;  %v7055_v15 = vld [vmem:[%s9159_s24 + $0x5b] sm:$0x3]  ;;  %v9463_v50 = vand.u32 4294901760, %v9447_v17  ;;  %2740 = vmatpush.msra.mxu0 %v9451_v7 }
 0x437   : >> { %3492 = vrot.lane.b32.xlu2 %v9240_v44, %s7325_s1  ;;  %12957 = vst [vmem:[#allocation88_spill] sm:$0xff] %v9425_v12  ;;  %v2785_v32 = vsub.f32 %v9415_v24, %v9425_v12  ;;  %v9443_v36 = vand.u32 4294901760, %v9429_v29  ;;  %2892 = vmatpush.msra.mxu2 %v9429_v29 }
 0x438   : >> { %12958 = vst [vmem:[#allocation89_spill] sm:$0xff] %v9429_v29 }
 0x439   : >> { %v9436_v58 = vpop.permute.xlu2 %2501  ;;  %v2516_v44 = vpop.permute.xlu1 %2515  ;;  %12960 = vst [vmem:[#allocation91_spill] sm:$0xff] %v9443_v36  ;;  %v9458_v9 = vand.u32 4294901760, %v2785_v32  ;;  %v2791_v23 = vsub.f32 %v9429_v29, %v9443_v36  ;;  %2895 = vmatpush.msra.mxu2 %v9447_v17 }
 0x43a   : >> { %v2508_v10 = vpop.permute.xlu0 %2507  ;;  %12964 = vst [vmem:[#allocation95_spill] sm:$0xff] %v9463_v50 }
 0x43b   : >> { %v2601_v63 = vsel %vm817_vm12, %v2598_v8, %v2508_v10  ;;  %12963 = vst [vmem:[#allocation94_spill] sm:$0xff] %v9458_v9  ;;  %v9477_v10 = vand.u32 4294901760, %v12938_v34  ;;  %2787 = vmatpush.msra.mxu1 %v9458_v9  ;;  %v9482_v32 = vand.u32 4294901760, %v2791_v23  ;;  %v2404_v23 = vld [vmem:[%s9159_s24 + $0x8] sm:$0x3] }
 0x43c   : >> { %v2604_v6 = vsel %vm827_vm13, %v2601_v63, %v2516_v44  ;;  %v9474_v44 = vsub.f32 %v12939_v21, %v9451_v7 }
 0x43d   : >> { %v9469_v8 = vsel %vm1017_vm15, %v2604_v6, %v9380_v20  ;;  %3652 = vrot.lane.b32.xlu1 %v7053_v22, %s7326_s2  ;;  %12967 = vst [vmem:[#allocation98_spill] sm:$0xff] %v9477_v10  ;;  %v2797_v20 = vsub.f32 %v9447_v17, %v9463_v50  ;;  %v9487_v22 = vand.u32 4294901760, %v12937_v25  ;;  %2793 = vmatpush.msra.mxu1 %v9482_v32 }
 0x43e   : >> { %12965 = vst [vmem:[#allocation96_spill] sm:$0xff] %v9469_v8  ;;  %3660 = vrot.lane.b32.xlu0 %v7055_v15, %s7330_s28  ;;  %v9492_v63 = vand.u32 4294901760, %v9474_v44  ;;  %v9496_v15 = vsub.f32 %v12938_v34, %v9477_v10  ;;  %2898 = vmatpush.msra.mxu2 %v9474_v44 }
 0x43f   : >> { %12966 = vst [vmem:[#allocation97_spill] sm:$0xff] %v9474_v44  ;;  %3510 = vrot.lane.b32.xlu2 %v9250_v35, %s7327_s17  ;;  %v9501_v6 = vand.u32 4294901760, %v2797_v20  ;;  %v9505_v21 = vsub.f32 %v12937_v25, %v9487_v22  ;;  %v9508_v35 = vand.u32 4294901760, %v12936_v45  ;;  %2955 = vmatpush.msra.mxu3 %v9477_v10  ;;  %v7057_v25 = vld [vmem:[%s9159_s24 + $0x5c] sm:$0x3] }
 0x440   : >> { %12968 = vst [vmem:[#allocation99_spill] sm:$0xff] %v9482_v32  ;;  %v2803_v29 = vsub.f32 %v9474_v44, %v9492_v63  ;;  %v9518_v24 = vand.u32 4294901760, %v9496_v15  ;;  %2901 = vmatpush.msra.mxu2 %v9496_v15  ;;  %2742 = vmatpush.msra.mxu0 %v9477_v10 }
 0x441   : >> { %12969 = vst [vmem:[#allocation100_spill] sm:$0xff] %v9487_v22  ;;  %v9511_v17 = vpop.permute.xlu2 %2571  ;;  %v9513_v34 = vpop.permute.xlu1 %2531  ;;  %2799 = vmatpush.msra.mxu1 %v9501_v6  ;;  %v9525_v32 = vand.u32 4294901760, %v9505_v21  ;;  %v9529_v9 = vsub.f32 %v12936_v45, %v9508_v35  ;;  %2957 = vmatpush.msra.mxu3 %v9487_v22 }
 0x442   : >> { %12970 = vst [vmem:[#allocation101_spill] sm:$0xff] %v9492_v63  ;;  %v2470_v20 = vpop.permute.xlu0 %2469  ;;  %v2809_v52 = vsub.f32 %v9496_v15, %v9518_v24  ;;  %2904 = vmatpush.msra.mxu2 %v9505_v21  ;;  %2744 = vmatpush.msra.mxu0 %v9487_v22 }
 0x443   : >> { %12971 = vst [vmem:[#allocation102_spill] sm:$0xff] %v9496_v15  ;;  %v2587_v44 = vsel %vm767_vm1, %v2404_v23, %v2470_v20  ;;  %v2815_v33 = vsub.f32 %v9505_v21, %v9525_v32  ;;  %v9547_v23 = vand.u32 4294901760, %v9529_v9  ;;  %2959 = vmatpush.msra.mxu3 %v9508_v35 }
 0x444   : >> { %12972 = vst [vmem:[#allocation103_spill] sm:$0xff] %v9501_v6  ;;  %v9539_v6 = vand.u32 4294901760, %v12935_v40  ;;  %v2590_v45 = vsel %vm777_vm3, %v2587_v44, %v9390_v42  ;;  %v9555_v20 = vand.u32 4294901760, %v2809_v52  ;;  %2907 = vmatpush.msra.mxu2 %v9529_v9  ;;  %v9573_v52 = vand.u32 4294901760, %v12933_v28  ;;  %2746 = vmatpush.msra.mxu0 %v9508_v35 }
 0x445   : >> { %12973 = vst [vmem:[#allocation104_spill] sm:$0xff] %v9505_v21  ;;  %3668 = vrot.lane.b32.xlu1 %v7057_v25, %s7329_s23  ;;  %v9563_v44 = vand.u32 4294901760, %v2815_v33  ;;  %v2821_v21 = vsub.f32 %v9529_v9, %v9547_v23 }
 0x446   : >> { %12974 = vst [vmem:[#allocation105_spill] sm:$0xff] %v9508_v35  ;;  %v9559_v42 = vsub.f32 %v12935_v40, %v9539_v6  ;;  %3498 = vrot.lane.b32.xlu0 %v9237_v43, %s7328_s20  ;;  %2961 = vmatpush.msra.mxu3 %v9539_v6 }
 0x447   : >> { %12975 = vst [vmem:[#allocation106_spill] sm:$0xff] %v9511_v17  ;;  %v9533_v17 = vand.u32 4294901760, %v2803_v29  ;;  %v9550_v29 = vand.u32 4294901760, %v12934_v30  ;;  %3528 = vrot.lane.b32.xlu2 %v9271_v54, %s7330_s28  ;;  %v9581_v43 = vand.u32 4294901760, %v2821_v21  ;;  %2748 = vmatpush.msra.mxu0 %v9539_v6 }
 0x448   : >> { %12976 = vst [vmem:[#allocation107_spill] sm:$0xff] %v9518_v24  ;;  %v9579_v33 = vand.u32 4294901760, %v9559_v42  ;;  %2910 = vmatpush.msra.mxu2 %v9559_v42 }
 0x449   : >> { %12977 = vst [vmem:[#allocation108_spill] sm:$0xff] %v9525_v32  ;;  %2805 = vmatpush.msra.mxu1 %v9533_v17  ;;  %v9570_v25 = vsub.f32 %v12934_v30, %v9550_v29  ;;  %v9589_v30 = vsub.f32 %v12933_v28, %v9573_v52  ;;  %v9595_v54 = vpop.permute.xlu2 %2525  ;;  %v2486_v15 = vpop.permute.xlu1 %2485  ;;  %2963 = vmatpush.msra.mxu3 %v9550_v29 }
 0x44a   : >> { %12978 = vst [vmem:[#allocation109_spill] sm:$0xff] %v9529_v9  ;;  %v9593_v9 = vand.u32 4294901760, %v12932_v13  ;;  %v2827_v21 = vsub.f32 %v9559_v42, %v9579_v33  ;;  %2750 = vmatpush.msra.mxu0 %v9550_v29 }
 0x44b   : >> { %12979 = vst [vmem:[#allocation110_spill] sm:$0xff] %v9533_v17  ;;  %2811 = vmatpush.msra.mxu1 %v9555_v20  ;;  %v9584_v40 = vand.u32 4294901760, %v9570_v25  ;;  %v9606_v17 = vand.u32 4294901760, %v9589_v30  ;;  %2913 = vmatpush.msra.mxu2 %v9570_v25 }
 0x44c   : >> { %12980 = vst [vmem:[#allocation111_spill] sm:$0xff] %v9539_v6  ;;  %2965 = vmatpush.msra.mxu3 %v9573_v52  ;;  %2752 = vmatpush.msra.mxu0 %v9573_v52 }
 0x44d   : >> { %12981 = vst [vmem:[#allocation112_spill] sm:$0xff] %v9547_v23  ;;  %2817 = vmatpush.msra.mxu1 %v9563_v44  ;;  %v2833_v28 = vsub.f32 %v9570_v25, %v9584_v40  ;;  %2916 = vmatpush.msra.mxu2 %v9589_v30 }
 0x44e   : >> { %12982 = vst [vmem:[#allocation113_spill] sm:$0xff] %v9550_v29  ;;  %3504 = vrot.lane.b32.xlu1 %v9234_v19, %s7324_s0  ;;  %3516 = vrot.lane.b32.xlu0 %v9262_v38, %s7323_s19  ;;  %v9648_v19 = vand.u32 4294901760, %v12929_v57 }
 0x44f   : >> { %12983 = vst [vmem:[#allocation114_spill] sm:$0xff] %v9555_v20  ;;  %v9601_v20 = vpop.permute.xlu0 %2539  ;;  %2823 = vmatpush.msra.mxu1 %v9581_v43  ;;  %3540 = vrot.lane.b32.xlu2 %v9279_v41, %s7331_s15  ;;  %v9670_v41 = vand.u32 4294901760, %v12928_v1 }
 0x450   : >> { %12984 = vst [vmem:[#allocation115_spill] sm:$0xff] %v9559_v42  ;;  %v9615_v42 = vand.u32 4294901760, %v2827_v21  ;;  %2967 = vmatpush.msra.mxu3 %v9593_v9  ;;  %2754 = vmatpush.msra.mxu0 %v9593_v9 }
 0x451   : >> { %12985 = vst [vmem:[#allocation116_spill] sm:$0xff] %v9563_v44  ;;  %v9619_v44 = vand.u32 4294901760, %v12931_v4 }
 0x452   : >> { %12986 = vst [vmem:[#allocation117_spill] sm:$0xff] %v9570_v25  ;;  %v2839_v25 = vsub.f32 %v9589_v30, %v9606_v17  ;;  %2829 = vmatpush.msra.mxu1 %v9615_v42 }
 0x453   : >> { %12987 = vst [vmem:[#allocation118_spill] sm:$0xff] %v9573_v52  ;;  %v9635_v21 = vsub.f32 %v12931_v4, %v9619_v44  ;;  %2969 = vmatpush.msra.mxu3 %v9619_v44  ;;  %2756 = vmatpush.msra.mxu0 %v9619_v44 }
 0x454   : >> { %12988 = vst [vmem:[#allocation119_spill] sm:$0xff] %v9579_v33 }
 0x455   : >> { %12989 = vst [vmem:[#allocation120_spill] sm:$0xff] %v9581_v43  ;;  %v9654_v4 = vand.u32 4294901760, %v9635_v21  ;;  %v9674_v43 = vpop.permute.xlu1 %2555 }
 0x456   : >> { %12990 = vst [vmem:[#allocation121_spill] sm:$0xff] %v9584_v40  ;;  %3522 = vrot.lane.b32.xlu1 %v9258_v62, %s7326_s2  ;;  %3534 = vrot.lane.b32.xlu0 %v9285_v48, %s7329_s23  ;;  %v9736_v62 = vand.u32 4294901760, %v12926_v47 }
 0x457   : >> { %12991 = vst [vmem:[#allocation122_spill] sm:$0xff] %v9589_v30  ;;  %3506 = vrot.lane.b32.xlu2 %v9294_v39, %s7324_s0  ;;  %v9751_v39 = vand.u32 4294901760, %v12925_v26 }
 0x458   : >> { %12992 = vst [vmem:[#allocation123_spill] sm:$0xff] %v9593_v9 }
 0x459   : >> { %12993 = vst [vmem:[#allocation124_spill] sm:$0xff] %v9595_v54  ;;  %v9611_v54 = vsub.f32 %v12932_v13, %v9593_v9  ;;  %v9642_v13 = vand.u32 4294901760, %v2839_v25  ;;  %v2593_v25 = vsel %vm787_vm5, %v2590_v45, %v2486_v15  ;;  %v2494_v15 = vpop.permute.xlu0 %2493 }
 0x45a   : >> { %12994 = vst [vmem:[#allocation125_spill] sm:$0xff] %v9601_v20  ;;  %v9621_v20 = vand.u32 4294901760, %v2833_v28  ;;  %v9638_v28 = vand.u32 4294901760, %v12930_v49 }
 0x45b   : >> { %12995 = vst [vmem:[#allocation126_spill] sm:$0xff] %v9606_v17  ;;  %v9626_v8 = vand.u32 4294901760, %v9611_v54  ;;  %2919 = vmatpush.msra.mxu2 %v9611_v54 }
 0x45c   : >> { %12996 = vst [vmem:[#allocation127_spill] sm:$0xff] %v9611_v54  ;;  %2835 = vmatpush.msra.mxu1 %v9621_v20  ;;  %v9658_v38 = vsub.f32 %v12930_v49, %v9638_v28  ;;  %2971 = vmatpush.msra.mxu3 %v9638_v28 }
 0x45d   : >> { %12997 = vst [vmem:[#allocation128_spill] sm:$0xff] %v9615_v42  ;;  %v2845_v30 = vsub.f32 %v9611_v54, %v9626_v8  ;;  %2922 = vmatpush.msra.mxu2 %v9635_v21  ;;  %v9667_v54 = vsub.f32 %v12929_v57, %v9648_v19  ;;  %v9690_v57 = vsub.f32 %v12928_v1, %v9670_v41 }
 0x45e   : >> { %12998 = vst [vmem:[#allocation129_spill] sm:$0xff] %v9619_v44  ;;  %2841 = vmatpush.msra.mxu1 %v9642_v13  ;;  %v9680_v45 = vand.u32 4294901760, %v9658_v38  ;;  %2973 = vmatpush.msra.mxu3 %v9648_v19 }
 0x45f   : >> { %12999 = vst [vmem:[#allocation130_spill] sm:$0xff] %v9621_v20  ;;  %v9661_v42 = vand.u32 4294901760, %v2845_v30  ;;  %v9672_v20 = vpop.permute.xlu2 %2533  ;;  %v2851_v30 = vsub.f32 %v9635_v21, %v9654_v4  ;;  %v9685_v49 = vand.u32 4294901760, %v9667_v54  ;;  %2925 = vmatpush.msra.mxu2 %v9658_v38  ;;  %2758 = vmatpush.msra.mxu0 %v9638_v28 }
 0x460   : >> { %13000 = vst [vmem:[#allocation131_spill] sm:$0xff] %v9626_v8  ;;  %2975 = vmatpush.msra.mxu3 %v9670_v41  ;;  %3494 = vrot.lane.b32.xlu1 %v9282_v56, %s7325_s1 }
 0x461   : >> { %13001 = vst [vmem:[#allocation132_spill] sm:$0xff] %v9635_v21  ;;  %v2596_v21 = vsel %vm797_vm7, %v2593_v25, %v2494_v15  ;;  %2847 = vmatpush.msra.mxu1 %v9661_v42  ;;  %v2863_v1 = vsub.f32 %v9667_v54, %v9685_v49  ;;  %v9710_v25 = vand.u32 4294901760, %v9690_v57  ;;  %2928 = vmatpush.msra.mxu2 %v9667_v54 }
 0x462   : >> { %13002 = vst [vmem:[#allocation133_spill] sm:$0xff] %v9642_v13  ;;  %v9693_v13 = vand.u32 4294901760, %v12927_v18  ;;  %2760 = vmatpush.msra.mxu0 %v9648_v19  ;;  %3500 = vrot.lane.b32.xlu0 %v9300_v59, %s7328_s20 }
 0x463   : >> { %13003 = vst [vmem:[#allocation134_spill] sm:$0xff] %v9648_v19  ;;  %v2869_v15 = vsub.f32 %v9690_v57, %v9710_v25  ;;  %2931 = vmatpush.msra.mxu2 %v9690_v57  ;;  %3560 = vrot.lane.b32.xlu2 %v9166_v53, %s7334_s30 }
 0x464   : >> { %13004 = vst [vmem:[#allocation135_spill] sm:$0xff] %v9654_v4  ;;  %v9704_v4 = vsel %vm807_vm9, %v2596_v21, %v9436_v58  ;;  %v9724_v21 = vand.u32 4294901760, %v2863_v1  ;;  %2977 = vmatpush.msra.mxu3 %v9693_v13  ;;  %2762 = vmatpush.msra.mxu0 %v9670_v41 }
 0x465   : >> { %13005 = vst [vmem:[#allocation136_spill] sm:$0xff] %v9658_v38 }
 0x466   : >> { %13006 = vst [vmem:[#allocation137_spill] sm:$0xff] %v9661_v42  ;;  %v9821_v42 = vand.u32 4294901760, %v12921_v27  ;;  %2764 = vmatpush.msra.mxu0 %v9693_v13 }
 0x467   : >> { %13007 = vst [vmem:[#allocation138_spill] sm:$0xff] %v9667_v54  ;;  %v9744_v48 = vpop.permute.xlu2 %3626  ;;  %v9746_v54 = vpop.permute.xlu1 %2509 }
 0x468   : >> { %13008 = vst [vmem:[#allocation139_spill] sm:$0xff] %v9670_v41  ;;  %2994 = vmatpush.msrb.mxu0 %v9425_v12  ;;  %3546 = vrot.lane.b32.xlu1 %v9297_v31, %s7333_s26 }
 0x469   : >> { %13009 = vst [vmem:[#allocation140_spill] sm:$0xff] %v9672_v20  ;;  %v9697_v20 = vand.u32 4294901760, %v2851_v30  ;;  %v9715_v30 = vsub.f32 %v12927_v18, %v9693_v13 }
 0x46a   : >> { %13010 = vst [vmem:[#allocation141_spill] sm:$0xff] %v9674_v43  ;;  %v2857_v43 = vsub.f32 %v9658_v38, %v9680_v45  ;;  %v9757_v38 = vpop.permute.xlu0 %2563  ;;  %3554 = vrot.lane.b32.xlu0 %v9335_v60, %s7332_s16  ;;  %2998 = vmatpush.msrb.mxu0 %v9443_v36 }
 0x46b   : >> { %13011 = vst [vmem:[#allocation142_spill] sm:$0xff] %v9685_v49  ;;  %2853 = vmatpush.msra.mxu1 %v9697_v20  ;;  %v9730_v18 = vand.u32 4294901760, %v9715_v30  ;;  %2934 = vmatpush.msra.mxu2 %v9715_v30 }
 0x46c   : >> { %13012 = vst [vmem:[#allocation143_spill] sm:$0xff] %v9690_v57  ;;  %v9720_v58 = vand.u32 4294901760, %v2857_v43  ;;  %v9738_v43 = vand.u32 4294901760, %v2869_v15  ;;  %v9755_v15 = vsub.f32 %v12926_v47, %v9736_v62  ;;  %v9773_v47 = vsub.f32 %v12925_v26, %v9751_v39  ;;  %3524 = vrot.lane.b32.xlu2 %v9321_v3, %s7326_s2  ;;  %3002 = vmatpush.msrb.mxu0 %v9463_v50 }
 0x46d   : >> { %13013 = vst [vmem:[#allocation144_spill] sm:$0xff] %v9697_v20  ;;  %v2875_v1 = vsub.f32 %v9715_v30, %v9730_v18  ;;  %3106 = vmatpush.msrb.mxu2 %v9736_v62 }
 0x46e   : >> { %13014 = vst [vmem:[#allocation145_spill] sm:$0xff] %v9710_v25  ;;  %2859 = vmatpush.msra.mxu1 %v9720_v58  ;;  %v9766_v57 = vand.u32 4294901760, %v9755_v15  ;;  %3006 = vmatpush.msrb.mxu0 %v9492_v63  ;;  %v13038_v63 = vld [vmem:[#allocation61_spill] sm:$0xff] }
 0x46f   : >> { %13015 = vst [vmem:[#allocation146_spill] sm:$0xff] %v9715_v30  ;;  %v9783_v30 = vand.u32 4294901760, %v9773_v47  ;;  %3108 = vmatpush.msrb.mxu2 %v9751_v39 }
 0x470   : >> { %13016 = vst [vmem:[#allocation147_spill] sm:$0xff] %v9720_v58  ;;  %2865 = vmatpush.msra.mxu1 %v9724_v21  ;;  %v9759_v58 = vand.u32 4294901760, %v2875_v1  ;;  %v3157_v1 = vsub.f32 %v9755_v15, %v9766_v57  ;;  %3010 = vmatpush.msrb.mxu0 %v9518_v24 }
 0x471   : >> { %13017 = vst [vmem:[#allocation148_spill] sm:$0xff] %v9724_v21  ;;  %v9769_v21 = vand.u32 4294901760, %v12924_v2 }
 0x472   : >> { %13018 = vst [vmem:[#allocation149_spill] sm:$0xff] %v9738_v43  ;;  %2871 = vmatpush.msra.mxu1 %v9738_v43  ;;  %v9786_v43 = vand.u32 4294901760, %v12923_v5  ;;  %v9798_v56 = vand.u32 4294901760, %v3157_v1  ;;  %3014 = vmatpush.msrb.mxu0 %v9525_v32 }
 0x473   : >> { %13019 = vst [vmem:[#allocation150_spill] sm:$0xff] %v9759_v58  ;;  %v9790_v26 = vsub.f32 %v12924_v2, %v9769_v21  ;;  %v9806_v2 = vand.u32 4294901760, %v12922_v61  ;;  %3110 = vmatpush.msrb.mxu2 %v9769_v21 }
 0x474   : >> { %13020 = vst [vmem:[#allocation151_spill] sm:$0xff] %v9773_v47  ;;  %2877 = vmatpush.msra.mxu1 %v9759_v58  ;;  %v3163_v58 = vsub.f32 %v9773_v47, %v9783_v30  ;;  %v9812_v53 = vsub.f32 %v12923_v5, %v9786_v43  ;;  %3159 = vmatpush.msrb.mxu3 %v9798_v56  ;;  %v9862_v47 = vand.u32 4294901760, %v12919_v37 }
 0x475   : >> { %13021 = vst [vmem:[#allocation152_spill] sm:$0xff] %v9790_v26  ;;  %v9803_v20 = vand.u32 4294901760, %v9790_v26  ;;  %3112 = vmatpush.msrb.mxu2 %v9786_v43  ;;  %3018 = vmatpush.msrb.mxu0 %v9547_v23  ;;  %v13055_v23 = vld [vmem:[#allocation76_spill] sm:$0xff] }
 0x476   : >> { %3065 = vmatpush.msrb.mxu1 %v9407_v14  ;;  %13022 = vst [vmem:[#allocation153_spill] sm:$0xff] %v9798_v56  ;;  %v9816_v59 = vand.u32 4294901760, %v3163_v58  ;;  %v9827_v14 = vpop.permute.xlu0 %2517  ;;  %v9832_v5 = vand.u32 4294901760, %v9812_v53  ;;  %v9834_v58 = vpop.permute.xlu2 %2557  ;;  %v9888_v60 = vsub.f32 %v12919_v37, %v9862_v47  ;;  %v9903_v37 = vand.u32 4294901760, %v12917_v51 }
 0x477   : >> { %v3169_v1 = vsub.f32 %v9790_v26, %v9803_v20  ;;  %13025 = vst [vmem:[#allocation156_spill] sm:$0xff] %v9834_v58  ;;  %v9836_v56 = vpop.permute.xlu1 %2579  ;;  %3114 = vmatpush.msrb.mxu2 %v9806_v2  ;;  %3022 = vmatpush.msrb.mxu0 %v9579_v33 }
 0x478   : >> { %3067 = vmatpush.msrb.mxu1 %v9418_v11  ;;  %13023 = vst [vmem:[#allocation154_spill] sm:$0xff] %v9816_v59  ;;  %v9825_v11 = vsub.f32 %v12922_v61, %v9806_v2  ;;  %3165 = vmatpush.msrb.mxu3 %v9816_v59  ;;  %v3175_v58 = vsub.f32 %v9812_v53, %v9832_v5  ;;  %v9900_v36 = vand.u32 4294901760, %v9888_v60 }
 0x479   : >> { %v9840_v26 = vand.u32 4294901760, %v3169_v1  ;;  %v9854_v59 = vsub.f32 %v12921_v27, %v9821_v42  ;;  %13031 = vst [vmem:[#allocation162_spill] sm:$0xff] %v9888_v60  ;;  %3116 = vmatpush.msrb.mxu2 %v9821_v42  ;;  %3026 = vmatpush.msrb.mxu0 %v9584_v40  ;;  %v13066_v40 = vld [vmem:[#allocation79_spill] sm:$0xff] }
 0x47a   : >> { %13024 = vst [vmem:[#allocation155_spill] sm:$0xff] %v9825_v11  ;;  %3069 = vmatpush.msrb.mxu1 %v9433_v16  ;;  %v9843_v61 = vand.u32 4294901760, %v9825_v11  ;;  %v9846_v16 = vand.u32 4294901760, %v12920_v55  ;;  %v9871_v27 = vand.u32 4294901760, %v3175_v58  ;;  %v3199_v3 = vsub.f32 %v9888_v60, %v9900_v36  ;;  %v13037_v60 = vld [vmem:[#allocation77_spill] sm:$0xff] }
 0x47b   : >> { %13026 = vst [vmem:[#allocation157_spill] sm:$0xff] %v9840_v26  ;;  %v9874_v31 = vand.u32 4294901760, %v9854_v59  ;;  %3171 = vmatpush.msrb.mxu3 %v9840_v26  ;;  %3512 = vrot.lane.b32.xlu1 %v13037_v60, %s7327_s17 }
 0x47c   : >> { %3071 = vmatpush.msrb.mxu1 %v9451_v7  ;;  %13027 = vst [vmem:[#allocation158_spill] sm:$0xff] %v9854_v59  ;;  %v3181_v1 = vsub.f32 %v9825_v11, %v9843_v61  ;;  %v9866_v12 = vsub.f32 %v12920_v55, %v9846_v16  ;;  %v9884_v55 = vand.u32 4294901760, %v12918_v46  ;;  %3118 = vmatpush.msrb.mxu2 %v9846_v16 }
 0x47d   : >> { %13029 = vst [vmem:[#allocation160_spill] sm:$0xff] %v9871_v27  ;;  %v3187_v58 = vsub.f32 %v9854_v59, %v9874_v31  ;;  %3177 = vmatpush.msrb.mxu3 %v9871_v27  ;;  %3030 = vmatpush.msrb.mxu0 %v9606_v17 }
 0x47e   : >> { %13028 = vst [vmem:[#allocation159_spill] sm:$0xff] %v9866_v12  ;;  %3073 = vmatpush.msrb.mxu1 %v9477_v10  ;;  %v9878_v7 = vand.u32 4294901760, %v3181_v1  ;;  %v9881_v11 = vand.u32 4294901760, %v9866_v12  ;;  %v9907_v26 = vsub.f32 %v12918_v46, %v9884_v55  ;;  %v9920_v10 = vpop.permute.xlu0 %3620  ;;  %v9933_v50 = vpop.permute.xlu2 %3650  ;;  %3120 = vmatpush.msrb.mxu2 %v9862_v47 }
 0x47f   : >> { %v9911_v27 = vand.u32 4294901760, %v3187_v58  ;;  %v9927_v58 = vand.u32 4294901760, %v12916_v0  ;;  %3034 = vmatpush.msrb.mxu0 %v9626_v8  ;;  %v13069_v8 = vld [vmem:[#allocation125_spill] sm:$0xff] }
 0x480   : >> { %13030 = vst [vmem:[#allocation161_spill] sm:$0xff] %v9878_v7  ;;  %3075 = vmatpush.msrb.mxu1 %v9487_v22  ;;  %v3193_v1 = vsub.f32 %v9866_v12, %v9881_v11  ;;  %3183 = vmatpush.msrb.mxu3 %v9878_v7  ;;  %v9918_v22 = vand.u32 4294901760, %v9907_v26  ;;  %v9931_v7 = vsub.f32 %v12917_v51, %v9903_v37  ;;  %v13039_v12 = vld [vmem:[#allocation78_spill] sm:$0xff]  ;;  %v9948_v51 = vand.u32 4294901760, %v3199_v3 }
 0x481   : >> { %13032 = vst [vmem:[#allocation163_spill] sm:$0xff] %v9907_v26  ;;  %3518 = vrot.lane.b32.xlu0 %v13039_v12, %s7323_s19  ;;  %v9955_v60 = vsub.f32 %v12916_v0, %v9927_v58  ;;  %3122 = vmatpush.msrb.mxu2 %v9884_v55 }
 0x482   : >> { %3077 = vmatpush.msrb.mxu1 %v9508_v35  ;;  %13033 = vst [vmem:[#allocation164_spill] sm:$0xff] %v9911_v27  ;;  %v9924_v46 = vand.u32 4294901760, %v3193_v1  ;;  %v9935_v35 = vpop.permute.xlu1 %3614  ;;  %v3205_v1 = vsub.f32 %v9907_v26, %v9918_v22  ;;  %3189 = vmatpush.msrb.mxu3 %v9911_v27  ;;  %v9951_v59 = vand.u32 4294901760, %v9931_v7  ;;  %v13043_v26 = vld [vmem:[#allocation60_spill] sm:$0xff] }
 0x483   : >> { %13034 = vst [vmem:[#allocation165_spill] sm:$0xff] %v9918_v22  ;;  %v9960_v22 = vand.u32 4294901760, %v13043_v26  ;;  %v9971_v0 = vand.u32 4294901760, %v9955_v60  ;;  %3124 = vmatpush.msrb.mxu2 %v9903_v37  ;;  %3566 = vrot.lane.b32.xlu1 %v13055_v23, %s7336_s14 }
 0x484   : >> { %3079 = vmatpush.msrb.mxu1 %v9539_v6  ;;  %13035 = vst [vmem:[#allocation166_spill] sm:$0xff] %v9924_v46  ;;  %v9943_v6 = vand.u32 4294901760, %v13038_v63  ;;  %3195 = vmatpush.msrb.mxu3 %v9924_v46  ;;  %v3211_v3 = vsub.f32 %v9931_v7, %v9951_v59  ;;  %v9975_v24 = vand.u32 4294901760, %v3205_v1  ;;  %v13050_v1 = vld [vmem:[#allocation75_spill] sm:$0xff] }
 0x485   : >> { %13036 = vst [vmem:[#allocation167_spill] sm:$0xff] %v9931_v7  ;;  %v9985_v46 = vsub.f32 %v13043_v26, %v9960_v22  ;;  %v3217_v32 = vsub.f32 %v9955_v60, %v9971_v0  ;;  %3578 = vrot.lane.b32.xlu2 %v13050_v1, %s7337_s13  ;;  %v13052_v7 = vld [vmem:[#allocation58_spill] sm:$0xff]  ;;  %3126 = vmatpush.msrb.mxu2 %v9927_v58 }
 0x486   : >> { %13040 = vst [vmem:[#allocation77_spill] sm:$0xff] %v9948_v51  ;;  %3081 = vmatpush.msrb.mxu1 %v9550_v29  ;;  %v9964_v12 = vsub.f32 %v13038_v63, %v9943_v6  ;;  %v13048_v63 = vld [vmem:[#allocation59_spill] sm:$0xff]  ;;  %3201 = vmatpush.msrb.mxu3 %v9948_v51  ;;  %v10002_v26 = vand.u32 4294901760, %v3211_v3  ;;  %v10020_v3 = vpop.permute.xlu0 %2549 }
 0x487   : >> { %13041 = vst [vmem:[#allocation78_spill] sm:$0xff] %v9951_v59  ;;  %v9981_v29 = vand.u32 4294901760, %v13048_v63  ;;  %v9998_v59 = vand.u32 4294901760, %v13052_v7  ;;  %3128 = vmatpush.msrb.mxu2 %v9943_v6 }
 0x488   : >> { %13042 = vst [vmem:[#allocation168_spill] sm:$0xff] %v9955_v60  ;;  %3083 = vmatpush.msrb.mxu1 %v9573_v52  ;;  %v9978_v27 = vand.u32 4294901760, %v9964_v12  ;;  %v9995_v52 = vand.u32 4294901760, %v9985_v46  ;;  %3207 = vmatpush.msrb.mxu3 %v9975_v24  ;;  %v13056_v60 = vld [vmem:[#allocation31_spill] sm:$0xff] }
 0x489   : >> { %13044 = vst [vmem:[#allocation169_spill] sm:$0xff] %v9964_v12  ;;  %v10008_v1 = vsub.f32 %v13048_v63, %v9981_v29  ;;  %v10025_v63 = vand.u32 4294901760, %v3217_v32  ;;  %3130 = vmatpush.msrb.mxu2 %v9960_v22 }
 0x48a   : >> { %13045 = vst [vmem:[#allocation170_spill] sm:$0xff] %v9971_v0  ;;  %3085 = vmatpush.msrb.mxu1 %v9593_v9  ;;  %v3223_v51 = vsub.f32 %v9964_v12, %v9978_v27  ;;  %v10014_v0 = vand.u32 4294901760, %v13056_v60  ;;  %v10018_v9 = vsub.f32 %v13052_v7, %v9998_v59  ;;  %v13058_v12 = vld [vmem:[#allocation74_spill] sm:$0xff]  ;;  %v3229_v7 = vsub.f32 %v9985_v46, %v9995_v52 }
 0x48b   : >> { %13046 = vst [vmem:[#allocation171_spill] sm:$0xff] %v9975_v24  ;;  %3572 = vrot.lane.b32.xlu0 %v13058_v12, %s7335_s12  ;;  %v10028_v23 = vand.u32 4294901760, %v10008_v1  ;;  %v10030_v24 = vpop.permute.xlu2 %2581  ;;  %3213 = vmatpush.msrb.mxu3 %v10002_v26 }
 0x48c   : >> { %13047 = vst [vmem:[#allocation172_spill] sm:$0xff] %v9978_v27  ;;  %v10032_v27 = vpop.permute.xlu1 %2541  ;;  %3087 = vmatpush.msrb.mxu1 %v9619_v44  ;;  %v10039_v12 = vand.u32 4294901760, %v10018_v9  ;;  %v10043_v32 = vsub.f32 %v13056_v60, %v10014_v0  ;;  %v10047_v33 = vand.u32 4294901760, %v3223_v51  ;;  %v10060_v51 = vand.u32 4294901760, %v3229_v7  ;;  %3530 = vrot.lane.b32.xlu1 %v13066_v40, %s7330_s28  ;;  %v13067_v7 = vld [vmem:[#allocation96_spill] sm:$0xff]  ;;  %v13070_v40 = vld [vmem:[#allocation135_spill] sm:$0xff] }
 0x48d   : >> { %13049 = vst [vmem:[#allocation173_spill] sm:$0xff] %v9985_v46  ;;  %v3235_v44 = vsub.f32 %v10008_v1, %v10028_v23  ;;  %3219 = vmatpush.msrb.mxu3 %v10025_v63  ;;  %3132 = vmatpush.msrb.mxu2 %v9981_v29 }
 0x48e   : >> { %13051 = vst [vmem:[#allocation75_spill] sm:$0xff] %v9995_v52  ;;  %3089 = vmatpush.msrb.mxu1 %v9638_v28  ;;  %v10054_v46 = vand.u32 4294901760, %v10043_v32  ;;  %v3241_v60 = vsub.f32 %v10018_v9, %v10039_v12  ;;  %3038 = vmatpush.msrb.mxu0 %v13070_v40  ;;  %v13074_v40 = vld [vmem:[#allocation141_spill] sm:$0xff] }
 0x48f   : >> { %13053 = vst [vmem:[#allocation174_spill] sm:$0xff] %v10002_v26  ;;  %3225 = vmatpush.msrb.mxu3 %v10047_v33  ;;  %v10069_v17 = vand.u32 4294901760, %v3235_v44  ;;  %v2610_v26 = vsel %vm2609_vm0, %v13067_v7, %v9513_v34  ;;  %3134 = vmatpush.msrb.mxu2 %v9998_v59  ;;  %v13073_v7 = vld [vmem:[#allocation83_spill] sm:$0xff] }
 0x490   : >> { %13054 = vst [vmem:[#allocation175_spill] sm:$0xff] %v10008_v1  ;;  %3091 = vmatpush.msrb.mxu1 %v9648_v19  ;;  %v13068_v19 = vld [vmem:[#allocation80_spill] sm:$0xff]  ;;  %v10083_v44 = vand.u32 4294901760, %v3241_v60  ;;  %3042 = vmatpush.msrb.mxu0 %v9680_v45 }
 0x491   : >> { %13057 = vst [vmem:[#allocation76_spill] sm:$0xff] %v10018_v9  ;;  %3231 = vmatpush.msrb.mxu3 %v10060_v51  ;;  %3136 = vmatpush.msrb.mxu2 %v10014_v0 }
 0x492   : >> { %13059 = vst [vmem:[#allocation74_spill] sm:$0xff] %v10025_v63  ;;  %3093 = vmatpush.msrb.mxu1 %v9670_v41  ;;  %v3247_v63 = vsub.f32 %v10043_v32, %v10054_v46  ;;  %v10085_v41 = vpop.permute.xlu0 %3642  ;;  %3542 = vrot.lane.b32.xlu2 %v13073_v7, %s7331_s15 }
 0x493   : >> { %13060 = vst [vmem:[#allocation176_spill] sm:$0xff] %v10028_v23  ;;  %3536 = vrot.lane.b32.xlu0 %v13068_v19, %s7329_s23  ;;  %v10089_v34 = vpop.permute.xlu2 %3616  ;;  %3237 = vmatpush.msrb.mxu3 %v10069_v17 }
 0x494   : >> { %13061 = vst [vmem:[#allocation177_spill] sm:$0xff] %v10039_v12  ;;  %3095 = vmatpush.msrb.mxu1 %v9693_v13  ;;  %v3635_v19 = vpop.permute.xlu1 %3634  ;;  %3046 = vmatpush.msrb.mxu0 %v9685_v49  ;;  %v7220_v49 = vld [vmem:[%s9159_s24 + $0x3a] sm:$0x3] }
 0x495   : >> { %13062 = vst [vmem:[#allocation178_spill] sm:$0xff] %v10043_v32  ;;  %3243 = vmatpush.msrb.mxu3 %v10083_v44 }
 0x496   : >> { %13063 = vst [vmem:[#allocation179_spill] sm:$0xff] %v10047_v33  ;;  %v2613_v33 = vsel %vm2612_vm2, %v2610_v26, %v13069_v8  ;;  %v10093_v26 = vand.u32 4294901760, %v3247_v63  ;;  %v13072_v8 = vld [vmem:[#allocation84_spill] sm:$0xff]  ;;  %3050 = vmatpush.msrb.mxu0 %v9710_v25 }
 0x497   : >> { %13064 = vst [vmem:[#allocation180_spill] sm:$0xff] %v10054_v46  ;;  %v2616_v60 = vsel %vm2615_vm4, %v2613_v33, %v13072_v8  ;;  %v13075_v33 = vld [vmem:[#allocation81_spill] sm:$0xff]  ;;  %v13076_v8 = vld [vmem:[#allocation106_spill] sm:$0xff] }
 0x498   : >> { %13065 = vst [vmem:[#allocation181_spill] sm:$0xff] %v10060_v51  ;;  %v2619_v51 = vsel %vm2618_vm6, %v2616_v60, %v13074_v40  ;;  %3249 = vmatpush.msrb.mxu3 %v10093_v26  ;;  %3054 = vmatpush.msrb.mxu0 %v9730_v18 }
 0x499   : >> { %13071 = vst [vmem:[#allocation79_spill] sm:$0xff] %v10093_v26  ;;  %v2622_v63 = vsel %vm2621_vm8, %v2619_v51, %v9757_v38  ;;  %v7219_v51 = vld [vmem:[%s9159_s24 + $0x41] sm:$0xff] }
 0x49a   : >> { %v2625_v40 = vsel %vm2624_vm10, %v2622_v63, %v13076_v8  ;;  %v2716_v7 = vpop.permute.xlu0 %2715  ;;  %v3672_v25 = vsel %vm767_vm1, %v7219_v51, %v9935_v35  ;;  %3562 = vrot.lane.b32.xlu2 %v7220_v49, %s7334_s30 }
 0x49b   : >> { %3548 = vrot.lane.b32.xlu0 %v13075_v33, %s7333_s26  ;;  %v2628_v60 = vsel %vm2627_vm11, %v2625_v40, %v9836_v56  ;;  %v10123_v33 = vpop.permute.xlu2 %3636  ;;  %v2602_v56 = vsel %vm817_vm12, %v9704_v4, %v9746_v54  ;;  %v3674_v35 = vsel %vm777_vm3, %v3672_v25, %v9920_v10  ;;  %v13077_v4 = vld [vmem:[#allocation124_spill] sm:$0xff] }
 0x49c   : >> { %v2728_v38 = vsel %vm2721_vm14, %v2628_v60, %v2716_v7  ;;  %v2566_v63 = vpop.permute.xlu1 %2565  ;;  %v2605_v40 = vsel %vm827_vm13, %v2602_v56, %v9827_v14  ;;  %v7221_v60 = vld [vmem:[%s9159_s24 + $0x3b] sm:$0x3]  ;;  %v3676_v14 = vsel %vm787_vm5, %v3674_v35, %v9744_v48  ;;  %v7222_v56 = vld [vmem:[%s9159_s24 + $0x48] sm:$0x3] }
 0x49d   : >> { %v10119_v26 = vand.u32 4294901760, %v2728_v38  ;;  %v2608_v54 = vsel %vm1017_vm15, %v2605_v40, %v13077_v4  ;;  %v3678_v25 = vsel %vm797_vm7, %v3676_v14, %v3635_v19 }
 0x49e   : >> { %v3680_v19 = vsel %vm807_vm9, %v3678_v25, %v10085_v41 }
 0x49f   : >> { %v2766_v8 = vsub.f32 %v2728_v38, %v10119_v26  ;;  %2879 = vmatmul.f32.vlgmr.msra.gmra.mxu1 %v10119_v26  ;;  %v3682_v41 = vsel %vm817_vm12, %v3680_v19, %v9933_v50  ;;  %v13082_v50 = vld [vmem:[#allocation156_spill] sm:$0xff] }
 0x4a0   : >> { %3319 = vmatpush.msra.mxu1 %v9736_v62 }
 0x4a1   : >> { %2937 = vmatmul.f32.vlgmr.msra.gmra.mxu2 %v2766_v8  ;;  %v2767_v49 = vand.u32 4294901760, %v2766_v8 }
 0x4a2   : >> { %3321 = vmatpush.msra.mxu1 %v9751_v39  ;;  %3366 = vmatpush.msra.mxu2 %v9766_v57  ;;  %v2574_v38 = vpop.permute.xlu0 %2573 }
 0x4a3   : >> { %3568 = vrot.lane.b32.xlu0 %v7221_v60, %s7336_s14  ;;  %2981 = vmatmul.f32.vlgmr.msra.gmra.mxu3 %v2767_v49  ;;  %v2768_v10 = vsub.f32 %v2766_v8, %v2767_v49  ;;  %v13078_v60 = vld [vmem:[#allocation140_spill] sm:$0xff]  ;;  %v10158_v8 = vpop.permute.xlu2 %2717  ;;  %v13080_v49 = vld [vmem:[#allocation151_spill] sm:$0xff] }
 0x4a4   : >> { %3323 = vmatpush.msra.mxu1 %v9769_v21  ;;  %3370 = vmatpush.msra.mxu2 %v9783_v30  ;;  %v2611_v40 = vsel %vm2609_vm0, %v2608_v54, %v13078_v60  ;;  %13079 = vst [vmem:[#allocation96_spill] sm:$0xff] %v10158_v8  ;;  %v3659_v35 = vpop.permute.xlu1 %3658  ;;  %v2722_v4 = vsel %vm2721_vm14, %v2716_v7, %v10158_v8 }
 0x4a5   : >> { %v2769_v51 = vand.u32 4294901760, %v2768_v10  ;;  %3437 = vmatpush.msra.mxu3 %v9736_v62  ;;  %3580 = vrot.lane.b32.xlu2 %v7222_v56, %s7337_s13  ;;  %v2614_v48 = vsel %vm2612_vm2, %v2611_v40, %v10032_v27  ;;  %v3684_v54 = vsel %vm827_vm13, %v3682_v41, %v3659_v35  ;;  %v10184_v56 = vand.u32 4294901760, %v2722_v4  ;;  %v13083_v40 = vld [vmem:[#allocation155_spill] sm:$0xff] }
 0x4a6   : >> { %3325 = vmatpush.msra.mxu1 %v9786_v43  ;;  %3374 = vmatpush.msra.mxu2 %v9803_v20  ;;  %v2617_v27 = vsel %vm2615_vm4, %v2614_v48, %v10020_v3  ;;  %v13081_v3 = vld [vmem:[#allocation152_spill] sm:$0xff] }
 0x4a7   : >> { %2770 = vmatmul.f32.vlgmr.msra.gmra.mxu0 %v2769_v51  ;;  %3439 = vmatpush.msra.mxu3 %v9751_v39  ;;  %v2620_v25 = vsel %vm2618_vm6, %v2617_v27, %v13082_v50 }
 0x4a8   : >> { %3261 = vmatpush.msra.mxu0 %v9755_v15  ;;  %3327 = vmatpush.msra.mxu1 %v9806_v2  ;;  %v2623_v7 = vsel %vm2621_vm8, %v2620_v25, %v2566_v63  ;;  %v10196_v63 = vsub.f32 %v2722_v4, %v10184_v56  ;;  %v13088_v25 = vld [vmem:[#allocation82_spill] sm:$0xff] }
 0x4a9   : >> { %3378 = vmatpush.msra.mxu2 %v9832_v5  ;;  %3441 = vmatpush.msra.mxu3 %v9769_v21  ;;  %v2626_v60 = vsel %vm2624_vm10, %v2623_v7, %v2574_v38  ;;  %v13084_v38 = vld [vmem:[#allocation158_spill] sm:$0xff] }
 0x4aa   : >> { %3264 = vmatpush.msra.mxu0 %v13080_v49  ;;  %3329 = vmatpush.msra.mxu1 %v9821_v42  ;;  %v3667_v14 = vpop.permute.xlu0 %3666  ;;  %v2629_v19 = vsel %vm2627_vm11, %v2626_v60, %v10030_v24  ;;  %v13086_v24 = vld [vmem:[#allocation159_spill] sm:$0xff]  ;;  %v13089_v7 = vld [vmem:[#allocation162_spill] sm:$0xff] }
 0x4ab   : >> { %3382 = vmatpush.msra.mxu2 %v9843_v61  ;;  %3443 = vmatpush.msra.mxu3 %v9786_v43  ;;  %v3686_v10 = vsel %vm1017_vm15, %v3684_v54, %v3667_v14  ;;  %v13085_v54 = vld [vmem:[#allocation165_spill] sm:$0xff]  ;;  %v13087_v14 = vld [vmem:[#allocation78_spill] sm:$0xff] }
 0x4ac   : >> { %3267 = vmatpush.msra.mxu0 %v13081_v3  ;;  %3331 = vmatpush.msra.mxu1 %v9846_v16  ;;  %v3688_v51 = vsel %vm2609_vm0, %v3686_v10, 0.0  ;;  %v2720_v48 = vpop.permute.xlu1 %2719 }
 0x4ad   : >> { %3386 = vmatpush.msra.mxu2 %v9874_v31  ;;  %3445 = vmatpush.msra.mxu3 %v9806_v2  ;;  %v2723_v35 = vsel %vm2721_vm14, %v2720_v48, %v10158_v8  ;;  %v2729_v27 = vsel %vm2721_vm14, %v2629_v19, %v2720_v48  ;;  %v7223_v48 = vld [vmem:[%s9159_s24 + $0x49] sm:$0x3] }
 0x4ae   : >> { %3692 = vrot.lane.b32.xlu1 %v3688_v51, %s7338_s29  ;;  %3270 = vmatpush.msra.mxu0 %v9812_v53  ;;  %v10207_v4 = vand.u32 4294901760, %v2729_v27  ;;  %v10214_v50 = vand.u32 4294901760, %v2723_v35  ;;  %v3673_v19 = vsel %vm767_vm1, %v7223_v48, %v10089_v34  ;;  %v13093_v34 = vld [vmem:[#allocation172_spill] sm:$0xff] }
 0x4af   : >> { %3333 = vmatpush.msra.mxu1 %v9862_v47  ;;  %3390 = vmatpush.msra.mxu2 %v9881_v11 }
 0x4b0   : >> { %3447 = vmatpush.msra.mxu3 %v9821_v42  ;;  %3273 = vmatpush.msra.mxu0 %v13083_v40  ;;  %v2774_v10 = vsub.f32 %v2729_v27, %v10207_v4  ;;  %v13090_v27 = vld [vmem:[#allocation170_spill] sm:$0xff] }
 0x4b1   : >> { %3335 = vmatpush.msra.mxu1 %v9884_v55  ;;  %3394 = vmatpush.msra.mxu2 %v9900_v36 }
 0x4b2   : >> { %3449 = vmatpush.msra.mxu3 %v9846_v16  ;;  %3276 = vmatpush.msra.mxu0 %v13084_v38  ;;  %v3623_v41 = vpop.permute.xlu0 %3622  ;;  %v2775_v60 = vand.u32 4294901760, %v2774_v10 }
 0x4b3   : >> { %3337 = vmatpush.msra.mxu1 %v9903_v37  ;;  %3398 = vmatpush.msra.mxu2 %v13085_v54  ;;  %v13092_v54 = vld [vmem:[#allocation163_spill] sm:$0xff] }
 0x4b4   : >> { %3451 = vmatpush.msra.mxu3 %v9862_v47  ;;  %3279 = vmatpush.msra.mxu0 %v13086_v24  ;;  %v3629_v51 = vpop.permute.xlu1 %3628 }
 0x4b5   : >> { %3339 = vmatpush.msra.mxu1 %v9927_v58  ;;  %3402 = vmatpush.msra.mxu2 %v13087_v14  ;;  %v2776_v14 = vsub.f32 %v2774_v10, %v2775_v60 }
 0x4b6   : >> { %3556 = vrot.lane.b32.xlu1 %v13088_v25, %s7332_s16  ;;  %2883 = vmatmul.f32.gmra.mxu1 %v10207_v4  ;;  %v10229_v25 = vsub.f32 %v2723_v35, %v10214_v50  ;;  %v3675_v35 = vsel %vm777_vm3, %v3673_v19, %v3623_v41  ;;  %v13095_v41 = vld [vmem:[#allocation168_spill] sm:$0xff] }
 0x4b7   : >> { %3453 = vmatpush.msra.mxu3 %v9884_v55  ;;  %3282 = vmatpush.msra.mxu0 %v13089_v7  ;;  %v13091_v7 = vand.u32 4294901760, %v10196_v63  ;;  %v2777_v48 = vand.u32 4294901760, %v2776_v14  ;;  %v3677_v14 = vsel %vm787_vm5, %v3675_v35, %v3629_v51  ;;  %v13097_v51 = vld [vmem:[#allocation173_spill] sm:$0xff]  ;;  %v13098_v35 = vld [vmem:[#allocation94_spill] sm:$0xff] }
 0x4b8   : >> { %2942 = vmatmul.f32.gmra.mxu2 %v2774_v10  ;;  %3341 = vmatpush.msra.mxu1 %v9943_v6  ;;  %v7224_v10 = vld [vmem:[%s9159_s24 + $0x3c] sm:$0x3] }
 0x4b9   : >> { %3406 = vmatpush.msra.mxu2 %v13090_v27  ;;  %3455 = vmatpush.msra.mxu3 %v9903_v37  ;;  %v3140_v24 = vsub.f32 %v10196_v63, %v13091_v7  ;;  %v13094_v27 = vld [vmem:[#allocation167_spill] sm:$0xff] }
 0x4ba   : >> { %2987 = vmatmul.f32.gmra.mxu3 %v2775_v60  ;;  %3285 = vmatpush.msra.mxu0 %v13092_v54  ;;  %v3645_v8 = vpop.permute.xlu0 %3644  ;;  %v3147_v60 = vand.u32 4294901760, %v10229_v25 }
 0x4bb   : >> { %3343 = vmatpush.msra.mxu1 %v9960_v22  ;;  %3410 = vmatpush.msra.mxu2 %v13093_v34  ;;  %v3141_v7 = vand.u32 4294901760, %v3140_v24 }
 0x4bc   : >> { %3457 = vmatpush.msra.mxu3 %v9927_v58  ;;  %3288 = vmatpush.msra.mxu0 %v13094_v27  ;;  %v3653_v19 = vpop.permute.xlu1 %3652  ;;  %v3148_v24 = vsub.f32 %v10229_v25, %v3147_v60  ;;  %v13149_v27 = vld [vmem:[#allocation91_spill] sm:$0xff] }
 0x4bd   : >> { %3345 = vmatpush.msra.mxu1 %v9981_v29  ;;  %3414 = vmatpush.msra.mxu2 %v9995_v52  ;;  %v13143_v52 = vld [vmem:[#allocation146_spill] sm:$0xff] }
 0x4be   : >> { %3574 = vrot.lane.b32.xlu1 %v7224_v10, %s7335_s12  ;;  %2778 = vmatmul.f32.gmra.mxu0 %v2777_v48  ;;  %v13096_v48 = vld [vmem:[#allocation169_spill] sm:$0xff]  ;;  %v3679_v10 = vsel %vm797_vm7, %v3677_v14, %v10123_v33 }
 0x4bf   : >> { %3097 = vmatmul.f32.vlgmr.msrb.gmra.mxu1 %v10119_v26  ;;  %3459 = vmatpush.msra.mxu3 %v9943_v6 }
 0x4c0   : >> { %3142 = vmatmul.f32.vlgmr.msrb.gmra.mxu2 %v3141_v7  ;;  %3291 = vmatpush.msra.mxu0 %v13095_v41  ;;  %v3681_v7 = vsel %vm807_vm9, %v3679_v10, %v3645_v8  ;;  %v13101_v10 = vld [vmem:[#allocation103_spill] sm:$0xff]  ;;  %v13142_v41 = vld [vmem:[#allocation134_spill] sm:$0xff] }
 0x4c1   : >> { %3347 = vmatpush.msra.mxu1 %v9998_v59  ;;  %3418 = vmatpush.msra.mxu2 %v10028_v23  ;;  %v3683_v33 = vsel %vm817_vm12, %v3681_v7, %v3653_v19  ;;  %v13102_v7 = vld [vmem:[#allocation85_spill] sm:$0xff] }
 0x4c2   : >> { %3251 = vmatmul.f32.vlgmr.msrb.gmra.mxu3 %v10184_v56  ;;  %3294 = vmatpush.msra.mxu0 %v13096_v48  ;;  %v3149_v48 = vand.u32 4294901760, %v3148_v24  ;;  %v3661_v14 = vpop.permute.xlu0 %3660  ;;  %v13100_v24 = vld [vmem:[#allocation86_spill] sm:$0xff]  ;;  %v13138_v23 = vld [vmem:[#allocation149_spill] sm:$0xff] }
 0x4c3   : >> { %3461 = vmatpush.msra.mxu3 %v9960_v22  ;;  %3349 = vmatpush.msra.mxu1 %v10014_v0  ;;  %v3685_v8 = vsel %vm827_vm13, %v3683_v33, %v3661_v14  ;;  %v13103_v33 = vld [vmem:[#allocation89_spill] sm:$0xff]  ;;  %v13104_v14 = vld [vmem:[#allocation110_spill] sm:$0xff] }
 0x4c4   : >> { %3422 = vmatpush.msra.mxu2 %v10039_v12  ;;  %3297 = vmatpush.msra.mxu0 %v13097_v51  ;;  %v13136_v51 = vld [vmem:[#allocation136_spill] sm:$0xff]  ;;  %v13137_v12 = vld [vmem:[#allocation129_spill] sm:$0xff] }
 0x4c5   : >> { %3463 = vmatpush.msra.mxu3 %v9981_v29  ;;  %3758 = vmatpush.msrb.mxu1 %v13098_v35  ;;  %v13099_v35 = vld [vmem:[#allocation99_spill] sm:$0xff] }
 0x4c6   : >> { %3056 = vmatmul.f32.vlgmr.msrb.gmra.mxu0 %v10119_v26  ;;  %3426 = vmatpush.msra.mxu2 %v10054_v46  ;;  %v3669_v26 = vpop.permute.xlu1 %3668  ;;  %v13133_v46 = vld [vmem:[#allocation132_spill] sm:$0xff] }
 0x4c7   : >> { %3101 = vmatmul.f32.gmra.mxu1 %v10207_v4  ;;  %3465 = vmatpush.msra.mxu3 %v9998_v59  ;;  %v3687_v19 = vsel %vm1017_vm15, %v3685_v8, %v3669_v26  ;;  %v13106_v8 = vld [vmem:[#allocation92_spill] sm:$0xff]  ;;  %v13107_v26 = vld [vmem:[#allocation87_spill] sm:$0xff] }
 0x4c8   : >> { %3150 = vmatmul.f32.gmra.mxu2 %v3149_v48  ;;  %3300 = vmatpush.msra.mxu0 %v10008_v1  ;;  %v3689_v48 = vsel %vm2609_vm0, %v3687_v19, 0.0  ;;  %v13108_v19 = vld [vmem:[#allocation114_spill] sm:$0xff]  ;;  %v13129_v1 = vld [vmem:[#allocation144_spill] sm:$0xff] }
 0x4c9   : >> { %3467 = vmatpush.msra.mxu3 %v10014_v0  ;;  %3764 = vmatpush.msrb.mxu1 %v13099_v35  ;;  %v13105_v35 = vand.u32 4294901760, %v10196_v63 }
 0x4ca   : >> { %3255 = vmatmul.f32.gmra.mxu3 %v10214_v50  ;;  %3303 = vmatpush.msra.mxu0 %v10018_v9  ;;  %v13128_v9 = vld [vmem:[#allocation113_spill] sm:$0xff] }
 0x4cb   : >> { %3860 = vmatpush.msrb.mxu2 %v13100_v24  ;;  %3770 = vmatpush.msrb.mxu1 %v13101_v10  ;;  %v13109_v24 = vld [vmem:[#allocation97_spill] sm:$0xff]  ;;  %v13111_v10 = vld [vmem:[#allocation116_spill] sm:$0xff] }
 0x4cc   : >> { %3306 = vmatpush.msra.mxu0 %v10043_v32  ;;  %3918 = vmatpush.msrb.mxu3 %v13102_v7  ;;  %v13127_v32 = vld [vmem:[#allocation122_spill] sm:$0xff] }
 0x4cd   : >> { %3694 = vrot.lane.b32.xlu0 %v3689_v48, %s7338_s29  ;;  %3863 = vmatpush.msrb.mxu2 %v13103_v33  ;;  %v13112_v48 = vld [vmem:[#allocation102_spill] sm:$0xff]  ;;  %v13113_v33 = vld [vmem:[#allocation93_spill] sm:$0xff] }
 0x4ce   : >> { %3060 = vmatmul.f32.gmra.mxu0 %v10207_v4  ;;  %3776 = vmatpush.msrb.mxu1 %v13104_v14  ;;  %v13110_v4 = vld [vmem:[#allocation90_spill] sm:$0xff]  ;;  %v13114_v14 = vld [vmem:[#allocation120_spill] sm:$0xff] }
 0x4cf   : >> { %3353 = vmatmul.f32.vlgmr.msra.gmra.mxu1 %v13105_v35  ;;  %3866 = vmatpush.msrb.mxu2 %v13106_v8  ;;  %v10301_v35 = vpop.permute.xlu2 %3492  ;;  %v13116_v8 = vld [vmem:[#allocation98_spill] sm:$0xff] }
 0x4d0   : >> { %3428 = vmatmul.f32.vlgmr.msra.gmra.mxu2 %v10184_v56  ;;  %3920 = vmatpush.msrb.mxu3 %v13107_v26 }
 0x4d1   : >> { %3705 = vmatpush.msrb.mxu0 %v13102_v7  ;;  %3782 = vmatpush.msrb.mxu1 %v13108_v19  ;;  %v13117_v19 = vld [vmem:[#allocation128_spill] sm:$0xff] }
 0x4d2   : >> { %3469 = vmatmul.f32.vlgmr.msra.gmra.mxu3 %v10184_v56  ;;  %3869 = vmatpush.msrb.mxu2 %v13109_v24  ;;  %v13115_v56 = vld [vmem:[#allocation104_spill] sm:$0xff]  ;;  %v13118_v24 = vld [vmem:[#allocation109_spill] sm:$0xff] }
 0x4d3   : >> { %3922 = vmatpush.msrb.mxu3 %v13110_v4  ;;  %3707 = vmatpush.msrb.mxu0 %v13107_v26 }
 0x4d4   : >> { %3788 = vmatpush.msrb.mxu1 %v13111_v10  ;;  %3872 = vmatpush.msrb.mxu2 %v13112_v48  ;;  %v13120_v10 = vld [vmem:[#allocation130_spill] sm:$0xff]  ;;  %v13122_v48 = vld [vmem:[#allocation105_spill] sm:$0xff] }
 0x4d5   : >> { %3924 = vmatpush.msrb.mxu3 %v13113_v33  ;;  %3709 = vmatpush.msrb.mxu0 %v13110_v4 }
 0x4d6   : >> { %3309 = vmatmul.f32.vlgmr.msra.gmra.mxu0 %v10196_v63  ;;  %3794 = vmatpush.msrb.mxu1 %v13114_v14  ;;  %v13119_v63 = vld [vmem:[#allocation100_spill] sm:$0xff]  ;;  %v10316_v14 = vpop.permute.xlu0 %3498 }
 0x4d7   : >> { %3359 = vmatmul.f32.gmra.mxu1 %v3147_v60  ;;  %3875 = vmatpush.msrb.mxu2 %v13115_v56  ;;  %v13121_v60 = vld [vmem:[#allocation115_spill] sm:$0xff]  ;;  %v10318_v56 = vpop.permute.xlu1 %3504 }
 0x4d8   : >> { %3432 = vmatmul.f32.gmra.mxu2 %v10214_v50  ;;  %3926 = vmatpush.msrb.mxu3 %v13116_v8 }
 0x4d9   : >> { %3711 = vmatpush.msrb.mxu0 %v13113_v33  ;;  %3800 = vmatpush.msrb.mxu1 %v13117_v19  ;;  %v13124_v19 = vld [vmem:[#allocation117_spill] sm:$0xff] }
 0x4da   : >> { %3473 = vmatmul.f32.gmra.mxu3 %v10214_v50  ;;  %3878 = vmatpush.msrb.mxu2 %v13118_v24  ;;  %v13123_v50 = vld [vmem:[#allocation133_spill] sm:$0xff]  ;;  %v13125_v24 = vld [vmem:[#allocation111_spill] sm:$0xff] }
 0x4db   : >> { %3928 = vmatpush.msrb.mxu3 %v13119_v63  ;;  %3713 = vmatpush.msrb.mxu0 %v13116_v8 }
 0x4dc   : >> { %3806 = vmatpush.msrb.mxu1 %v13120_v10  ;;  %3881 = vmatpush.msrb.mxu2 %v13121_v60  ;;  %v13126_v10 = vld [vmem:[#allocation137_spill] sm:$0xff]  ;;  %v10326_v60 = vpop.permute.xlu2 %3510 }
 0x4dd   : >> { %3930 = vmatpush.msrb.mxu3 %v13122_v48  ;;  %3715 = vmatpush.msrb.mxu0 %v13119_v63 }
 0x4de   : >> { %3314 = vmatmul.f32.gmra.mxu0 %v10229_v25  ;;  %3812 = vmatpush.msrb.mxu1 %v13123_v50  ;;  %v13130_v25 = vld [vmem:[#allocation127_spill] sm:$0xff]  ;;  %v13131_v50 = vld [vmem:[#allocation118_spill] sm:$0xff] }
 0x4df   : >> { %3884 = vmatpush.msrb.mxu2 %v13124_v19  ;;  %3932 = vmatpush.msrb.mxu3 %v13125_v24  ;;  %v13132_v19 = vld [vmem:[#allocation147_spill] sm:$0xff] }
 0x4e0   : >> { %3717 = vmatpush.msrb.mxu0 %v13122_v48  ;;  %3818 = vmatpush.msrb.mxu1 %v13126_v10  ;;  %v13134_v10 = vld [vmem:[#allocation123_spill] sm:$0xff] }
 0x4e1   : >> { %3887 = vmatpush.msrb.mxu2 %v13127_v32  ;;  %3934 = vmatpush.msrb.mxu3 %v13128_v9  ;;  %v13135_v32 = vld [vmem:[#allocation148_spill] sm:$0xff] }
 0x4e2   : >> { %3719 = vmatpush.msrb.mxu0 %v13125_v24  ;;  %3824 = vmatpush.msrb.mxu1 %v13129_v1  ;;  %v10342_v1 = vpop.permute.xlu0 %3516 }
 0x4e3   : >> { %3890 = vmatpush.msrb.mxu2 %v13130_v25  ;;  %3936 = vmatpush.msrb.mxu3 %v13131_v50  ;;  %v10344_v25 = vpop.permute.xlu1 %3522 }
 0x4e4   : >> { %3721 = vmatpush.msrb.mxu0 %v13128_v9  ;;  %3830 = vmatpush.msrb.mxu1 %v13132_v19  ;;  %v13139_v19 = vld [vmem:[#allocation138_spill] sm:$0xff] }
 0x4e5   : >> { %3893 = vmatpush.msrb.mxu2 %v13133_v46  ;;  %3938 = vmatpush.msrb.mxu3 %v13134_v10  ;;  %v13140_v46 = vld [vmem:[#allocation150_spill] sm:$0xff] }
 0x4e6   : >> { %3723 = vmatpush.msrb.mxu0 %v13131_v50  ;;  %3836 = vmatpush.msrb.mxu1 %v13135_v32  ;;  %v10352_v32 = vpop.permute.xlu2 %3528 }
 0x4e7   : >> { %3896 = vmatpush.msrb.mxu2 %v13136_v51  ;;  %3940 = vmatpush.msrb.mxu3 %v13137_v12  ;;  %v13141_v51 = vld [vmem:[#allocation143_spill] sm:$0xff] }
 0x4e8   : >> { %3725 = vmatpush.msrb.mxu0 %v13134_v10  ;;  %3842 = vmatpush.msrb.mxu1 %v13138_v23  ;;  %v13144_v23 = vld [vmem:[#allocation139_spill] sm:$0xff] }
 0x4e9   : >> { %3899 = vmatpush.msrb.mxu2 %v13139_v19  ;;  %3942 = vmatpush.msrb.mxu3 %v9638_v28 }
 0x4ea   : >> { %3727 = vmatpush.msrb.mxu0 %v13137_v12  ;;  %3848 = vmatpush.msrb.mxu1 %v13140_v46  ;;  %v13147_v46 = vld [vmem:[#allocation88_spill] sm:$0xff] }
 0x4eb   : >> { %3902 = vmatpush.msrb.mxu2 %v13141_v51  ;;  %3944 = vmatpush.msrb.mxu3 %v13142_v41  ;;  %v10370_v19 = vpop.permute.xlu1 %3494  ;;  %v13148_v51 = vld [vmem:[#allocation157_spill] sm:$0xff] }
 0x4ec   : >> { %4036 = vmatpush.msra.mxu1 %v13102_v7  ;;  %3729 = vmatpush.msrb.mxu0 %v9638_v28  ;;  %v13145_v7 = vld [vmem:[#allocation153_spill] sm:$0xff] }
 0x4ed   : >> { %3905 = vmatpush.msrb.mxu2 %v13143_v52  ;;  %3946 = vmatpush.msrb.mxu3 %v13144_v23  ;;  %v10368_v52 = vpop.permute.xlu0 %3534 }
 0x4ee   : >> { %4038 = vmatpush.msra.mxu1 %v13107_v26  ;;  %3731 = vmatpush.msrb.mxu0 %v13142_v41  ;;  %v13146_v26 = vld [vmem:[#allocation154_spill] sm:$0xff] }
 0x4ef   : >> { %4077 = vmatpush.msra.mxu2 %v9736_v62  ;;  %3948 = vmatpush.msrb.mxu3 %v9693_v13 }
 0x4f0   : >> { %4040 = vmatpush.msra.mxu1 %v13110_v4  ;;  %3733 = vmatpush.msrb.mxu0 %v13144_v23  ;;  %v10378_v4 = vpop.permute.xlu2 %3540 }
 0x4f1   : >> { %4079 = vmatpush.msra.mxu2 %v9751_v39  ;;  %4130 = vmatpush.msra.mxu3 %v13145_v7  ;;  %v7225_v7 = vld [vmem:[%s9159_s24 + $0x10] sm:$0xff] }
 0x4f2   : >> { %4042 = vmatpush.msra.mxu1 %v13113_v33  ;;  %3735 = vmatpush.msrb.mxu0 %v9693_v13  ;;  %v3584_v33 = vsel %vm767_vm1, %v7225_v7, %v10301_v35  ;;  %v13153_v35 = vld [vmem:[#allocation101_spill] sm:$0xff] }
 0x4f3   : >> { %4081 = vmatpush.msra.mxu2 %v9769_v21  ;;  %4136 = vmatpush.msra.mxu3 %v13146_v26  ;;  %v13150_v26 = vld [vmem:[#allocation160_spill] sm:$0xff] }
 0x4f4   : >> { %3965 = vmatpush.msra.mxu0 %v13147_v46  ;;  %4044 = vmatpush.msra.mxu1 %v13116_v8  ;;  %v13151_v46 = vld [vmem:[#allocation95_spill] sm:$0xff]  ;;  %v3586_v8 = vsel %vm777_vm3, %v3584_v33, %v10316_v14  ;;  %v13156_v14 = vld [vmem:[#allocation166_spill] sm:$0xff]  ;;  %v13157_v33 = vld [vmem:[#allocation108_spill] sm:$0xff] }
 0x4f5   : >> { %4083 = vmatpush.msra.mxu2 %v9786_v43  ;;  %4142 = vmatpush.msra.mxu3 %v13148_v51  ;;  %v13152_v51 = vld [vmem:[#allocation161_spill] sm:$0xff]  ;;  %v10401_v7 = vpop.permute.xlu0 %3500 }
 0x4f6   : >> { %3969 = vmatpush.msra.mxu0 %v13149_v27  ;;  %4046 = vmatpush.msra.mxu1 %v13119_v63  ;;  %v13154_v27 = vld [vmem:[#allocation164_spill] sm:$0xff]  ;;  %v3588_v63 = vsel %vm787_vm5, %v3586_v8, %v10318_v56  ;;  %v13158_v56 = vld [vmem:[#allocation77_spill] sm:$0xff] }
 0x4f7   : >> { %4085 = vmatpush.msra.mxu2 %v9806_v2  ;;  %4148 = vmatpush.msra.mxu3 %v13150_v26  ;;  %v13155_v26 = vld [vmem:[#allocation107_spill] sm:$0xff]  ;;  %v13159_v8 = vld [vmem:[#allocation112_spill] sm:$0xff] }
 0x4f8   : >> { %3973 = vmatpush.msra.mxu0 %v13151_v46  ;;  %4048 = vmatpush.msra.mxu1 %v13122_v48  ;;  %v3547_v48 = vpop.permute.xlu1 %3546  ;;  %v3507_v46 = vpop.permute.xlu2 %3506 }
 0x4f9   : >> { %4087 = vmatpush.msra.mxu2 %v9821_v42  ;;  %4154 = vmatpush.msra.mxu3 %v13152_v51 }
 0x4fa   : >> { %3977 = vmatpush.msra.mxu0 %v13153_v35  ;;  %4050 = vmatpush.msra.mxu1 %v13125_v24  ;;  %v3590_v24 = vsel %vm797_vm7, %v3588_v63, %v10326_v60  ;;  %v13162_v60 = vld [vmem:[#allocation174_spill] sm:$0xff]  ;;  %v13163_v35 = vld [vmem:[#allocation121_spill] sm:$0xff] }
 0x4fb   : >> { %4089 = vmatpush.msra.mxu2 %v9846_v16  ;;  %4160 = vmatpush.msra.mxu3 %v13154_v27  ;;  %v3592_v51 = vsel %vm807_vm9, %v3590_v24, %v10342_v1  ;;  %v13164_v27 = vld [vmem:[#allocation74_spill] sm:$0xff]  ;;  %v13169_v24 = vld [vmem:[#allocation135_spill] sm:$0xff] }
 0x4fc   : >> { %3981 = vmatpush.msra.mxu0 %v13155_v26  ;;  %4052 = vmatpush.msra.mxu1 %v13128_v9  ;;  %v13160_v9 = vld [vmem:[#allocation171_spill] sm:$0xff]  ;;  %v13165_v26 = vld [vmem:[#allocation126_spill] sm:$0xff] }
 0x4fd   : >> { %4091 = vmatpush.msra.mxu2 %v9862_v47  ;;  %4166 = vmatpush.msra.mxu3 %v13156_v14  ;;  %v3555_v1 = vpop.permute.xlu0 %3554  ;;  %v13167_v14 = vld [vmem:[#allocation131_spill] sm:$0xff] }
 0x4fe   : >> { %3985 = vmatpush.msra.mxu0 %v13157_v33  ;;  %4054 = vmatpush.msra.mxu1 %v13131_v50  ;;  %v13161_v50 = vld [vmem:[#allocation119_spill] sm:$0xff]  ;;  %v13168_v33 = vld [vmem:[#allocation181_spill] sm:$0xff] }
 0x4ff   : >> { %4093 = vmatpush.msra.mxu2 %v9884_v55  ;;  %4172 = vmatpush.msra.mxu3 %v13158_v56 }
 0x500   : >> { %3989 = vmatpush.msra.mxu0 %v13159_v8  ;;  %4056 = vmatpush.msra.mxu1 %v13134_v10  ;;  %v3594_v10 = vsel %vm817_vm12, %v3592_v51, %v10344_v25  ;;  %v3513_v63 = vpop.permute.xlu1 %3512  ;;  %v3561_v25 = vpop.permute.xlu2 %3560  ;;  %v13172_v8 = vld [vmem:[#allocation145_spill] sm:$0xff] }
 0x501   : >> { %4095 = vmatpush.msra.mxu2 %v9903_v37  ;;  %4178 = vmatpush.msra.mxu3 %v13160_v9 }
 0x502   : >> { %3993 = vmatpush.msra.mxu0 %v13161_v50  ;;  %4058 = vmatpush.msra.mxu1 %v13137_v12  ;;  %v13166_v12 = vld [vmem:[#allocation179_spill] sm:$0xff]  ;;  %v7226_v50 = vld [vmem:[%s9159_s24 + $0x18] sm:$0x3]  ;;  %s7058_s24 = sshll.u32 %s7305_s22, 3  ;;  %s2399_s22 = sadd.s32 1, %s7305_s22  }
 0x503   : >> { %4097 = vmatpush.msra.mxu2 %v9927_v58  ;;  %4184 = vmatpush.msra.mxu3 %v13162_v60  ;;  %s4459_s19 = scalar_lea.vmem [#allocation3], %s7058_s24  ;;  %p2396_p12 = scmp.ge.s32.totalorder %s2399_s22, 5  }
 0x504   : >> { %3997 = vmatpush.msra.mxu0 %v13163_v35  ;;  %4060 = vmatpush.msra.mxu1 %v9638_v28  ;;  %v3596_v28 = vsel %vm827_vm13, %v3594_v10, %v10352_v32  ;;  %s7340_s0 = smov (%p2396_p12), 16   ;;  %s7341_s1 = smov (%p2396_p12), 48  }
 0x505   : >> { %4099 = vmatpush.msra.mxu2 %v9943_v6  ;;  %4190 = vmatpush.msra.mxu3 %v13164_v27  ;;  %v3519_v56 = vpop.permute.xlu0 %3518  ;;  %s7342_s2 = smov (%p2396_p12), 80   ;;  %s7343_s17 = smov (%p2396_p12), 32  }
 0x506   : >> { %4001 = vmatpush.msra.mxu0 %v13165_v26  ;;  %4062 = vmatpush.msra.mxu1 %v13142_v41  ;;  %v3598_v41 = vsel %vm1017_vm15, %v3596_v28, %v10368_v52  ;;  %v13173_v28 = vld [vmem:[#allocation73_spill] sm:$0xff]  ;;  %s7344_s20 = smov (%p2396_p12), 64   ;;  %s7345_s30 = smov (%p2396_p12), 96  }
 0x507   : >> { %4101 = vmatpush.msra.mxu2 %v9960_v22  ;;  %4196 = vmatpush.msra.mxu3 %v13166_v12  ;;  %v3600_v32 = vsel %vm2609_vm0, %v3598_v41, %v10378_v4  ;;  %v3585_v4 = vsel %vm767_vm1, %v7226_v50, %v10370_v19  ;;  %v10471_v19 = vperm.slane %v13173_v28, 0  ;;  %v13183_v28 = vld [vmem:[#allocation176_spill] sm:$0xff]  ;;  %s7346_s12 = smov (%p2396_p12), 112   ;;  %vm4546_vm1 = vcmask (%p2396_p12), 130048   ;;  %s6762_s26 = sshll.u32 (%p2396_p12), %s7550_s25, 4  ;;  %s6763_s26 = int_to_ptr.vmem [resolvable:$true] %s6762_s26 }
 0x508   : >> { %4005 = vmatpush.msra.mxu0 %v13167_v14  ;;  %4064 = vmatpush.msra.mxu1 %v13144_v23  ;;  %v13170_v23 = vld [vmem:[#allocation142_spill] sm:$0xff]  ;;  %v3567_v52 = vpop.permute.xlu1 %3566  ;;  %v3587_v10 = vsel %vm777_vm3, %v3585_v4, %v10401_v7  ;;  %vm4548_vm3 = vcmask (%p2396_p12), 261120   ;;  %s7247_s14 = scalar_lea.hbm (%p2396_p12), %s12446_s11, 2 }
 0x509   : >> { %4103 = vmatpush.msra.mxu2 %v9981_v29  ;;  %4202 = vmatpush.msra.mxu3 %v13168_v33 }
 0x50a   : >> { %4009 = vmatpush.msra.mxu0 %v13169_v24  ;;  %4066 = vmatpush.msra.mxu1 %v9693_v13  ;;  %v13171_v13 = vld [vmem:[#allocation79_spill] sm:$0xff] }
 0x50b   : >> { %4105 = vmatpush.msra.mxu2 %v9998_v59  ;;  %4208 = vmatpush.msra.mxu3 %v10069_v17  ;;  %v3602_v17 = vsel %vm2612_vm2, %v3600_v32, %v3547_v48 }
 0x50c   : >> { %4013 = vmatpush.msra.mxu0 %v9680_v45  ;;  %v3525_v45 = vpop.permute.xlu2 %3524  ;;  %v3604_v9 = vsel %vm2615_vm4, %v3602_v17, %v3555_v1 }
 0x50d   : >> { %4107 = vmatpush.msra.mxu2 %v10014_v0  ;;  %4214 = vmatpush.msra.mxu3 %v10083_v44  ;;  %v3606_v44 = vsel %vm2618_vm6, %v3604_v9, %v3561_v25  ;;  %v3573_v35 = vpop.permute.xlu0 %3572 }
 0x50e   : >> { %4017 = vmatpush.msra.mxu0 %v13170_v23  ;;  %v3608_v60 = vsel %vm2621_vm8, %v3606_v44, %v3567_v52 }
 0x50f   : >> { %4220 = vmatpush.msra.mxu3 %v13171_v13  ;;  %v3610_v48 = vsel %vm2624_vm10, %v3608_v60, %v3573_v35 }
 0x510   : >> { %4021 = vmatpush.msra.mxu0 %v13172_v8  ;;  %v3531_v51 = vpop.permute.xlu1 %3530 }
 0x512   : >> { %4025 = vmatpush.msra.mxu0 %v9730_v18  ;;  %v3589_v18 = vsel %vm787_vm5, %v3587_v10, %v3507_v46  ;;  %vm4552_vm5 = vcmask (%p2396_p12), 523264  }
 0x513   : >> { %v3591_v14 = vsel %vm797_vm7, %v3589_v18, %v3513_v63  ;;  %vm4554_vm7 = vcmask (%p2396_p12), 654336  }
 0x514   : >> { %v3579_v27 = vpop.permute.xlu2 %3578  ;;  %v3593_v46 = vsel %vm807_vm9, %v3591_v14, %v3519_v56  ;;  %vm4558_vm9 = vcmask (%p2396_p12), 916480  }
 0x515   : >> { %v3612_v1 = vsel %vm2627_vm11, %v3610_v48, %v3579_v27  ;;  %v3537_v24 = vpop.permute.xlu0 %3536  ;;  %v3595_v63 = vsel %vm817_vm12, %v3593_v46, %v3525_v45  ;;  %v13179_v45 = vld [vmem:[#allocation170_spill] sm:$0xff]  ;;  %v13180_v27 = vld [vmem:[#allocation167_spill] sm:$0xff]  ;;  %v13184_v46 = vld [vmem:[#allocation169_spill] sm:$0xff] }
 0x516   : >> { %v3597_v50 = vsel %vm827_vm13, %v3595_v63, %v3531_v51  ;;  %v13188_v63 = vld [vmem:[#allocation175_spill] sm:$0xff] }
 0x51c   : >> { %v2880_v32 = vpop.f32.mrf.mxu1  ;;  %v3543_v56 = vpop.permute.xlu2 %3542 }
 0x520   : >> { %v10466_v26 = vpop.permute.xlu1 %3692 }
 0x521   : >> { %v3702_v12 = vsel %vm2721_vm14, %v3612_v1, %v10466_v26  ;;  %v13181_v1 = vld [vmem:[#allocation75_spill] sm:$0xff] }
 0x522   : >> { %v10474_v25 = vand.u32 4294901760, %v3702_v12 }
 0x524   : >> { %v3737_v7 = vsub.f32 %v3702_v12, %v10474_v25  ;;  %v2771_v33 = vpop.f32.mrf.mxu0  ;;  %3850 = vmatmul.f32.vlgmr.msrb.gmra.mxu1 %v10474_v25  ;;  %v2938_v8 = vpop.f32.mrf.mxu2 }
 0x525   : >> { %v2772_v41 = vadd.f32 %v2771_v33, %v10471_v19  ;;  %4290 = vmatpush.msrb.mxu1 %v9736_v62 }
 0x526   : >> { %v3738_v23 = vand.u32 4294901760, %v3737_v7  ;;  %3908 = vmatmul.f32.vlgmr.msrb.gmra.mxu2 %v3737_v7  ;;  %v2982_v9 = vpop.f32.mrf.mxu3 }
 0x527   : >> { %v2881_v13 = vadd.f32 %v2880_v32, %v2772_v41  ;;  %4292 = vmatpush.msrb.mxu1 %v9751_v39  ;;  %4337 = vmatpush.msrb.mxu2 %v9766_v57  ;;  %v3599_v57 = vsel %vm1017_vm15, %v3597_v50, %v3537_v24  ;;  %v13186_v41 = vld [vmem:[#allocation173_spill] sm:$0xff]  ;;  %v13187_v32 = vld [vmem:[#allocation180_spill] sm:$0xff] }
 0x528   : >> { %v3739_v52 = vsub.f32 %v3737_v7, %v3738_v23  ;;  %3952 = vmatmul.f32.vlgmr.msrb.gmra.mxu3 %v3738_v23 }
 0x529   : >> { %v2939_v17 = vadd.f32 %v2938_v8, %v2881_v13  ;;  %4294 = vmatpush.msrb.mxu1 %v9769_v21  ;;  %4341 = vmatpush.msrb.mxu2 %v9783_v30  ;;  %v3549_v30 = vpop.permute.xlu0 %3548  ;;  %v13189_v8 = vld [vmem:[#allocation76_spill] sm:$0xff] }
 0x52a   : >> { %v3740_v44 = vand.u32 4294901760, %v3739_v52  ;;  %4408 = vmatpush.msrb.mxu3 %v9736_v62  ;;  %v3557_v62 = vpop.permute.xlu1 %3556 }
 0x52b   : >> { %v10488_v4 = vadd.f32 %v2982_v9, %v2939_v17  ;;  %4296 = vmatpush.msrb.mxu1 %v9786_v43  ;;  %4345 = vmatpush.msrb.mxu2 %v9803_v20  ;;  %v3601_v20 = vsel %vm2609_vm0, %v3599_v57, %v3543_v56  ;;  %v13190_v56 = vld [vmem:[#allocation178_spill] sm:$0xff] }
 0x52c   : >> { %3741 = vmatmul.f32.vlgmr.msrb.gmra.mxu0 %v3740_v44  ;;  %4410 = vmatpush.msrb.mxu3 %v9751_v39  ;;  %v3563_v39 = vpop.permute.xlu2 %3562 }
 0x52d   : >> { %4232 = vmatpush.msrb.mxu0 %v9755_v15  ;;  %4298 = vmatpush.msrb.mxu1 %v9806_v2 }
 0x52e   : >> { %4349 = vmatpush.msrb.mxu2 %v9832_v5  ;;  %4412 = vmatpush.msrb.mxu3 %v9769_v21  ;;  %v3603_v5 = vsel %vm2612_vm2, %v3601_v20, %v3549_v30  ;;  %v13174_v21 = vld [vmem:[#allocation96_spill] sm:$0xff] }
 0x52f   : >> { %4235 = vmatpush.msrb.mxu0 %v13080_v49  ;;  %4300 = vmatpush.msrb.mxu1 %v9821_v42 }
 0x530   : >> { %4353 = vmatpush.msrb.mxu2 %v9843_v61  ;;  %4414 = vmatpush.msrb.mxu3 %v9786_v43  ;;  %v3605_v61 = vsel %vm2615_vm4, %v3603_v5, %v3557_v62  ;;  %v13175_v43 = vld [vmem:[#allocation165_spill] sm:$0xff] }
 0x531   : >> { %4238 = vmatpush.msrb.mxu0 %v13081_v3  ;;  %4302 = vmatpush.msrb.mxu1 %v9846_v16  ;;  %v13178_v3 = vld [vmem:[#allocation162_spill] sm:$0xff] }
 0x532   : >> { %4357 = vmatpush.msrb.mxu2 %v9874_v31  ;;  %4416 = vmatpush.msrb.mxu3 %v9806_v2  ;;  %v3569_v2 = vpop.permute.xlu0 %3568  ;;  %v3575_v15 = vpop.permute.xlu1 %3574 }
 0x533   : >> { %4241 = vmatpush.msrb.mxu0 %v9812_v53  ;;  %4304 = vmatpush.msrb.mxu1 %v9862_v47  ;;  %v13176_v53 = vld [vmem:[#allocation159_spill] sm:$0xff]  ;;  %v2884_v51 = vpop.f32.mrf.mxu1 }
 0x534   : >> { %4361 = vmatpush.msrb.mxu2 %v9881_v11  ;;  %4418 = vmatpush.msrb.mxu3 %v9821_v42  ;;  %v3696_v11 = vsel %vm2721_vm14, %v10466_v26, %v13174_v21  ;;  %v3607_v42 = vsel %vm2618_vm6, %v3605_v61, %v3563_v39  ;;  %v13182_v26 = vld [vmem:[#allocation168_spill] sm:$0xff] }
 0x535   : >> { %4244 = vmatpush.msrb.mxu0 %v13083_v40  ;;  %4306 = vmatpush.msrb.mxu1 %v9884_v55  ;;  %v3609_v31 = vsel %vm2621_vm8, %v3607_v42, %v3569_v2  ;;  %v3581_v40 = vpop.permute.xlu2 %3580 }
 0x536   : >> { %4365 = vmatpush.msrb.mxu2 %v9900_v36  ;;  %4420 = vmatpush.msrb.mxu3 %v9846_v16  ;;  %v13177_v16 = vld [vmem:[#allocation78_spill] sm:$0xff]  ;;  %v10529_v36 = vand.u32 4294901760, %v3696_v11 }
 0x537   : >> { %4247 = vmatpush.msrb.mxu0 %v13084_v38  ;;  %4308 = vmatpush.msrb.mxu1 %v9903_v37 }
 0x538   : >> { %4369 = vmatpush.msrb.mxu2 %v13175_v43  ;;  %4422 = vmatpush.msrb.mxu3 %v9862_v47  ;;  %v3611_v47 = vsel %vm2624_vm10, %v3609_v31, %v3575_v15  ;;  %v4109_v60 = vsub.f32 %v3696_v11, %v10529_v36 }
 0x539   : >> { %4250 = vmatpush.msrb.mxu0 %v13176_v53  ;;  %4310 = vmatpush.msrb.mxu1 %v9927_v58  ;;  %v3613_v35 = vsel %vm2627_vm11, %v3611_v47, %v3581_v40 }
 0x53a   : >> { %4373 = vmatpush.msrb.mxu2 %v13177_v16  ;;  %4424 = vmatpush.msrb.mxu3 %v9884_v55  ;;  %v4110_v14 = vand.u32 4294901760, %v4109_v60 }
 0x53b   : >> { %v2779_v49 = vpop.f32.mrf.mxu0  ;;  %4253 = vmatpush.msrb.mxu0 %v13178_v3  ;;  %4312 = vmatpush.msrb.mxu1 %v9943_v6  ;;  %v2943_v10 = vpop.f32.mrf.mxu2 }
 0x53c   : >> { %v2780_v38 = vadd.f32 %v2779_v49, %v10471_v19  ;;  %4377 = vmatpush.msrb.mxu2 %v13179_v45  ;;  %4426 = vmatpush.msrb.mxu3 %v9903_v37  ;;  %v4111_v23 = vsub.f32 %v4109_v60, %v4110_v14 }
 0x53d   : >> { %4256 = vmatpush.msrb.mxu0 %v13092_v54  ;;  %4314 = vmatpush.msrb.mxu1 %v9960_v22 }
 0x53e   : >> { %v2885_v55 = vadd.f32 %v2884_v51, %v2780_v38  ;;  %4381 = vmatpush.msrb.mxu2 %v13093_v34  ;;  %4428 = vmatpush.msrb.mxu3 %v9927_v58  ;;  %v2988_v58 = vpop.f32.mrf.mxu3 }
 0x53f   : >> { %v3695_v48 = vpop.permute.xlu0 %3694  ;;  %4259 = vmatpush.msrb.mxu0 %v13180_v27  ;;  %4316 = vmatpush.msrb.mxu1 %v9981_v29 }
 0x540   : >> { %v2944_v37 = vadd.f32 %v2943_v10, %v2885_v55  ;;  %v3697_v54 = vsel %vm2721_vm14, %v3695_v48, %v13174_v21  ;;  %v3703_v18 = vsel %vm2721_vm14, %v3613_v35, %v3695_v48  ;;  %4385 = vmatpush.msrb.mxu2 %v13181_v1  ;;  %4430 = vmatpush.msrb.mxu3 %v9943_v6  ;;  %v13185_v6 = vld [vmem:[#allocation177_spill] sm:$0xff] }
 0x541   : >> { %v3744_v34 = vand.u32 4294901760, %v3703_v18  ;;  %4262 = vmatpush.msrb.mxu0 %v13182_v26  ;;  %4318 = vmatpush.msrb.mxu1 %v9998_v59  ;;  %v4116_v33 = vand.u32 4294901760, %v3697_v54 }
 0x542   : >> { %v10553_v12 = vadd.f32 %v2988_v58, %v2944_v37  ;;  %4389 = vmatpush.msrb.mxu2 %v13183_v28  ;;  %4432 = vmatpush.msrb.mxu3 %v9960_v22 }
 0x543   : >> { %v3745_v7 = vsub.f32 %v3703_v18, %v3744_v34  ;;  %3854 = vmatmul.f32.gmra.mxu1 %v3744_v34  ;;  %4265 = vmatpush.msrb.mxu0 %v13184_v46  ;;  %v4117_v22 = vsub.f32 %v3697_v54, %v4116_v33  ;;  %v3057_v44 = vpop.f32.mrf.mxu0  ;;  %v3143_v50 = vpop.f32.mrf.mxu2 }
 0x544   : >> { %4320 = vmatpush.msrb.mxu1 %v10014_v0  ;;  %4393 = vmatpush.msrb.mxu2 %v13185_v6  ;;  %v3058_v45 = vadd.f32 %v3057_v44, %v10488_v4 }
 0x545   : >> { %3913 = vmatmul.f32.gmra.mxu2 %v3745_v7  ;;  %v3746_v24 = vand.u32 4294901760, %v3745_v7  ;;  %4434 = vmatpush.msrb.mxu3 %v9981_v29  ;;  %v4112_v29 = vand.u32 4294901760, %v4111_v23  ;;  %v4118_v17 = vand.u32 4294901760, %v4117_v22 }
 0x546   : >> { %4268 = vmatpush.msrb.mxu0 %v13186_v41  ;;  %4397 = vmatpush.msrb.mxu2 %v13187_v32  ;;  %v3252_v57 = vpop.f32.mrf.mxu3 }
 0x547   : >> { %3958 = vmatmul.f32.gmra.mxu3 %v3746_v24  ;;  %v3747_v13 = vsub.f32 %v3745_v7, %v3746_v24  ;;  %v4119_v9 = vsub.f32 %v4117_v22, %v4118_v17 }
 0x548   : >> { %4436 = vmatpush.msrb.mxu3 %v9998_v59  ;;  %4271 = vmatpush.msrb.mxu0 %v13188_v63 }
 0x549   : >> { %v3748_v52 = vand.u32 4294901760, %v3747_v13  ;;  %v4120_v59 = vand.u32 4294901760, %v4119_v9 }
 0x54a   : >> { %4438 = vmatpush.msrb.mxu3 %v10014_v0  ;;  %4274 = vmatpush.msrb.mxu0 %v13189_v8  ;;  %v3098_v0 = vpop.f32.mrf.mxu1 }
 0x54b   : >> { %3749 = vmatmul.f32.gmra.mxu0 %v3748_v52  ;;  %4068 = vmatmul.f32.vlgmr.msra.gmra.mxu1 %v10474_v25  ;;  %v3061_v30 = vpop.f32.mrf.mxu0  ;;  %v3151_v62 = vpop.f32.mrf.mxu2  ;;  %v3099_v35 = vadd.f32 %v3098_v0, %v3058_v45 }
 0x54c   : >> { %4277 = vmatpush.msrb.mxu0 %v13190_v56  ;;  %v3062_v1 = vadd.f32 %v3061_v30, %v10553_v12 }
 0x54d   : >> { %4113 = vmatmul.f32.vlgmr.msra.gmra.mxu2 %v4112_v29  ;;  %v3144_v18 = vadd.f32 %v3143_v50, %v3099_v35 }
 0x54e   : >> { %v3256_v20 = vpop.f32.mrf.mxu3 }
 0x54f   : >> { %4222 = vmatmul.f32.vlgmr.msra.gmra.mxu3 %v10529_v36  ;;  %v3253_v28 = vadd.f32 %v3252_v57, %v3144_v18 }
 0x553   : >> { %4027 = vmatmul.f32.vlgmr.msra.gmra.mxu0 %v10474_v25  ;;  %4072 = vmatmul.f32.gmra.mxu1 %v3744_v34  ;;  %v3102_v25 = vpop.f32.mrf.mxu1  ;;  %v3310_v5 = vpop.f32.mrf.mxu0 }
 0x554   : >> { %v3429_v61 = vpop.f32.mrf.mxu2  ;;  %v3311_v46 = vadd.f32 %v3310_v5, %v3253_v28 }
 0x555   : >> { %4121 = vmatmul.f32.gmra.mxu2 %v4120_v59 }
 0x556   : >> { %v3470_v2 = vpop.f32.mrf.mxu3 }
 0x557   : >> { %4226 = vmatmul.f32.gmra.mxu3 %v4116_v33 }
 0x55b   : >> { %4031 = vmatmul.f32.gmra.mxu0 %v3744_v34  ;;  %4324 = vmatmul.f32.vlgmr.msrb.gmra.mxu1 %v4110_v14  ;;  %v3354_v39 = vpop.f32.mrf.mxu1  ;;  %v3315_v11 = vpop.f32.mrf.mxu0  ;;  %v3103_v14 = vadd.f32 %v3102_v25, %v3062_v1 }
 0x55c   : >> { %v3433_v42 = vpop.f32.mrf.mxu2  ;;  %v3355_v23 = vadd.f32 %v3354_v39, %v3311_v46 }
 0x55d   : >> { %4399 = vmatmul.f32.vlgmr.msrb.gmra.mxu2 %v10529_v36  ;;  %v3152_v24 = vadd.f32 %v3151_v62, %v3103_v14 }
 0x55e   : >> { %v10573_v43 = vpop.f32.mrf.mxu3  ;;  %v3430_v8 = vadd.f32 %v3429_v61, %v3355_v23 }
 0x55f   : >> { %4440 = vmatmul.f32.vlgmr.msrb.gmra.mxu3 %v10529_v36 }
 0x560   : >> { %v3471_v44 = vadd.f32 %v3470_v2, %v3430_v8 }
 0x562   : >> { %v3477_v5 = vmax.f32 %v3471_v44, 0.0  ;;  %v4609_v44 = vld [vmem:[%s12440_s5 + $0x30] sm:$0xff] (%p2396_p12) }
 0x563   : >> { %4280 = vmatmul.f32.vlgmr.msrb.gmra.mxu0 %v4109_v60  ;;  %4330 = vmatmul.f32.gmra.mxu1 %v4118_v17  ;;  %v3360_v21 = vpop.f32.mrf.mxu1 }
 0x565   : >> { %4403 = vmatmul.f32.gmra.mxu2 %v4116_v33 }
 0x567   : >> { %4444 = vmatmul.f32.gmra.mxu3 %v4116_v33 }
 0x56b   : >> { %4285 = vmatmul.f32.gmra.mxu0 %v4117_v22  ;;  %v3257_v22 = vadd.f32 %v3256_v20, %v3152_v24  ;;  %v4615_v24 = vld [vmem:[%s12440_s5 + $0x60] sm:$0xff] (%p2396_p12) }
 0x56d   : >> { %v3316_v29 = vadd.f32 %v3315_v11, %v3257_v22  ;;  %v10641_v22 = vand.u32 (%p2396_p12), 4294901760, %v4615_v24 }
 0x56f   : >> { %v3361_v50 = vadd.f32 %v3360_v21, %v3316_v29  ;;  %v4611_v29 = vld [vmem:[%s12440_s5 + $0x40] sm:$0xff] (%p2396_p12) }
 0x571   : >> { %v3434_v39 = vadd.f32 %v3433_v42, %v3361_v50  ;;  %v4608_v50 = vld [vmem:[%s12440_s5 + $0x28] sm:$0xff] (%p2396_p12) }
 0x5a1   : >> { %v3851_v15 = vpop.f32.mrf.mxu1 }
 0x5a9   : >> { %v3742_v53 = vpop.f32.mrf.mxu0  ;;  %v3909_v16 = vpop.f32.mrf.mxu2 }
 0x5aa   : >> { %v3743_v49 = vadd.f32 %v3742_v53, %v10471_v19 }
 0x5ab   : >> { %v3953_v36 = vpop.f32.mrf.mxu3 }
 0x5ac   : >> { %v3852_v40 = vadd.f32 %v3851_v15, %v3743_v49 }
 0x5ae   : >> { %v3910_v55 = vadd.f32 %v3909_v16, %v3852_v40 }
 0x5b0   : >> { %v3954_v27 = vadd.f32 %v3953_v36, %v3910_v55  ;;  %v3475_v36 = vadd.f32 %v10573_v43, %v3434_v39 }
 0x5b2   : >> { %v3478_v21 = vmax.f32 %v3475_v36, 0.0 }
 0x5c0   : >> { %v3855_v31 = vpop.f32.mrf.mxu1 }
 0x5c8   : >> { %v3750_v3 = vpop.f32.mrf.mxu0  ;;  %v3914_v47 = vpop.f32.mrf.mxu2 }
 0x5c9   : >> { %v4069_v51 = vpop.f32.mrf.mxu1  ;;  %v3751_v60 = vadd.f32 %v3750_v3, %v10471_v19 }
 0x5ca   : >> { %v3959_v38 = vpop.f32.mrf.mxu3 }
 0x5cb   : >> { %v3856_v37 = vadd.f32 %v3855_v31, %v3751_v60 }
 0x5cd   : >> { %v3915_v34 = vadd.f32 %v3914_v47, %v3856_v37 }
 0x5cf   : >> { %v3960_v6 = vadd.f32 %v3959_v38, %v3915_v34 }
 0x5d0   : >> { %v4028_v10 = vpop.f32.mrf.mxu0  ;;  %v4114_v48 = vpop.f32.mrf.mxu2 }
 0x5d1   : >> { %v4029_v58 = vadd.f32 %v4028_v10, %v3954_v27  ;;  %v4073_v26 = vpop.f32.mrf.mxu1  ;;  %v4618_v10 = vld [vmem:[%s12440_s5 + $0x78] sm:$0xff] (%p2396_p12) }
 0x5d2   : >> { %v4223_v54 = vpop.f32.mrf.mxu3  ;;  %v10595_v27 = vand.u32 (%p2396_p12), 4294901760, %v4618_v10 }
 0x5d3   : >> { %v4070_v7 = vadd.f32 %v4069_v51, %v4029_v58 }
 0x5d4   : > { %v10606_v1 = vsub.f32 (%p2396_p12), %v4618_v10, %v10595_v27  ;;  %4865 = vmatpush.msra.mxu3 (%p2396_p12), %v10595_v27  ;;  %4669 = vmatpush.msra.mxu0 (%p2396_p12), %v10595_v27  ;;  %v4604_v10 = vld [vmem:[%s12440_s5 + $0x8] sm:$0xff] (%p2396_p12) }
 0x5d5   : >> { %v4115_v41 = vadd.f32 %v4114_v48, %v4070_v7  ;;  %v4617_v48 = vld [vmem:[%s12440_s5 + $0x70] sm:$0xff] (%p2396_p12) }
 0x5d6   : > { %v10597_v37 = vand.u32 (%p2396_p12), 4294901760, %v4617_v48  ;;  %v4711_v14 = vand.u32 (%p2396_p12), 4294901760, %v10606_v1  ;;  %4812 = vmatpush.msra.mxu2 (%p2396_p12), %v10606_v1 }
 0x5d7   : >> { %v4224_v13 = vadd.f32 %v4223_v54, %v4115_v41  ;;  %v4616_v54 = vld [vmem:[%s12440_s5 + $0x68] sm:$0xff] (%p2396_p12)  ;;  %v4614_v41 = vld [vmem:[%s12440_s5 + $0x58] sm:$0xff] (%p2396_p12) }
 0x5d8   : >> { %v4032_v4 = vpop.f32.mrf.mxu0  ;;  %v4122_v33 = vpop.f32.mrf.mxu2  ;;  %v10602_v18 = vand.u32 (%p2396_p12), 4294901760, %v4616_v54  ;;  %v10609_v58 = vsub.f32 (%p2396_p12), %v4617_v48, %v10597_v37  ;;  %4867 = vmatpush.msra.mxu3 (%p2396_p12), %v10597_v37  ;;  %4671 = vmatpush.msra.mxu0 (%p2396_p12), %v10597_v37 }
 0x5d9   : >> { %v4033_v32 = vadd.f32 %v4032_v4, %v3960_v6  ;;  %v4325_v52 = vpop.f32.mrf.mxu1 }
 0x5da   : >> { %v4227_v19 = vpop.f32.mrf.mxu3  ;;  %v4717_v7 = vand.u32 (%p2396_p12), 4294901760, %v10609_v58  ;;  %4815 = vmatpush.msra.mxu2 (%p2396_p12), %v10609_v58  ;;  %4869 = vmatpush.msra.mxu3 (%p2396_p12), %v10602_v18 }
 0x5db   : >> { %v4074_v63 = vadd.f32 %v4073_v26, %v4033_v32  ;;  %v10613_v26 = vsub.f32 (%p2396_p12), %v4616_v54, %v10602_v18  ;;  %4673 = vmatpush.msra.mxu0 (%p2396_p12), %v10602_v18 }
 0x5dc   : > { %v4718_v46 = vsub.f32 (%p2396_p12), %v10609_v58, %v4717_v7  ;;  %4871 = vmatpush.msra.mxu3 (%p2396_p12), %v10641_v22 }
 0x5dd   : >> { %v4123_v9 = vadd.f32 %v4122_v33, %v4074_v63  ;;  %v4723_v4 = vand.u32 (%p2396_p12), 4294901760, %v10613_v26  ;;  %v4712_v33 = vsub.f32 (%p2396_p12), %v10606_v1, %v4711_v14  ;;  %4818 = vmatpush.msra.mxu2 (%p2396_p12), %v10613_v26  ;;  %v4613_v63 = vld [vmem:[%s12440_s5 + $0x50] sm:$0xff] (%p2396_p12)  ;;  %4675 = vmatpush.msra.mxu0 (%p2396_p12), %v10641_v22 }
 0x5de   : > { %v4719_v23 = vand.u32 (%p2396_p12), 4294901760, %v4718_v46 }
 0x5df   : >> { %v4228_v25 = vadd.f32 %v4227_v19, %v4123_v9  ;;  %v4724_v19 = vsub.f32 (%p2396_p12), %v10613_v26, %v4723_v4  ;;  %v4713_v32 = vand.u32 (%p2396_p12), 4294901760, %v4712_v33  ;;  %v4628_v26 = vld [vmem:[%s12440_s5 + $0xc8] sm:$0xff] (%p2396_p12) }
 0x5e0   : >> { %v4281_v12 = vpop.f32.mrf.mxu0  ;;  %v4400_v56 = vpop.f32.mrf.mxu2 }
 0x5e1   : >> { %v4282_v17 = vadd.f32 %v4281_v12, %v4224_v13  ;;  %v4331_v53 = vpop.f32.mrf.mxu1  ;;  %v10644_v13 = vand.u32 (%p2396_p12), 4294901760, %v4614_v41  ;;  %v10653_v12 = vand.u32 (%p2396_p12), 4294901760, %v4613_v63  ;;  %4714 = vmatpush.msra.mxu1 (%p2396_p12), %v4713_v32 }
 0x5e2   : >> { %v4441_v0 = vpop.f32.mrf.mxu3 }
 0x5e3   : >> { %v4326_v59 = vadd.f32 %v4325_v52, %v4282_v17  ;;  %v4612_v52 = vld [vmem:[%s12440_s5 + $0x48] sm:$0xff] (%p2396_p12)  ;;  %v4725_v17 = vand.u32 (%p2396_p12), 4294901760, %v4724_v19  ;;  %v10665_v9 = vsub.f32 (%p2396_p12), %v4614_v41, %v10644_v13  ;;  %4720 = vmatpush.msra.mxu1 (%p2396_p12), %v4719_v23  ;;  %4873 = vmatpush.msra.mxu3 (%p2396_p12), %v10644_v13  ;;  %v4603_v19 = vld [vmem:[%s12440_s5] sm:$0xff] (%p2396_p12) }
 0x5e4   : > { %v10655_v8 = vand.u32 (%p2396_p12), 4294901760, %v4612_v52  ;;  %4677 = vmatpush.msra.mxu0 (%p2396_p12), %v10644_v13 }
 0x5e5   : >> { %v4401_v57 = vadd.f32 %v4400_v56, %v4326_v59  ;;  %v10662_v56 = vsub.f32 (%p2396_p12), %v4615_v24, %v10641_v22  ;;  %v10667_v59 = vand.u32 (%p2396_p12), 4294901760, %v4611_v29  ;;  %4726 = vmatpush.msra.mxu1 (%p2396_p12), %v4725_v17  ;;  %4875 = vmatpush.msra.mxu3 (%p2396_p12), %v10653_v12 }
 0x5e6   : > { %4679 = vmatpush.msra.mxu0 (%p2396_p12), %v10653_v12 }
 0x5e7   : >> { %v4442_v30 = vadd.f32 %v4441_v0, %v4401_v57  ;;  %v4610_v0 = vld [vmem:[%s12440_s5 + $0x38] sm:$0xff] (%p2396_p12)  ;;  %4821 = vmatpush.msra.mxu2 (%p2396_p12), %v10662_v56  ;;  %4877 = vmatpush.msra.mxu3 (%p2396_p12), %v10655_v8 }
 0x5e8   : >> { %v4286_v62 = vpop.f32.mrf.mxu0  ;;  %v4404_v11 = vpop.f32.mrf.mxu2  ;;  %4681 = vmatpush.msra.mxu0 (%p2396_p12), %v10655_v8 }
 0x5e9   : >> { %v4448_v20 = vmax.f32 %v4442_v30, 0.0  ;;  %v4287_v15 = vadd.f32 %v4286_v62, %v4228_v25  ;;  %v10679_v25 = vsub.f32 (%p2396_p12), %v4613_v63, %v10653_v12  ;;  %v10683_v30 = vsub.f32 (%p2396_p12), %v4612_v52, %v10655_v8  ;;  %4824 = vmatpush.msra.mxu2 (%p2396_p12), %v10665_v9  ;;  %4879 = vmatpush.msra.mxu3 (%p2396_p12), %v10667_v59 }
 0x5ea   : >> { %v4445_v49 = vpop.f32.mrf.mxu3  ;;  %v10686_v62 = vand.u32 (%p2396_p12), 4294901760, %v4610_v0  ;;  %v10770_v52 = vand.u32 (%p2396_p12), 4294901760, %v4604_v10  ;;  %4683 = vmatpush.msra.mxu0 (%p2396_p12), %v10667_v59 }
 0x5eb   : >> { %v4450_v16 = vmax.f32 %v3477_v5, %v4448_v20  ;;  %v4332_v61 = vadd.f32 %v4331_v53, %v4287_v15  ;;  %v10688_v5 = vand.u32 (%p2396_p12), 4294901760, %v4609_v44  ;;  %v4729_v20 = vand.u32 (%p2396_p12), 4294901760, %v10662_v56  ;;  %4827 = vmatpush.msra.mxu2 (%p2396_p12), %v10679_v25 }
 0x5ec   : > { %v4735_v15 = vand.u32 (%p2396_p12), 4294901760, %v10665_v9  ;;  %v10694_v53 = vsub.f32 (%p2396_p12), %v4611_v29, %v10667_v59  ;;  %v10703_v36 = vsub.f32 (%p2396_p12), %v4610_v0, %v10686_v62  ;;  %4881 = vmatpush.msra.mxu3 (%p2396_p12), %v10686_v62  ;;  %4685 = vmatpush.msra.mxu0 (%p2396_p12), %v10686_v62 }
 0x5ed   : >> { %4452 = vst [vmem:[#allocation4] sm:$0xff] %v4450_v16  ;;  %v4405_v31 = vadd.f32 %v4404_v11, %v4332_v61  ;;  %v10696_v16 = vand.u32 (%p2396_p12), 4294901760, %v4608_v50  ;;  %v4741_v61 = vand.u32 (%p2396_p12), 4294901760, %v10679_v25  ;;  %v4747_v11 = vand.u32 (%p2396_p12), 4294901760, %v10683_v30  ;;  %4830 = vmatpush.msra.mxu2 (%p2396_p12), %v10683_v30 }
 0x5ee   : > { %4883 = vmatpush.msra.mxu3 (%p2396_p12), %v10688_v5  ;;  %4687 = vmatpush.msra.mxu0 (%p2396_p12), %v10688_v5 }
 0x5ef   : >> { %v4446_v2 = vadd.f32 %v4445_v49, %v4405_v31  ;;  %v10706_v31 = vsub.f32 (%p2396_p12), %v4609_v44, %v10688_v5  ;;  %v4730_v49 = vsub.f32 (%p2396_p12), %v10662_v56, %v4729_v20  ;;  %4833 = vmatpush.msra.mxu2 (%p2396_p12), %v10694_v53 }
 0x5f0   : > { %4885 = vmatpush.msra.mxu3 (%p2396_p12), %v10696_v16  ;;  %4689 = vmatpush.msra.mxu0 (%p2396_p12), %v10696_v16 }
 0x5f1   : >> { %v4449_v3 = vmax.f32 %v4446_v2, 0.0  ;;  %v4736_v2 = vsub.f32 (%p2396_p12), %v10665_v9, %v4735_v15  ;;  %4836 = vmatpush.msra.mxu2 (%p2396_p12), %v10703_v36 }
 0x5f3   : >> { %v4451_v47 = vmax.f32 %v3478_v21, %v4449_v3  ;;  %v4753_v21 = vand.u32 (%p2396_p12), 4294901760, %v10694_v53  ;;  %4839 = vmatpush.msra.mxu2 (%p2396_p12), %v10706_v31 }
 0x5f5   : >> { %4453 = vst [vmem:[#allocation4 + $0x8] sm:$0x3] %v4451_v47  ;;  %v4742_v47 = vsub.f32 (%p2396_p12), %v10679_v25, %v4741_v61  ;;  %v4754_v54 = vsub.f32 (%p2396_p12), %v10694_v53, %v4753_v21  ;;  %v4625_v53 = vld [vmem:[%s12440_s5 + $0xb0] sm:$0xff] (%p2396_p12) }
 0x5f7   : > { %v4743_v48 = vand.u32 (%p2396_p12), 4294901760, %v4742_v47  ;;  %v4755_v17 = vand.u32 (%p2396_p12), 4294901760, %v4754_v54  ;;  %v10795_v47 = vsub.f32 (%p2396_p12), %v4604_v10, %v10770_v52  ;;  %v4632_v10 = vld [vmem:[%s12440_s5 + $0xe8] sm:$0xff] (%p2396_p12) }
 0x5fb   : > { %2398 = sbr.rel (!%p2396_p12) target bundleno = 901 (0x385), region = 146 }
 0x5fc   : >> { %v4454_v40 = vld [vmem:[#allocation4] ss:$2 sm:$0x1f]  ;;  %v4456_v42 = vld [vmem:[#allocation4 + $0x1] ss:$2 sm:$0x1f] }
 0x5fd   : >> { %v4457_v38 = vmax.f32 %v4454_v40, %v4456_v42  ;;  %v4748_v40 = vsub.f32 (%p2396_p12), %v10683_v30, %v4747_v11  ;;  %v10725_v42 = vsub.f32 (%p2396_p12), %v4608_v50, %v10696_v16  ;;  %v10782_v50 = vand.u32 (%p2396_p12), 4294901760, %v4603_v19 }
 0x5ff   : >> { %4460 = vst [vmem:[%s4459_s19] sm:$0x1f] %v4457_v38  ;;  %v4607_v38 = vld [vmem:[%s12440_s5 + $0x20] sm:$0xff] (%p2396_p12)  ;;  %v4749_v33 = vand.u32 (%p2396_p12), 4294901760, %v4748_v40  ;;  %v4771_v46 = vand.u32 (%p2396_p12), 4294901760, %v10725_v42  ;;  %v4633_v40 = vld [vmem:[%s12440_s5 + $0xf0] sm:$0xff] (%p2396_p12)  ;;  %4842 = vmatpush.msra.mxu2 (%p2396_p12), %v10725_v42 }
 0x600   : > { %v10817_v54 = vand.u32 4294901760, %v4633_v40 }
 0x606   : > { %v4462_v43 = vld [vmem:[#allocation3 + $0x1] sm:$0x1]  ;;  %v4464_v45 = vld [vmem:[#allocation3 + $0x3] sm:$0x1]  ;;  %v4467_v51 = vld [vmem:[#allocation3 + $0x8] sm:$0x1] }
 0x607   : > { %4491 = vrot.lane.b32.xlu0 %v4462_v43, %s7340_s0  ;;  %4499 = vrot.lane.b32.xlu1 %v4464_v45, %s7341_s1  ;;  %v4463_v55 = vld [vmem:[#allocation3 + $0x2] sm:$0x1]  ;;  %v4465_v60 = vld [vmem:[#allocation3 + $0x4] sm:$0x1]  ;;  %v4468_v35 = vld [vmem:[#allocation3 + $0x9] sm:$0x1] }
 0x608   : > { %4507 = vrot.lane.b32.xlu2 %v4467_v51, %s7342_s2  ;;  %v4469_v34 = vld [vmem:[#allocation3 + $0xa] sm:$0x1]  ;;  %v4471_v28 = vld [vmem:[#allocation3 + $0xc] sm:$0x1]  ;;  %v4473_v6 = vld [vmem:[#allocation3 + $0x10] sm:$0x1] }
 0x609   : > { %v4474_v57 = vld [vmem:[#allocation3 + $0x11] sm:$0x1]  ;;  %v4475_v39 = vld [vmem:[#allocation3 + $0x12] sm:$0x1]  ;;  %v4476_v3 = vld [vmem:[#allocation3 + $0x13] sm:$0x1] }
 0x60a   : > { %v4606_v43 = vld [vmem:[%s12440_s5 + $0x18] sm:$0xff]  ;;  %v4731_v45 = vand.u32 4294901760, %v4730_v49  ;;  %v4737_v51 = vand.u32 4294901760, %v4736_v2  ;;  %v4479_v41 = vld [vmem:[#allocation3 + $0x18] sm:$0x1]  ;;  %v4772_v2 = vsub.f32 %v10725_v42, %v4771_v46 }
 0x60b   : > { %v4477_v24 = vld [vmem:[#allocation3 + $0x14] sm:$0x1] }
 0x60c   : > { %4732 = vmatpush.msra.mxu1 %v4731_v45 }
 0x60e   : > { %4738 = vmatpush.msra.mxu1 %v4737_v51 }
 0x60f   : > { %4495 = vrot.lane.b32.xlu0 %v4463_v55, %s7343_s17  ;;  %4503 = vrot.lane.b32.xlu1 %v4465_v60, %s7344_s20  ;;  %v4759_v55 = vand.u32 4294901760, %v10703_v36  ;;  %v4605_v60 = vld [vmem:[%s12440_s5 + $0x10] sm:$0xff] }
 0x610   : > { %4511 = vrot.lane.b32.xlu2 %v4468_v35, %s7345_s30  ;;  %v4765_v35 = vand.u32 4294901760, %v10706_v31  ;;  %4744 = vmatpush.msra.mxu1 %v4743_v48  ;;  %v4482_v48 = vld [vmem:[#allocation3 + $0x1b] sm:$0x1] }
 0x611   : > { %v4760_v32 = vsub.f32 %v10703_v36, %v4759_v55 }
 0x612   : > { %v4766_v29 = vsub.f32 %v10706_v31, %v4765_v35  ;;  %4750 = vmatpush.msra.mxu1 %v4749_v33  ;;  %v4483_v33 = vld [vmem:[#allocation3 + $0x1c] sm:$0x1] }
 0x613   : > { %v4761_v49 = vand.u32 4294901760, %v4760_v32  ;;  %v4631_v32 = vld [vmem:[%s12440_s5 + $0xe0] sm:$0xff] }
 0x614   : > { %4756 = vmatpush.msra.mxu1 %v4755_v17  ;;  %v10832_v17 = vand.u32 4294901760, %v4632_v10 }
 0x616   : > { %4762 = vmatpush.msra.mxu1 %v4761_v49 }
 0x617   : > { %4515 = vrot.lane.b32.xlu0 %v4469_v34, %s7346_s12  ;;  %4519 = vrot.lane.b32.xlu1 %v4471_v28, %s7340_s0  ;;  %v10748_v34 = vand.u32 4294901760, %v4607_v38  ;;  %v10750_v28 = vand.u32 4294901760, %v4606_v43 }
 0x618   : > { %4523 = vrot.lane.b32.xlu2 %v4473_v6, %s7343_s17  ;;  %v10755_v6 = vand.u32 4294901760, %v4605_v60 }
 0x619   : > { %v10765_v23 = vsub.f32 %v4607_v38, %v10748_v34  ;;  %v10768_v63 = vsub.f32 %v4606_v43, %v10750_v28  ;;  %v4767_v43 = vand.u32 4294901760, %v4766_v29  ;;  %4887 = vmatpush.msra.mxu3 %v10748_v34  ;;  %4691 = vmatpush.msra.mxu0 %v10748_v34 }
 0x61a   : > { %v10780_v44 = vsub.f32 %v4605_v60, %v10755_v6  ;;  %v10810_v60 = vsub.f32 %v4603_v19, %v10782_v50  ;;  %v12724_v19 = vand.u32 4294901760, %v10795_v47 }
 0x61b   : > { %v12723_v0 = vand.u32 4294901760, %v10765_v23  ;;  %4768 = vmatpush.msra.mxu1 %v4767_v43  ;;  %4845 = vmatpush.msra.mxu2 %v10765_v23  ;;  %v13191_v9 = vand.u32 4294901760, %v10765_v23 }
 0x61c   : > { %v12725_v51 = vand.u32 4294901760, %v10780_v44  ;;  %4889 = vmatpush.msra.mxu3 %v10750_v28  ;;  %4693 = vmatpush.msra.mxu0 %v10750_v28  ;;  %v13193_v42 = vand.u32 4294901760, %v10780_v44 }
 0x61d   : > { %v4778_v45 = vsub.f32 %v10765_v23, %v12723_v0  ;;  %v10844_v0 = vand.u32 4294901760, %v4631_v32  ;;  %4848 = vmatpush.msra.mxu2 %v10768_v63  ;;  %v13194_v23 = vand.u32 4294901760, %v10795_v47 }
 0x61e   : > { %v4790_v49 = vsub.f32 %v10780_v44, %v12725_v51  ;;  %v4486_v51 = vld [vmem:[#allocation3 + $0x21] sm:$0x1]  ;;  %4891 = vmatpush.msra.mxu3 %v10755_v6  ;;  %4695 = vmatpush.msra.mxu0 %v10755_v6 }
 0x61f   : > { %4527 = vrot.lane.b32.xlu0 %v4474_v57, %s7341_s1  ;;  %4531 = vrot.lane.b32.xlu1 %v4475_v39, %s7344_s20  ;;  %v4634_v57 = vld [vmem:[%s12440_s5 + $0xf8] sm:$0xff]  ;;  %v4481_v39 = vld [vmem:[#allocation3 + $0x1a] sm:$0x1] }
 0x620   : > { %4535 = vrot.lane.b32.xlu2 %v4476_v3, %s7342_s2  ;;  %v12722_v3 = vand.u32 4294901760, %v10768_v63  ;;  %v10802_v38 = vand.u32 4294901760, %v4634_v57  ;;  %4851 = vmatpush.msra.mxu2 %v10780_v44 }
 0x621   : > { %4893 = vmatpush.msra.mxu3 %v10770_v52  ;;  %4697 = vmatpush.msra.mxu0 %v10770_v52 }
 0x622   : > { %v10830_v29 = vsub.f32 %v4634_v57, %v10802_v38  ;;  %v10842_v57 = vsub.f32 %v4633_v40, %v10817_v54  ;;  %v4791_v40 = vand.u32 4294901760, %v4790_v49  ;;  %4854 = vmatpush.msra.mxu2 %v10795_v47 }
 0x623   : > { %4895 = vmatpush.msra.mxu3 %v10782_v50  ;;  %4699 = vmatpush.msra.mxu0 %v10782_v50 }
 0x624   : > { %4857 = vmatpush.msra.mxu2 %v10810_v60 }
 0x625   : > { %4906 = vmatpush.msrb.mxu0 %v4711_v14 }
 0x626   : > { %5010 = vmatpush.msrb.mxu2 %v10802_v38 }
 0x627   : > { %4539 = vrot.lane.b32.xlu0 %v4477_v24, %s7345_s30  ;;  %4543 = vrot.lane.b32.xlu1 %v4479_v41, %s7346_s12  ;;  %v4773_v24 = vand.u32 4294901760, %v4772_v2  ;;  %v4784_v41 = vsub.f32 %v10768_v63, %v12722_v3  ;;  %v12726_v2 = vand.u32 4294901760, %v10810_v60  ;;  %v4485_v3 = vld [vmem:[#allocation3 + $0x20] sm:$0x1] }
 0x628   : > { %4568 = vrot.lane.b32.xlu2 %v4481_v39, %s7340_s0  ;;  %v4779_v39 = vand.u32 4294901760, %v4778_v45  ;;  %v4796_v45 = vsub.f32 %v10795_v47, %v12724_v19  ;;  %v10864_v19 = vsub.f32 %v4631_v32, %v10844_v0  ;;  %v4488_v32 = vld [vmem:[#allocation3 + $0x23] sm:$0x1]  ;;  %5012 = vmatpush.msrb.mxu2 %v10817_v54  ;;  %v4622_v47 = vld [vmem:[%s12440_s5 + $0x98] sm:$0xff]  ;;  %s6760_s0 = scalar_lea.hbm %s12446_s11, %s7428_s21 }
 0x629   : > { %4774 = vmatpush.msra.mxu1 %v4773_v24  ;;  %v4785_v43 = vand.u32 4294901760, %v4784_v41  ;;  %v4802_v24 = vsub.f32 %v10810_v60, %v12726_v2  ;;  %v5058_v41 = vand.u32 4294901760, %v10842_v57  ;;  %4910 = vmatpush.msrb.mxu0 %v4717_v7  ;;  %v10949_v7 = vand.u32 4294901760, %v4628_v26 }
 0x62a   : > { %5014 = vmatpush.msrb.mxu2 %v10832_v17 }
 0x62b   : > { %4780 = vmatpush.msra.mxu1 %v4779_v39  ;;  %v4797_v39 = vand.u32 4294901760, %v4796_v45  ;;  %v4803_v2 = vand.u32 4294901760, %v4802_v24  ;;  %v5070_v45 = vand.u32 4294901760, %v10864_v19  ;;  %4914 = vmatpush.msrb.mxu0 %v4723_v4  ;;  %v10968_v56 = vsub.f32 %v4628_v26, %v10949_v7 }
 0x62c   : > { %5016 = vmatpush.msrb.mxu2 %v10844_v0 }
 0x62d   : > { %4786 = vmatpush.msra.mxu1 %v4785_v43  ;;  %v5059_v43 = vsub.f32 %v10842_v57, %v5058_v41  ;;  %4918 = vmatpush.msrb.mxu0 %v4729_v20  ;;  %v13192_v20 = vand.u32 4294901760, %v10768_v63 }
 0x62f   : > { %4572 = vrot.lane.b32.xlu0 %v4482_v48, %s7343_s17  ;;  %4576 = vrot.lane.b32.xlu1 %v4483_v33, %s7341_s1  ;;  %v5052_v48 = vand.u32 4294901760, %v10830_v29  ;;  %v10854_v33 = vsub.f32 %v4632_v10, %v10832_v17  ;;  %v4487_v10 = vld [vmem:[#allocation3 + $0x22] sm:$0x1]  ;;  %v5060_v24 = vand.u32 4294901760, %v5059_v43  ;;  %s6764_s1 = sshll.u32 %s6760_s0, 4  ;;  %s6765_s1 = int_to_ptr.hbm [resolvable:$true] %s6764_s1 }
 0x630   : > { %4580 = vrot.lane.b32.xlu2 %v4485_v3, %s7344_s20  ;;  %4792 = vmatpush.msra.mxu1 %v4791_v40  ;;  %s7241_s20 = sshra.s32 %s6765_s1, 4  ;;  %s7242_s20 = int_to_ptr.hbm [resolvable:$true] %s7241_s20 }
 0x631   : > { %v5053_v3 = vsub.f32 %v10830_v29, %v5052_v48  ;;  %v5064_v49 = vand.u32 4294901760, %v10854_v33  ;;  %4922 = vmatpush.msrb.mxu0 %v4735_v15  ;;  %p7248_p2 = scmp.lt.s32.totalorder %s7242_s20, %s12446_s11 }
 0x632   : > { %4798 = vmatpush.msra.mxu1 %v4797_v39 }
 0x633   : > { %v5054_v40 = vand.u32 4294901760, %v5053_v3  ;;  %4926 = vmatpush.msrb.mxu0 %v4741_v61 }
 0x634   : > { %4804 = vmatpush.msra.mxu1 %v4803_v2 }
 0x635   : > { %5055 = vmatpush.msrb.mxu3 %v5054_v40  ;;  %4930 = vmatpush.msrb.mxu0 %v4747_v11  ;;  %v10996_v11 = vand.u32 4294901760, %v4625_v53 }
 0x636   : > { %4973 = vmatpush.msrb.mxu1 %v10595_v27  ;;  %v4630_v27 = vld [vmem:[%s12440_s5 + $0xd8] sm:$0xff] }
 0x637   : > { %4584 = vrot.lane.b32.xlu0 %v4486_v51, %s7342_s2  ;;  %4588 = vrot.lane.b32.xlu1 %v4487_v10, %s7345_s30  ;;  %v5065_v51 = vsub.f32 %v10854_v33, %v5064_v49  ;;  %v5071_v10 = vsub.f32 %v10864_v19, %v5070_v45  ;;  %s13219_s2 = sand.u32 1, %s7289_s18   ;;  %s7243_s30 = scalar_lea.hbm %s7242_s20, 1 }
 0x638   : > { %4592 = vrot.lane.b32.xlu2 %v4488_v32, %s7346_s12  ;;  %4975 = vmatpush.msrb.mxu1 %v10597_v37  ;;  %v10908_v37 = vand.u32 4294901760, %v4630_v27  ;;  %v13195_v32 = vand.u32 4294901760, %v10810_v60  ;;  %v4621_v60 = vld [vmem:[%s12440_s5 + $0x90] sm:$0xff]  ;;  %s6752_s17 = scalar_lea.sflag [#allocation6], %s13219_s2  ;;  %p7244_p13 = scmp.ne.s32.totalorder %s7242_s20, %s7243_s30 }
 0x639   : > { %v5066_v39 = vand.u32 4294901760, %v5065_v51  ;;  %5061 = vmatpush.msrb.mxu3 %v5060_v24  ;;  %v5072_v2 = vand.u32 4294901760, %v5071_v10  ;;  %4934 = vmatpush.msrb.mxu0 %v4753_v21  ;;  %v4624_v21 = vld [vmem:[%s12440_s5 + $0xa8] sm:$0xff]  ;;  %v11042_v51 = vand.u32 4294901760, %v4622_v47  ;;  %p7249_p3 = scmp.lt.s32.totalorder %s7247_s14, %s7243_s30 }
 0x63a   : > { %4977 = vmatpush.msrb.mxu1 %v10602_v18  ;;  %5018 = vmatpush.msrb.mxu2 %v10908_v37  ;;  %v4629_v18 = vld [vmem:[%s12440_s5 + $0xd0] sm:$0xff]  ;;  %v10939_v58 = vsub.f32 %v4630_v27, %v10908_v37  ;;  %p7245_p0 = pnand %p7244_p13, %p7445_p5 }
 0x63b   : > { %5067 = vmatpush.msrb.mxu3 %v5066_v39  ;;  %4938 = vmatpush.msrb.mxu0 %v4759_v55  ;;  %v10936_v1 = vand.u32 4294901760, %v4629_v18  ;;  %v11058_v26 = vsub.f32 %v4622_v47, %v11042_v51  ;;  %p7250_p4 = por %p7249_p3, %p7248_p2 }
 0x63c   : > { %4979 = vmatpush.msrb.mxu1 %v10641_v22  ;;  %v5076_v14 = vand.u32 4294901760, %v10939_v58  ;;  %v4627_v22 = vld [vmem:[%s12440_s5 + $0xc0] sm:$0xff]  ;;  %p7246_p1 = pneg %p7245_p0 }
 0x63d   : > { %5073 = vmatpush.msrb.mxu3 %v5072_v2  ;;  %4942 = vmatpush.msrb.mxu0 %v4765_v35  ;;  %v10952_v4 = vsub.f32 %v4629_v18, %v10936_v1  ;;  %v11008_v35 = vand.u32 4294901760, %v4624_v21  ;;  %v11055_v18 = vand.u32 4294901760, %v4621_v60 }
 0x63e   : > { %4981 = vmatpush.msrb.mxu1 %v10644_v13  ;;  %5020 = vmatpush.msrb.mxu2 %v10936_v1  ;;  %v5077_v13 = vsub.f32 %v10939_v58, %v5076_v14  ;;  %p7251_p7 = pnand %p7250_p4, %p7246_p1 }
 0x63f   : > { %4946 = vmatpush.msrb.mxu0 %v4771_v46  ;;  %v11027_v44 = vsub.f32 %v4624_v21, %v11008_v35 }
 0x640   : > { %4983 = vmatpush.msrb.mxu1 %v10653_v12  ;;  %5022 = vmatpush.msrb.mxu2 %v10949_v7  ;;  %v5082_v12 = vand.u32 4294901760, %v10952_v4  ;;  %v5078_v25 = vand.u32 4294901760, %v5077_v13 }
 0x641   : > { %4950 = vmatpush.msrb.mxu0 %v13191_v9  ;;  %v5112_v40 = vand.u32 4294901760, %v11027_v44 }
 0x642   : > { %4985 = vmatpush.msrb.mxu1 %v10655_v8  ;;  %v10965_v8 = vand.u32 4294901760, %v4627_v22  ;;  %v5083_v30 = vsub.f32 %v10952_v4, %v5082_v12  ;;  %5079 = vmatpush.msrb.mxu3 %v5078_v25  ;;  %v5124_v25 = vand.u32 4294901760, %v11058_v26 }
 0x643   : > { %4954 = vmatpush.msrb.mxu0 %v13192_v20  ;;  %v5113_v27 = vsub.f32 %v11027_v44, %v5112_v40 }
 0x644   : > { %4987 = vmatpush.msrb.mxu1 %v10667_v59  ;;  %v4626_v59 = vld [vmem:[%s12440_s5 + $0xb8] sm:$0xff]  ;;  %5024 = vmatpush.msrb.mxu2 %v10965_v8  ;;  %v10986_v15 = vsub.f32 %v4627_v22, %v10965_v8  ;;  %v4620_v22 = vld [vmem:[%s12440_s5 + $0x88] sm:$0xff] }
 0x645   : > { %4958 = vmatpush.msrb.mxu0 %v13193_v42  ;;  %v5114_v13 = vand.u32 4294901760, %v5113_v27 }
 0x646   : > { %4989 = vmatpush.msrb.mxu1 %v10686_v62  ;;  %v5088_v62 = vand.u32 4294901760, %v10968_v56  ;;  %v5094_v36 = vand.u32 4294901760, %v10986_v15 }
 0x647   : > { %4962 = vmatpush.msrb.mxu0 %v13194_v23 }
 0x648   : > { %4991 = vmatpush.msrb.mxu1 %v10688_v5  ;;  %v10981_v5 = vand.u32 4294901760, %v4626_v59  ;;  %v5089_v61 = vsub.f32 %v10968_v56, %v5088_v62 }
 0x649   : > { %4966 = vmatpush.msrb.mxu0 %v13195_v32 }
 0x64a   : > { %4993 = vmatpush.msrb.mxu1 %v10696_v16  ;;  %v5084_v16 = vand.u32 4294901760, %v5083_v30  ;;  %5026 = vmatpush.msrb.mxu2 %v10981_v5  ;;  %v11000_v31 = vsub.f32 %v4626_v59, %v10981_v5  ;;  %v5090_v55 = vand.u32 4294901760, %v5089_v61  ;;  %v11067_v59 = vand.u32 4294901760, %v4620_v22 }
 0x64b   : > { %v11071_v30 = vsub.f32 %v4621_v60, %v11055_v18 }
 0x64c   : > { %4995 = vmatpush.msrb.mxu1 %v10748_v34  ;;  %5085 = vmatpush.msrb.mxu3 %v5084_v16  ;;  %v11011_v34 = vsub.f32 %v4625_v53, %v10996_v11  ;;  %v5100_v46 = vand.u32 4294901760, %v11000_v31  ;;  %v4619_v53 = vld [vmem:[%s12440_s5 + $0x80] sm:$0xff]  ;;  %v5125_v16 = vsub.f32 %v11058_v26, %v5124_v25  ;;  %v11084_v42 = vsub.f32 %v4620_v22, %v11067_v59  ;;  %v4461_v22 = vld [vmem:[#allocation3] sm:$0x1] }
 0x64d   : > { %5028 = vmatpush.msrb.mxu2 %v10996_v11  ;;  %v5130_v61 = vand.u32 4294901760, %v11071_v30  ;;  %v11081_v21 = vand.u32 4294901760, %v4619_v53 }
 0x64e   : > { %4997 = vmatpush.msrb.mxu1 %v10750_v28  ;;  %v5095_v28 = vsub.f32 %v10986_v15, %v5094_v36  ;;  %5091 = vmatpush.msrb.mxu3 %v5090_v55  ;;  %v5106_v63 = vand.u32 4294901760, %v11011_v34  ;;  %v5101_v3 = vsub.f32 %v11000_v31, %v5100_v46  ;;  %v5126_v55 = vand.u32 4294901760, %v5125_v16 }
 0x64f   : > { %5030 = vmatpush.msrb.mxu2 %v11008_v35  ;;  %v11092_v23 = vsub.f32 %v4619_v53, %v11081_v21 }
 0x650   : > { %4999 = vmatpush.msrb.mxu1 %v10755_v6  ;;  %v4623_v6 = vld [vmem:[%s12440_s5 + $0xa0] sm:$0xff]  ;;  %v5107_v43 = vsub.f32 %v11011_v34, %v5106_v63  ;;  %v5102_v10 = vand.u32 4294901760, %v5101_v3 }
 0x651   : > { %v12727_v47 = vand.u32 4294901760, %v11092_v23 }
 0x652   : > { %5001 = vmatpush.msrb.mxu1 %v10770_v52  ;;  %v11024_v52 = vand.u32 4294901760, %v4623_v6  ;;  %v5108_v39 = vand.u32 4294901760, %v5107_v43 }
 0x653   : > { %v5143_v43 = vsub.f32 %v11092_v23, %v12727_v47 }
 0x654   : > { %5003 = vmatpush.msrb.mxu1 %v10782_v50  ;;  %v5096_v50 = vand.u32 4294901760, %v5095_v28  ;;  %5032 = vmatpush.msrb.mxu2 %v11024_v52  ;;  %v11045_v24 = vsub.f32 %v4623_v6, %v11024_v52  ;;  %v5131_v28 = vsub.f32 %v11071_v30, %v5130_v61  ;;  %v5136_v6 = vand.u32 4294901760, %v11084_v42 }
 0x656   : > { %5097 = vmatpush.msrb.mxu3 %v5096_v50  ;;  %5034 = vmatpush.msrb.mxu2 %v11042_v51  ;;  %v5118_v2 = vand.u32 4294901760, %v11045_v24  ;;  %v5132_v50 = vand.u32 4294901760, %v5131_v28  ;;  %v5137_v3 = vsub.f32 %v11084_v42, %v5136_v6 }
 0x658   : > { %5103 = vmatpush.msrb.mxu3 %v5102_v10  ;;  %v5119_v9 = vsub.f32 %v11045_v24, %v5118_v2  ;;  %5036 = vmatpush.msrb.mxu2 %v11055_v18  ;;  %v5138_v32 = vand.u32 4294901760, %v5137_v3  ;;  %v5144_v10 = vand.u32 4294901760, %v5143_v43  ;;  %v4470_v43 = vld [vmem:[#allocation3 + $0xb] sm:$0x1] }
 0x65a   : > { %5109 = vmatpush.msrb.mxu3 %v5108_v39  ;;  %v5120_v20 = vand.u32 4294901760, %v5119_v9  ;;  %5038 = vmatpush.msrb.mxu2 %v11067_v59 }
 0x65c   : > { %5115 = vmatpush.msrb.mxu3 %v5114_v13  ;;  %5040 = vmatpush.msrb.mxu2 %v11081_v21 }
 0x65e   : > { %5121 = vmatpush.msrb.mxu3 %v5120_v20 }
 0x660   : > { %5127 = vmatpush.msrb.mxu3 %v5126_v55 }
 0x662   : > { %5133 = vmatpush.msrb.mxu3 %v5132_v50  ;;  %v4508_v60 = vpop.permute.xlu2 %4507 }
 0x664   : > { %5139 = vmatpush.msrb.mxu3 %v5138_v32 }
 0x666   : > { %5145 = vmatpush.msrb.mxu3 %v5144_v10 }
 0x66a   : > { %v4512_v16 = vpop.permute.xlu2 %4511 }
 0x679   : > { %v4492_v39 = vpop.permute.xlu0 %4491  ;;  %v4500_v27 = vpop.permute.xlu1 %4499 }
 0x67a   : > { %v4547_v13 = vsel %vm4546_vm1, %v4461_v22, %v4492_v39  ;;  %v4524_v22 = vpop.permute.xlu2 %4523 }
 0x681   : > { %v4496_v9 = vpop.permute.xlu0 %4495  ;;  %v4504_v20 = vpop.permute.xlu1 %4503 }
 0x682   : > { %v4549_v53 = vsel %vm4548_vm3, %v4547_v13, %v4496_v9 }
 0x683   : > { %v4551_v55 = vsel %vm1017_vm15, %v4549_v53, %v4500_v27 }
 0x684   : > { %v4553_v28 = vsel %vm4552_vm5, %v4551_v55, %v4504_v20 }
 0x685   : > { %v4555_v50 = vsel %vm4554_vm7, %v4553_v28, %v4508_v60 }
 0x686   : > { %v4557_v3 = vsel %vm2721_vm14, %v4555_v50, %v4512_v16 }
 0x689   : > { %v4516_v32 = vpop.permute.xlu0 %4515  ;;  %v4520_v10 = vpop.permute.xlu1 %4519 }
 0x68a   : > { %v4559_v39 = vsel %vm4558_vm9, %v4557_v3, %v4516_v32  ;;  %v4560_v13 = vsel %vm4546_vm1, %v4470_v43, %v4520_v10 }
 0x68b   : > { %v4700_v47 = vand.u32 4294901760, %v4559_v39  ;;  %v4561_v27 = vsel %vm4548_vm3, %v4560_v13, %v4524_v22 }
 0x68d   : > { %v4701_v9 = vsub.f32 %v4559_v39, %v4700_v47  ;;  %4806 = vmatmul.f32.vlgmr.msra.gmra.mxu1 %v4700_v47  ;;  %v4645_v39 = vld [vmem:[%s12440_s5 + $0x150] sm:$0xff] }
 0x68e   : > { %5206 = vmatpush.msra.mxu1 %v10802_v38 }
 0x68f   : > { %4860 = vmatmul.f32.vlgmr.msra.gmra.mxu2 %v4701_v9  ;;  %v4702_v60 = vand.u32 4294901760, %v4701_v9 }
 0x690   : > { %5208 = vmatpush.msra.mxu1 %v10817_v54  ;;  %5247 = vmatpush.msra.mxu2 %v5052_v48  ;;  %v4536_v48 = vpop.permute.xlu2 %4535 }
 0x691   : > { %v4528_v20 = vpop.permute.xlu0 %4527  ;;  %4899 = vmatmul.f32.vlgmr.msra.gmra.mxu3 %v4702_v60  ;;  %v4532_v53 = vpop.permute.xlu1 %4531  ;;  %v4703_v16 = vsub.f32 %v4701_v9, %v4702_v60 }
 0x692   : > { %v4562_v55 = vsel %vm1017_vm15, %v4561_v27, %v4528_v20  ;;  %5210 = vmatpush.msra.mxu1 %v10832_v17  ;;  %5251 = vmatpush.msra.mxu2 %v5058_v41  ;;  %v11227_v20 = vand.u32 4294901760, %v4645_v39 }
 0x693   : > { %5314 = vmatpush.msra.mxu3 %v10802_v38  ;;  %v4704_v28 = vand.u32 4294901760, %v4703_v16  ;;  %v4563_v50 = vsel %vm4552_vm5, %v4562_v55, %v4532_v53  ;;  %v4643_v53 = vld [vmem:[%s12440_s5 + $0x140] sm:$0xff] }
 0x694   : > { %5212 = vmatpush.msra.mxu1 %v10844_v0  ;;  %5255 = vmatpush.msra.mxu2 %v5064_v49  ;;  %v4564_v38 = vsel %vm4554_vm7, %v4563_v50, %v4536_v48  ;;  %v11247_v55 = vand.u32 4294901760, %v4643_v53  ;;  %v11260_v48 = vsub.f32 %v4645_v39, %v11227_v20 }
 0x695   : > { %5316 = vmatpush.msra.mxu3 %v10817_v54  ;;  %4705 = vmatmul.f32.vlgmr.msra.gmra.mxu0 %v4704_v28 }
 0x696   : > { %5005 = vmatmul.f32.vlgmr.msrb.gmra.mxu1 %v4700_v47  ;;  %5153 = vmatpush.msra.mxu0 %v10830_v29  ;;  %v4650_v29 = vld [vmem:[%s12440_s5 + $0x178] sm:$0xff] }
 0x697   : > { %5214 = vmatpush.msra.mxu1 %v10908_v37  ;;  %5259 = vmatpush.msra.mxu2 %v5070_v45  ;;  %v11148_v45 = vand.u32 4294901760, %v4650_v29 }
 0x698   : > { %5318 = vmatpush.msra.mxu3 %v10832_v17  ;;  %5156 = vmatpush.msra.mxu0 %v10842_v57 }
 0x699   : > { %5216 = vmatpush.msra.mxu1 %v10936_v1  ;;  %5263 = vmatpush.msra.mxu2 %v5076_v14  ;;  %v4540_v54 = vpop.permute.xlu0 %4539  ;;  %v4544_v41 = vpop.permute.xlu1 %4543  ;;  %v4480_v14 = vld [vmem:[#allocation3 + $0x19] sm:$0x1] }
 0x69a   : > { %5320 = vmatpush.msra.mxu3 %v10844_v0  ;;  %v4565_v49 = vsel %vm2721_vm14, %v4564_v38, %v4540_v54  ;;  %5159 = vmatpush.msra.mxu0 %v10854_v33  ;;  %v4649_v0 = vld [vmem:[%s12440_s5 + $0x170] sm:$0xff]  ;;  %v4569_v33 = vpop.permute.xlu2 %4568 }
 0x69b   : > { %5218 = vmatpush.msra.mxu1 %v10949_v7  ;;  %5267 = vmatpush.msra.mxu2 %v5082_v12  ;;  %v4566_v17 = vsel %vm4558_vm9, %v4565_v49, %v4544_v41 }
 0x69c   : > { %5322 = vmatpush.msra.mxu3 %v10908_v37  ;;  %v11145_v57 = vand.u32 4294901760, %v4566_v17  ;;  %5162 = vmatpush.msra.mxu0 %v10864_v19  ;;  %v4648_v19 = vld [vmem:[%s12440_s5 + $0x168] sm:$0xff]  ;;  %v11165_v37 = vand.u32 4294901760, %v4649_v0 }
 0x69d   : > { %5220 = vmatpush.msra.mxu1 %v10965_v8  ;;  %5271 = vmatpush.msra.mxu2 %v5088_v62  ;;  %v11180_v3 = vand.u32 4294901760, %v4648_v19 }
 0x69e   : > { %v11157_v12 = vsub.f32 %v4566_v17, %v11145_v57  ;;  %5324 = vmatpush.msra.mxu3 %v10936_v1  ;;  %4968 = vmatmul.f32.vlgmr.msrb.gmra.mxu0 %v4700_v47  ;;  %v11172_v1 = vsub.f32 %v4650_v29, %v11148_v45  ;;  %v4647_v47 = vld [vmem:[%s12440_s5 + $0x160] sm:$0xff] }
 0x69f   : > { %5165 = vmatpush.msra.mxu0 %v10939_v58  ;;  %5222 = vmatpush.msra.mxu1 %v10981_v5  ;;  %v4595_v58 = vsel %vm4546_vm1, %v4480_v14, %v4569_v33  ;;  %v11210_v9 = vsub.f32 %v4648_v19, %v11180_v3  ;;  %v11287_v33 = vsub.f32 %v4643_v53, %v11247_v55 }
 0x6a0   : > { %5275 = vmatpush.msra.mxu2 %v5094_v36  ;;  %5326 = vmatpush.msra.mxu3 %v10949_v7  ;;  %v5043_v62 = vand.u32 4294901760, %v11157_v12  ;;  %v4646_v36 = vld [vmem:[%s12440_s5 + $0x158] sm:$0xff]  ;;  %v5393_v10 = vand.u32 4294901760, %v11172_v1 }
 0x6a1   : > { %5168 = vmatpush.msra.mxu0 %v10952_v4  ;;  %5224 = vmatpush.msra.mxu1 %v10996_v11  ;;  %v4573_v32 = vpop.permute.xlu0 %4572  ;;  %v4577_v43 = vpop.permute.xlu1 %4576  ;;  %v11194_v4 = vsub.f32 %v4649_v0, %v11165_v37  ;;  %v11212_v27 = vand.u32 4294901760, %v4646_v36 }
 0x6a2   : > { %5279 = vmatpush.msra.mxu2 %v5100_v46  ;;  %5328 = vmatpush.msra.mxu3 %v10965_v8  ;;  %v5044_v7 = vsub.f32 %v11157_v12, %v5043_v62  ;;  %v11196_v46 = vand.u32 4294901760, %v4647_v47  ;;  %v4596_v8 = vsel %vm4548_vm3, %v4595_v58, %v4573_v32  ;;  %v4581_v22 = vpop.permute.xlu2 %4580  ;;  %v4638_v32 = vld [vmem:[%s12440_s5 + $0x118] sm:$0xff] }
 0x6a3   : > { %5147 = vmatmul.f32.vlgmr.msrb.gmra.mxu3 %v11145_v57  ;;  %5171 = vmatpush.msra.mxu0 %v10968_v56  ;;  %v4597_v56 = vsel %vm1017_vm15, %v4596_v8, %v4577_v43  ;;  %v11243_v16 = vsub.f32 %v4646_v36, %v11212_v27 }
 0x6a4   : > { %5226 = vmatpush.msra.mxu1 %v11008_v35  ;;  %5283 = vmatpush.msra.mxu2 %v5106_v63  ;;  %v5045_v13 = vand.u32 4294901760, %v5044_v7  ;;  %v4644_v63 = vld [vmem:[%s12440_s5 + $0x148] sm:$0xff]  ;;  %v4598_v60 = vsel %vm4552_vm5, %v4597_v56, %v4581_v22 }
 0x6a5   : > { %5330 = vmatpush.msra.mxu3 %v10981_v5  ;;  %5174 = vmatpush.msra.mxu0 %v10986_v15  ;;  %v5399_v5 = vand.u32 4294901760, %v11194_v4  ;;  %v11225_v15 = vsub.f32 %v4647_v47, %v11196_v46  ;;  %v12742_v49 = vand.u32 4294901760, %v11243_v16 }
 0x6a6   : > { %5228 = vmatpush.msra.mxu1 %v11024_v52  ;;  %5287 = vmatpush.msra.mxu2 %v5112_v40  ;;  %v5405_v40 = vand.u32 4294901760, %v11210_v9 }
 0x6a7   : > { %5332 = vmatpush.msra.mxu3 %v10996_v11  ;;  %5177 = vmatpush.msra.mxu0 %v11000_v31  ;;  %v5394_v11 = vsub.f32 %v11172_v1, %v5393_v10  ;;  %v11238_v31 = vand.u32 4294901760, %v4644_v63  ;;  %v5418_v7 = vsub.f32 %v11243_v16, %v12742_v49 }
 0x6a8   : > { %5230 = vmatpush.msra.mxu1 %v11042_v51  ;;  %5291 = vmatpush.msra.mxu2 %v5118_v2  ;;  %v4642_v2 = vld [vmem:[%s12440_s5 + $0x138] sm:$0xff] }
 0x6a9   : > { %5334 = vmatpush.msra.mxu3 %v11008_v35  ;;  %5046 = vmatmul.f32.vlgmr.msrb.gmra.mxu2 %v5045_v13  ;;  %v4585_v28 = vpop.permute.xlu0 %4584  ;;  %v4589_v50 = vpop.permute.xlu1 %4588  ;;  %v5400_v35 = vsub.f32 %v11194_v4, %v5399_v5  ;;  %v5395_v54 = vand.u32 4294901760, %v5394_v11  ;;  %v11279_v17 = vand.u32 4294901760, %v4642_v2  ;;  %v5419_v22 = vand.u32 4294901760, %v5418_v7 }
 0x6aa   : > { %5180 = vmatpush.msra.mxu0 %v11011_v34  ;;  %5232 = vmatpush.msra.mxu1 %v11055_v18  ;;  %v12743_v34 = vand.u32 4294901760, %v11225_v15  ;;  %v4599_v38 = vsel %vm4554_vm7, %v4598_v60, %v4585_v28  ;;  %v4593_v29 = vpop.permute.xlu2 %4592 }
 0x6ab   : > { %5295 = vmatpush.msra.mxu2 %v5124_v25  ;;  %5336 = vmatpush.msra.mxu3 %v11024_v52  ;;  %v11266_v25 = vsub.f32 %v4644_v63, %v11238_v31  ;;  %v4641_v52 = vld [vmem:[%s12440_s5 + $0x130] sm:$0xff]  ;;  %v4600_v41 = vsel %vm2721_vm14, %v4599_v38, %v4589_v50  ;;  %v11314_v36 = vsub.f32 %v4642_v2, %v11279_v17  ;;  %v4635_v50 = vld [vmem:[%s12440_s5 + $0x100] sm:$0xff] }
 0x6ac   : > { %5183 = vmatpush.msra.mxu0 %v11027_v44  ;;  %5234 = vmatpush.msra.mxu1 %v11067_v59  ;;  %v5406_v44 = vsub.f32 %v11210_v9, %v5405_v40  ;;  %v11282_v0 = vsel %vm4558_vm9, %v4600_v41, %v4593_v29  ;;  %v5412_v14 = vsub.f32 %v11225_v15, %v12743_v34  ;;  %v11299_v19 = vand.u32 4294901760, %v4641_v52 }
 0x6ad   : > { %5299 = vmatpush.msra.mxu2 %v5130_v61  ;;  %5338 = vmatpush.msra.mxu3 %v11042_v51  ;;  %v4640_v51 = vld [vmem:[%s12440_s5 + $0x128] sm:$0xff]  ;;  %v5401_v61 = vand.u32 4294901760, %v5400_v35  ;;  %v12738_v47 = vand.u32 4294901760, %v11266_v25  ;;  %v12735_v13 = vand.u32 4294901760, %v11314_v36 }
 0x6ae   : > { %5186 = vmatpush.msra.mxu0 %v11045_v24  ;;  %5236 = vmatpush.msra.mxu1 %v11081_v21  ;;  %v12740_v24 = vand.u32 4294901760, %v11260_v48  ;;  %v5407_v58 = vand.u32 4294901760, %v5406_v44  ;;  %v5413_v43 = vand.u32 4294901760, %v5412_v14  ;;  %v11329_v39 = vsub.f32 %v4641_v52, %v11299_v19 }
 0x6af   : > { %5303 = vmatpush.msra.mxu2 %v5136_v6  ;;  %5340 = vmatpush.msra.mxu3 %v11055_v18  ;;  %v4639_v18 = vld [vmem:[%s12440_s5 + $0x120] sm:$0xff]  ;;  %v13196_v6 = vand.u32 4294901760, %v11092_v23  ;;  %v5430_v56 = vsub.f32 %v11266_v25, %v12738_v47  ;;  %v5442_v35 = vsub.f32 %v11314_v36, %v12735_v13  ;;  %v11388_v44 = vand.u32 4294901760, %v4635_v50  ;;  %v4658_v13 = vld [vmem:[%s12440_s5 + $0x1b8] sm:$0xff] }
 0x6b0   : > { %5240 = vmatmul.f32.vlgmr.msra.gmra.mxu1 %v5043_v62  ;;  %5189 = vmatpush.msra.mxu0 %v11058_v26  ;;  %v11316_v62 = vand.u32 4294901760, %v4640_v51  ;;  %v12737_v26 = vand.u32 4294901760, %v11287_v33  ;;  %v5424_v8 = vsub.f32 %v11260_v48, %v12740_v24  ;;  %v12734_v11 = vand.u32 4294901760, %v11329_v39 }
 0x6b1   : > { %5396 = vmatpush.msrb.mxu1 %v5395_v54  ;;  %5307 = vmatpush.msra.mxu2 %v13196_v6  ;;  %v5431_v28 = vand.u32 4294901760, %v5430_v56  ;;  %v11554_v24 = vand.u32 4294901760, %v4658_v13 }
 0x6b2   : > { %5342 = vmatpush.msra.mxu3 %v11067_v59  ;;  %5309 = vmatmul.f32.vlgmr.msra.gmra.mxu2 %v11145_v57  ;;  %v11331_v59 = vand.u32 4294901760, %v4639_v18  ;;  %v11344_v63 = vsub.f32 %v4640_v51, %v11316_v62  ;;  %v5436_v60 = vsub.f32 %v11287_v33, %v12737_v26  ;;  %v5425_v53 = vand.u32 4294901760, %v5424_v8 }
 0x6b3   : > { %5402 = vmatpush.msrb.mxu1 %v5401_v61  ;;  %5192 = vmatpush.msra.mxu0 %v11071_v30  ;;  %v4637_v30 = vld [vmem:[%s12440_s5 + $0x110] sm:$0xff]  ;;  %v5443_v51 = vand.u32 4294901760, %v5442_v35 }
 0x6b4   : > { %5344 = vmatpush.msra.mxu3 %v11081_v21  ;;  %5494 = vmatpush.msrb.mxu2 %v11172_v1  ;;  %v11346_v21 = vand.u32 4294901760, %v4638_v32  ;;  %v11359_v2 = vsub.f32 %v4639_v18, %v11331_v59  ;;  %v12733_v38 = vand.u32 4294901760, %v11344_v63  ;;  %v5437_v52 = vand.u32 4294901760, %v5436_v60  ;;  %v4665_v35 = vld [vmem:[%s12440_s5 + $0x1f0] sm:$0xff] }
 0x6b5   : > { %5346 = vmatmul.f32.vlgmr.msra.gmra.mxu3 %v11145_v57  ;;  %5408 = vmatpush.msrb.mxu1 %v5407_v58  ;;  %v4636_v57 = vld [vmem:[%s12440_s5 + $0x108] sm:$0xff] }
 0x6b6   : > { %5195 = vmatpush.msra.mxu0 %v11084_v42  ;;  %5497 = vmatpush.msrb.mxu2 %v11194_v4  ;;  %v11361_v42 = vand.u32 4294901760, %v4637_v30  ;;  %v11374_v54 = vsub.f32 %v4638_v32, %v11346_v21  ;;  %v12732_v41 = vand.u32 4294901760, %v11359_v2  ;;  %v5454_v61 = vsub.f32 %v11344_v63, %v12733_v38 }
 0x6b7   : > { %5414 = vmatpush.msrb.mxu1 %v5413_v43  ;;  %5547 = vmatpush.msrb.mxu3 %v11148_v45  ;;  %v11408_v32 = vsub.f32 %v4635_v50, %v11388_v44 }
 0x6b8   : > { %5198 = vmatpush.msra.mxu0 %v11092_v23  ;;  %5500 = vmatpush.msrb.mxu2 %v11210_v9  ;;  %v11376_v23 = vand.u32 4294901760, %v4636_v57  ;;  %v11386_v29 = vsub.f32 %v4637_v30, %v11361_v42  ;;  %v12731_v14 = vand.u32 4294901760, %v11374_v54  ;;  %v5460_v58 = vsub.f32 %v11359_v2, %v12732_v41  ;;  %v4659_v41 = vld [vmem:[%s12440_s5 + $0x1c0] sm:$0xff] }
 0x6b9   : > { %5201 = vmatmul.f32.vlgmr.msra.gmra.mxu0 %v11157_v12  ;;  %5420 = vmatpush.msrb.mxu1 %v5419_v22  ;;  %v5448_v12 = vsub.f32 %v11329_v39, %v12734_v11  ;;  %v5455_v43 = vand.u32 4294901760, %v5454_v61  ;;  %v12728_v60 = vand.u32 4294901760, %v11408_v32  ;;  %v4664_v61 = vld [vmem:[%s12440_s5 + $0x1e8] sm:$0xff] }
 0x6ba   : > { %5351 = vmatpush.msrb.mxu0 %v11148_v45  ;;  %5549 = vmatpush.msrb.mxu3 %v11165_v37  ;;  %v11398_v18 = vsub.f32 %v4636_v57, %v11376_v23  ;;  %v12730_v7 = vand.u32 4294901760, %v11386_v29  ;;  %v5466_v8 = vsub.f32 %v11374_v54, %v12731_v14  ;;  %v5461_v30 = vand.u32 4294901760, %v5460_v58  ;;  %v4666_v57 = vld [vmem:[%s12440_s5 + $0x1f8] sm:$0xff] }
 0x6bb   : > { %5426 = vmatpush.msrb.mxu1 %v5425_v53  ;;  %5503 = vmatpush.msrb.mxu2 %v11225_v15  ;;  %v5449_v6 = vand.u32 4294901760, %v5448_v12  ;;  %v5484_v12 = vsub.f32 %v11408_v32, %v12728_v60 }
 0x6bc   : > { %5353 = vmatpush.msrb.mxu0 %v11165_v37  ;;  %5551 = vmatpush.msrb.mxu3 %v11180_v3  ;;  %v12729_v56 = vand.u32 4294901760, %v11398_v18  ;;  %v5472_v22 = vsub.f32 %v11386_v29, %v12730_v7  ;;  %v5467_v53 = vand.u32 4294901760, %v5466_v8  ;;  %v4663_v8 = vld [vmem:[%s12440_s5 + $0x1e0] sm:$0xff] }
 0x6bd   : > { %5432 = vmatpush.msrb.mxu1 %v5431_v28  ;;  %5506 = vmatpush.msrb.mxu2 %v11243_v16  ;;  %v11431_v28 = vand.u32 4294901760, %v11282_v0 }
 0x6be   : > { %5355 = vmatpush.msrb.mxu0 %v11180_v3  ;;  %5553 = vmatpush.msrb.mxu3 %v11196_v46  ;;  %v5478_v50 = vsub.f32 %v11398_v18, %v12729_v56  ;;  %v4660_v56 = vld [vmem:[%s12440_s5 + $0x1c8] sm:$0xff] }
 0x6bf   : > { %5438 = vmatpush.msrb.mxu1 %v5437_v52  ;;  %5509 = vmatpush.msrb.mxu2 %v11260_v48  ;;  %v5473_v52 = vand.u32 4294901760, %v5472_v22 }
 0x6c0   : > { %5357 = vmatpush.msrb.mxu0 %v11196_v46  ;;  %5555 = vmatpush.msrb.mxu3 %v11212_v27  ;;  %v5479_v58 = vand.u32 4294901760, %v5478_v50 }
 0x6c1   : > { %5444 = vmatpush.msrb.mxu1 %v5443_v51  ;;  %5512 = vmatpush.msrb.mxu2 %v11266_v25  ;;  %v11445_v51 = vand.u32 4294901760, %v4666_v57 }
 0x6c2   : > { %5359 = vmatpush.msrb.mxu0 %v11212_v27  ;;  %5557 = vmatpush.msrb.mxu3 %v11227_v20 }
 0x6c3   : > { %5450 = vmatpush.msrb.mxu1 %v5449_v6  ;;  %5515 = vmatpush.msrb.mxu2 %v11287_v33  ;;  %v11455_v6 = vsub.f32 %v11282_v0, %v11431_v28  ;;  %v11466_v22 = vsub.f32 %v4666_v57, %v11445_v51  ;;  %v11468_v0 = vand.u32 4294901760, %v4664_v61  ;;  %v11480_v57 = vand.u32 4294901760, %v4663_v8 }
 0x6c4   : > { %5361 = vmatpush.msrb.mxu0 %v11227_v20  ;;  %5559 = vmatpush.msrb.mxu3 %v11238_v31 }
 0x6c5   : > { %5456 = vmatpush.msrb.mxu1 %v5455_v43  ;;  %5518 = vmatpush.msrb.mxu2 %v11314_v36  ;;  %v11457_v43 = vand.u32 4294901760, %v4665_v35  ;;  %v5384_v50 = vand.u32 4294901760, %v11455_v6  ;;  %v11490_v60 = vsub.f32 %v4664_v61, %v11468_v0  ;;  %v11504_v61 = vsub.f32 %v4663_v8, %v11480_v57 }
 0x6c6   : > { %5363 = vmatpush.msrb.mxu0 %v11238_v31  ;;  %5561 = vmatpush.msrb.mxu3 %v11247_v55 }
 0x6c7   : > { %5462 = vmatpush.msrb.mxu1 %v5461_v30  ;;  %5521 = vmatpush.msrb.mxu2 %v11329_v39  ;;  %v5485_v30 = vand.u32 4294901760, %v5484_v12  ;;  %v4661_v12 = vld [vmem:[%s12440_s5 + $0x1d0] sm:$0xff]  ;;  %v5385_v7 = vsub.f32 %v11455_v6, %v5384_v50  ;;  %v12741_v38 = vand.u32 4294901760, %v11490_v60  ;;  %v12749_v26 = vand.u32 4294901760, %v11504_v61 }
 0x6c8   : > { %5365 = vmatpush.msrb.mxu0 %v11247_v55  ;;  %5563 = vmatpush.msrb.mxu3 %v11279_v17  ;;  %v11506_v14 = vand.u32 4294901760, %v4661_v12 }
 0x6c9   : > { %5468 = vmatpush.msrb.mxu1 %v5467_v53  ;;  %5524 = vmatpush.msrb.mxu2 %v11344_v63  ;;  %v4662_v53 = vld [vmem:[%s12440_s5 + $0x1d8] sm:$0xff] }
 0x6ca   : > { %5367 = vmatpush.msrb.mxu0 %v11279_v17  ;;  %5565 = vmatpush.msrb.mxu3 %v11299_v19  ;;  %v11538_v47 = vsub.f32 %v4661_v12, %v11506_v14  ;;  %v5747_v12 = vsub.f32 %v11490_v60, %v12741_v38  ;;  %v5753_v38 = vsub.f32 %v11504_v61, %v12749_v26 }
 0x6cb   : > { %5474 = vmatpush.msrb.mxu1 %v5473_v52  ;;  %5527 = vmatpush.msrb.mxu2 %v11359_v2  ;;  %v11478_v52 = vsub.f32 %v4665_v35, %v11457_v43  ;;  %v11492_v35 = vand.u32 4294901760, %v4662_v53 }
 0x6cc   : > { %5369 = vmatpush.msrb.mxu0 %v11299_v19  ;;  %5567 = vmatpush.msrb.mxu3 %v11316_v62  ;;  %v12745_v49 = vand.u32 4294901760, %v11538_v47 }
 0x6cd   : > { %5480 = vmatpush.msrb.mxu1 %v5479_v58  ;;  %5530 = vmatpush.msrb.mxu2 %v11374_v54  ;;  %v12736_v58 = vand.u32 4294901760, %v11466_v22  ;;  %v11522_v11 = vsub.f32 %v4662_v53, %v11492_v35 }
 0x6ce   : > { %5371 = vmatpush.msrb.mxu0 %v11316_v62  ;;  %5569 = vmatpush.msrb.mxu3 %v11331_v59 }
 0x6cf   : > { %5486 = vmatpush.msrb.mxu1 %v5485_v30  ;;  %5533 = vmatpush.msrb.mxu2 %v11386_v29  ;;  %v12739_v30 = vand.u32 4294901760, %v11478_v52  ;;  %v5735_v8 = vsub.f32 %v11466_v22, %v12736_v58  ;;  %v5386_v58 = vand.u32 4294901760, %v5385_v7  ;;  %v4657_v7 = vld [vmem:[%s12440_s5 + $0x1b0] sm:$0xff] }
 0x6d0   : > { %5373 = vmatpush.msrb.mxu0 %v11331_v59  ;;  %5571 = vmatpush.msrb.mxu3 %v11346_v21  ;;  %v11568_v34 = vand.u32 4294901760, %v4657_v7 }
 0x6d1   : > { %5655 = vmatpush.msra.mxu1 %v11148_v45  ;;  %5536 = vmatpush.msrb.mxu2 %v11398_v18  ;;  %v11513_v45 = vand.u32 4294901760, %v4660_v56  ;;  %v5741_v53 = vsub.f32 %v11478_v52, %v12739_v30  ;;  %v12744_v30 = vand.u32 4294901760, %v11522_v11 }
 0x6d2   : > { %5375 = vmatpush.msrb.mxu0 %v11346_v21  ;;  %5573 = vmatpush.msrb.mxu3 %v11361_v42  ;;  %v11598_v4 = vsub.f32 %v4657_v7, %v11568_v34 }
 0x6d3   : > { %5657 = vmatpush.msra.mxu1 %v11165_v37  ;;  %5539 = vmatpush.msrb.mxu2 %v11408_v32  ;;  %v11526_v37 = vand.u32 4294901760, %v4659_v41 }
 0x6d4   : > { %5377 = vmatpush.msrb.mxu0 %v11361_v42  ;;  %5575 = vmatpush.msrb.mxu3 %v11376_v23 }
 0x6d5   : > { %5659 = vmatpush.msra.mxu1 %v11180_v3  ;;  %5542 = vmatmul.f32.vlgmr.msrb.gmra.mxu2 %v11455_v6  ;;  %v11543_v3 = vsub.f32 %v4660_v56, %v11513_v45  ;;  %v5736_v6 = vand.u32 4294901760, %v5735_v8  ;;  %v4656_v56 = vld [vmem:[%s12440_s5 + $0x1a8] sm:$0xff]  ;;  %v5742_v8 = vand.u32 4294901760, %v5741_v53  ;;  %v11582_v53 = vsub.f32 %v4658_v13, %v11554_v24 }
 0x6d6   : > { %5379 = vmatpush.msrb.mxu0 %v11376_v23  ;;  %5692 = vmatpush.msra.mxu2 %v11445_v51  ;;  %v11584_v1 = vand.u32 4294901760, %v4656_v56  ;;  %v5765_v13 = vsub.f32 %v11538_v47, %v12745_v49 }
 0x6d7   : > { %5661 = vmatpush.msra.mxu1 %v11196_v46  ;;  %5577 = vmatpush.msrb.mxu3 %v11388_v44  ;;  %v11558_v46 = vsub.f32 %v4659_v41, %v11526_v37  ;;  %v12746_v41 = vand.u32 4294901760, %v11543_v3 }
 0x6d8   : > { %5381 = vmatpush.msrb.mxu0 %v11388_v44  ;;  %5581 = vmatmul.f32.vlgmr.msrb.gmra.mxu3 %v5384_v50  ;;  %v5748_v50 = vand.u32 4294901760, %v5747_v12  ;;  %v4489_v12 = vld [vmem:[#allocation3 + $0x24] sm:$0x1]  ;;  %v11614_v49 = vsub.f32 %v4656_v56, %v11584_v1  ;;  %v5766_v56 = vand.u32 4294901760, %v5765_v13 }
 0x6d9   : > { %5387 = vmatmul.f32.vlgmr.msrb.gmra.mxu0 %v5386_v58  ;;  %5663 = vmatpush.msra.mxu1 %v11212_v27  ;;  %v4655_v27 = vld [vmem:[%s12440_s5 + $0x1a0] sm:$0xff]  ;;  %v5759_v58 = vsub.f32 %v11522_v11, %v12744_v30  ;;  %v5754_v30 = vand.u32 4294901760, %v5753_v38  ;;  %v4653_v38 = vld [vmem:[%s12440_s5 + $0x190] sm:$0xff] }
 0x6da   : > { %5588 = vmatpush.msra.mxu0 %v5393_v10  ;;  %5694 = vmatpush.msra.mxu2 %v11457_v43  ;;  %v12747_v10 = vand.u32 4294901760, %v11558_v46 }
 0x6db   : > { %5737 = vmatpush.msra.mxu3 %v5736_v6  ;;  %5488 = vmatmul.f32.vlgmr.msrb.gmra.mxu1 %v11431_v28  ;;  %v4654_v6 = vld [vmem:[%s12440_s5 + $0x198] sm:$0xff]  ;;  %v5760_v7 = vand.u32 4294901760, %v5759_v58  ;;  %v5788_v58 = vand.u32 4294901760, %v11598_v4 }
 0x6dc   : > { %5592 = vmatpush.msra.mxu0 %v5399_v5  ;;  %5665 = vmatpush.msra.mxu1 %v11227_v20  ;;  %v11600_v5 = vand.u32 4294901760, %v4655_v27  ;;  %v5771_v20 = vsub.f32 %v11543_v3, %v12746_v41  ;;  %v11616_v9 = vand.u32 4294901760, %v4654_v6  ;;  %v5777_v41 = vsub.f32 %v11558_v46, %v12747_v10  ;;  %v4651_v10 = vld [vmem:[%s12440_s5 + $0x180] sm:$0xff] }
 0x6dd   : > { %5696 = vmatpush.msra.mxu2 %v11468_v0  ;;  %5743 = vmatpush.msra.mxu3 %v5742_v8  ;;  %v12748_v8 = vand.u32 4294901760, %v11582_v53  ;;  %v11664_v26 = vand.u32 4294901760, %v4651_v10 }
 0x6de   : > { %5596 = vmatpush.msra.mxu0 %v5405_v40  ;;  %5667 = vmatpush.msra.mxu1 %v11238_v31  ;;  %v4602_v31 = vsel %vm4546_vm1, %v4489_v12, 0.0  ;;  %v13197_v40 = vand.u32 4294901760, %v11225_v15  ;;  %v11631_v12 = vsub.f32 %v4655_v27, %v11600_v5  ;;  %v11633_v15 = vand.u32 4294901760, %v4653_v38 }
 0x6df   : > { %5698 = vmatpush.msra.mxu2 %v11480_v57  ;;  %5749 = vmatpush.msra.mxu3 %v5748_v50  ;;  %v4652_v50 = vld [vmem:[%s12440_s5 + $0x188] sm:$0xff]  ;;  %v5794_v27 = vand.u32 4294901760, %v11614_v49  ;;  %v11647_v13 = vsub.f32 %v4654_v6, %v11616_v9 }
 0x6e0   : > { %5600 = vmatpush.msra.mxu0 %v13197_v40  ;;  %5669 = vmatpush.msra.mxu1 %v11247_v55  ;;  %v13198_v55 = vand.u32 4294901760, %v11243_v16  ;;  %v5772_v40 = vand.u32 4294901760, %v5771_v20  ;;  %v11649_v16 = vand.u32 4294901760, %v4652_v50  ;;  %v13199_v20 = vand.u32 4294901760, %v11260_v48 }
 0x6e1   : > { %5700 = vmatpush.msra.mxu2 %v11492_v35  ;;  %5755 = vmatpush.msra.mxu3 %v5754_v30  ;;  %v5783_v30 = vsub.f32 %v11582_v53, %v12748_v8  ;;  %v5800_v6 = vand.u32 4294901760, %v11631_v12  ;;  %v11662_v8 = vsub.f32 %v4653_v38, %v11633_v15  ;;  %v13200_v48 = vand.u32 4294901760, %v11266_v25 }
 0x6e2   : > { %5604 = vmatpush.msra.mxu0 %v13198_v55  ;;  %5671 = vmatpush.msra.mxu1 %v11279_v17  ;;  %v11651_v17 = vand.u32 4294901760, %v4602_v31  ;;  %v5778_v55 = vand.u32 4294901760, %v5777_v41  ;;  %v5795_v41 = vsub.f32 %v11614_v49, %v5794_v27  ;;  %v11675_v38 = vsub.f32 %v4652_v50, %v11649_v16 }
 0x6e3   : > { %5702 = vmatpush.msra.mxu2 %v11506_v14  ;;  %5761 = vmatpush.msra.mxu3 %v5760_v7  ;;  %v5789_v7 = vsub.f32 %v11598_v4, %v5788_v58  ;;  %v13201_v25 = vand.u32 4294901760, %v11287_v33  ;;  %v11689_v50 = vsub.f32 %v4651_v10, %v11664_v26 }
 0x6e4   : > { %5608 = vmatpush.msra.mxu0 %v13199_v20  ;;  %5673 = vmatpush.msra.mxu1 %v11299_v19  ;;  %v5784_v19 = vand.u32 4294901760, %v5783_v30  ;;  %v11678_v20 = vsub.f32 %v4602_v31, %v11651_v17  ;;  %v5812_v30 = vand.u32 4294901760, %v11662_v8  ;;  %v13202_v31 = vand.u32 4294901760, %v11314_v36 }
 0x6e5   : > { %5704 = vmatpush.msra.mxu2 %v11513_v45  ;;  %5767 = vmatpush.msra.mxu3 %v5766_v56  ;;  %v5806_v56 = vand.u32 4294901760, %v11647_v13  ;;  %v5796_v33 = vand.u32 4294901760, %v5795_v41  ;;  %v13205_v41 = vand.u32 4294901760, %v11359_v2 }
 0x6e6   : > { %5612 = vmatpush.msra.mxu0 %v13200_v48  ;;  %5675 = vmatpush.msra.mxu1 %v11316_v62  ;;  %v5790_v62 = vand.u32 4294901760, %v5789_v7  ;;  %v13203_v7 = vand.u32 4294901760, %v11329_v39  ;;  %v5725_v36 = vand.u32 4294901760, %v11678_v20  ;;  %v5813_v10 = vsub.f32 %v11662_v8, %v5812_v30 }
 0x6e7   : > { %5706 = vmatpush.msra.mxu2 %v11526_v37  ;;  %5773 = vmatpush.msra.mxu3 %v5772_v40  ;;  %v5801_v40 = vsub.f32 %v11631_v12, %v5800_v6  ;;  %v5824_v48 = vand.u32 4294901760, %v11689_v50 }
 0x6e8   : > { %5616 = vmatpush.msra.mxu0 %v13201_v25  ;;  %5677 = vmatpush.msra.mxu1 %v11331_v59  ;;  %v5807_v59 = vsub.f32 %v11647_v13, %v5806_v56 }
 0x6e9   : > { %5708 = vmatpush.msra.mxu2 %v11554_v24  ;;  %5779 = vmatpush.msra.mxu3 %v5778_v55  ;;  %v5818_v55 = vand.u32 4294901760, %v11675_v38  ;;  %v5825_v25 = vsub.f32 %v11689_v50, %v5824_v48 }
 0x6ea   : > { %5620 = vmatpush.msra.mxu0 %v13202_v31  ;;  %5679 = vmatpush.msra.mxu1 %v11346_v21  ;;  %v5802_v21 = vand.u32 4294901760, %v5801_v40  ;;  %v5808_v39 = vand.u32 4294901760, %v5807_v59 }
 0x6eb   : > { %5710 = vmatpush.msra.mxu2 %v11568_v34  ;;  %5785 = vmatpush.msra.mxu3 %v5784_v19  ;;  %v13204_v19 = vand.u32 4294901760, %v11344_v63  ;;  %v5726_v63 = vsub.f32 %v11678_v20, %v5725_v36  ;;  %v5826_v31 = vand.u32 4294901760, %v5825_v25 }
 0x6ec   : > { %5624 = vmatpush.msra.mxu0 %v13203_v7  ;;  %5681 = vmatpush.msra.mxu1 %v11361_v42  ;;  %v5819_v42 = vsub.f32 %v11675_v38, %v5818_v55 }
 0x6ed   : > { %5712 = vmatpush.msra.mxu2 %v11584_v1  ;;  %5791 = vmatpush.msra.mxu3 %v5790_v62  ;;  %v13206_v62 = vand.u32 4294901760, %v11374_v54  ;;  %v5727_v40 = vand.u32 4294901760, %v5726_v63  ;;  %v13209_v54 = vand.u32 4294901760, %v11408_v32  ;;  %v13212_v32 = vand.u32 4294901760, %v11490_v60 }
 0x6ee   : > { %5628 = vmatpush.msra.mxu0 %v13204_v19  ;;  %5683 = vmatpush.msra.mxu1 %v11376_v23  ;;  %v5814_v23 = vand.u32 4294901760, %v5813_v10  ;;  %v5820_v2 = vand.u32 4294901760, %v5819_v42  ;;  %v6040_v19 = vld [vmem:[%s12442_s7 + $0x38] sm:$0xff] }
 0x6ef   : > { %5714 = vmatpush.msra.mxu2 %v11600_v5  ;;  %5797 = vmatpush.msra.mxu3 %v5796_v33  ;;  %v13208_v33 = vand.u32 4294901760, %v11398_v18  ;;  %v13211_v18 = vand.u32 4294901760, %v11478_v52 }
 0x6f0   : > { %5632 = vmatpush.msra.mxu0 %v13205_v41  ;;  %5685 = vmatpush.msra.mxu1 %v11388_v44  ;;  %v13207_v44 = vand.u32 4294901760, %v11386_v29  ;;  %v13210_v29 = vand.u32 4294901760, %v11466_v22 }
 0x6f1   : > { %5716 = vmatpush.msra.mxu2 %v11616_v9  ;;  %5803 = vmatpush.msra.mxu3 %v5802_v21 }
 0x6f2   : > { %5687 = vmatmul.f32.vlgmr.msra.gmra.mxu1 %v11431_v28  ;;  %5636 = vmatpush.msra.mxu0 %v13206_v62 }
 0x6f3   : > { %5718 = vmatpush.msra.mxu2 %v11633_v15  ;;  %5809 = vmatpush.msra.mxu3 %v5808_v39 }
 0x6f4   : > { %5640 = vmatpush.msra.mxu0 %v13207_v44  ;;  %5888 = vmatpush.msrb.mxu1 %v11445_v51 }
 0x6f5   : > { %5720 = vmatpush.msra.mxu2 %v11649_v16  ;;  %5815 = vmatpush.msra.mxu3 %v5814_v23  ;;  %v11935_v23 = vand.u32 4294901760, %v6040_v19 }
 0x6f6   : > { %5644 = vmatpush.msra.mxu0 %v13208_v33  ;;  %5890 = vmatpush.msrb.mxu1 %v11457_v43 }
 0x6f7   : > { %5722 = vmatpush.msra.mxu2 %v11664_v26  ;;  %5821 = vmatpush.msra.mxu3 %v5820_v2  ;;  %v6039_v2 = vld [vmem:[%s12442_s7 + $0x30] sm:$0xff] }
 0x6f8   : > { %5728 = vmatmul.f32.vlgmr.msra.gmra.mxu2 %v5727_v40  ;;  %5648 = vmatpush.msra.mxu0 %v13209_v54  ;;  %v11954_v54 = vand.u32 4294901760, %v6039_v2 }
 0x6f9   : > { %5929 = vmatpush.msrb.mxu2 %v13210_v29  ;;  %5827 = vmatpush.msra.mxu3 %v5826_v31  ;;  %v11951_v31 = vsub.f32 %v6040_v19, %v11935_v23  ;;  %v6038_v29 = vld [vmem:[%s12442_s7 + $0x28] sm:$0xff] }
 0x6fa   : > { %5650 = vmatmul.f32.vlgmr.msra.gmra.mxu0 %v11431_v28  ;;  %5829 = vmatmul.f32.vlgmr.msra.gmra.mxu3 %v11651_v17  ;;  %v13213_v28 = vand.u32 4294901760, %v11504_v61 }
 0x6fb   : > { %5835 = vmatpush.msrb.mxu0 %v11466_v22  ;;  %5933 = vmatpush.msrb.mxu2 %v13211_v18 }
 0x6fc   : > { %5996 = vmatpush.msrb.mxu3 %v11445_v51  ;;  %5892 = vmatpush.msrb.mxu1 %v11468_v0  ;;  %v13214_v51 = vand.u32 4294901760, %v11522_v11 }
 0x6fd   : > { %5838 = vmatpush.msrb.mxu0 %v11478_v52  ;;  %5937 = vmatpush.msrb.mxu2 %v13212_v32 }
 0x6fe   : > { %5998 = vmatpush.msrb.mxu3 %v11457_v43  ;;  %5894 = vmatpush.msrb.mxu1 %v11480_v57  ;;  %v13216_v43 = vand.u32 4294901760, %v11543_v3 }
 0x6ff   : > { %5841 = vmatpush.msrb.mxu0 %v11490_v60  ;;  %5941 = vmatpush.msrb.mxu2 %v13213_v28  ;;  %v13215_v60 = vand.u32 4294901760, %v11538_v47 }
 0x700   : > { %6000 = vmatpush.msrb.mxu3 %v11468_v0  ;;  %5896 = vmatpush.msrb.mxu1 %v11492_v35  ;;  %v6047_v0 = vld [vmem:[%s12442_s7 + $0x70] sm:$0xff] }
 0x701   : > { %5844 = vmatpush.msrb.mxu0 %v11504_v61  ;;  %5945 = vmatpush.msrb.mxu2 %v13214_v51  ;;  %v11842_v52 = vand.u32 4294901760, %v6047_v0  ;;  %v6141_v51 = vand.u32 4294901760, %v11951_v31 }
 0x702   : > { %6002 = vmatpush.msrb.mxu3 %v11480_v57  ;;  %5898 = vmatpush.msrb.mxu1 %v11506_v14  ;;  %v6046_v57 = vld [vmem:[%s12442_s7 + $0x68] sm:$0xff] }
 0x703   : > { %5847 = vmatpush.msrb.mxu0 %v11522_v11  ;;  %5949 = vmatpush.msrb.mxu2 %v13215_v60  ;;  %v13217_v11 = vand.u32 4294901760, %v11558_v46  ;;  %v11850_v61 = vand.u32 4294901760, %v6046_v57 }
 0x704   : > { %6004 = vmatpush.msrb.mxu3 %v11492_v35  ;;  %5900 = vmatpush.msrb.mxu1 %v11513_v45  ;;  %v11848_v35 = vsub.f32 %v6047_v0, %v11842_v52 }
 0x705   : > { %5850 = vmatpush.msrb.mxu0 %v11538_v47  ;;  %5953 = vmatpush.msrb.mxu2 %v13216_v43  ;;  %v13218_v47 = vand.u32 4294901760, %v11582_v53  ;;  %v11967_v43 = vsub.f32 %v6039_v2, %v11954_v54 }
 0x706   : > { %6006 = vmatpush.msrb.mxu3 %v11506_v14  ;;  %5902 = vmatpush.msrb.mxu1 %v11526_v37 }
 0x707   : > { %5853 = vmatpush.msrb.mxu0 %v11543_v3  ;;  %5957 = vmatpush.msrb.mxu2 %v13217_v11  ;;  %v11859_v3 = vsub.f32 %v6046_v57, %v11850_v61  ;;  %v11969_v11 = vand.u32 4294901760, %v6038_v29  ;;  %v6147_v0 = vand.u32 4294901760, %v11967_v43 }
 0x708   : > { %6008 = vmatpush.msrb.mxu3 %v11513_v45  ;;  %5904 = vmatpush.msrb.mxu1 %v11554_v24  ;;  %v6045_v45 = vld [vmem:[%s12442_s7 + $0x60] sm:$0xff] }
 0x709   : > { %5856 = vmatpush.msrb.mxu0 %v11558_v46  ;;  %5961 = vmatpush.msrb.mxu2 %v13218_v47  ;;  %v11861_v46 = vand.u32 4294901760, %v6045_v45  ;;  %v6037_v47 = vld [vmem:[%s12442_s7 + $0x20] sm:$0xff]  ;;  %v11984_v57 = vsub.f32 %v6038_v29, %v11969_v11 }
 0x70a   : > { %6010 = vmatpush.msrb.mxu3 %v11526_v37  ;;  %5906 = vmatpush.msrb.mxu1 %v11568_v34  ;;  %v6099_v37 = vand.u32 4294901760, %v11848_v35  ;;  %v4807_v39 = vpop.f32.mrf.mxu1 }
 0x70b   : > { %5859 = vmatpush.msrb.mxu0 %v11582_v53  ;;  %5965 = vmatpush.msrb.mxu2 %v5788_v58  ;;  %v6044_v53 = vld [vmem:[%s12442_s7 + $0x58] sm:$0xff]  ;;  %v4667_v58 = vld [vmem:[%s12441_s6] sm:$0x1] }
 0x70c   : > { %6012 = vmatpush.msrb.mxu3 %v11554_v24  ;;  %5908 = vmatpush.msrb.mxu1 %v11584_v1 }
 0x70d   : > { %5862 = vmatpush.msrb.mxu0 %v11598_v4  ;;  %5969 = vmatpush.msrb.mxu2 %v5794_v27  ;;  %v6105_v4 = vand.u32 4294901760, %v11859_v3 }
 0x70e   : > { %6014 = vmatpush.msrb.mxu3 %v11568_v34  ;;  %5910 = vmatpush.msrb.mxu1 %v11600_v5  ;;  %v6048_v34 = vld [vmem:[%s12442_s7 + $0x78] sm:$0xff] }
 0x70f   : > { %5865 = vmatpush.msrb.mxu0 %v11614_v49  ;;  %5973 = vmatpush.msrb.mxu2 %v5800_v6  ;;  %v11827_v49 = vand.u32 4294901760, %v6048_v34  ;;  %v6106_v27 = vsub.f32 %v11859_v3, %v6105_v4  ;;  %v6042_v6 = vld [vmem:[%s12442_s7 + $0x48] sm:$0xff] }
 0x710   : > { %6016 = vmatpush.msrb.mxu3 %v11584_v1  ;;  %5912 = vmatpush.msrb.mxu1 %v11616_v9  ;;  %v6100_v1 = vsub.f32 %v11848_v35, %v6099_v37 }
 0x711   : > { %5868 = vmatpush.msrb.mxu0 %v11631_v12  ;;  %5977 = vmatpush.msrb.mxu2 %v5806_v56  ;;  %v11830_v24 = vsub.f32 %v6048_v34, %v11827_v49  ;;  %v6107_v56 = vand.u32 4294901760, %v6106_v27  ;;  %v6153_v27 = vand.u32 4294901760, %v11984_v57 }
 0x712   : > { %6018 = vmatpush.msrb.mxu3 %v11600_v5  ;;  %5914 = vmatpush.msrb.mxu1 %v11633_v15  ;;  %v11874_v5 = vsub.f32 %v6045_v45, %v11861_v46  ;;  %v4706_v12 = vpop.f32.mrf.mxu0  ;;  %v4861_v18 = vpop.f32.mrf.mxu2  ;;  %v6036_v45 = vld [vmem:[%s12442_s7 + $0x18] sm:$0xff] }
 0x713   : > { %5871 = vmatpush.msrb.mxu0 %v11647_v13  ;;  %5981 = vmatpush.msrb.mxu2 %v5812_v30  ;;  %v6093_v14 = vand.u32 4294901760, %v11830_v24  ;;  %v11906_v30 = vand.u32 4294901760, %v6042_v6 }
 0x714   : > { %6020 = vmatpush.msrb.mxu3 %v11616_v9  ;;  %5916 = vmatpush.msrb.mxu1 %v11649_v16  ;;  %v6043_v9 = vld [vmem:[%s12442_s7 + $0x50] sm:$0xff]  ;;  %v6111_v13 = vand.u32 4294901760, %v11874_v5 }
 0x715   : > { %5874 = vmatpush.msrb.mxu0 %v11662_v8  ;;  %5985 = vmatpush.msrb.mxu2 %v5818_v55  ;;  %v11876_v8 = vand.u32 4294901760, %v6044_v53  ;;  %v6041_v55 = vld [vmem:[%s12442_s7 + $0x40] sm:$0xff]  ;;  %v11921_v21 = vsub.f32 %v6042_v6, %v11906_v30  ;;  %v6035_v6 = vld [vmem:[%s12442_s7 + $0x10] sm:$0xff] }
 0x716   : > { %6022 = vmatpush.msrb.mxu3 %v11633_v15  ;;  %5918 = vmatpush.msrb.mxu1 %v11664_v26  ;;  %v6101_v15 = vand.u32 4294901760, %v6100_v1  ;;  %v11923_v10 = vand.u32 4294901760, %v6041_v55 }
 0x717   : > { %5877 = vmatpush.msrb.mxu0 %v11675_v38  ;;  %5989 = vmatpush.msrb.mxu2 %v5824_v48  ;;  %v6112_v38 = vsub.f32 %v11874_v5, %v6111_v13  ;;  %v6129_v41 = vand.u32 4294901760, %v11921_v21 }
 0x718   : > { %6024 = vmatpush.msrb.mxu3 %v11649_v16  ;;  %5991 = vmatmul.f32.vlgmr.msrb.gmra.mxu2 %v11651_v17  ;;  %v11892_v16 = vsub.f32 %v6044_v53, %v11876_v8  ;;  %v11933_v63 = vsub.f32 %v6041_v55, %v11923_v10  ;;  %v4900_v53 = vpop.f32.mrf.mxu3 }
 0x719   : > { %5880 = vmatpush.msrb.mxu0 %v11689_v50  ;;  %5922 = vmatmul.f32.vlgmr.msrb.gmra.mxu1 %v5725_v36  ;;  %v4707_v50 = vadd.f32 %v4706_v12, %v4667_v58  ;;  %v6113_v7 = vand.u32 4294901760, %v6112_v38  ;;  %v6130_v44 = vsub.f32 %v11921_v21, %v6129_v41  ;;  %v11993_v58 = vand.u32 4294901760, %v6036_v45  ;;  %v6033_v38 = vld [vmem:[%s12442_s7] sm:$0xff] }
 0x71a   : > { %6026 = vmatpush.msrb.mxu3 %v11664_v26  ;;  %5883 = vmatmul.f32.vlgmr.msrb.gmra.mxu0 %v11678_v20  ;;  %v6094_v26 = vsub.f32 %v11830_v24, %v6093_v14  ;;  %v6117_v20 = vand.u32 4294901760, %v11892_v16  ;;  %v6135_v40 = vand.u32 4294901760, %v11933_v63 }
 0x71b   : > { %6028 = vmatmul.f32.vlgmr.msrb.gmra.mxu3 %v11651_v17  ;;  %6051 = vmatpush.msra.mxu0 %v11827_v49  ;;  %v11896_v17 = vand.u32 4294901760, %v6043_v9  ;;  %v4808_v25 = vadd.f32 %v4807_v39, %v4707_v50  ;;  %v6131_v32 = vand.u32 4294901760, %v6130_v44  ;;  %v4969_v50 = vpop.f32.mrf.mxu0 }
 0x71c   : > { %6247 = vmatpush.msra.mxu3 %v11827_v49  ;;  %6194 = vmatpush.msra.mxu2 %v11830_v24  ;;  %v6095_v22 = vand.u32 4294901760, %v6094_v26  ;;  %v6118_v36 = vsub.f32 %v11892_v16, %v6117_v20  ;;  %v6136_v28 = vsub.f32 %v11933_v63, %v6135_v40  ;;  %v6142_v26 = vsub.f32 %v11951_v31, %v6141_v51 }
 0x71d   : > { %6053 = vmatpush.msra.mxu0 %v11842_v52  ;;  %v11910_v59 = vsub.f32 %v6043_v9, %v11896_v17  ;;  %v4862_v60 = vadd.f32 %v4861_v18, %v4808_v25  ;;  %v12024_v25 = vand.u32 4294901760, %v6033_v38 }
 0x71e   : > { %6096 = vmatpush.msra.mxu1 %v6095_v22  ;;  %6249 = vmatpush.msra.mxu3 %v11842_v52  ;;  %v6119_v42 = vand.u32 4294901760, %v6118_v36  ;;  %v6137_v34 = vand.u32 4294901760, %v6136_v28  ;;  %v11978_v22 = vand.u32 4294901760, %v6037_v47  ;;  %v6143_v1 = vand.u32 4294901760, %v6142_v26 }
 0x71f   : > { %6055 = vmatpush.msra.mxu0 %v11850_v61  ;;  %6197 = vmatpush.msra.mxu2 %v11848_v35  ;;  %v6123_v48 = vand.u32 4294901760, %v11910_v59  ;;  %v4901_v12 = vadd.f32 %v4900_v53, %v4862_v60  ;;  %v12015_v36 = vand.u32 4294901760, %v6035_v6 }
 0x720   : > { %6251 = vmatpush.msra.mxu3 %v11850_v61  ;;  %6102 = vmatpush.msra.mxu1 %v6101_v15  ;;  %v11991_v9 = vsub.f32 %v6037_v47, %v11978_v22  ;;  %v6148_v15 = vsub.f32 %v11967_v43, %v6147_v0 }
 0x721   : > { %6057 = vmatpush.msra.mxu0 %v11861_v46  ;;  %6200 = vmatpush.msra.mxu2 %v11859_v3  ;;  %v6124_v62 = vsub.f32 %v11910_v59, %v6123_v48  ;;  %v12032_v44 = vsub.f32 %v6035_v6, %v12015_v36  ;;  %v4970_v29 = vadd.f32 %v4969_v50, %v4901_v12 }
 0x722   : > { %6253 = vmatpush.msra.mxu3 %v11861_v46  ;;  %6108 = vmatpush.msra.mxu1 %v6107_v56  ;;  %v6034_v56 = vld [vmem:[%s12442_s7 + $0x8] sm:$0xff]  ;;  %v6159_v55 = vand.u32 4294901760, %v11991_v9  ;;  %v6149_v39 = vand.u32 4294901760, %v6148_v15 }
 0x723   : > { %6059 = vmatpush.msra.mxu0 %v11876_v8  ;;  %6203 = vmatpush.msra.mxu2 %v11874_v5  ;;  %v6125_v33 = vand.u32 4294901760, %v6124_v62  ;;  %v12017_v19 = vand.u32 4294901760, %v6034_v56  ;;  %v6171_v47 = vand.u32 4294901760, %v12032_v44 }
 0x724   : > { %6255 = vmatpush.msra.mxu3 %v11876_v8  ;;  %6114 = vmatpush.msra.mxu1 %v6113_v7  ;;  %v12013_v7 = vsub.f32 %v6036_v45, %v11993_v58  ;;  %v6160_v62 = vsub.f32 %v11991_v9, %v6159_v55  ;;  %v5006_v45 = vpop.f32.mrf.mxu1 }
 0x725   : > { %6206 = vmatpush.msra.mxu2 %v11892_v16  ;;  %6061 = vmatpush.msra.mxu0 %v11896_v17  ;;  %v6172_v12 = vsub.f32 %v12032_v44, %v6171_v47  ;;  %v5007_v6 = vadd.f32 %v5006_v45, %v4970_v29 }
 0x726   : > { %6257 = vmatpush.msra.mxu3 %v11896_v17  ;;  %6120 = vmatpush.msra.mxu1 %v6119_v42  ;;  %v6154_v42 = vsub.f32 %v11984_v57, %v6153_v27  ;;  %v6165_v2 = vand.u32 4294901760, %v12013_v7  ;;  %v6161_v28 = vand.u32 4294901760, %v6160_v62  ;;  %v5148_v62 = vpop.f32.mrf.mxu3 }
 0x727   : > { %6063 = vmatpush.msra.mxu0 %v11906_v30  ;;  %6209 = vmatpush.msra.mxu2 %v11910_v59 }
 0x728   : > { %6259 = vmatpush.msra.mxu3 %v11906_v30  ;;  %6126 = vmatpush.msra.mxu1 %v6125_v33  ;;  %v12035_v33 = vsub.f32 %v6034_v56, %v12017_v19  ;;  %v6155_v18 = vand.u32 4294901760, %v6154_v42  ;;  %v6166_v60 = vsub.f32 %v12013_v7, %v6165_v2 }
 0x729   : > { %6065 = vmatpush.msra.mxu0 %v11923_v10  ;;  %6212 = vmatpush.msra.mxu2 %v11921_v21 }
 0x72a   : > { %6261 = vmatpush.msra.mxu3 %v11923_v10  ;;  %6132 = vmatpush.msra.mxu1 %v6131_v32  ;;  %v12040_v32 = vsub.f32 %v6033_v38, %v12024_v25  ;;  %v6173_v38 = vand.u32 4294901760, %v6172_v12 }
 0x72b   : > { %6067 = vmatpush.msra.mxu0 %v11935_v23  ;;  %6215 = vmatpush.msra.mxu2 %v11933_v63 }
 0x72c   : > { %6263 = vmatpush.msra.mxu3 %v11935_v23  ;;  %6138 = vmatpush.msra.mxu1 %v6137_v34  ;;  %v6177_v34 = vand.u32 4294901760, %v12035_v33  ;;  %v6183_v26 = vand.u32 4294901760, %v12040_v32  ;;  %v5047_v53 = vpop.f32.mrf.mxu2 }
 0x72d   : > { %6069 = vmatpush.msra.mxu0 %v11954_v54  ;;  %6218 = vmatpush.msra.mxu2 %v11951_v31  ;;  %v5048_v50 = vadd.f32 %v5047_v53, %v5007_v6  ;;  %v5241_v35 = vpop.f32.mrf.mxu1  ;;  %v6405_v31 = vld [vmem:[%s12444_s9 + $0x68] sm:$0xff] }
 0x72e   : > { %6265 = vmatpush.msra.mxu3 %v11954_v54  ;;  %6144 = vmatpush.msra.mxu1 %v6143_v1  ;;  %v6167_v1 = vand.u32 4294901760, %v6166_v60  ;;  %v6178_v15 = vsub.f32 %v12035_v33, %v6177_v34  ;;  %v6184_v56 = vsub.f32 %v12040_v32, %v6183_v26 }
 0x72f   : > { %6071 = vmatpush.msra.mxu0 %v11969_v11  ;;  %6221 = vmatpush.msra.mxu2 %v11967_v43  ;;  %v5149_v24 = vadd.f32 %v5148_v62, %v5048_v50  ;;  %v6399_v62 = vld [vmem:[%s12444_s9 + $0x38] sm:$0xff] }
 0x730   : > { %6267 = vmatpush.msra.mxu3 %v11969_v11  ;;  %6150 = vmatpush.msra.mxu1 %v6149_v39  ;;  %v6179_v39 = vand.u32 4294901760, %v6178_v15  ;;  %v6185_v42 = vand.u32 4294901760, %v6184_v56  ;;  %v6400_v15 = vld [vmem:[%s12444_s9 + $0x40] sm:$0xff] }
 0x731   : > { %6073 = vmatpush.msra.mxu0 %v11978_v22  ;;  %6224 = vmatpush.msra.mxu2 %v11984_v57  ;;  %v6402_v57 = vld [vmem:[%s12444_s9 + $0x50] sm:$0xff] }
 0x732   : > { %6269 = vmatpush.msra.mxu3 %v11978_v22  ;;  %6156 = vmatpush.msra.mxu1 %v6155_v18 }
 0x733   : > { %6075 = vmatpush.msra.mxu0 %v11993_v58  ;;  %6227 = vmatpush.msra.mxu2 %v11991_v9 }
 0x734   : > { %6271 = vmatpush.msra.mxu3 %v11993_v58  ;;  %6162 = vmatpush.msra.mxu1 %v6161_v28 }
 0x735   : > { %6077 = vmatpush.msra.mxu0 %v12015_v36  ;;  %6230 = vmatpush.msra.mxu2 %v12013_v7  ;;  %v5310_v3 = vpop.f32.mrf.mxu2  ;;  %v12143_v7 = vand.u32 4294901760, %v6402_v57 }
 0x736   : > { %6273 = vmatpush.msra.mxu3 %v12015_v36  ;;  %6168 = vmatpush.msra.mxu1 %v6167_v1  ;;  %v5202_v29 = vpop.f32.mrf.mxu0 }
 0x737   : > { %6079 = vmatpush.msra.mxu0 %v12017_v19  ;;  %6233 = vmatpush.msra.mxu2 %v12032_v44 }
 0x738   : > { %6275 = vmatpush.msra.mxu3 %v12017_v19  ;;  %6174 = vmatpush.msra.mxu1 %v6173_v38 }
 0x739   : > { %6081 = vmatpush.msra.mxu0 %v12024_v25  ;;  %6236 = vmatpush.msra.mxu2 %v12035_v33 }
 0x73a   : > { %6277 = vmatpush.msra.mxu3 %v12024_v25  ;;  %6180 = vmatpush.msra.mxu1 %v6179_v39 }
 0x73b   : > { %6288 = vmatpush.msrb.mxu0 %v6093_v14  ;;  %6239 = vmatpush.msra.mxu2 %v12040_v32  ;;  %v5203_v14 = vadd.f32 %v5202_v29, %v5149_v24  ;;  %v12165_v32 = vsub.f32 %v6402_v57, %v12143_v7  ;;  %v6398_v29 = vld [vmem:[%s12444_s9 + $0x30] sm:$0xff] }
 0x73c   : > { %6186 = vmatpush.msra.mxu1 %v6185_v42 }
 0x73d   : > { %6292 = vmatpush.msrb.mxu0 %v6099_v37  ;;  %v5242_v37 = vadd.f32 %v5241_v35, %v5203_v14  ;;  %v6482_v42 = vand.u32 4294901760, %v12165_v32 }
 0x73e   : > { %6355 = vmatpush.msrb.mxu1 %v11827_v49 }
 0x73f   : > { %6296 = vmatpush.msrb.mxu0 %v6105_v4  ;;  %v5311_v49 = vadd.f32 %v5310_v3, %v5242_v37  ;;  %v12202_v37 = vand.u32 4294901760, %v6400_v15  ;;  %v6397_v3 = vld [vmem:[%s12444_s9 + $0x28] sm:$0xff] }
 0x740   : > { %6357 = vmatpush.msrb.mxu1 %v11842_v52  ;;  %v5347_v52 = vpop.f32.mrf.mxu3 }
 0x741   : > { %6300 = vmatpush.msrb.mxu0 %v6111_v13 }
 0x742   : > { %6359 = vmatpush.msrb.mxu1 %v11850_v61  ;;  %v5348_v61 = vadd.f32 %v5347_v52, %v5311_v49 }
 0x743   : > { %6304 = vmatpush.msrb.mxu0 %v6117_v20 }
 0x744   : > { %6361 = vmatpush.msrb.mxu1 %v11861_v46 }
 0x745   : > { %6308 = vmatpush.msrb.mxu0 %v6123_v48 }
 0x746   : > { %6363 = vmatpush.msrb.mxu1 %v11876_v8 }
 0x747   : > { %6312 = vmatpush.msrb.mxu0 %v6129_v41 }
 0x748   : > { %6365 = vmatpush.msrb.mxu1 %v11896_v17 }
 0x749   : > { %6316 = vmatpush.msrb.mxu0 %v6135_v40  ;;  %v6406_v40 = vld [vmem:[%s12444_s9 + $0x70] sm:$0xff] }
 0x74a   : > { %6367 = vmatpush.msrb.mxu1 %v11906_v30  ;;  %v12126_v43 = vand.u32 4294901760, %v6406_v40 }
 0x74b   : > { %6320 = vmatpush.msrb.mxu0 %v6141_v51 }
 0x74c   : > { %6369 = vmatpush.msrb.mxu1 %v11923_v10 }
 0x74d   : > { %6324 = vmatpush.msrb.mxu0 %v6147_v0  ;;  %v6403_v0 = vld [vmem:[%s12444_s9 + $0x58] sm:$0xff] }
 0x74e   : > { %6371 = vmatpush.msrb.mxu1 %v11935_v23  ;;  %v6407_v23 = vld [vmem:[%s12444_s9 + $0x78] sm:$0xff] }
 0x74f   : > { %6328 = vmatpush.msrb.mxu0 %v6153_v27  ;;  %v12124_v51 = vand.u32 4294901760, %v6407_v23 }
 0x750   : > { %6373 = vmatpush.msrb.mxu1 %v11954_v54 }
 0x751   : > { %6332 = vmatpush.msrb.mxu0 %v6159_v55  ;;  %v12141_v55 = vand.u32 4294901760, %v6403_v0  ;;  %6410 = vmatpush.msrb.mxu2 %v12124_v51 }
 0x752   : > { %6375 = vmatpush.msrb.mxu1 %v11969_v11  ;;  %v12128_v11 = vand.u32 4294901760, %v6405_v31 }
 0x753   : > { %6336 = vmatpush.msrb.mxu0 %v6165_v2  ;;  %v12152_v2 = vsub.f32 %v6406_v40, %v12126_v43  ;;  %v12162_v18 = vsub.f32 %v6403_v0, %v12141_v55  ;;  %6412 = vmatpush.msrb.mxu2 %v12126_v43  ;;  %v6394_v40 = vld [vmem:[%s12444_s9 + $0x10] sm:$0xff] }
 0x754   : > { %6377 = vmatpush.msrb.mxu1 %v11978_v22  ;;  %v6404_v22 = vld [vmem:[%s12444_s9 + $0x60] sm:$0xff]  ;;  %v12155_v44 = vsub.f32 %v6405_v31, %v12128_v11 }
 0x755   : > { %6340 = vmatpush.msrb.mxu0 %v6171_v47  ;;  %v12139_v27 = vand.u32 4294901760, %v6404_v22  ;;  %v6476_v1 = vand.u32 4294901760, %v12162_v18  ;;  %6414 = vmatpush.msrb.mxu2 %v12128_v11 }
 0x756   : > { %v5388_v4 = vpop.f32.mrf.mxu0  ;;  %6379 = vmatpush.msrb.mxu1 %v11993_v58 }
 0x757   : > { %v5389_v46 = vadd.f32 %v5388_v4, %v5348_v61  ;;  %6344 = vmatpush.msrb.mxu0 %v6177_v34  ;;  %v12159_v33 = vsub.f32 %v6404_v22, %v12139_v27  ;;  %v6458_v34 = vand.u32 4294901760, %v12152_v2  ;;  %6416 = vmatpush.msrb.mxu2 %v12139_v27  ;;  %v6477_v52 = vsub.f32 %v12162_v18, %v6476_v1  ;;  %v6396_v61 = vld [vmem:[%s12444_s9 + $0x20] sm:$0xff] }
 0x758   : > { %v5489_v5 = vpop.f32.mrf.mxu1  ;;  %v5543_v13 = vpop.f32.mrf.mxu2  ;;  %6381 = vmatpush.msrb.mxu1 %v12015_v36  ;;  %v6401_v36 = vld [vmem:[%s12444_s9 + $0x48] sm:$0xff] }
 0x759   : > { %v5490_v8 = vadd.f32 %v5489_v5, %v5389_v46  ;;  %6348 = vmatpush.msrb.mxu0 %v6183_v26  ;;  %v12167_v28 = vand.u32 4294901760, %v6401_v36  ;;  %v6464_v26 = vand.u32 4294901760, %v12155_v44  ;;  %v6470_v53 = vand.u32 4294901760, %v12159_v33  ;;  %6418 = vmatpush.msrb.mxu2 %v12141_v55 }
 0x75a   : > { %6383 = vmatpush.msrb.mxu1 %v12017_v19  ;;  %v6459_v38 = vsub.f32 %v12152_v2, %v6458_v34  ;;  %v12215_v5 = vsub.f32 %v6400_v15, %v12202_v37  ;;  %v6478_v31 = vand.u32 4294901760, %v6477_v52 }
 0x75b   : > { %v5544_v16 = vadd.f32 %v5543_v13, %v5490_v8  ;;  %v5582_v17 = vpop.f32.mrf.mxu3  ;;  %v12176_v12 = vsub.f32 %v6401_v36, %v12167_v28  ;;  %v6465_v50 = vsub.f32 %v12155_v44, %v6464_v26  ;;  %v6471_v39 = vsub.f32 %v12159_v33, %v6470_v53  ;;  %6420 = vmatpush.msrb.mxu2 %v12143_v7 }
 0x75c   : > { %6385 = vmatpush.msrb.mxu1 %v12024_v25  ;;  %v12149_v25 = vsub.f32 %v6407_v23, %v12124_v51  ;;  %v6460_v35 = vand.u32 4294901760, %v6459_v38  ;;  %v12218_v8 = vand.u32 4294901760, %v6399_v62  ;;  %v12220_v13 = vand.u32 4294901760, %v6398_v29 }
 0x75d   : > { %v5583_v30 = vadd.f32 %v5582_v17, %v5544_v16  ;;  %v6488_v4 = vand.u32 4294901760, %v12176_v12  ;;  %v6466_v46 = vand.u32 4294901760, %v6465_v50  ;;  %v6472_v17 = vand.u32 4294901760, %v6471_v39  ;;  %6422 = vmatpush.msrb.mxu2 %v12167_v28 }
 0x75e   : > { %v6452_v47 = vand.u32 4294901760, %v12149_v25 }
 0x75f   : > { %v6489_v23 = vsub.f32 %v12176_v12, %v6488_v4  ;;  %6424 = vmatpush.msrb.mxu2 %v12202_v37 }
 0x760   : > { %v6453_v56 = vsub.f32 %v12149_v25, %v6452_v47 }
 0x761   : > { %6426 = vmatpush.msrb.mxu2 %v12218_v8 }
 0x762   : > { %v6454_v14 = vand.u32 4294901760, %v6453_v56 }
 0x763   : > { %6428 = vmatpush.msrb.mxu2 %v12220_v13 }
 0x764   : > { %6455 = vmatpush.msrb.mxu3 %v6454_v14 }
 0x766   : > { %6461 = vmatpush.msrb.mxu3 %v6460_v35 }
 0x768   : > { %6467 = vmatpush.msrb.mxu3 %v6466_v46 }
 0x76a   : > { %6473 = vmatpush.msrb.mxu3 %v6472_v17 }
 0x76c   : > { %6479 = vmatpush.msrb.mxu3 %v6478_v31 }
 0x76f   : > { %v5688_v21 = vpop.f32.mrf.mxu1 }
 0x777   : > { %v5651_v20 = vpop.f32.mrf.mxu0 }
 0x778   : > { %v5652_v59 = vadd.f32 %v5651_v20, %v5583_v30  ;;  %v6483_v20 = vsub.f32 %v12165_v32, %v6482_v42  ;;  %v12225_v30 = vand.u32 4294901760, %v6397_v3 }
 0x77a   : > { %v5689_v10 = vadd.f32 %v5688_v21, %v5652_v59  ;;  %v6395_v59 = vld [vmem:[%s12444_s9 + $0x18] sm:$0xff]  ;;  %v6494_v21 = vand.u32 4294901760, %v12215_v5  ;;  %v12251_v22 = vsub.f32 %v6397_v3, %v12225_v30  ;;  %6430 = vmatpush.msrb.mxu2 %v12225_v30 }
 0x77b   : > { %v5729_v48 = vpop.f32.mrf.mxu2  ;;  %v12253_v0 = vand.u32 4294901760, %v6395_v59 }
 0x77c   : > { %v5730_v41 = vadd.f32 %v5729_v48, %v5689_v10  ;;  %v12232_v10 = vsub.f32 %v6399_v62, %v12218_v8  ;;  %v12236_v48 = vsub.f32 %v6398_v29, %v12220_v13  ;;  %v6495_v36 = vsub.f32 %v12215_v5, %v6494_v21 }
 0x77d   : > { %v5830_v63 = vpop.f32.mrf.mxu3  ;;  %v6512_v38 = vand.u32 4294901760, %v12251_v22  ;;  %v12277_v50 = vsub.f32 %v6395_v59, %v12253_v0 }
 0x77e   : > { %v5831_v54 = vadd.f32 %v5830_v63, %v5730_v41  ;;  %v12238_v41 = vand.u32 4294901760, %v6396_v61  ;;  %v6496_v29 = vand.u32 4294901760, %v6495_v36 }
 0x77f   : > { %v6513_v52 = vsub.f32 %v12251_v22, %v6512_v38 }
 0x780   : > { %6432 = vmatpush.msrb.mxu2 %v12238_v41 }
 0x781   : > { %v6514_v59 = vand.u32 4294901760, %v6513_v52 }
 0x782   : > { %6434 = vmatpush.msrb.mxu2 %v12253_v0 }
 0x796   : > { %v5923_v58 = vpop.f32.mrf.mxu1 }
 0x797   : > { %v5884_v9 = vpop.f32.mrf.mxu0 }
 0x798   : > { %v5885_v19 = vadd.f32 %v5884_v9, %v5831_v54  ;;  %v6500_v54 = vand.u32 4294901760, %v12232_v10  ;;  %v6484_v9 = vand.u32 4294901760, %v6483_v20 }
 0x79a   : > { %v5924_v60 = vadd.f32 %v5923_v58, %v5885_v19  ;;  %v6393_v58 = vld [vmem:[%s12444_s9 + $0x8] sm:$0xff]  ;;  %v6506_v19 = vand.u32 4294901760, %v12236_v48  ;;  %v6501_v56 = vsub.f32 %v12232_v10, %v6500_v54  ;;  %6485 = vmatpush.msrb.mxu3 %v6484_v9 }
 0x79b   : > { %v5992_v45 = vpop.f32.mrf.mxu2  ;;  %v12279_v39 = vand.u32 4294901760, %v6393_v58 }
 0x79c   : > { %v5993_v6 = vadd.f32 %v5992_v45, %v5924_v60  ;;  %v12266_v60 = vsub.f32 %v6396_v61, %v12238_v41  ;;  %v12268_v45 = vand.u32 4294901760, %v6394_v40  ;;  %v6524_v61 = vand.u32 4294901760, %v12277_v50 }
 0x79d   : > { %v12297_v46 = vsub.f32 %v6393_v58, %v12279_v39 }
 0x79e   : > { %v6029_v24 = vpop.f32.mrf.mxu3  ;;  %v6518_v14 = vand.u32 4294901760, %v12266_v60  ;;  %v12288_v35 = vsub.f32 %v6394_v40, %v12268_v45  ;;  %6436 = vmatpush.msrb.mxu2 %v12268_v45 }
 0x79f   : > { %v6030_v49 = vadd.f32 %v6029_v24, %v5993_v6  ;;  %v6490_v6 = vand.u32 4294901760, %v6489_v23  ;;  %v6507_v24 = vsub.f32 %v12236_v48, %v6506_v19  ;;  %v6525_v23 = vsub.f32 %v12277_v50, %v6524_v61 }
 0x7a0   : > { %v6519_v17 = vsub.f32 %v12266_v60, %v6518_v14  ;;  %v6530_v20 = vand.u32 4294901760, %v12288_v35  ;;  %v6536_v40 = vand.u32 4294901760, %v12297_v46  ;;  %6438 = vmatpush.msrb.mxu2 %v12279_v39 }
 0x7a1   : > { %v6032_v16 = vmax.f32 %v6030_v49, 0.0  ;;  %6491 = vmatpush.msrb.mxu3 %v6490_v6  ;;  %v6502_v49 = vand.u32 4294901760, %v6501_v56  ;;  %v6526_v9 = vand.u32 4294901760, %v6525_v23 }
 0x7a2   : > { %v6520_v31 = vand.u32 4294901760, %v6519_v17  ;;  %v6537_v58 = vsub.f32 %v12297_v46, %v6536_v40 }
 0x7a3   : > { %v12240_v63 = vand.u32 4294901760, %v6032_v16  ;;  %6497 = vmatpush.msrb.mxu3 %v6496_v29 }
 0x7a5   : > { %v6083_v57 = vsub.f32 %v6032_v16, %v12240_v63  ;;  %6188 = vmatmul.f32.vlgmr.msra.gmra.mxu1 %v12240_v63  ;;  %v6508_v16 = vand.u32 4294901760, %v6507_v24  ;;  %6503 = vmatpush.msrb.mxu3 %v6502_v49 }
 0x7a6   : > { %6606 = vmatpush.msra.mxu1 %v12124_v51 }
 0x7a7   : > { %v6084_v15 = vand.u32 4294901760, %v6083_v57  ;;  %6242 = vmatmul.f32.vlgmr.msra.gmra.mxu2 %v6083_v57  ;;  %6509 = vmatpush.msrb.mxu3 %v6508_v16 }
 0x7a8   : > { %6608 = vmatpush.msra.mxu1 %v12126_v43 }
 0x7a9   : > { %v6085_v62 = vsub.f32 %v6083_v57, %v6084_v15  ;;  %6281 = vmatmul.f32.vlgmr.msra.gmra.mxu3 %v6084_v15  ;;  %v6531_v57 = vsub.f32 %v12288_v35, %v6530_v20  ;;  %v6538_v15 = vand.u32 4294901760, %v6537_v58 }
 0x7aa   : > { %6610 = vmatpush.msra.mxu1 %v12128_v11  ;;  %6515 = vmatpush.msrb.mxu3 %v6514_v59 }
 0x7ab   : > { %v6086_v3 = vand.u32 4294901760, %v6085_v62  ;;  %v6532_v36 = vand.u32 4294901760, %v6531_v57 }
 0x7ac   : > { %6612 = vmatpush.msra.mxu1 %v12139_v27  ;;  %6521 = vmatpush.msrb.mxu3 %v6520_v31 }
 0x7ad   : > { %6087 = vmatmul.f32.vlgmr.msra.gmra.mxu0 %v6086_v3  ;;  %6387 = vmatmul.f32.vlgmr.msrb.gmra.mxu1 %v12240_v63 }
 0x7ae   : > { %6553 = vmatpush.msra.mxu0 %v12149_v25  ;;  %6614 = vmatpush.msra.mxu1 %v12141_v55 }
 0x7af   : > { %6527 = vmatpush.msrb.mxu3 %v6526_v9 }
 0x7b0   : > { %6556 = vmatpush.msra.mxu0 %v12152_v2  ;;  %6616 = vmatpush.msra.mxu1 %v12143_v7 }
 0x7b1   : > { %6533 = vmatpush.msrb.mxu3 %v6532_v36 }
 0x7b2   : > { %6559 = vmatpush.msra.mxu0 %v12155_v44  ;;  %6618 = vmatpush.msra.mxu1 %v12167_v28 }
 0x7b3   : > { %6539 = vmatpush.msrb.mxu3 %v6538_v15 }
 0x7b4   : > { %6562 = vmatpush.msra.mxu0 %v12159_v33  ;;  %6620 = vmatpush.msra.mxu1 %v12202_v37 }
 0x7b5   : > { %6350 = vmatmul.f32.vlgmr.msrb.gmra.mxu0 %v12240_v63  ;;  %v6392_v63 = vld [vmem:[%s12444_s9] sm:$0xff] }
 0x7b6   : > { %6565 = vmatpush.msra.mxu0 %v12162_v18  ;;  %6622 = vmatpush.msra.mxu1 %v12218_v8  ;;  %v6439_v6 = vand.u32 4294901760, %v6392_v63 }
 0x7b8   : > { %6568 = vmatpush.msra.mxu0 %v12165_v32  ;;  %6624 = vmatpush.msra.mxu1 %v12220_v13  ;;  %v6541_v56 = vsub.f32 %v6392_v63, %v6439_v6 }
 0x7b9   : > { %6440 = vmatpush.msrb.mxu2 %v6439_v6 }
 0x7ba   : > { %6571 = vmatpush.msra.mxu0 %v12176_v12  ;;  %6626 = vmatpush.msra.mxu1 %v12225_v30  ;;  %v6542_v62 = vand.u32 4294901760, %v6541_v56 }
 0x7bb   : > { %6647 = vmatpush.msra.mxu2 %v6452_v47 }
 0x7bc   : > { %6574 = vmatpush.msra.mxu0 %v12215_v5  ;;  %6628 = vmatpush.msra.mxu1 %v12238_v41  ;;  %v6543_v29 = vsub.f32 %v6541_v56, %v6542_v62 }
 0x7bd   : > { %6651 = vmatpush.msra.mxu2 %v6458_v34 }
 0x7be   : > { %6577 = vmatpush.msra.mxu0 %v12232_v10  ;;  %6630 = vmatpush.msra.mxu1 %v12253_v0  ;;  %v6544_v24 = vand.u32 4294901760, %v6543_v29 }
 0x7bf   : > { %6655 = vmatpush.msra.mxu2 %v6464_v26 }
 0x7c0   : > { %6580 = vmatpush.msra.mxu0 %v12236_v48  ;;  %6632 = vmatpush.msra.mxu1 %v12268_v45 }
 0x7c1   : > { %6659 = vmatpush.msra.mxu2 %v6470_v53  ;;  %6545 = vmatpush.msrb.mxu3 %v6544_v24 }
 0x7c2   : > { %6583 = vmatpush.msra.mxu0 %v12251_v22  ;;  %6634 = vmatpush.msra.mxu1 %v12279_v39 }
 0x7c3   : > { %6714 = vmatpush.msra.mxu3 %v12124_v51  ;;  %6663 = vmatpush.msra.mxu2 %v6476_v1  ;;  %v6049_v51 = vld [vmem:[%s12443_s8] sm:$0x1] }
 0x7c4   : > { %6586 = vmatpush.msra.mxu0 %v12266_v60  ;;  %6636 = vmatpush.msra.mxu1 %v6439_v6 }
 0x7c5   : > { %6716 = vmatpush.msra.mxu3 %v12126_v43  ;;  %6667 = vmatpush.msra.mxu2 %v6482_v42  ;;  %v6408_v42 = vld [vmem:[%s12445_s10] sm:$0x1] }
 0x7c6   : > { %6589 = vmatpush.msra.mxu0 %v12277_v50 }
 0x7c7   : > { %6718 = vmatpush.msra.mxu3 %v12128_v11  ;;  %6671 = vmatpush.msra.mxu2 %v6488_v4 }
 0x7c8   : > { %6592 = vmatpush.msra.mxu0 %v12288_v35 }
 0x7c9   : > { %6720 = vmatpush.msra.mxu3 %v12139_v27  ;;  %6675 = vmatpush.msra.mxu2 %v6494_v21 }
 0x7ca   : > { %6595 = vmatpush.msra.mxu0 %v12297_v46 }
 0x7cb   : > { %6722 = vmatpush.msra.mxu3 %v12141_v55  ;;  %6679 = vmatpush.msra.mxu2 %v6500_v54 }
 0x7cc   : > { %6598 = vmatpush.msra.mxu0 %v6541_v56 }
 0x7cd   : > { %6724 = vmatpush.msra.mxu3 %v12143_v7  ;;  %6683 = vmatpush.msra.mxu2 %v6506_v19 }
 0x7cf   : > { %6726 = vmatpush.msra.mxu3 %v12167_v28  ;;  %6687 = vmatpush.msra.mxu2 %v6512_v38 }
 0x7d1   : > { %6728 = vmatpush.msra.mxu3 %v12202_v37  ;;  %6691 = vmatpush.msra.mxu2 %v6518_v14 }
 0x7d3   : > { %6730 = vmatpush.msra.mxu3 %v12218_v8  ;;  %6695 = vmatpush.msra.mxu2 %v6524_v61 }
 0x7d5   : > { %6732 = vmatpush.msra.mxu3 %v12220_v13  ;;  %6699 = vmatpush.msra.mxu2 %v6530_v20 }
 0x7d7   : > { %6734 = vmatpush.msra.mxu3 %v12225_v30  ;;  %6703 = vmatpush.msra.mxu2 %v6536_v40 }
 0x7d9   : > { %6736 = vmatpush.msra.mxu3 %v12238_v41  ;;  %6707 = vmatpush.msra.mxu2 %v6542_v62 }
 0x7db   : > { %6738 = vmatpush.msra.mxu3 %v12253_v0 }
 0x7dd   : > { %6740 = vmatpush.msra.mxu3 %v12268_v45 }
 0x7df   : > { %6742 = vmatpush.msra.mxu3 %v12279_v39 }
 0x7e1   : > { %6744 = vmatpush.msra.mxu3 %v6439_v6 }
 0x822   : > { %v6189_v43 = vpop.f32.mrf.mxu1 }
 0x82a   : > { %v6088_v11 = vpop.f32.mrf.mxu0  ;;  %v6243_v7 = vpop.f32.mrf.mxu2 }
 0x82b   : > { %v6089_v27 = vadd.f32 %v6088_v11, %v6049_v51  ;;  %v6388_v32 = vpop.f32.mrf.mxu1 }
 0x82c   : > { %v6282_v2 = vpop.f32.mrf.mxu3 }
 0x82d   : > { %v6190_v55 = vadd.f32 %v6189_v43, %v6089_v27 }
 0x82f   : > { %v6244_v25 = vadd.f32 %v6243_v7, %v6190_v55 }
 0x831   : > { %v6283_v44 = vadd.f32 %v6282_v2, %v6244_v25 }
 0x832   : > { %v6351_v33 = vpop.f32.mrf.mxu0 }
 0x833   : > { %v6352_v18 = vadd.f32 %v6351_v33, %v6283_v44 }
 0x835   : > { %v6389_v28 = vadd.f32 %v6388_v32, %v6352_v18 }
 0x837   : > { %v6391_v47 = vmax.f32 %v6389_v28, 0.0 }
 0x839   : > { %v6441_v34 = vand.u32 4294901760, %v6391_v47 }
 0x83b   : > { %v6442_v26 = vsub.f32 %v6391_v47, %v6441_v34  ;;  %6547 = vmatmul.f32.vlgmr.msrb.gmra.mxu3 %v6441_v34 }
 0x83d   : > { %6601 = vmatmul.f32.vlgmr.msra.gmra.mxu0 %v6442_v26  ;;  %v6443_v53 = vand.u32 4294901760, %v6442_v26 }
 0x83f   : > { %6640 = vmatmul.f32.vlgmr.msra.gmra.mxu1 %v6443_v53  ;;  %v6444_v1 = vsub.f32 %v6442_v26, %v6443_v53 }
 0x841   : > { %v6445_v12 = vand.u32 4294901760, %v6444_v1 }
 0x843   : > { %6446 = vmatmul.f32.vlgmr.msrb.gmra.mxu2 %v6445_v12  ;;  %6746 = vmatmul.f32.vlgmr.msra.gmra.mxu3 %v6441_v34 }
 0x84b   : > { %6709 = vmatmul.f32.vlgmr.msra.gmra.mxu2 %v6441_v34 }
 0x8ba   : > { %v6602_v13 = vpop.f32.mrf.mxu0 }
 0x8bc   : > { %v6641_v21 = vpop.f32.mrf.mxu1 }
 0x8be   : > { %v6548_v37 = vpop.f32.mrf.mxu3 }
 0x8c6   : > { %v6447_v4 = vpop.f32.mrf.mxu2  ;;  %v6747_v54 = vpop.f32.mrf.mxu3 }
 0x8c7   : > { %v6448_v5 = vadd.f32 %v6447_v4, %v6408_v42 }
 0x8c9   : > { %v6549_v8 = vadd.f32 %v6548_v37, %v6448_v5 }
 0x8cb   : > { %v6603_v30 = vadd.f32 %v6602_v13, %v6549_v8 }
 0x8cd   : > { %v6642_v10 = vadd.f32 %v6641_v21, %v6603_v30 }
 0x8ce   : > { %v6710_v48 = vpop.f32.mrf.mxu2 }
 0x8cf   : > { %v6711_v41 = vadd.f32 %v6710_v48, %v6642_v10 }
 0x8d1   : > { %v6748_v22 = vadd.f32 %v6747_v54, %v6711_v41 }
 0x8d3   : > { %6750 = vst [vmem:[%s7550_s25] sm:$0x1] %v6748_v22 }
 0x8d4   : > { %7254 = shalt.err (!%p7251_p7)
}
 0x8d5   : > { %7074 = dma.vmem_to_hbm [thread:$0]  (%p7445_p5), %s6763_s26, 16, %s6765_s1, %s6752_s17  }
 0x8d6 PF: > { %s13220_s25 = sld [smem:[#allocation10_spill]] }
 0x8d7   : > { %s13221_s24 = sld [smem:[#allocation8_spill]] }
 0x8dc   : > { %p7080_p8 = scmp.ge.s32.totalorder %s13220_s25, 2 }
 0x8dd   : > { %s6776_s22 = sand.u32 1, %s13221_s24  }
 0x8de   : > { %p7077_p9 = pnand %p7080_p8, %p7449_p6  ;;  %s6777_s23 = scalar_lea.sflag [#allocation6], %s6776_s22 }
 0x8e0   : > { %p7078_p10 = pneg %p7077_p9 }
 0x8e2   : > { %7280 = dma.done.wait (%p7078_p10), %s6777_s23, 16  }
 0x8e3   : > { %7282 = vsyncadd (%p7078_p10), %s6777_s23, 4294967280  ;;  %s13223_s20 = sld [smem:[#allocation11_spill]]  ;;  %s13226_s17 = smov %s7289_s18 }
 0x8e4   : > { %s13224_s28 = sld [smem:[#allocation9_spill]] }
 0x8e5   : > { %s13225_s19 = sld [smem:[#allocation12_spill]] }
 0x8e9   : > { %p21_p11 = scmp.ge.s32.totalorder %s13223_s20, 4  }
 0x8ea   : > { %s13227_s18 = smov %s13224_s28 }
 0x8eb   :  { %23 = sbr.rel (!%p21_p11) target bundleno = 7 (0x7), region = 157 }
 0x8f0   :  { %6782 = vsyncpa [#allocation6], 1 }
 0x8f1   :  { %6784 = vsyncpa [#allocation6 + $0x1], 1 }

</bundles_post_ra>
